<compile_context>
chip_gen: v5e
topology: v5e:2x2
jax: 0.10.0
libtpu: 0.0.40
codegen_flags: <defaults>
</compile_context>

<pallas_src>
import functools

import jax
import jax.numpy as jnp
from jax.experimental import pallas as pl
from jax.experimental.pallas import tpu as pltpu

_SQRT_2_OVER_PI = 0.7978845608028654


def _gelu(y):
    # tanh-approximate GELU (PyTorch nn.GELU default is exact erf; difference ~1e-3).
    return 0.5 * y * (1.0 + jnp.tanh(_SQRT_2_OVER_PI * (y + 0.044715 * y * y * y)))


def _pick_tile(m, target, multiple=8):
    """Largest divisor of m that is a multiple of `multiple` and <= target (else m)."""
    if m <= target:
        return m
    best, t = m, multiple
    while t <= target:
        if m % t == 0:
            best = t
        t += multiple
    return best


# ---------------------------------------------------------------------------
# Pallas kernels
# ---------------------------------------------------------------------------
def _layer_norm_kernel(x_ref, g_ref, b_ref, o_ref, *, eps):
    x = x_ref[...].astype(jnp.float32)                       # (tm, C) lane-dense
    c = x.shape[-1]
    s1 = jnp.sum(x, axis=-1, keepdims=True)                  # single-pass statistics
    s2 = jnp.sum(x * x, axis=-1, keepdims=True)
    mean = s1 / c
    var = s2 / c - mean * mean
    y = (x - mean) * jax.lax.rsqrt(var + eps)
    y = y * g_ref[...].astype(jnp.float32) + b_ref[...].astype(jnp.float32)
    o_ref[...] = y.astype(o_ref.dtype)


def layer_norm_pallas(x2d, gamma, beta, *, eps=1e-5, row_tile=256):
    m, c = x2d.shape
    tm = _pick_tile(m, row_tile)
    kernel = functools.partial(_layer_norm_kernel, eps=eps)
    return pl.pallas_call(
        kernel,
        out_shape=jax.ShapeDtypeStruct((m, c), x2d.dtype),
        grid=(m // tm,),
        in_specs=[
            pl.BlockSpec((tm, c), lambda i: (i, 0)),
            pl.BlockSpec((1, c), lambda i: (0, 0)),
            pl.BlockSpec((1, c), lambda i: (0, 0)),
        ],
        out_specs=pl.BlockSpec((tm, c), lambda i: (i, 0)),
        compiler_params=pltpu.CompilerParams(dimension_semantics=("parallel",)),
    )(x2d, gamma.reshape(1, c), beta.reshape(1, c))


def _linear_kernel(x_ref, w_ref, b_ref, *rest, act, has_res):
    if has_res:
        r_ref, o_ref = rest
    else:
        (o_ref,) = rest
    x = x_ref[...].astype(jnp.float32)
    w = w_ref[...].astype(jnp.float32)
    y = jnp.dot(x, w, preferred_element_type=jnp.float32)
    y = y + b_ref[...].astype(jnp.float32)
    if act == "relu":
        y = jnp.maximum(y, 0.0)
    elif act == "gelu":
        y = _gelu(y)
    if has_res:
        y = y + r_ref[...].astype(jnp.float32)
    o_ref[...] = y.astype(o_ref.dtype)


def linear_pallas(x2d, w, b, *, act=None, residual=None, row_tile=256):
    """y = act(x @ w + b) [+ residual]; rows tiled, whole (small) K/N per block."""
    m, k = x2d.shape
    _, n = w.shape
    tm = _pick_tile(m, row_tile)
    has_res = residual is not None
    in_specs = [
        pl.BlockSpec((tm, k), lambda i: (i, 0)),
        pl.BlockSpec((k, n), lambda i: (0, 0)),
        pl.BlockSpec((1, n), lambda i: (0, 0)),
    ]
    args = [x2d, w, b.reshape(1, n)]
    if has_res:
        in_specs.append(pl.BlockSpec((tm, n), lambda i: (i, 0)))
        args.append(residual)
    kernel = functools.partial(_linear_kernel, act=act, has_res=has_res)
    return pl.pallas_call(
        kernel,
        out_shape=jax.ShapeDtypeStruct((m, n), x2d.dtype),
        grid=(m // tm,),
        in_specs=in_specs,
        out_specs=pl.BlockSpec((tm, n), lambda i: (i, 0)),
        compiler_params=pltpu.CompilerParams(dimension_semantics=("parallel",)),
    )(*args)


def _strip_attn_kernel(q_ref, k_ref, v_ref, lepe_ref, o_ref, *, scale):
    q = q_ref[...].astype(jnp.float32) * scale                # (tg, N, d)
    k = k_ref[...].astype(jnp.float32)
    v = v_ref[...].astype(jnp.float32)
    s = jnp.einsum("gnd,gmd->gnm", q, k, preferred_element_type=jnp.float32)
    s = s - jnp.max(s, axis=-1, keepdims=True)
    p = jnp.exp(s)
    p = p / jnp.sum(p, axis=-1, keepdims=True)
    o = jnp.einsum("gnm,gmd->gnd", p, v, preferred_element_type=jnp.float32)
    o_ref[...] = (o + lepe_ref[...].astype(jnp.float32)).astype(o_ref.dtype)


def strip_attention_pallas(q, k, v, lepe, *, scale, g_tile=64):
    g, n, d = q.shape
    tg = _pick_tile(g, g_tile)
    mk = lambda: pl.BlockSpec((tg, n, d), lambda i: (i, 0, 0))
    kernel = functools.partial(_strip_attn_kernel, scale=scale)
    return pl.pallas_call(
        kernel,
        out_shape=jax.ShapeDtypeStruct((g, n, d), q.dtype),
        grid=(g // tg,),
        in_specs=[mk(), mk(), mk(), mk()],
        out_specs=mk(),
        compiler_params=pltpu.CompilerParams(dimension_semantics=("parallel",)),
    )(q, k, v, lepe)


# ---------------------------------------------------------------------------
# Pure-JAX reference ops (same math, used for validation)
# ---------------------------------------------------------------------------
def layer_norm_ref(x2d, gamma, beta, *, eps=1e-5):
    x = x2d.astype(jnp.float32)
    mean = jnp.mean(x, axis=-1, keepdims=True)
    var = jnp.mean(x * x, axis=-1, keepdims=True) - mean * mean
    y = (x - mean) * jax.lax.rsqrt(var + eps)
    y = y * gamma[None].astype(jnp.float32) + beta[None].astype(jnp.float32)
    return y.astype(x2d.dtype)


def linear_ref(x2d, w, b, *, act=None, residual=None):
    y = jnp.dot(x2d.astype(jnp.float32), w.astype(jnp.float32),
                precision=jax.lax.Precision.HIGHEST) + b[None].astype(jnp.float32)
    if act == "relu":
        y = jnp.maximum(y, 0.0)
    elif act == "gelu":
        y = _gelu(y)
    if residual is not None:
        y = y + residual.astype(jnp.float32)
    return y.astype(x2d.dtype)


def strip_attention_ref(q, k, v, lepe, *, scale):
    qf = q.astype(jnp.float32) * scale
    s = jnp.einsum("gnd,gmd->gnm", qf, k.astype(jnp.float32),
                   precision=jax.lax.Precision.HIGHEST)
    p = jax.nn.softmax(s, axis=-1)
    o = jnp.einsum("gnm,gmd->gnd", p, v.astype(jnp.float32),
                   precision=jax.lax.Precision.HIGHEST)
    return (o + lepe.astype(jnp.float32)).astype(q.dtype)


# ---------------------------------------------------------------------------
# LePE attention helpers (cswin-style strip windows)
# ---------------------------------------------------------------------------
def _im2cswin(t, res, H_sp, W_sp, heads):
    bp, n, cp = t.shape
    d = cp // heads
    img = jnp.transpose(t, (0, 2, 1)).reshape(bp, cp, res, res)
    img = img.reshape(bp, cp, res // H_sp, H_sp, res // W_sp, W_sp)
    img = jnp.transpose(img, (0, 2, 4, 3, 5, 1)).reshape(-1, H_sp * W_sp, cp)
    img = img.reshape(-1, H_sp * W_sp, heads, d)
    return jnp.transpose(img, (0, 2, 1, 3))                   # (B'', heads, Nsp, d)


def _get_lepe(t, res, H_sp, W_sp, heads, conv_w, conv_b):
    bp, n, cp = t.shape
    d = cp // heads
    img = jnp.transpose(t, (0, 2, 1)).reshape(bp, cp, res, res)
    img = img.reshape(bp, cp, res // H_sp, H_sp, res // W_sp, W_sp)
    img = jnp.transpose(img, (0, 2, 4, 1, 3, 5)).reshape(-1, cp, H_sp, W_sp)
    # TODO(synk): 3x3 depthwise conv (get_v / LePE) stays on XLA; tiny strip shapes
    #             (e.g. 8x1) do not map cleanly to a Pallas kernel.
    lepe = jax.lax.conv_general_dilated(
        img, conv_w, window_strides=(1, 1), padding=((1, 1), (1, 1)),
        feature_group_count=cp,
        dimension_numbers=("NCHW", "OIHW", "NCHW")) + conv_b[None, :, None, None]

    def to_heads(y):
        y = y.reshape(-1, heads, d, H_sp * W_sp)
        return jnp.transpose(y, (0, 1, 3, 2))                 # (B'', heads, Nsp, d)

    return to_heads(img), to_heads(lepe)


def _lepe_attention(qkv, *, resolution, idx, split_size, num_heads, conv_w, conv_b, attn_core):
    q, k, v = qkv[0], qkv[1], qkv[2]                          # each (b', n, cp)
    bp, n, cp = q.shape
    if idx == 0:
        H_sp, W_sp = resolution, split_size
    else:
        H_sp, W_sp = split_size, resolution
    heads = num_heads
    d = cp // heads
    scale = d ** -0.5

    qh = _im2cswin(q, resolution, H_sp, W_sp, heads)
    kh = _im2cswin(k, resolution, H_sp, W_sp, heads)
    vh, lepe = _get_lepe(v, resolution, H_sp, W_sp, heads, conv_w, conv_b)

    bpp, _, nsp, _ = qh.shape
    g = bpp * heads
    out = attn_core(qh.reshape(g, nsp, d), kh.reshape(g, nsp, d),
                    vh.reshape(g, nsp, d), lepe.reshape(g, nsp, d), scale=scale)
    out = out.reshape(bpp, heads, nsp, d)
    out = jnp.transpose(out, (0, 2, 1, 3)).reshape(bpp, nsp, cp)
    # windows2img
    out = out.reshape(bp, resolution // H_sp, resolution // W_sp, H_sp, W_sp, cp)
    out = jnp.transpose(out, (0, 1, 3, 2, 4, 5)).reshape(bp, resolution, resolution, cp)
    return out.reshape(bp, resolution * resolution, cp)


# ---------------------------------------------------------------------------
# GMIB forward
# ---------------------------------------------------------------------------
def gmib_forward(params, x, x_size, *, window_size, num_heads, shift_size=0, use_pallas=True):
    if use_pallas:
        ln, dense, attn_core = layer_norm_pallas, linear_pallas, strip_attention_pallas
    else:
        ln, dense, attn_core = layer_norm_ref, linear_ref, strip_attention_ref

    h, w = x_size
    b, L, c = x.shape
    c2 = c // 2
    ws = window_size
    shortcut = x

    # ---- norm1 ----
    xn = ln(x.reshape(b * L, c), params["norm1_g"], params["norm1_b"]).reshape(b, h, w, c)

    # ---- FFGB (fourier) branch: every 1x1 conv is a channel-last matmul ----
    t = dense(xn.reshape(b * h * w, c), params["ffgb_conv1_w"], params["ffgb_conv1_b"],
              act="relu")
    t_nchw = jnp.transpose(t.reshape(b, h, w, c2), (0, 3, 1, 2))         # (b, c2, h, w)
    # TODO(synk): rfftn/irfftn (FourierUnit) have no Pallas equivalent; kept on XLA FFT.
    ffted = jnp.fft.rfftn(t_nchw, axes=(-2, -1), norm="ortho")           # (b, c2, h, wf)
    wf = ffted.shape[-1]
    fr = jnp.stack([jnp.real(ffted), jnp.imag(ffted)], axis=-1)          # (b, c2, h, wf, 2)
    fr = jnp.transpose(fr, (0, 1, 4, 2, 3)).reshape(b, 2 * c2, h, wf)    # (b, 2c2, h, wf)
    fr_cl = jnp.transpose(fr, (0, 2, 3, 1)).reshape(b * h * wf, 2 * c2)
    fr_cl = dense(fr_cl, params["fu_conv_w"], params["fu_conv_b"], act="relu")
    fr = jnp.transpose(fr_cl.reshape(b, h, wf, 2 * c2), (0, 3, 1, 2)).reshape(b, c2, 2, h, wf)
    comp = jax.lax.complex(fr[:, :, 0], fr[:, :, 1])
    fu = jnp.fft.irfftn(comp, s=(h, w), axes=(-2, -1), norm="ortho")     # (b, c2, h, w)
    add_cl = jnp.transpose(t_nchw + fu, (0, 2, 3, 1)).reshape(b * h * w, c2)
    f = dense(add_cl, params["ffgb_conv2_w"], params["ffgb_conv2_b"]).reshape(b, h, w, c)

    # ---- window attention branch (RAB with two LePE strip attentions) ----
    shifted = xn if shift_size == 0 else jnp.roll(xn, (-shift_size, -shift_size), axis=(1, 2))
    xw = shifted.reshape(b, h // ws, ws, w // ws, ws, c)
    xw = jnp.transpose(xw, (0, 1, 3, 2, 4, 5)).reshape(-1, ws * ws, c)   # (b', n, c)
    bp, n, _ = xw.shape

    qkv = dense(xw.reshape(bp * n, c), params["qkv_w"], params["qkv_b"]).reshape(bp, n, 3, c)
    qkv = jnp.transpose(qkv, (2, 0, 1, 3))                               # (3, b', n, c)

    x1 = _lepe_attention(qkv[..., : c // 2], resolution=ws, idx=0, split_size=1,
                         num_heads=num_heads // 2, conv_w=params["getv0_w"],
                         conv_b=params["getv0_b"], attn_core=attn_core)
    x2 = _lepe_attention(qkv[..., c // 2:], resolution=ws, idx=1, split_size=1,
                         num_heads=num_heads // 2, conv_w=params["getv1_w"],
                         conv_b=params["getv1_b"], attn_core=attn_core)
    att = jnp.concatenate([x1, x2], axis=2)                              # (b', n, c)
    # rearrange 'b n (g d) -> b n (d g)', g=4
    att = jnp.transpose(att.reshape(bp, n, 4, c // 4), (0, 1, 3, 2)).reshape(bp, n, c)
    att = dense(att.reshape(bp * n, c), params["proj_w"], params["proj_b"]).reshape(bp, n, c)

    aw = att.reshape(b, h // ws, w // ws, ws, ws, c)
    aw = jnp.transpose(aw, (0, 1, 3, 2, 4, 5)).reshape(b, h, w, c)
    attn_img = aw if shift_size == 0 else jnp.roll(aw, (shift_size, shift_size), axis=(1, 2))

    # ---- fusion (1x1 conv on concat) + shortcut, then MLP + residual ----
    cat = jnp.concatenate([attn_img, f], axis=-1).reshape(b * h * w, 2 * c)
    x = dense(cat, params["fusion_w"], params["fusion_b"],
              residual=shortcut.reshape(b * L, c))                       # shortcut fused in
    xn2 = ln(x, params["norm2_g"], params["norm2_b"])
    hmid = dense(xn2, params["fc1_w"], params["fc1_b"], act="gelu")
    out = dense(hmid, params["fc2_w"], params["fc2_b"], residual=x)      # residual fused in
    return out.reshape(b, L, c)


# ---------------------------------------------------------------------------
# Parameters
# ---------------------------------------------------------------------------
def init_params(key, dim, num_heads, mlp_ratio=4.0):
    c, c2, hid = dim, dim // 2, int(dim * mlp_ratio)
    kit = iter(jax.random.split(key, 32))

    def nrm(shape, scale):
        return scale * jax.random.normal(next(kit), shape, jnp.float32)

    def dense_w(shape):
        return nrm(shape, shape[0] ** -0.5)

    return {
        "norm1_g": 1.0 + nrm((c,), 0.1), "norm1_b": nrm((c,), 0.05),
        "norm2_g": 1.0 + nrm((c,), 0.1), "norm2_b": nrm((c,), 0.05),
        "qkv_w": dense_w((c, 3 * c)), "qkv_b": nrm((3 * c,), 0.02),
        "proj_w": dense_w((c, c)), "proj_b": nrm((c,), 0.02),
        "getv0_w": nrm((c2, 1, 3, 3), 0.2), "getv0_b": nrm((c2,), 0.02),
        "getv1_w": nrm((c2, 1, 3, 3), 0.2), "getv1_b": nrm((c2,), 0.02),
        "ffgb_conv1_w": dense_w((c, c2)), "ffgb_conv1_b": nrm((c2,), 0.02),
        "fu_conv_w": dense_w((2 * c2, 2 * c2)), "fu_conv_b": nrm((2 * c2,), 0.02),
        "ffgb_conv2_w": dense_w((c2, c)), "ffgb_conv2_b": nrm((c,), 0.02),
        "fusion_w": dense_w((2 * c, c)), "fusion_b": nrm((c,), 0.02),
        "fc1_w": dense_w((c, hid)), "fc1_b": nrm((hid,), 0.02),
        "fc2_w": dense_w((hid, c)), "fc2_b": nrm((c,), 0.02),
    }


if __name__ == "__main__":
    # Small shapes consistent with GMIB: dim=32, 4 heads, window 8, 16x16 tokens, batch 2.
    B, C, H, W = 2, 32, 16, 16
    NUM_HEADS, WINDOW = 4, 8

    key = jax.random.PRNGKey(0)
    kx, kp = jax.random.split(key)
    x = jax.random.normal(kx, (B, H * W, C), dtype=jnp.float32)
    params = init_params(kp, C, NUM_HEADS)

    fwd_pallas = jax.jit(lambda p, xx: gmib_forward(
        p, xx, (H, W), window_size=WINDOW, num_heads=NUM_HEADS, shift_size=0, use_pallas=True))
    fwd_ref = jax.jit(lambda p, xx: gmib_forward(
        p, xx, (H, W), window_size=WINDOW, num_heads=NUM_HEADS, shift_size=0, use_pallas=False))

    out = jax.block_until_ready(fwd_pallas(params, x))
    ref = jax.block_until_ready(fwd_ref(params, x))

    assert out.shape == (B, H * W, C)
    assert bool(jnp.all(jnp.isfinite(out)))
    err = float(jnp.max(jnp.abs(out - ref)))
    assert err < 0.1, f"Pallas vs JAX reference mismatch: max abs err = {err}"

    print("KERNEL_OK")
</pallas_src>

<mosaic_0001>
module attributes {stable_mosaic.version = 11 : i64} {
  func.func @_linear_kernel(%arg0: i32, %arg1: memref<256x32xf32, #tpu.memory_space<vmem>>, %arg2: memref<32x16xf32, #tpu.memory_space<vmem>>, %arg3: memref<1x16xf32, #tpu.memory_space<vmem>>, %arg4: memref<256x16xf32, #tpu.memory_space<vmem>>) attributes {dimension_semantics = [#tpu.dimension_semantics<parallel>], iteration_bounds = array<i64: 2>, scalar_prefetch = 0 : i64, scratch_operands = 0 : i64, tpu.core_type = #tpu.core_type<tc>, window_params = [{transform_indices = @transform_0, window_bounds = array<i64: 256, 32>}, {pipeline_mode = #tpu.pipeline_mode<synchronous>, transform_indices = @transform_1, window_bounds = array<i64: 32, 16>}, {pipeline_mode = #tpu.pipeline_mode<synchronous>, transform_indices = @transform_2, window_bounds = array<i64: 1, 16>}, {transform_indices = @transform_3, window_bounds = array<i64: 256, 16>}]} {
    %c0 = arith.constant 0 : index
    %c0_0 = arith.constant 0 : index
    %0 = vector.load %arg1[%c0, %c0_0] : memref<256x32xf32, #tpu.memory_space<vmem>>, vector<256x32xf32>
    %c0_1 = arith.constant 0 : index
    %c0_2 = arith.constant 0 : index
    %1 = vector.load %arg2[%c0_1, %c0_2] : memref<32x16xf32, #tpu.memory_space<vmem>>, vector<32x16xf32>
    %cst = arith.constant dense<0.000000e+00> : vector<256x16xf32>
    %2 = tpu.matmul %0, %1, %cst {dimension_numbers = #tpu.dot_dimension_numbers<[1], [0], [0], [1], [0, 0, 1, 1], [], []>} : vector<256x32xf32>, vector<32x16xf32>, vector<256x16xf32> -> vector<256x16xf32>
    %c0_3 = arith.constant 0 : index
    %c0_4 = arith.constant 0 : index
    %3 = vector.load %arg3[%c0_3, %c0_4] : memref<1x16xf32, #tpu.memory_space<vmem>>, vector<1x16xf32>
    %4 = vector.broadcast %3 : vector<1x16xf32> to vector<256x16xf32>
    %5 = arith.addf %2, %4 : vector<256x16xf32>
    %cst_5 = arith.constant 0.000000e+00 : f32
    %6 = vector.broadcast %cst_5 : f32 to vector<256x16xf32>
    %7 = arith.maximumf %5, %6 : vector<256x16xf32>
    %c0_6 = arith.constant 0 : index
    %c0_7 = arith.constant 0 : index
    %8 = vector.load %arg4[%c0_6, %c0_7] : memref<256x16xf32, #tpu.memory_space<vmem>>, vector<256x16xf32>
    tpu.vector_store %arg4[%c0_6, %c0_7], %7 {strides = array<i32>} : memref<256x16xf32, #tpu.memory_space<vmem>>, vector<256x16xf32>,
    return
  }
  func.func @transform_0(%arg0: i32) -> (i32, i32) {
    %c0_i32 = arith.constant 0 : i32
    %c0_i32_0 = arith.constant 0 : i32
    return %arg0, %c0_i32 : i32, i32
  }
  func.func @transform_1(%arg0: i32) -> (i32, i32) {
    %c0_i32 = arith.constant 0 : i32
    %c0_i32_0 = arith.constant 0 : i32
    %c0_i32_1 = arith.constant 0 : i32
    return %c0_i32, %c0_i32_0 : i32, i32
  }
  func.func @transform_2(%arg0: i32) -> (i32, i32) {
    %c0_i32 = arith.constant 0 : i32
    %c0_i32_0 = arith.constant 0 : i32
    %c0_i32_1 = arith.constant 0 : i32
    return %c0_i32, %c0_i32_0 : i32, i32
  }
  func.func @transform_3(%arg0: i32) -> (i32, i32) {
    %c0_i32 = arith.constant 0 : i32
    %c0_i32_0 = arith.constant 0 : i32
    return %arg0, %c0_i32 : i32, i32
  }
}

module attributes {stable_mosaic.version = 11 : i64} {
  func.func @_layer_norm_kernel(%arg0: i32, %arg1: memref<256x32xf32, #tpu.memory_space<vmem>>, %arg2: memref<1x32xf32, #tpu.memory_space<vmem>>, %arg3: memref<1x32xf32, #tpu.memory_space<vmem>>, %arg4: memref<256x32xf32, #tpu.memory_space<vmem>>) attributes {dimension_semantics = [#tpu.dimension_semantics<parallel>], iteration_bounds = array<i64: 2>, scalar_prefetch = 0 : i64, scratch_operands = 0 : i64, tpu.core_type = #tpu.core_type<tc>, window_params = [{transform_indices = @transform_0, window_bounds = array<i64: 256, 32>}, {pipeline_mode = #tpu.pipeline_mode<synchronous>, transform_indices = @transform_1, window_bounds = array<i64: 1, 32>}, {pipeline_mode = #tpu.pipeline_mode<synchronous>, transform_indices = @transform_2, window_bounds = array<i64: 1, 32>}, {transform_indices = @transform_3, window_bounds = array<i64: 256, 32>}]} {
    %c0 = arith.constant 0 : index
    %c0_0 = arith.constant 0 : index
    %0 = vector.load %arg1[%c0, %c0_0] : memref<256x32xf32, #tpu.memory_space<vmem>>, vector<256x32xf32>
    %cst = arith.constant dense<0.000000e+00> : vector<256xf32>
    %1 = vector.multi_reduction <add>, %0, %cst [1] : vector<256x32xf32> to vector<256xf32>
    %2 = vector.shape_cast %1 : vector<256xf32> to vector<256x1xf32>
    %3 = arith.mulf %0, %0 : vector<256x32xf32>
    %cst_1 = arith.constant dense<0.000000e+00> : vector<256xf32>
    %4 = vector.multi_reduction <add>, %3, %cst_1 [1] : vector<256x32xf32> to vector<256xf32>
    %5 = vector.shape_cast %4 : vector<256xf32> to vector<256x1xf32>
    %cst_2 = arith.constant 3.200000e+01 : f32
    %6 = vector.broadcast %cst_2 : f32 to vector<256x1xf32>
    %7 = arith.divf %2, %6 : vector<256x1xf32>
    %cst_3 = arith.constant 3.200000e+01 : f32
    %8 = vector.broadcast %cst_3 : f32 to vector<256x1xf32>
    %9 = arith.divf %5, %8 : vector<256x1xf32>
    %10 = arith.mulf %7, %7 : vector<256x1xf32>
    %11 = arith.subf %9, %10 : vector<256x1xf32>
    %12 = vector.broadcast %7 : vector<256x1xf32> to vector<256x32xf32>
    %13 = arith.subf %0, %12 : vector<256x32xf32>
    %cst_4 = arith.constant 9.99999974E-6 : f32
    %14 = vector.broadcast %cst_4 : f32 to vector<256x1xf32>
    %15 = arith.addf %11, %14 : vector<256x1xf32>
    %16 = math.rsqrt %15 : vector<256x1xf32>
    %17 = vector.broadcast %16 : vector<256x1xf32> to vector<256x32xf32>
    %18 = arith.mulf %13, %17 : vector<256x32xf32>
    %c0_5 = arith.constant 0 : index
    %c0_6 = arith.constant 0 : index
    %19 = vector.load %arg2[%c0_5, %c0_6] : memref<1x32xf32, #tpu.memory_space<vmem>>, vector<1x32xf32>
    %20 = vector.broadcast %19 : vector<1x32xf32> to vector<256x32xf32>
    %21 = arith.mulf %18, %20 : vector<256x32xf32>
    %c0_7 = arith.constant 0 : index
    %c0_8 = arith.constant 0 : index
    %22 = vector.load %arg3[%c0_7, %c0_8] : memref<1x32xf32, #tpu.memory_space<vmem>>, vector<1x32xf32>
    %23 = vector.broadcast %22 : vector<1x32xf32> to vector<256x32xf32>
    %24 = arith.addf %21, %23 : vector<256x32xf32>
    %c0_9 = arith.constant 0 : index
    %c0_10 = arith.constant 0 : index
    %25 = vector.load %arg4[%c0_9, %c0_10] : memref<256x32xf32, #tpu.memory_space<vmem>>, vector<256x32xf32>
    tpu.vector_store %arg4[%c0_9, %c0_10], %24 {strides = array<i32>} : memref<256x32xf32, #tpu.memory_space<vmem>>, vector<256x32xf32>,
    return
  }
  func.func @transform_0(%arg0: i32) -> (i32, i32) {
    %c0_i32 = arith.constant 0 : i32
    %c0_i32_0 = arith.constant 0 : i32
    return %arg0, %c0_i32 : i32, i32
  }
  func.func @transform_1(%arg0: i32) -> (i32, i32) {
    %c0_i32 = arith.constant 0 : i32
    %c0_i32_0 = arith.constant 0 : i32
    %c0_i32_1 = arith.constant 0 : i32
    return %c0_i32, %c0_i32_0 : i32, i32
  }
  func.func @transform_2(%arg0: i32) -> (i32, i32) {
    %c0_i32 = arith.constant 0 : i32
    %c0_i32_0 = arith.constant 0 : i32
    %c0_i32_1 = arith.constant 0 : i32
    return %c0_i32, %c0_i32_0 : i32, i32
  }
  func.func @transform_3(%arg0: i32) -> (i32, i32) {
    %c0_i32 = arith.constant 0 : i32
    %c0_i32_0 = arith.constant 0 : i32
    return %arg0, %c0_i32 : i32, i32
  }
}

module attributes {stable_mosaic.version = 11 : i64} {
  func.func @_linear_kernel(%arg0: i32, %arg1: memref<144x32xf32, #tpu.memory_space<vmem>>, %arg2: memref<32x32xf32, #tpu.memory_space<vmem>>, %arg3: memref<1x32xf32, #tpu.memory_space<vmem>>, %arg4: memref<144x32xf32, #tpu.memory_space<vmem>>) attributes {dimension_semantics = [#tpu.dimension_semantics<parallel>], iteration_bounds = array<i64: 2>, scalar_prefetch = 0 : i64, scratch_operands = 0 : i64, tpu.core_type = #tpu.core_type<tc>, window_params = [{transform_indices = @transform_0, window_bounds = array<i64: 144, 32>}, {pipeline_mode = #tpu.pipeline_mode<synchronous>, transform_indices = @transform_1, window_bounds = array<i64: 32, 32>}, {pipeline_mode = #tpu.pipeline_mode<synchronous>, transform_indices = @transform_2, window_bounds = array<i64: 1, 32>}, {transform_indices = @transform_3, window_bounds = array<i64: 144, 32>}]} {
    %c0 = arith.constant 0 : index
    %c0_0 = arith.constant 0 : index
    %0 = vector.load %arg1[%c0, %c0_0] : memref<144x32xf32, #tpu.memory_space<vmem>>, vector<144x32xf32>
    %c0_1 = arith.constant 0 : index
    %c0_2 = arith.constant 0 : index
    %1 = vector.load %arg2[%c0_1, %c0_2] : memref<32x32xf32, #tpu.memory_space<vmem>>, vector<32x32xf32>
    %cst = arith.constant dense<0.000000e+00> : vector<144x32xf32>
    %2 = tpu.matmul %0, %1, %cst {dimension_numbers = #tpu.dot_dimension_numbers<[1], [0], [0], [1], [0, 0, 1, 1], [], []>} : vector<144x32xf32>, vector<32x32xf32>, vector<144x32xf32> -> vector<144x32xf32>
    %c0_3 = arith.constant 0 : index
    %c0_4 = arith.constant 0 : index
    %3 = vector.load %arg3[%c0_3, %c0_4] : memref<1x32xf32, #tpu.memory_space<vmem>>, vector<1x32xf32>
    %4 = vector.broadcast %3 : vector<1x32xf32> to vector<144x32xf32>
    %5 = arith.addf %2, %4 : vector<144x32xf32>
    %cst_5 = arith.constant 0.000000e+00 : f32
    %6 = vector.broadcast %cst_5 : f32 to vector<144x32xf32>
    %7 = arith.maximumf %5, %6 : vector<144x32xf32>
    %c0_6 = arith.constant 0 : index
    %c0_7 = arith.constant 0 : index
    %8 = vector.load %arg4[%c0_6, %c0_7] : memref<144x32xf32, #tpu.memory_space<vmem>>, vector<144x32xf32>
    tpu.vector_store %arg4[%c0_6, %c0_7], %7 {strides = array<i32>} : memref<144x32xf32, #tpu.memory_space<vmem>>, vector<144x32xf32>,
    return
  }
  func.func @transform_0(%arg0: i32) -> (i32, i32) {
    %c0_i32 = arith.constant 0 : i32
    %c0_i32_0 = arith.constant 0 : i32
    return %arg0, %c0_i32 : i32, i32
  }
  func.func @transform_1(%arg0: i32) -> (i32, i32) {
    %c0_i32 = arith.constant 0 : i32
    %c0_i32_0 = arith.constant 0 : i32
    %c0_i32_1 = arith.constant 0 : i32
    return %c0_i32, %c0_i32_0 : i32, i32
  }
  func.func @transform_2(%arg0: i32) -> (i32, i32) {
    %c0_i32 = arith.constant 0 : i32
    %c0_i32_0 = arith.constant 0 : i32
    %c0_i32_1 = arith.constant 0 : i32
    return %c0_i32, %c0_i32_0 : i32, i32
  }
  func.func @transform_3(%arg0: i32) -> (i32, i32) {
    %c0_i32 = arith.constant 0 : i32
    %c0_i32_0 = arith.constant 0 : i32
    return %arg0, %c0_i32 : i32, i32
  }
}

module attributes {stable_mosaic.version = 11 : i64} {
  func.func @_linear_kernel(%arg0: i32, %arg1: memref<256x16xf32, #tpu.memory_space<vmem>>, %arg2: memref<16x32xf32, #tpu.memory_space<vmem>>, %arg3: memref<1x32xf32, #tpu.memory_space<vmem>>, %arg4: memref<256x32xf32, #tpu.memory_space<vmem>>) attributes {dimension_semantics = [#tpu.dimension_semantics<parallel>], iteration_bounds = array<i64: 2>, scalar_prefetch = 0 : i64, scratch_operands = 0 : i64, tpu.core_type = #tpu.core_type<tc>, window_params = [{transform_indices = @transform_0, window_bounds = array<i64: 256, 16>}, {pipeline_mode = #tpu.pipeline_mode<synchronous>, transform_indices = @transform_1, window_bounds = array<i64: 16, 32>}, {pipeline_mode = #tpu.pipeline_mode<synchronous>, transform_indices = @transform_2, window_bounds = array<i64: 1, 32>}, {transform_indices = @transform_3, window_bounds = array<i64: 256, 32>}]} {
    %c0 = arith.constant 0 : index
    %c0_0 = arith.constant 0 : index
    %0 = vector.load %arg1[%c0, %c0_0] : memref<256x16xf32, #tpu.memory_space<vmem>>, vector<256x16xf32>
    %c0_1 = arith.constant 0 : index
    %c0_2 = arith.constant 0 : index
    %1 = vector.load %arg2[%c0_1, %c0_2] : memref<16x32xf32, #tpu.memory_space<vmem>>, vector<16x32xf32>
    %cst = arith.constant dense<0.000000e+00> : vector<256x32xf32>
    %2 = tpu.matmul %0, %1, %cst {dimension_numbers = #tpu.dot_dimension_numbers<[1], [0], [0], [1], [0, 0, 1, 1], [], []>} : vector<256x16xf32>, vector<16x32xf32>, vector<256x32xf32> -> vector<256x32xf32>
    %c0_3 = arith.constant 0 : index
    %c0_4 = arith.constant 0 : index
    %3 = vector.load %arg3[%c0_3, %c0_4] : memref<1x32xf32, #tpu.memory_space<vmem>>, vector<1x32xf32>
    %4 = vector.broadcast %3 : vector<1x32xf32> to vector<256x32xf32>
    %5 = arith.addf %2, %4 : vector<256x32xf32>
    %c0_5 = arith.constant 0 : index
    %c0_6 = arith.constant 0 : index
    %6 = vector.load %arg4[%c0_5, %c0_6] : memref<256x32xf32, #tpu.memory_space<vmem>>, vector<256x32xf32>
    tpu.vector_store %arg4[%c0_5, %c0_6], %5 {strides = array<i32>} : memref<256x32xf32, #tpu.memory_space<vmem>>, vector<256x32xf32>,
    return
  }
  func.func @transform_0(%arg0: i32) -> (i32, i32) {
    %c0_i32 = arith.constant 0 : i32
    %c0_i32_0 = arith.constant 0 : i32
    return %arg0, %c0_i32 : i32, i32
  }
  func.func @transform_1(%arg0: i32) -> (i32, i32) {
    %c0_i32 = arith.constant 0 : i32
    %c0_i32_0 = arith.constant 0 : i32
    %c0_i32_1 = arith.constant 0 : i32
    return %c0_i32, %c0_i32_0 : i32, i32
  }
  func.func @transform_2(%arg0: i32) -> (i32, i32) {
    %c0_i32 = arith.constant 0 : i32
    %c0_i32_0 = arith.constant 0 : i32
    %c0_i32_1 = arith.constant 0 : i32
    return %c0_i32, %c0_i32_0 : i32, i32
  }
  func.func @transform_3(%arg0: i32) -> (i32, i32) {
    %c0_i32 = arith.constant 0 : i32
    %c0_i32_0 = arith.constant 0 : i32
    return %arg0, %c0_i32 : i32, i32
  }
}

module attributes {stable_mosaic.version = 11 : i64} {
  func.func @_linear_kernel(%arg0: i32, %arg1: memref<256x32xf32, #tpu.memory_space<vmem>>, %arg2: memref<32x96xf32, #tpu.memory_space<vmem>>, %arg3: memref<1x96xf32, #tpu.memory_space<vmem>>, %arg4: memref<256x96xf32, #tpu.memory_space<vmem>>) attributes {dimension_semantics = [#tpu.dimension_semantics<parallel>], iteration_bounds = array<i64: 2>, scalar_prefetch = 0 : i64, scratch_operands = 0 : i64, tpu.core_type = #tpu.core_type<tc>, window_params = [{transform_indices = @transform_0, window_bounds = array<i64: 256, 32>}, {pipeline_mode = #tpu.pipeline_mode<synchronous>, transform_indices = @transform_1, window_bounds = array<i64: 32, 96>}, {pipeline_mode = #tpu.pipeline_mode<synchronous>, transform_indices = @transform_2, window_bounds = array<i64: 1, 96>}, {transform_indices = @transform_3, window_bounds = array<i64: 256, 96>}]} {
    %c0 = arith.constant 0 : index
    %c0_0 = arith.constant 0 : index
    %0 = vector.load %arg1[%c0, %c0_0] : memref<256x32xf32, #tpu.memory_space<vmem>>, vector<256x32xf32>
    %c0_1 = arith.constant 0 : index
    %c0_2 = arith.constant 0 : index
    %1 = vector.load %arg2[%c0_1, %c0_2] : memref<32x96xf32, #tpu.memory_space<vmem>>, vector<32x96xf32>
    %cst = arith.constant dense<0.000000e+00> : vector<256x96xf32>
    %2 = tpu.matmul %0, %1, %cst {dimension_numbers = #tpu.dot_dimension_numbers<[1], [0], [0], [1], [0, 0, 1, 1], [], []>} : vector<256x32xf32>, vector<32x96xf32>, vector<256x96xf32> -> vector<256x96xf32>
    %c0_3 = arith.constant 0 : index
    %c0_4 = arith.constant 0 : index
    %3 = vector.load %arg3[%c0_3, %c0_4] : memref<1x96xf32, #tpu.memory_space<vmem>>, vector<1x96xf32>
    %4 = vector.broadcast %3 : vector<1x96xf32> to vector<256x96xf32>
    %5 = arith.addf %2, %4 : vector<256x96xf32>
    %c0_5 = arith.constant 0 : index
    %c0_6 = arith.constant 0 : index
    %6 = vector.load %arg4[%c0_5, %c0_6] : memref<256x96xf32, #tpu.memory_space<vmem>>, vector<256x96xf32>
    tpu.vector_store %arg4[%c0_5, %c0_6], %5 {strides = array<i32>} : memref<256x96xf32, #tpu.memory_space<vmem>>, vector<256x96xf32>,
    return
  }
  func.func @transform_0(%arg0: i32) -> (i32, i32) {
    %c0_i32 = arith.constant 0 : i32
    %c0_i32_0 = arith.constant 0 : i32
    return %arg0, %c0_i32 : i32, i32
  }
  func.func @transform_1(%arg0: i32) -> (i32, i32) {
    %c0_i32 = arith.constant 0 : i32
    %c0_i32_0 = arith.constant 0 : i32
    %c0_i32_1 = arith.constant 0 : i32
    return %c0_i32, %c0_i32_0 : i32, i32
  }
  func.func @transform_2(%arg0: i32) -> (i32, i32) {
    %c0_i32 = arith.constant 0 : i32
    %c0_i32_0 = arith.constant 0 : i32
    %c0_i32_1 = arith.constant 0 : i32
    return %c0_i32, %c0_i32_0 : i32, i32
  }
  func.func @transform_3(%arg0: i32) -> (i32, i32) {
    %c0_i32 = arith.constant 0 : i32
    %c0_i32_0 = arith.constant 0 : i32
    return %arg0, %c0_i32 : i32, i32
  }
}

module attributes {stable_mosaic.version = 11 : i64} {
  func.func @_strip_attn_kernel(%arg0: i32, %arg1: memref<64x8x8xf32, #tpu.memory_space<vmem>>, %arg2: memref<64x8x8xf32, #tpu.memory_space<vmem>>, %arg3: memref<64x8x8xf32, #tpu.memory_space<vmem>>, %arg4: memref<64x8x8xf32, #tpu.memory_space<vmem>>, %arg5: memref<64x8x8xf32, #tpu.memory_space<vmem>>) attributes {dimension_semantics = [#tpu.dimension_semantics<parallel>], iteration_bounds = array<i64: 2>, scalar_prefetch = 0 : i64, scratch_operands = 0 : i64, tpu.core_type = #tpu.core_type<tc>, window_params = [{transform_indices = @transform_0, window_bounds = array<i64: 64, 8, 8>}, {transform_indices = @transform_1, window_bounds = array<i64: 64, 8, 8>}, {transform_indices = @transform_2, window_bounds = array<i64: 64, 8, 8>}, {transform_indices = @transform_3, window_bounds = array<i64: 64, 8, 8>}, {transform_indices = @transform_4, window_bounds = array<i64: 64, 8, 8>}]} {
    %c0 = arith.constant 0 : index
    %c0_0 = arith.constant 0 : index
    %c0_1 = arith.constant 0 : index
    %0 = vector.load %arg1[%c0, %c0_0, %c0_1] : memref<64x8x8xf32, #tpu.memory_space<vmem>>, vector<64x8x8xf32>
    %cst = arith.constant 0.353553385 : f32
    %1 = vector.broadcast %cst : f32 to vector<64x8x8xf32>
    %2 = arith.mulf %0, %1 : vector<64x8x8xf32>
    %c0_2 = arith.constant 0 : index
    %c0_3 = arith.constant 0 : index
    %c0_4 = arith.constant 0 : index
    %3 = vector.load %arg2[%c0_2, %c0_3, %c0_4] : memref<64x8x8xf32, #tpu.memory_space<vmem>>, vector<64x8x8xf32>
    %c0_5 = arith.constant 0 : index
    %c0_6 = arith.constant 0 : index
    %c0_7 = arith.constant 0 : index
    %4 = vector.load %arg3[%c0_5, %c0_6, %c0_7] : memref<64x8x8xf32, #tpu.memory_space<vmem>>, vector<64x8x8xf32>
    "tpu.trace_start"() <{level = 10 : i32, message = "gnd,gmd->gnm"}> : () -> ()
    %cst_8 = arith.constant dense<0.000000e+00> : vector<64x8x8xf32>
    %5 = tpu.matmul %2, %3, %cst_8 {dimension_numbers = #tpu.dot_dimension_numbers<[2], [2], [1], [1], [0, 0, 0, 1, 1, 1], [0], [0]>} : vector<64x8x8xf32>, vector<64x8x8xf32>, vector<64x8x8xf32> -> vector<64x8x8xf32>
    "tpu.trace_stop"() : () -> ()
    %cst_9 = arith.constant dense<0xFF800000> : vector<64x8xf32>
    %6 = vector.multi_reduction <maximumf>, %5, %cst_9 [2] : vector<64x8x8xf32> to vector<64x8xf32>
    %7 = vector.shape_cast %6 : vector<64x8xf32> to vector<64x8x1xf32>
    %8 = vector.broadcast %7 : vector<64x8x1xf32> to vector<64x8x8xf32>
    %9 = arith.subf %5, %8 : vector<64x8x8xf32>
    %10 = math.exp %9 : vector<64x8x8xf32>
    %cst_10 = arith.constant dense<0.000000e+00> : vector<64x8xf32>
    %11 = vector.multi_reduction <add>, %10, %cst_10 [2] : vector<64x8x8xf32> to vector<64x8xf32>
    %12 = vector.shape_cast %11 : vector<64x8xf32> to vector<64x8x1xf32>
    %13 = vector.broadcast %12 : vector<64x8x1xf32> to vector<64x8x8xf32>
    %14 = arith.divf %10, %13 : vector<64x8x8xf32>
    "tpu.trace_start"() <{level = 10 : i32, message = "gnm,gmd->gnd"}> : () -> ()
    %cst_11 = arith.constant dense<0.000000e+00> : vector<64x8x8xf32>
    %15 = tpu.matmul %14, %4, %cst_11 {dimension_numbers = #tpu.dot_dimension_numbers<[2], [1], [1], [2], [0, 0, 0, 1, 1, 2], [0], [0]>} : vector<64x8x8xf32>, vector<64x8x8xf32>, vector<64x8x8xf32> -> vector<64x8x8xf32>
    "tpu.trace_stop"() : () -> ()
    %c0_12 = arith.constant 0 : index
    %c0_13 = arith.constant 0 : index
    %c0_14 = arith.constant 0 : index
    %16 = vector.load %arg4[%c0_12, %c0_13, %c0_14] : memref<64x8x8xf32, #tpu.memory_space<vmem>>, vector<64x8x8xf32>
    %17 = arith.addf %15, %16 : vector<64x8x8xf32>
    %c0_15 = arith.constant 0 : index
    %c0_16 = arith.constant 0 : index
    %c0_17 = arith.constant 0 : index
    %18 = vector.load %arg5[%c0_15, %c0_16, %c0_17] : memref<64x8x8xf32, #tpu.memory_space<vmem>>, vector<64x8x8xf32>
    tpu.vector_store %arg5[%c0_15, %c0_16, %c0_17], %17 {strides = array<i32>} : memref<64x8x8xf32, #tpu.memory_space<vmem>>, vector<64x8x8xf32>,
    return
  }
  func.func @transform_0(%arg0: i32) -> (i32, i32, i32) {
    %c0_i32 = arith.constant 0 : i32
    %c0_i32_0 = arith.constant 0 : i32
    %c0_i32_1 = arith.constant 0 : i32
    return %arg0, %c0_i32, %c0_i32_0 : i32, i32, i32
  }
  func.func @transform_1(%arg0: i32) -> (i32, i32, i32) {
    %c0_i32 = arith.constant 0 : i32
    %c0_i32_0 = arith.constant 0 : i32
    %c0_i32_1 = arith.constant 0 : i32
    return %arg0, %c0_i32, %c0_i32_0 : i32, i32, i32
  }
  func.func @transform_2(%arg0: i32) -> (i32, i32, i32) {
    %c0_i32 = arith.constant 0 : i32
    %c0_i32_0 = arith.constant 0 : i32
    %c0_i32_1 = arith.constant 0 : i32
    return %arg0, %c0_i32, %c0_i32_0 : i32, i32, i32
  }
  func.func @transform_3(%arg0: i32) -> (i32, i32, i32) {
    %c0_i32 = arith.constant 0 : i32
    %c0_i32_0 = arith.constant 0 : i32
    %c0_i32_1 = arith.constant 0 : i32
    return %arg0, %c0_i32, %c0_i32_0 : i32, i32, i32
  }
  func.func @transform_4(%arg0: i32) -> (i32, i32, i32) {
    %c0_i32 = arith.constant 0 : i32
    %c0_i32_0 = arith.constant 0 : i32
    %c0_i32_1 = arith.constant 0 : i32
    return %arg0, %c0_i32, %c0_i32_0 : i32, i32, i32
  }
}

module attributes {stable_mosaic.version = 11 : i64} {
  func.func @_linear_kernel(%arg0: i32, %arg1: memref<256x64xf32, #tpu.memory_space<vmem>>, %arg2: memref<64x32xf32, #tpu.memory_space<vmem>>, %arg3: memref<1x32xf32, #tpu.memory_space<vmem>>, %arg4: memref<256x32xf32, #tpu.memory_space<vmem>>, %arg5: memref<256x32xf32, #tpu.memory_space<vmem>>) attributes {dimension_semantics = [#tpu.dimension_semantics<parallel>], iteration_bounds = array<i64: 2>, scalar_prefetch = 0 : i64, scratch_operands = 0 : i64, tpu.core_type = #tpu.core_type<tc>, window_params = [{transform_indices = @transform_0, window_bounds = array<i64: 256, 64>}, {pipeline_mode = #tpu.pipeline_mode<synchronous>, transform_indices = @transform_1, window_bounds = array<i64: 64, 32>}, {pipeline_mode = #tpu.pipeline_mode<synchronous>, transform_indices = @transform_2, window_bounds = array<i64: 1, 32>}, {transform_indices = @transform_3, window_bounds = array<i64: 256, 32>}, {transform_indices = @transform_4, window_bounds = array<i64: 256, 32>}]} {
    %c0 = arith.constant 0 : index
    %c0_0 = arith.constant 0 : index
    %0 = vector.load %arg1[%c0, %c0_0] : memref<256x64xf32, #tpu.memory_space<vmem>>, vector<256x64xf32>
    %c0_1 = arith.constant 0 : index
    %c0_2 = arith.constant 0 : index
    %1 = vector.load %arg2[%c0_1, %c0_2] : memref<64x32xf32, #tpu.memory_space<vmem>>, vector<64x32xf32>
    %cst = arith.constant dense<0.000000e+00> : vector<256x32xf32>
    %2 = tpu.matmul %0, %1, %cst {dimension_numbers = #tpu.dot_dimension_numbers<[1], [0], [0], [1], [0, 0, 1, 1], [], []>} : vector<256x64xf32>, vector<64x32xf32>, vector<256x32xf32> -> vector<256x32xf32>
    %c0_3 = arith.constant 0 : index
    %c0_4 = arith.constant 0 : index
    %3 = vector.load %arg3[%c0_3, %c0_4] : memref<1x32xf32, #tpu.memory_space<vmem>>, vector<1x32xf32>
    %4 = vector.broadcast %3 : vector<1x32xf32> to vector<256x32xf32>
    %5 = arith.addf %2, %4 : vector<256x32xf32>
    %c0_5 = arith.constant 0 : index
    %c0_6 = arith.constant 0 : index
    %6 = vector.load %arg4[%c0_5, %c0_6] : memref<256x32xf32, #tpu.memory_space<vmem>>, vector<256x32xf32>
    %7 = arith.addf %5, %6 : vector<256x32xf32>
    %c0_7 = arith.constant 0 : index
    %c0_8 = arith.constant 0 : index
    %8 = vector.load %arg5[%c0_7, %c0_8] : memref<256x32xf32, #tpu.memory_space<vmem>>, vector<256x32xf32>
    tpu.vector_store %arg5[%c0_7, %c0_8], %7 {strides = array<i32>} : memref<256x32xf32, #tpu.memory_space<vmem>>, vector<256x32xf32>,
    return
  }
  func.func @transform_0(%arg0: i32) -> (i32, i32) {
    %c0_i32 = arith.constant 0 : i32
    %c0_i32_0 = arith.constant 0 : i32
    return %arg0, %c0_i32 : i32, i32
  }
  func.func @transform_1(%arg0: i32) -> (i32, i32) {
    %c0_i32 = arith.constant 0 : i32
    %c0_i32_0 = arith.constant 0 : i32
    %c0_i32_1 = arith.constant 0 : i32
    return %c0_i32, %c0_i32_0 : i32, i32
  }
  func.func @transform_2(%arg0: i32) -> (i32, i32) {
    %c0_i32 = arith.constant 0 : i32
    %c0_i32_0 = arith.constant 0 : i32
    %c0_i32_1 = arith.constant 0 : i32
    return %c0_i32, %c0_i32_0 : i32, i32
  }
  func.func @transform_3(%arg0: i32) -> (i32, i32) {
    %c0_i32 = arith.constant 0 : i32
    %c0_i32_0 = arith.constant 0 : i32
    return %arg0, %c0_i32 : i32, i32
  }
  func.func @transform_4(%arg0: i32) -> (i32, i32) {
    %c0_i32 = arith.constant 0 : i32
    %c0_i32_0 = arith.constant 0 : i32
    return %arg0, %c0_i32 : i32, i32
  }
}

module attributes {stable_mosaic.version = 11 : i64} {
  func.func @_linear_kernel(%arg0: i32, %arg1: memref<256x32xf32, #tpu.memory_space<vmem>>, %arg2: memref<32x32xf32, #tpu.memory_space<vmem>>, %arg3: memref<1x32xf32, #tpu.memory_space<vmem>>, %arg4: memref<256x32xf32, #tpu.memory_space<vmem>>) attributes {dimension_semantics = [#tpu.dimension_semantics<parallel>], iteration_bounds = array<i64: 2>, scalar_prefetch = 0 : i64, scratch_operands = 0 : i64, tpu.core_type = #tpu.core_type<tc>, window_params = [{transform_indices = @transform_0, window_bounds = array<i64: 256, 32>}, {pipeline_mode = #tpu.pipeline_mode<synchronous>, transform_indices = @transform_1, window_bounds = array<i64: 32, 32>}, {pipeline_mode = #tpu.pipeline_mode<synchronous>, transform_indices = @transform_2, window_bounds = array<i64: 1, 32>}, {transform_indices = @transform_3, window_bounds = array<i64: 256, 32>}]} {
    %c0 = arith.constant 0 : index
    %c0_0 = arith.constant 0 : index
    %0 = vector.load %arg1[%c0, %c0_0] : memref<256x32xf32, #tpu.memory_space<vmem>>, vector<256x32xf32>
    %c0_1 = arith.constant 0 : index
    %c0_2 = arith.constant 0 : index
    %1 = vector.load %arg2[%c0_1, %c0_2] : memref<32x32xf32, #tpu.memory_space<vmem>>, vector<32x32xf32>
    %cst = arith.constant dense<0.000000e+00> : vector<256x32xf32>
    %2 = tpu.matmul %0, %1, %cst {dimension_numbers = #tpu.dot_dimension_numbers<[1], [0], [0], [1], [0, 0, 1, 1], [], []>} : vector<256x32xf32>, vector<32x32xf32>, vector<256x32xf32> -> vector<256x32xf32>
    %c0_3 = arith.constant 0 : index
    %c0_4 = arith.constant 0 : index
    %3 = vector.load %arg3[%c0_3, %c0_4] : memref<1x32xf32, #tpu.memory_space<vmem>>, vector<1x32xf32>
    %4 = vector.broadcast %3 : vector<1x32xf32> to vector<256x32xf32>
    %5 = arith.addf %2, %4 : vector<256x32xf32>
    %c0_5 = arith.constant 0 : index
    %c0_6 = arith.constant 0 : index
    %6 = vector.load %arg4[%c0_5, %c0_6] : memref<256x32xf32, #tpu.memory_space<vmem>>, vector<256x32xf32>
    tpu.vector_store %arg4[%c0_5, %c0_6], %5 {strides = array<i32>} : memref<256x32xf32, #tpu.memory_space<vmem>>, vector<256x32xf32>,
    return
  }
  func.func @transform_0(%arg0: i32) -> (i32, i32) {
    %c0_i32 = arith.constant 0 : i32
    %c0_i32_0 = arith.constant 0 : i32
    return %arg0, %c0_i32 : i32, i32
  }
  func.func @transform_1(%arg0: i32) -> (i32, i32) {
    %c0_i32 = arith.constant 0 : i32
    %c0_i32_0 = arith.constant 0 : i32
    %c0_i32_1 = arith.constant 0 : i32
    return %c0_i32, %c0_i32_0 : i32, i32
  }
  func.func @transform_2(%arg0: i32) -> (i32, i32) {
    %c0_i32 = arith.constant 0 : i32
    %c0_i32_0 = arith.constant 0 : i32
    %c0_i32_1 = arith.constant 0 : i32
    return %c0_i32, %c0_i32_0 : i32, i32
  }
  func.func @transform_3(%arg0: i32) -> (i32, i32) {
    %c0_i32 = arith.constant 0 : i32
    %c0_i32_0 = arith.constant 0 : i32
    return %arg0, %c0_i32 : i32, i32
  }
}

module attributes {stable_mosaic.version = 11 : i64} {
  func.func @_linear_kernel(%arg0: i32, %arg1: memref<256x32xf32, #tpu.memory_space<vmem>>, %arg2: memref<32x128xf32, #tpu.memory_space<vmem>>, %arg3: memref<1x128xf32, #tpu.memory_space<vmem>>, %arg4: memref<256x128xf32, #tpu.memory_space<vmem>>) attributes {dimension_semantics = [#tpu.dimension_semantics<parallel>], iteration_bounds = array<i64: 2>, scalar_prefetch = 0 : i64, scratch_operands = 0 : i64, tpu.core_type = #tpu.core_type<tc>, window_params = [{transform_indices = @transform_0, window_bounds = array<i64: 256, 32>}, {pipeline_mode = #tpu.pipeline_mode<synchronous>, transform_indices = @transform_1, window_bounds = array<i64: 32, 128>}, {pipeline_mode = #tpu.pipeline_mode<synchronous>, transform_indices = @transform_2, window_bounds = array<i64: 1, 128>}, {transform_indices = @transform_3, window_bounds = array<i64: 256, 128>}]} {
    %c0 = arith.constant 0 : index
    %c0_0 = arith.constant 0 : index
    %0 = vector.load %arg1[%c0, %c0_0] : memref<256x32xf32, #tpu.memory_space<vmem>>, vector<256x32xf32>
    %c0_1 = arith.constant 0 : index
    %c0_2 = arith.constant 0 : index
    %1 = vector.load %arg2[%c0_1, %c0_2] : memref<32x128xf32, #tpu.memory_space<vmem>>, vector<32x128xf32>
    %cst = arith.constant dense<0.000000e+00> : vector<256x128xf32>
    %2 = tpu.matmul %0, %1, %cst {dimension_numbers = #tpu.dot_dimension_numbers<[1], [0], [0], [1], [0, 0, 1, 1], [], []>} : vector<256x32xf32>, vector<32x128xf32>, vector<256x128xf32> -> vector<256x128xf32>
    %c0_3 = arith.constant 0 : index
    %c0_4 = arith.constant 0 : index
    %3 = vector.load %arg3[%c0_3, %c0_4] : memref<1x128xf32, #tpu.memory_space<vmem>>, vector<1x128xf32>
    %4 = vector.broadcast %3 : vector<1x128xf32> to vector<256x128xf32>
    %5 = arith.addf %2, %4 : vector<256x128xf32>
    %cst_5 = arith.constant 5.000000e-01 : f32
    %6 = vector.broadcast %cst_5 : f32 to vector<256x128xf32>
    %7 = arith.mulf %6, %5 : vector<256x128xf32>
    %cst_6 = arith.constant 4.471500e-02 : f32
    %8 = vector.broadcast %cst_6 : f32 to vector<256x128xf32>
    %9 = arith.mulf %8, %5 : vector<256x128xf32>
    %10 = arith.mulf %9, %5 : vector<256x128xf32>
    %11 = arith.mulf %10, %5 : vector<256x128xf32>
    %12 = arith.addf %5, %11 : vector<256x128xf32>
    %cst_7 = arith.constant 0.797884583 : f32
    %13 = vector.broadcast %cst_7 : f32 to vector<256x128xf32>
    %14 = arith.mulf %13, %12 : vector<256x128xf32>
    %15 = math.tanh %14 : vector<256x128xf32>
    %cst_8 = arith.constant 1.000000e+00 : f32
    %16 = vector.broadcast %cst_8 : f32 to vector<256x128xf32>
    %17 = arith.addf %16, %15 : vector<256x128xf32>
    %18 = arith.mulf %7, %17 : vector<256x128xf32>
    %c0_9 = arith.constant 0 : index
    %c0_10 = arith.constant 0 : index
    %19 = vector.load %arg4[%c0_9, %c0_10] : memref<256x128xf32, #tpu.memory_space<vmem>>, vector<256x128xf32>
    tpu.vector_store %arg4[%c0_9, %c0_10], %18 {strides = array<i32>} : memref<256x128xf32, #tpu.memory_space<vmem>>, vector<256x128xf32>,
    return
  }
  func.func @transform_0(%arg0: i32) -> (i32, i32) {
    %c0_i32 = arith.constant 0 : i32
    %c0_i32_0 = arith.constant 0 : i32
    return %arg0, %c0_i32 : i32, i32
  }
  func.func @transform_1(%arg0: i32) -> (i32, i32) {
    %c0_i32 = arith.constant 0 : i32
    %c0_i32_0 = arith.constant 0 : i32
    %c0_i32_1 = arith.constant 0 : i32
    return %c0_i32, %c0_i32_0 : i32, i32
  }
  func.func @transform_2(%arg0: i32) -> (i32, i32) {
    %c0_i32 = arith.constant 0 : i32
    %c0_i32_0 = arith.constant 0 : i32
    %c0_i32_1 = arith.constant 0 : i32
    return %c0_i32, %c0_i32_0 : i32, i32
  }
  func.func @transform_3(%arg0: i32) -> (i32, i32) {
    %c0_i32 = arith.constant 0 : i32
    %c0_i32_0 = arith.constant 0 : i32
    return %arg0, %c0_i32 : i32, i32
  }
}

module attributes {stable_mosaic.version = 11 : i64} {
  func.func @_linear_kernel(%arg0: i32, %arg1: memref<256x128xf32, #tpu.memory_space<vmem>>, %arg2: memref<128x32xf32, #tpu.memory_space<vmem>>, %arg3: memref<1x32xf32, #tpu.memory_space<vmem>>, %arg4: memref<256x32xf32, #tpu.memory_space<vmem>>, %arg5: memref<256x32xf32, #tpu.memory_space<vmem>>) attributes {dimension_semantics = [#tpu.dimension_semantics<parallel>], iteration_bounds = array<i64: 2>, scalar_prefetch = 0 : i64, scratch_operands = 0 : i64, tpu.core_type = #tpu.core_type<tc>, window_params = [{transform_indices = @transform_0, window_bounds = array<i64: 256, 128>}, {pipeline_mode = #tpu.pipeline_mode<synchronous>, transform_indices = @transform_1, window_bounds = array<i64: 128, 32>}, {pipeline_mode = #tpu.pipeline_mode<synchronous>, transform_indices = @transform_2, window_bounds = array<i64: 1, 32>}, {transform_indices = @transform_3, window_bounds = array<i64: 256, 32>}, {transform_indices = @transform_4, window_bounds = array<i64: 256, 32>}]} {
    %c0 = arith.constant 0 : index
    %c0_0 = arith.constant 0 : index
    %0 = vector.load %arg1[%c0, %c0_0] : memref<256x128xf32, #tpu.memory_space<vmem>>, vector<256x128xf32>
    %c0_1 = arith.constant 0 : index
    %c0_2 = arith.constant 0 : index
    %1 = vector.load %arg2[%c0_1, %c0_2] : memref<128x32xf32, #tpu.memory_space<vmem>>, vector<128x32xf32>
    %cst = arith.constant dense<0.000000e+00> : vector<256x32xf32>
    %2 = tpu.matmul %0, %1, %cst {dimension_numbers = #tpu.dot_dimension_numbers<[1], [0], [0], [1], [0, 0, 1, 1], [], []>} : vector<256x128xf32>, vector<128x32xf32>, vector<256x32xf32> -> vector<256x32xf32>
    %c0_3 = arith.constant 0 : index
    %c0_4 = arith.constant 0 : index
    %3 = vector.load %arg3[%c0_3, %c0_4] : memref<1x32xf32, #tpu.memory_space<vmem>>, vector<1x32xf32>
    %4 = vector.broadcast %3 : vector<1x32xf32> to vector<256x32xf32>
    %5 = arith.addf %2, %4 : vector<256x32xf32>
    %c0_5 = arith.constant 0 : index
    %c0_6 = arith.constant 0 : index
    %6 = vector.load %arg4[%c0_5, %c0_6] : memref<256x32xf32, #tpu.memory_space<vmem>>, vector<256x32xf32>
    %7 = arith.addf %5, %6 : vector<256x32xf32>
    %c0_7 = arith.constant 0 : index
    %c0_8 = arith.constant 0 : index
    %8 = vector.load %arg5[%c0_7, %c0_8] : memref<256x32xf32, #tpu.memory_space<vmem>>, vector<256x32xf32>
    tpu.vector_store %arg5[%c0_7, %c0_8], %7 {strides = array<i32>} : memref<256x32xf32, #tpu.memory_space<vmem>>, vector<256x32xf32>,
    return
  }
  func.func @transform_0(%arg0: i32) -> (i32, i32) {
    %c0_i32 = arith.constant 0 : i32
    %c0_i32_0 = arith.constant 0 : i32
    return %arg0, %c0_i32 : i32, i32
  }
  func.func @transform_1(%arg0: i32) -> (i32, i32) {
    %c0_i32 = arith.constant 0 : i32
    %c0_i32_0 = arith.constant 0 : i32
    %c0_i32_1 = arith.constant 0 : i32
    return %c0_i32, %c0_i32_0 : i32, i32
  }
  func.func @transform_2(%arg0: i32) -> (i32, i32) {
    %c0_i32 = arith.constant 0 : i32
    %c0_i32_0 = arith.constant 0 : i32
    %c0_i32_1 = arith.constant 0 : i32
    return %c0_i32, %c0_i32_0 : i32, i32
  }
  func.func @transform_3(%arg0: i32) -> (i32, i32) {
    %c0_i32 = arith.constant 0 : i32
    %c0_i32_0 = arith.constant 0 : i32
    return %arg0, %c0_i32 : i32, i32
  }
  func.func @transform_4(%arg0: i32) -> (i32, i32) {
    %c0_i32 = arith.constant 0 : i32
    %c0_i32_0 = arith.constant 0 : i32
    return %arg0, %c0_i32 : i32, i32
  }
}

</mosaic_0001>

<bundles_post_ra>
// kernel: _lambda_.17
= control target key start
LH: loop header
LB: loop body
LE: loop exit
PB: predicated region body
PF: predicated region fallthrough
CT: control target
= control target key end

     0   :  { %s637_s12 = smov 0   ;;  %s842_s0 = inlined_call_operand.vmem [shape: f32[512,32], index: 0, kind: input, shape index: {}]   ;;  %s843_s1 = inlined_call_operand.vmem [shape: f32[32,16], index: 1, kind: input, shape index: {}]   ;;  %s844_s2 = inlined_call_operand.vmem [shape: f32[1,16], index: 2, kind: input, shape index: {}]   ;;  %s845_s3 = inlined_call_operand.vmem [shape: f32[512,16], index: 3, kind: output, shape index: {}]  }
   0x1 LB: > { %s545_s13 = sadd.s32 4294967295, %s615_s12   ;;  %p549_p0 = scmp.ge.s32.totalorder %s615_s12, 1  ;;  %s615_s12 = sphi %s637_s12, %s13_s12  }
   0x2   : > { %p138_p1 = scmp.lt.s32.totalorder %s615_s12, 3 }
   0x4   : > { %p139_p2 = pnand %p549_p0, %p138_p1 }
   0x5   : > { %s550_s18 = sshll.u32 (!%p139_p2), %s545_s13, 5 }
   0x6   : > { %142 = sbr.rel (%p139_p2) target bundleno = 213 (0xd5), region = 32  ;;  %p163_p3 = scmp.lt.s32.totalorder (!%p139_p2), %s550_s18, 63 }
   0xb   : > { %v209_v0 = vld [vmem:[%s843_s1 + $0x18] sm:$0xff]  ;;  %v208_v1 = vld [vmem:[%s843_s1 + $0x10] sm:$0xff]  ;;  %v207_v2 = vld [vmem:[%s843_s1 + $0x8] sm:$0xff]  ;;  %s847_s18 = smov (!%p163_p3, %s550_s18), 63  ;;  %vm214_vm0 = vcmask 261120   ;;  %vm456_vm1 = vcmask 130048  }
   0xc   : > { %589 = vmatpush.msra.mxu2 %v209_v0  ;;  %590 = vmatpush.msra.mxu3 %v209_v0  ;;  %v206_v3 = vld [vmem:[%s843_s1] sm:$0xff]  ;;  %s551_s23 = sshll.u32 %s847_s18, 3 }
   0xd   : > { %323 = vmatpush.msra.mxu0 %v209_v0  ;;  %588 = vmatpush.msra.mxu1 %v209_v0  ;;  %s665_s26 = scalar_lea.vmem %s842_s0, %s551_s23  ;;  %v734_v36 = vld [vmem:[%s844_s2] ss:$0 sm:$0xff]  ;;  %s743_s4 = scalar_lea.vmem %s845_s3, %s551_s23 }
   0xe   : > { %592 = vmatpush.msra.mxu2 %v208_v1  ;;  %593 = vmatpush.msra.mxu3 %v208_v1  ;;  %v190_v4 = vld [vmem:[%s665_s26 + $0x80] sm:$0xff]  ;;  %v191_v8 = vld [vmem:[%s665_s26 + $0x88] sm:$0xff]  ;;  %v192_v12 = vld [vmem:[%s665_s26 + $0x90] sm:$0xff] }
   0xf   : > { %324 = vmatpush.msra.mxu0 %v208_v1  ;;  %591 = vmatpush.msra.mxu1 %v208_v1  ;;  %v198_v5 = vld [vmem:[%s665_s26 + $0xc0] sm:$0xff]  ;;  %v199_v9 = vld [vmem:[%s665_s26 + $0xc8] sm:$0xff]  ;;  %v200_v13 = vld [vmem:[%s665_s26 + $0xd0] sm:$0xff] }
  0x10   : > { %595 = vmatpush.msra.mxu2 %v207_v2  ;;  %596 = vmatpush.msra.mxu3 %v207_v2  ;;  %v174_v6 = vld [vmem:[%s665_s26] sm:$0xff]  ;;  %v175_v10 = vld [vmem:[%s665_s26 + $0x8] sm:$0xff]  ;;  %v176_v14 = vld [vmem:[%s665_s26 + $0x10] sm:$0xff] }
  0x11   : > { %325 = vmatpush.msra.mxu0 %v207_v2  ;;  %594 = vmatpush.msra.mxu1 %v207_v2  ;;  %v182_v7 = vld [vmem:[%s665_s26 + $0x40] sm:$0xff]  ;;  %v183_v11 = vld [vmem:[%s665_s26 + $0x48] sm:$0xff]  ;;  %v184_v15 = vld [vmem:[%s665_s26 + $0x50] sm:$0xff] }
  0x12   : > { %598 = vmatpush.msra.mxu2 %v206_v3  ;;  %599 = vmatpush.msra.mxu3 %v206_v3  ;;  %v193_v16 = vld [vmem:[%s665_s26 + $0x98] sm:$0xff]  ;;  %v194_v20 = vld [vmem:[%s665_s26 + $0xa0] sm:$0xff]  ;;  %v195_v24 = vld [vmem:[%s665_s26 + $0xa8] sm:$0xff] }
  0x13   : > { %570 = vmatmul.msk.f32.vlgmr.msra.gmra.mxu2 %vm214_vm0, %v190_v4  ;;  %578 = vmatmul.msk.f32.vlgmr.msra.gmra.mxu3 %vm214_vm0, %v198_v5  ;;  %v201_v17 = vld [vmem:[%s665_s26 + $0xd8] sm:$0xff]  ;;  %v202_v21 = vld [vmem:[%s665_s26 + $0xe0] sm:$0xff]  ;;  %v203_v25 = vld [vmem:[%s665_s26 + $0xe8] sm:$0xff] }
  0x14   : > { %326 = vmatpush.msra.mxu0 %v206_v3  ;;  %597 = vmatpush.msra.mxu1 %v206_v3  ;;  %v177_v18 = vld [vmem:[%s665_s26 + $0x18] sm:$0xff]  ;;  %v178_v22 = vld [vmem:[%s665_s26 + $0x20] sm:$0xff]  ;;  %v179_v26 = vld [vmem:[%s665_s26 + $0x28] sm:$0xff] }
  0x15   : > { %554 = vmatmul.msk.f32.vlgmr.msra.gmra.mxu0 %vm214_vm0, %v174_v6  ;;  %562 = vmatmul.msk.f32.vlgmr.msra.gmra.mxu1 %vm214_vm0, %v182_v7  ;;  %v185_v19 = vld [vmem:[%s665_s26 + $0x58] sm:$0xff]  ;;  %v186_v23 = vld [vmem:[%s665_s26 + $0x60] sm:$0xff]  ;;  %v187_v27 = vld [vmem:[%s665_s26 + $0x68] sm:$0xff] }
  0x16   : > { %v196_v28 = vld [vmem:[%s665_s26 + $0xb0] sm:$0xff]  ;;  %v197_v32 = vld [vmem:[%s665_s26 + $0xb8] sm:$0xff] }
  0x17   : > { %v204_v29 = vld [vmem:[%s665_s26 + $0xf0] sm:$0xff]  ;;  %v205_v33 = vld [vmem:[%s665_s26 + $0xf8] sm:$0xff] }
  0x18   : > { %v180_v30 = vld [vmem:[%s665_s26 + $0x30] sm:$0xff]  ;;  %v181_v34 = vld [vmem:[%s665_s26 + $0x38] sm:$0xff] }
  0x19   : > { %v188_v31 = vld [vmem:[%s665_s26 + $0x70] sm:$0xff]  ;;  %v189_v35 = vld [vmem:[%s665_s26 + $0x78] sm:$0xff] }
  0x1b   : > { %571 = vmatmul.msk.f32.gmra.mxu2 %vm214_vm0, %v191_v8  ;;  %579 = vmatmul.msk.f32.gmra.mxu3 %vm214_vm0, %v199_v9 }
  0x1d   : > { %555 = vmatmul.msk.f32.gmra.mxu0 %vm214_vm0, %v175_v10  ;;  %563 = vmatmul.msk.f32.gmra.mxu1 %vm214_vm0, %v183_v11 }
  0x23   : > { %572 = vmatmul.msk.f32.gmra.mxu2 %vm214_vm0, %v192_v12  ;;  %580 = vmatmul.msk.f32.gmra.mxu3 %vm214_vm0, %v200_v13 }
  0x25   : > { %556 = vmatmul.msk.f32.gmra.mxu0 %vm214_vm0, %v176_v14  ;;  %564 = vmatmul.msk.f32.gmra.mxu1 %vm214_vm0, %v184_v15 }
  0x2b   : > { %573 = vmatmul.msk.f32.gmra.mxu2 %vm214_vm0, %v193_v16  ;;  %581 = vmatmul.msk.f32.gmra.mxu3 %vm214_vm0, %v201_v17 }
  0x2d   : > { %557 = vmatmul.msk.f32.gmra.mxu0 %vm214_vm0, %v177_v18  ;;  %565 = vmatmul.msk.f32.gmra.mxu1 %vm214_vm0, %v185_v19 }
  0x33   : > { %574 = vmatmul.msk.f32.gmra.mxu2 %vm214_vm0, %v194_v20  ;;  %582 = vmatmul.msk.f32.gmra.mxu3 %vm214_vm0, %v202_v21 }
  0x35   : > { %558 = vmatmul.msk.f32.gmra.mxu0 %vm214_vm0, %v178_v22  ;;  %566 = vmatmul.msk.f32.gmra.mxu1 %vm214_vm0, %v186_v23 }
  0x3b   : > { %575 = vmatmul.msk.f32.gmra.mxu2 %vm214_vm0, %v195_v24  ;;  %583 = vmatmul.msk.f32.gmra.mxu3 %vm214_vm0, %v203_v25 }
  0x3d   : > { %559 = vmatmul.msk.f32.gmra.mxu0 %vm214_vm0, %v179_v26  ;;  %567 = vmatmul.msk.f32.gmra.mxu1 %vm214_vm0, %v187_v27 }
  0x43   : > { %576 = vmatmul.msk.f32.gmra.mxu2 %vm214_vm0, %v196_v28  ;;  %584 = vmatmul.msk.f32.gmra.mxu3 %vm214_vm0, %v204_v29 }
  0x45   : > { %560 = vmatmul.msk.f32.gmra.mxu0 %vm214_vm0, %v180_v30  ;;  %568 = vmatmul.msk.f32.gmra.mxu1 %vm214_vm0, %v188_v31 }
  0x4b   : > { %577 = vmatmul.msk.f32.gmra.mxu2 %vm214_vm0, %v197_v32  ;;  %585 = vmatmul.msk.f32.gmra.mxu3 %vm214_vm0, %v205_v33 }
  0x4d   : > { %561 = vmatmul.msk.f32.gmra.mxu0 %vm214_vm0, %v181_v34  ;;  %569 = vmatmul.msk.f32.gmra.mxu1 %vm214_vm0, %v189_v35 }
  0x92   : > { %v328_v37 = vpop.f32.mrf.mxu0  ;;  %v352_v38 = vpop.f32.mrf.mxu1 }
  0x93   : > { %v329_v39 = vadd.f32 %v734_v36, %v328_v37  ;;  %v353_v40 = vadd.f32 %v734_v36, %v352_v38 }
  0x95   : > { %v424_v41 = vmax.f32 %v329_v39, 0.0  ;;  %v432_v42 = vmax.f32 %v353_v40, 0.0 }
  0x96   : > { %v376_v43 = vpop.f32.mrf.mxu2  ;;  %v400_v44 = vpop.f32.mrf.mxu3 }
  0x97   : > { %457 = vst.msk [vmem:[%s743_s4] sm:$0xff] %vm456_vm1, %v424_v41  ;;  %v377_v45 = vadd.f32 %v734_v36, %v376_v43  ;;  %v401_v46 = vadd.f32 %v734_v36, %v400_v44 }
  0x98   : > { %465 = vst.msk [vmem:[%s743_s4 + $0x40] sm:$0xff] %vm456_vm1, %v432_v42 }
  0x99   : > { %v440_v47 = vmax.f32 %v377_v45, 0.0  ;;  %v448_v48 = vmax.f32 %v401_v46, 0.0 }
  0x9a   : > { %v331_v49 = vpop.f32.mrf.mxu0  ;;  %v355_v50 = vpop.f32.mrf.mxu1 }
  0x9b   : > { %473 = vst.msk [vmem:[%s743_s4 + $0x80] sm:$0xff] %vm456_vm1, %v440_v47  ;;  %v332_v51 = vadd.f32 %v734_v36, %v331_v49  ;;  %v356_v52 = vadd.f32 %v734_v36, %v355_v50 }
  0x9c   : > { %481 = vst.msk [vmem:[%s743_s4 + $0xc0] sm:$0xff] %vm456_vm1, %v448_v48 }
  0x9d   : > { %v425_v53 = vmax.f32 %v332_v51, 0.0  ;;  %v433_v54 = vmax.f32 %v356_v52, 0.0 }
  0x9e   : > { %v379_v55 = vpop.f32.mrf.mxu2  ;;  %v403_v56 = vpop.f32.mrf.mxu3 }
  0x9f   : > { %458 = vst.msk [vmem:[%s743_s4 + $0x8] sm:$0xff] %vm456_vm1, %v425_v53  ;;  %v380_v57 = vadd.f32 %v734_v36, %v379_v55  ;;  %v404_v58 = vadd.f32 %v734_v36, %v403_v56 }
  0xa0   : > { %466 = vst.msk [vmem:[%s743_s4 + $0x48] sm:$0xff] %vm456_vm1, %v433_v54 }
  0xa1   : > { %v441_v59 = vmax.f32 %v380_v57, 0.0  ;;  %v449_v60 = vmax.f32 %v404_v58, 0.0 }
  0xa2   : > { %v334_v61 = vpop.f32.mrf.mxu0  ;;  %v358_v62 = vpop.f32.mrf.mxu1 }
  0xa3   : > { %474 = vst.msk [vmem:[%s743_s4 + $0x88] sm:$0xff] %vm456_vm1, %v441_v59  ;;  %v335_v63 = vadd.f32 %v734_v36, %v334_v61  ;;  %v359_v0 = vadd.f32 %v734_v36, %v358_v62 }
  0xa4   : > { %482 = vst.msk [vmem:[%s743_s4 + $0xc8] sm:$0xff] %vm456_vm1, %v449_v60 }
  0xa5   : > { %v426_v1 = vmax.f32 %v335_v63, 0.0  ;;  %v434_v2 = vmax.f32 %v359_v0, 0.0 }
  0xa6   : > { %v382_v3 = vpop.f32.mrf.mxu2  ;;  %v406_v4 = vpop.f32.mrf.mxu3 }
  0xa7   : > { %459 = vst.msk [vmem:[%s743_s4 + $0x10] sm:$0xff] %vm456_vm1, %v426_v1  ;;  %v383_v5 = vadd.f32 %v734_v36, %v382_v3  ;;  %v407_v6 = vadd.f32 %v734_v36, %v406_v4 }
  0xa8   : > { %467 = vst.msk [vmem:[%s743_s4 + $0x50] sm:$0xff] %vm456_vm1, %v434_v2 }
  0xa9   : > { %v442_v7 = vmax.f32 %v383_v5, 0.0  ;;  %v450_v8 = vmax.f32 %v407_v6, 0.0 }
  0xaa   : > { %v337_v9 = vpop.f32.mrf.mxu0  ;;  %v361_v10 = vpop.f32.mrf.mxu1 }
  0xab   : > { %475 = vst.msk [vmem:[%s743_s4 + $0x90] sm:$0xff] %vm456_vm1, %v442_v7  ;;  %v338_v11 = vadd.f32 %v734_v36, %v337_v9  ;;  %v362_v12 = vadd.f32 %v734_v36, %v361_v10 }
  0xac   : > { %483 = vst.msk [vmem:[%s743_s4 + $0xd0] sm:$0xff] %vm456_vm1, %v450_v8 }
  0xad   : > { %v427_v13 = vmax.f32 %v338_v11, 0.0  ;;  %v435_v14 = vmax.f32 %v362_v12, 0.0 }
  0xae   : > { %v385_v15 = vpop.f32.mrf.mxu2  ;;  %v409_v16 = vpop.f32.mrf.mxu3 }
  0xaf   : > { %460 = vst.msk [vmem:[%s743_s4 + $0x18] sm:$0xff] %vm456_vm1, %v427_v13  ;;  %v386_v17 = vadd.f32 %v734_v36, %v385_v15  ;;  %v410_v18 = vadd.f32 %v734_v36, %v409_v16 }
  0xb0   : > { %468 = vst.msk [vmem:[%s743_s4 + $0x58] sm:$0xff] %vm456_vm1, %v435_v14 }
  0xb1   : > { %v443_v19 = vmax.f32 %v386_v17, 0.0  ;;  %v451_v20 = vmax.f32 %v410_v18, 0.0 }
  0xb2   : > { %v340_v21 = vpop.f32.mrf.mxu0  ;;  %v364_v22 = vpop.f32.mrf.mxu1 }
  0xb3   : > { %476 = vst.msk [vmem:[%s743_s4 + $0x98] sm:$0xff] %vm456_vm1, %v443_v19  ;;  %v341_v23 = vadd.f32 %v734_v36, %v340_v21  ;;  %v365_v24 = vadd.f32 %v734_v36, %v364_v22 }
  0xb4   : > { %484 = vst.msk [vmem:[%s743_s4 + $0xd8] sm:$0xff] %vm456_vm1, %v451_v20 }
  0xb5   : > { %v428_v25 = vmax.f32 %v341_v23, 0.0  ;;  %v436_v26 = vmax.f32 %v365_v24, 0.0 }
  0xb6   : > { %v388_v27 = vpop.f32.mrf.mxu2  ;;  %v412_v28 = vpop.f32.mrf.mxu3 }
  0xb7   : > { %461 = vst.msk [vmem:[%s743_s4 + $0x20] sm:$0xff] %vm456_vm1, %v428_v25  ;;  %v389_v29 = vadd.f32 %v734_v36, %v388_v27  ;;  %v413_v30 = vadd.f32 %v734_v36, %v412_v28 }
  0xb8   : > { %469 = vst.msk [vmem:[%s743_s4 + $0x60] sm:$0xff] %vm456_vm1, %v436_v26 }
  0xb9   : > { %v444_v31 = vmax.f32 %v389_v29, 0.0  ;;  %v452_v32 = vmax.f32 %v413_v30, 0.0 }
  0xba   : > { %v343_v33 = vpop.f32.mrf.mxu0  ;;  %v367_v34 = vpop.f32.mrf.mxu1 }
  0xbb   : > { %477 = vst.msk [vmem:[%s743_s4 + $0xa0] sm:$0xff] %vm456_vm1, %v444_v31  ;;  %v344_v35 = vadd.f32 %v734_v36, %v343_v33  ;;  %v368_v37 = vadd.f32 %v734_v36, %v367_v34 }
  0xbc   : > { %485 = vst.msk [vmem:[%s743_s4 + $0xe0] sm:$0xff] %vm456_vm1, %v452_v32 }
  0xbd   : > { %v429_v38 = vmax.f32 %v344_v35, 0.0  ;;  %v437_v39 = vmax.f32 %v368_v37, 0.0 }
  0xbe   : > { %v391_v40 = vpop.f32.mrf.mxu2  ;;  %v415_v41 = vpop.f32.mrf.mxu3 }
  0xbf   : > { %462 = vst.msk [vmem:[%s743_s4 + $0x28] sm:$0xff] %vm456_vm1, %v429_v38  ;;  %v392_v42 = vadd.f32 %v734_v36, %v391_v40  ;;  %v416_v43 = vadd.f32 %v734_v36, %v415_v41 }
  0xc0   : > { %470 = vst.msk [vmem:[%s743_s4 + $0x68] sm:$0xff] %vm456_vm1, %v437_v39 }
  0xc1   : > { %v445_v44 = vmax.f32 %v392_v42, 0.0  ;;  %v453_v45 = vmax.f32 %v416_v43, 0.0 }
  0xc2   : > { %v346_v46 = vpop.f32.mrf.mxu0  ;;  %v370_v47 = vpop.f32.mrf.mxu1 }
  0xc3   : > { %478 = vst.msk [vmem:[%s743_s4 + $0xa8] sm:$0xff] %vm456_vm1, %v445_v44  ;;  %v347_v48 = vadd.f32 %v734_v36, %v346_v46  ;;  %v371_v49 = vadd.f32 %v734_v36, %v370_v47 }
  0xc4   : > { %486 = vst.msk [vmem:[%s743_s4 + $0xe8] sm:$0xff] %vm456_vm1, %v453_v45 }
  0xc5   : > { %v430_v50 = vmax.f32 %v347_v48, 0.0  ;;  %v438_v51 = vmax.f32 %v371_v49, 0.0 }
  0xc6   : > { %v394_v52 = vpop.f32.mrf.mxu2  ;;  %v418_v53 = vpop.f32.mrf.mxu3 }
  0xc7   : > { %463 = vst.msk [vmem:[%s743_s4 + $0x30] sm:$0xff] %vm456_vm1, %v430_v50  ;;  %v395_v54 = vadd.f32 %v734_v36, %v394_v52  ;;  %v419_v55 = vadd.f32 %v734_v36, %v418_v53 }
  0xc8   : > { %471 = vst.msk [vmem:[%s743_s4 + $0x70] sm:$0xff] %vm456_vm1, %v438_v51 }
  0xc9   : > { %v446_v56 = vmax.f32 %v395_v54, 0.0  ;;  %v454_v57 = vmax.f32 %v419_v55, 0.0 }
  0xca   : > { %v349_v58 = vpop.f32.mrf.mxu0  ;;  %v373_v59 = vpop.f32.mrf.mxu1 }
  0xcb   : > { %479 = vst.msk [vmem:[%s743_s4 + $0xb0] sm:$0xff] %vm456_vm1, %v446_v56  ;;  %v350_v60 = vadd.f32 %v734_v36, %v349_v58  ;;  %v374_v61 = vadd.f32 %v734_v36, %v373_v59 }
  0xcc   : > { %487 = vst.msk [vmem:[%s743_s4 + $0xf0] sm:$0xff] %vm456_vm1, %v454_v57 }
  0xcd   : > { %v431_v62 = vmax.f32 %v350_v60, 0.0  ;;  %v439_v63 = vmax.f32 %v374_v61, 0.0 }
  0xce   : > { %v397_v0 = vpop.f32.mrf.mxu2  ;;  %v421_v1 = vpop.f32.mrf.mxu3 }
  0xcf   : > { %464 = vst.msk [vmem:[%s743_s4 + $0x38] sm:$0xff] %vm456_vm1, %v431_v62  ;;  %v398_v2 = vadd.f32 %v734_v36, %v397_v0  ;;  %v422_v3 = vadd.f32 %v734_v36, %v421_v1 }
  0xd0   : > { %472 = vst.msk [vmem:[%s743_s4 + $0x78] sm:$0xff] %vm456_vm1, %v439_v63 }
  0xd1   : > { %v447_v4 = vmax.f32 %v398_v2, 0.0  ;;  %v455_v5 = vmax.f32 %v422_v3, 0.0 }
  0xd3   : > { %480 = vst.msk [vmem:[%s743_s4 + $0xb8] sm:$0xff] %vm456_vm1, %v447_v4 }
  0xd4   : > { %488 = vst.msk [vmem:[%s743_s4 + $0xf8] sm:$0xff] %vm456_vm1, %v455_v5 }
  0xd5 PF: > { %s13_s12 = sadd.s32 1, %s615_s12  }
  0xd6   : > { %p10_p4 = scmp.ge.s32.totalorder %s13_s12, 4  }
  0xd8   :  { %12 = sbr.rel (!%p10_p4) target bundleno = 1 (0x1), region = 62 }

// kernel: _lambda_.12
= control target key start
LH: loop header
LB: loop body
LE: loop exit
PB: predicated region body
PF: predicated region fallthrough
CT: control target
= control target key end

     0   :  { %s1267_s12 = smov 0   ;;  %s2619_s0 = inlined_call_operand.vmem [shape: f32[512,32], index: 0, kind: input, shape index: {}]   ;;  %s2620_s1 = inlined_call_operand.vmem [shape: f32[1,32], index: 1, kind: input, shape index: {}]   ;;  %s2621_s2 = inlined_call_operand.vmem [shape: f32[1,32], index: 2, kind: input, shape index: {}]   ;;  %s2622_s3 = inlined_call_operand.vmem [shape: f32[512,32], index: 3, kind: output, shape index: {}]  }
   0x1 LB: > { %s1142_s13 = sadd.s32 4294967295, %s1244_s12   ;;  %p1146_p0 = scmp.ge.s32.totalorder %s1244_s12, 1  ;;  %s1244_s12 = sphi %s1267_s12, %s13_s12  }
   0x2   : > { %p138_p1 = scmp.lt.s32.totalorder %s1244_s12, 3 }
   0x4   : > { %p139_p2 = pnand %p1146_p0, %p138_p1 }
   0x6   : > { %142 = sbr.rel (%p139_p2) target bundleno = 371 (0x173), region = 32 }
   0xb   : > { %s1147_s14 = sshll.u32 %s1142_s13, 5  ;;  %vm206_vm0 = vcmask 261120  }
   0xc   : > { %p163_p3 = scmp.lt.s32.totalorder %s1147_s14, 63 }
   0xe   : > { %s2768_s14 = smov (!%p163_p3, %s1147_s14), 63 }
   0xf   : > { %s1148_s15 = sshll.u32 %s2768_s14, 3 }
  0x10   : > { %s1283_s18 = scalar_lea.vmem %s2619_s0, %s1148_s15  ;;  %s1957_s25 = scalar_lea.vmem %s2622_s3, %s1148_s15 }
  0x11   : > { %v1286_v0 = vld [vmem:[%s1283_s18 + $0x20] sm:$0xff]  ;;  %v1289_v1 = vld [vmem:[%s1283_s18 + $0x10] sm:$0xff]  ;;  %v1301_v6 = vld [vmem:[%s1283_s18 + $0x28] sm:$0xff] }
  0x12   : > { %2659 = vst [vmem:[#allocation2_spill] sm:$0xff] %v1286_v0  ;;  %v1292_v2 = vld [vmem:[%s1283_s18] sm:$0xff]  ;;  %v219_v3 = vsel %vm206_vm0, %v1286_v0, 0.0  ;;  %v213_v4 = vsel %vm206_vm0, %v1289_v1, 0.0  ;;  %v1304_v7 = vld [vmem:[%s1283_s18 + $0x18] sm:$0xff]  ;;  %v1307_v8 = vld [vmem:[%s1283_s18 + $0x8] sm:$0xff] }
  0x13   : > { %v207_v5 = vsel %vm206_vm0, %v1292_v2, 0.0  ;;  %220 = vadd.xlane.f32.xlu2 %v219_v3  ;;  %214 = vadd.xlane.f32.xlu1 %v213_v4  ;;  %2660 = vst [vmem:[#allocation3_spill] sm:$0xff] %v1301_v6  ;;  %v222_v9 = vsel %vm206_vm0, %v1301_v6, 0.0  ;;  %v216_v10 = vsel %vm206_vm0, %v1304_v7, 0.0  ;;  %v210_v11 = vsel %vm206_vm0, %v1307_v8, 0.0  ;;  %v1316_v12 = vld [vmem:[%s1283_s18 + $0x40] sm:$0xff] }
  0x14   : > { %208 = vadd.xlane.f32.xlu0 %v207_v5  ;;  %2661 = vst [vmem:[#allocation4_spill] sm:$0xff] %v1316_v12  ;;  %v1319_v13 = vld [vmem:[%s1283_s18 + $0x38] sm:$0xff]  ;;  %v1322_v14 = vld [vmem:[%s1283_s18 + $0x30] sm:$0xff]  ;;  %v231_v15 = vsel %vm206_vm0, %v1316_v12, 0.0  ;;  %v1337_v20 = vld [vmem:[%s1283_s18 + $0x48] sm:$0xff]  ;;  %v303_v60 = vmul.f32 %v1292_v2, %v1292_v2  ;;  %v305_v5 = vmul.f32 %v1289_v1, %v1289_v1 }
  0x15   : > { %2662 = vst [vmem:[#allocation5_spill] sm:$0xff] %v1319_v13  ;;  %v228_v16 = vsel %vm206_vm0, %v1319_v13, 0.0  ;;  %v225_v17 = vsel %vm206_vm0, %v1322_v14, 0.0  ;;  %v1331_v18 = vld [vmem:[%s1283_s18 + $0x58] sm:$0xff]  ;;  %v1334_v19 = vld [vmem:[%s1283_s18 + $0x50] sm:$0xff]  ;;  %v234_v23 = vsel %vm206_vm0, %v1337_v20, 0.0 }
  0x16   : > { %2663 = vst [vmem:[#allocation6_spill] sm:$0xff] %v1334_v19  ;;  %v240_v21 = vsel %vm206_vm0, %v1331_v18, 0.0  ;;  %v237_v22 = vsel %vm206_vm0, %v1334_v19, 0.0  ;;  %v1346_v24 = vld [vmem:[%s1283_s18 + $0x70] sm:$0xff]  ;;  %v1349_v25 = vld [vmem:[%s1283_s18 + $0x68] sm:$0xff]  ;;  %v1352_v26 = vld [vmem:[%s1283_s18 + $0x60] sm:$0xff] }
  0x17   : > { %2664 = vst [vmem:[#allocation7_spill] sm:$0xff] %v1346_v24  ;;  %v249_v27 = vsel %vm206_vm0, %v1346_v24, 0.0  ;;  %v246_v28 = vsel %vm206_vm0, %v1349_v25, 0.0  ;;  %v243_v29 = vsel %vm206_vm0, %v1352_v26, 0.0  ;;  %v1361_v30 = vld [vmem:[%s1283_s18 + $0x88] sm:$0xff]  ;;  %v1364_v31 = vld [vmem:[%s1283_s18 + $0x80] sm:$0xff] }
  0x18   : > { %2665 = vst [vmem:[#allocation8_spill] sm:$0xff] %v1349_v25  ;;  %v1367_v32 = vld [vmem:[%s1283_s18 + $0x78] sm:$0xff]  ;;  %v258_v33 = vsel %vm206_vm0, %v1361_v30, 0.0  ;;  %v255_v34 = vsel %vm206_vm0, %v1364_v31, 0.0  ;;  %v1376_v36 = vld [vmem:[%s1283_s18 + $0xa0] sm:$0xff]  ;;  %v1382_v38 = vld [vmem:[%s1283_s18 + $0x90] sm:$0xff] }
  0x19   : > { %2666 = vst [vmem:[#allocation9_spill] sm:$0xff] %v1361_v30  ;;  %v252_v35 = vsel %vm206_vm0, %v1367_v32, 0.0  ;;  %v1379_v37 = vld [vmem:[%s1283_s18 + $0x98] sm:$0xff]  ;;  %v267_v39 = vsel %vm206_vm0, %v1376_v36, 0.0  ;;  %v261_v41 = vsel %vm206_vm0, %v1382_v38, 0.0  ;;  %v1394_v43 = vld [vmem:[%s1283_s18 + $0xb0] sm:$0xff] }
  0x1a   : > { %2667 = vst [vmem:[#allocation10_spill] sm:$0xff] %v1364_v31  ;;  %v264_v40 = vsel %vm206_vm0, %v1379_v37, 0.0  ;;  %v1391_v42 = vld [vmem:[%s1283_s18 + $0xb8] sm:$0xff]  ;;  %v1397_v44 = vld [vmem:[%s1283_s18 + $0xa8] sm:$0xff]  ;;  %v273_v46 = vsel %vm206_vm0, %v1394_v43, 0.0  ;;  %v1406_v48 = vld [vmem:[%s1283_s18 + $0xd0] sm:$0xff] }
  0x1b   : > { %223 = vadd.xlane.f32.xlu2 %v222_v9  ;;  %217 = vadd.xlane.f32.xlu1 %v216_v10  ;;  %2668 = vst [vmem:[#allocation11_spill] sm:$0xff] %v1376_v36  ;;  %v276_v45 = vsel %vm206_vm0, %v1391_v42, 0.0  ;;  %v270_v47 = vsel %vm206_vm0, %v1397_v44, 0.0  ;;  %v1409_v49 = vld [vmem:[%s1283_s18 + $0xc8] sm:$0xff]  ;;  %v1412_v50 = vld [vmem:[%s1283_s18 + $0xc0] sm:$0xff]  ;;  %v285_v51 = vsel %vm206_vm0, %v1406_v48, 0.0  ;;  %v306_v9 = vmul.f32 %v1304_v7, %v1304_v7 }
  0x1c   : > { %211 = vadd.xlane.f32.xlu0 %v210_v11  ;;  %2669 = vst [vmem:[#allocation12_spill] sm:$0xff] %v1379_v37  ;;  %v282_v52 = vsel %vm206_vm0, %v1409_v49, 0.0  ;;  %v279_v53 = vsel %vm206_vm0, %v1412_v50, 0.0  ;;  %v1421_v54 = vld [vmem:[%s1283_s18 + $0xe8] sm:$0xff]  ;;  %v1424_v55 = vld [vmem:[%s1283_s18 + $0xe0] sm:$0xff]  ;;  %v1427_v56 = vld [vmem:[%s1283_s18 + $0xd8] sm:$0xff]  ;;  %v304_v10 = vmul.f32 %v1307_v8, %v1307_v8 }
  0x1d   : > { %2670 = vst [vmem:[#allocation13_spill] sm:$0xff] %v1391_v42  ;;  %v294_v57 = vsel %vm206_vm0, %v1421_v54, 0.0  ;;  %v291_v58 = vsel %vm206_vm0, %v1424_v55, 0.0  ;;  %v288_v59 = vsel %vm206_vm0, %v1427_v56, 0.0  ;;  %v1438_v61 = vld [vmem:[%s1283_s18 + $0xf8] sm:$0xff]  ;;  %v1441_v62 = vld [vmem:[%s1283_s18 + $0xf0] sm:$0xff] }
  0x1e   : > { %2671 = vst [vmem:[#allocation14_spill] sm:$0xff] %v1394_v43  ;;  %v300_v63 = vsel %vm206_vm0, %v1438_v61, 0.0  ;;  %v335_v3 = vsel %vm206_vm0, %v303_v60, 0.0  ;;  %v297_v4 = vsel %vm206_vm0, %v1441_v62, 0.0  ;;  %v341_v11 = vsel %vm206_vm0, %v305_v5, 0.0 }
  0x1f   : > { %2672 = vst [vmem:[#allocation15_spill] sm:$0xff] %v1397_v44 }
  0x20   : > { %2673 = vst [vmem:[#allocation16_spill] sm:$0xff] %v1406_v48 }
  0x21   : > { %2674 = vst [vmem:[#allocation17_spill] sm:$0xff] %v1412_v50 }
  0x23   : > { %232 = vadd.xlane.f32.xlu2 %v231_v15  ;;  %229 = vadd.xlane.f32.xlu1 %v228_v16  ;;  %v344_v15 = vsel %vm206_vm0, %v306_v9, 0.0  ;;  %v338_v16 = vsel %vm206_vm0, %v304_v10, 0.0  ;;  %v320_v9 = vmul.f32 %v1361_v30, %v1361_v30  ;;  %v321_v10 = vmul.f32 %v1382_v38, %v1382_v38 }
  0x24   : > { %226 = vadd.xlane.f32.xlu0 %v225_v17  ;;  %v308_v17 = vmul.f32 %v1301_v6, %v1301_v6 }
  0x2b   : > { %241 = vadd.xlane.f32.xlu2 %v240_v21  ;;  %238 = vadd.xlane.f32.xlu1 %v237_v22  ;;  %v309_v21 = vmul.f32 %v1322_v14, %v1322_v14  ;;  %v307_v22 = vmul.f32 %v1286_v0, %v1286_v0 }
  0x2c   : > { %235 = vadd.xlane.f32.xlu0 %v234_v23  ;;  %v350_v23 = vsel %vm206_vm0, %v308_v17, 0.0 }
  0x33   : > { %250 = vadd.xlane.f32.xlu2 %v249_v27  ;;  %247 = vadd.xlane.f32.xlu1 %v246_v28  ;;  %v353_v27 = vsel %vm206_vm0, %v309_v21, 0.0  ;;  %v347_v28 = vsel %vm206_vm0, %v307_v22, 0.0  ;;  %v386_v21 = vsel %vm206_vm0, %v320_v9, 0.0  ;;  %v389_v22 = vsel %vm206_vm0, %v321_v10, 0.0 }
  0x34   : > { %244 = vadd.xlane.f32.xlu0 %v243_v29  ;;  %v311_v29 = vmul.f32 %v1316_v12, %v1316_v12  ;;  %v328_v9 = vmul.f32 %v1409_v49, %v1409_v49  ;;  %v333_v49 = vmul.f32 %v1441_v62, %v1441_v62 }
  0x3b   : > { %259 = vadd.xlane.f32.xlu2 %v258_v33  ;;  %256 = vadd.xlane.f32.xlu1 %v255_v34  ;;  %v312_v33 = vmul.f32 %v1337_v20, %v1337_v20  ;;  %v310_v34 = vmul.f32 %v1319_v13, %v1319_v13 }
  0x3c   : > { %253 = vadd.xlane.f32.xlu0 %v252_v35  ;;  %v359_v35 = vsel %vm206_vm0, %v311_v29, 0.0  ;;  %v322_v29 = vmul.f32 %v1379_v37, %v1379_v37 }
  0x43   : > { %268 = vadd.xlane.f32.xlu2 %v267_v39  ;;  %265 = vadd.xlane.f32.xlu1 %v264_v40  ;;  %v362_v39 = vsel %vm206_vm0, %v312_v33, 0.0  ;;  %v356_v40 = vsel %vm206_vm0, %v310_v34, 0.0 }
  0x44   : > { %262 = vadd.xlane.f32.xlu0 %v261_v41  ;;  %v314_v41 = vmul.f32 %v1331_v18, %v1331_v18 }
  0x4b   : > { %277 = vadd.xlane.f32.xlu2 %v276_v45  ;;  %274 = vadd.xlane.f32.xlu1 %v273_v46  ;;  %v315_v45 = vmul.f32 %v1352_v26, %v1352_v26  ;;  %v313_v46 = vmul.f32 %v1334_v19, %v1334_v19 }
  0x4c   : > { %271 = vadd.xlane.f32.xlu0 %v270_v47  ;;  %v368_v47 = vsel %vm206_vm0, %v314_v41, 0.0  ;;  %v392_v41 = vsel %vm206_vm0, %v322_v29, 0.0 }
  0x53   : > { %286 = vadd.xlane.f32.xlu2 %v285_v51  ;;  %283 = vadd.xlane.f32.xlu1 %v282_v52  ;;  %v371_v51 = vsel %vm206_vm0, %v315_v45, 0.0  ;;  %v365_v52 = vsel %vm206_vm0, %v313_v46, 0.0  ;;  %v326_v45 = vmul.f32 %v1391_v42, %v1391_v42  ;;  %v327_v46 = vmul.f32 %v1412_v50, %v1412_v50 }
  0x54   : > { %280 = vadd.xlane.f32.xlu0 %v279_v53  ;;  %v317_v53 = vmul.f32 %v1346_v24, %v1346_v24 }
  0x5b   : > { %295 = vadd.xlane.f32.xlu2 %v294_v57  ;;  %292 = vadd.xlane.f32.xlu1 %v291_v58  ;;  %v318_v57 = vmul.f32 %v1367_v32, %v1367_v32  ;;  %v316_v58 = vmul.f32 %v1349_v25, %v1349_v25 }
  0x5c   : > { %289 = vadd.xlane.f32.xlu0 %v288_v59 }
  0x5d   : > { %v374_v5 = vsel %vm206_vm0, %v316_v58, 0.0  ;;  %v407_v58 = vsel %vm206_vm0, %v327_v46, 0.0 }
  0x63   : > { %301 = vadd.xlane.f32.xlu1 %v300_v63  ;;  %336 = vadd.xlane.f32.xlu2 %v335_v3  ;;  %v377_v3 = vsel %vm206_vm0, %v317_v53, 0.0 }
  0x64   : > { %298 = vadd.xlane.f32.xlu0 %v297_v4  ;;  %v380_v4 = vsel %vm206_vm0, %v318_v57, 0.0  ;;  %v404_v57 = vsel %vm206_vm0, %v326_v45, 0.0  ;;  %v425_v45 = vsel %vm206_vm0, %v333_v49, 0.0 }
  0x6b   : > { %342 = vadd.xlane.f32.xlu1 %v341_v11  ;;  %345 = vadd.xlane.f32.xlu2 %v344_v15  ;;  %v319_v11 = vmul.f32 %v1364_v31, %v1364_v31 }
  0x6c   : > { %339 = vadd.xlane.f32.xlu0 %v338_v16 }
  0x73   : > { %351 = vadd.xlane.f32.xlu1 %v350_v23  ;;  %354 = vadd.xlane.f32.xlu2 %v353_v27  ;;  %v383_v23 = vsel %vm206_vm0, %v319_v11, 0.0  ;;  %v323_v27 = vmul.f32 %v1376_v36, %v1376_v36 }
  0x74   : > { %348 = vadd.xlane.f32.xlu0 %v347_v28  ;;  %v324_v28 = vmul.f32 %v1397_v44, %v1397_v44 }
  0x7b   : > { %360 = vadd.xlane.f32.xlu1 %v359_v35  ;;  %363 = vadd.xlane.f32.xlu2 %v362_v39  ;;  %v395_v39 = vsel %vm206_vm0, %v323_v27, 0.0  ;;  %v410_v27 = vsel %vm206_vm0, %v328_v9, 0.0 }
  0x7c   : > { %357 = vadd.xlane.f32.xlu0 %v356_v40  ;;  %v398_v40 = vsel %vm206_vm0, %v324_v28, 0.0  ;;  %v331_v28 = vmul.f32 %v1424_v55, %v1424_v55 }
  0x7e   : > { %v419_v46 = vsel %vm206_vm0, %v331_v28, 0.0 }
  0x83   : > { %369 = vadd.xlane.f32.xlu1 %v368_v47  ;;  %372 = vadd.xlane.f32.xlu2 %v371_v51  ;;  %v325_v47 = vmul.f32 %v1394_v43, %v1394_v43 }
  0x84   : > { %366 = vadd.xlane.f32.xlu0 %v365_v52 }
  0x86   : > { %v1490_v59 = vpop.xlane.xlu2 %220  ;;  %v1492_v60 = vpop.xlane.xlu1 %214 }
  0x87   : > { %v1494_v63 = vpop.xlane.xlu0 %208 }
  0x8b   : > { %378 = vadd.xlane.f32.xlu1 %v377_v3  ;;  %381 = vadd.xlane.f32.xlu2 %v380_v4  ;;  %v401_v3 = vsel %vm206_vm0, %v325_v47, 0.0  ;;  %v329_v4 = vmul.f32 %v1406_v48, %v1406_v48  ;;  %v1246_v47 = vmov 32.0  }
  0x8c   : > { %375 = vadd.xlane.f32.xlu0 %v374_v5  ;;  %v330_v5 = vmul.f32 %v1427_v56, %v1427_v56  ;;  %v332_v56 = vmul.f32 %v1421_v54, %v1421_v54  ;;  %1164 = vrcp.f32 %v1246_v47  ;;  %v334_v54 = vmul.f32 %v1438_v61, %v1438_v61 }
  0x8e   : > { %v1505_v15 = vpop.xlane.xlu2 %223  ;;  %v1507_v16 = vpop.xlane.xlu1 %217 }
  0x8f   : > { %v1509_v17 = vpop.xlane.xlu0 %211 }
  0x93   : > { %387 = vadd.xlane.f32.xlu1 %v386_v21  ;;  %390 = vadd.xlane.f32.xlu2 %v389_v22  ;;  %v413_v22 = vsel %vm206_vm0, %v329_v4, 0.0 }
  0x94   : > { %384 = vadd.xlane.f32.xlu0 %v383_v23  ;;  %v416_v23 = vsel %vm206_vm0, %v330_v5, 0.0 }
  0x96   : > { %v1520_v33 = vpop.xlane.xlu2 %232  ;;  %v1522_v34 = vpop.xlane.xlu1 %229 }
  0x97   : > { %v1524_v35 = vpop.xlane.xlu0 %226 }
  0x9b   : > { %396 = vadd.xlane.f32.xlu1 %v395_v39  ;;  %399 = vadd.xlane.f32.xlu2 %v398_v40 }
  0x9c   : > { %393 = vadd.xlane.f32.xlu0 %v392_v41  ;;  %v422_v41 = vsel %vm206_vm0, %v332_v56, 0.0 }
  0x9e   : > { %v1535_v51 = vpop.xlane.xlu2 %241  ;;  %v1537_v52 = vpop.xlane.xlu1 %238 }
  0x9f   : > { %v1539_v53 = vpop.xlane.xlu0 %235 }
  0xa3   : > { %405 = vadd.xlane.f32.xlu1 %v404_v57  ;;  %408 = vadd.xlane.f32.xlu2 %v407_v58  ;;  %v1165_v58 = vpop.eup %1164 }
  0xa4   : > { %402 = vadd.xlane.f32.xlu0 %v401_v3  ;;  %v428_v3 = vsel %vm206_vm0, %v334_v54, 0.0  ;;  %v432_v4 = vmul.f32 32.0, %v1165_v58  ;;  %vm436_vm1 = vweird.f32 %v1165_v58 }
  0xa6   : > { %v1550_v10 = vpop.xlane.xlu2 %250  ;;  %v1552_v11 = vpop.xlane.xlu1 %247 }
  0xa7   : > { %v1554_v21 = vpop.xlane.xlu0 %244 }
  0xab   : > { %414 = vadd.xlane.f32.xlu1 %v413_v22  ;;  %417 = vadd.xlane.f32.xlu2 %v416_v23  ;;  %v433_v23 = vsub.f32 1.0, %v432_v4 }
  0xac   : > { %411 = vadd.xlane.f32.xlu0 %v410_v27 }
  0xad   : > { %v434_v27 = vmul.f32 %v1165_v58, %v433_v23 }
  0xae   : > { %v1565_v29 = vpop.xlane.xlu2 %259  ;;  %v1567_v39 = vpop.xlane.xlu1 %256 }
  0xaf   : > { %v1569_v40 = vpop.xlane.xlu0 %253  ;;  %v435_v28 = vadd.f32 %v1165_v58, %v434_v27 }
  0xb3   : > { %423 = vadd.xlane.f32.xlu1 %v422_v41  ;;  %426 = vadd.xlane.f32.xlu2 %v425_v45  ;;  %v1595_v41 = vsel %vm436_vm1, %v1165_v58, %v435_v28 }
  0xb4   : > { %420 = vadd.xlane.f32.xlu0 %v419_v46  ;;  %v1599_v45 = vmul.f32 %v1595_v41, %v1490_v59  ;;  %v1607_v54 = vmul.f32 %v1595_v41, %v1492_v60  ;;  %v1617_v58 = vmul.f32 %v1595_v41, %v1505_v15  ;;  %v1621_v59 = vmul.f32 %v1595_v41, %v1507_v16 }
  0xb5   : > { %v1625_v23 = vmul.f32 %v1595_v41, %v1509_v17  ;;  %v1635_v27 = vmul.f32 %v1595_v41, %v1520_v33  ;;  %v1647_v28 = vmul.f32 %v1595_v41, %v1522_v34  ;;  %v1659_v16 = vmul.f32 %v1595_v41, %v1524_v35 }
  0xb6   : > { %v1576_v55 = vpop.xlane.xlu2 %268  ;;  %v1578_v62 = vpop.xlane.xlu1 %265  ;;  %2675 = vst [vmem:[#allocation18_spill] sm:$0xff] %v1599_v45  ;;  %v1629_v60 = vmul.f32 %v1599_v45, %v1599_v45  ;;  %v1639_v15 = vmul.f32 %v1607_v54, %v1607_v54  ;;  %v1653_v33 = vmul.f32 %v1617_v58, %v1617_v58  ;;  %v1663_v0 = vmul.f32 %v1621_v59, %v1621_v59 }
  0xb7   : > { %v1580_v57 = vpop.xlane.xlu0 %262  ;;  %2677 = vst [vmem:[#allocation20_spill] sm:$0xff] %v1617_v58  ;;  %v1679_v35 = vmul.f32 %v1635_v27, %v1635_v27  ;;  %v1685_v34 = vmul.f32 %v1595_v41, %v1537_v52  ;;  %v1695_v45 = vmul.f32 %v1595_v41, %v1539_v53  ;;  %v1714_v53 = vmul.f32 %v1595_v41, %v1552_v11 }
  0xb8   : > { %2678 = vst [vmem:[#allocation21_spill] sm:$0xff] %v1621_v59  ;;  %v1724_v52 = vmul.f32 %v1595_v41, %v1554_v21  ;;  %v1734_v12 = vmul.f32 %v1595_v41, %v1565_v29  ;;  %v1738_v13 = vmul.f32 %v1595_v41, %v1567_v39  ;;  %v1772_v29 = vmul.f32 %v1595_v41, %v1576_v55 }
  0xb9   : > { %2679 = vst [vmem:[#allocation22_spill] sm:$0xff] %v1625_v23  ;;  %v1742_v21 = vmul.f32 %v1695_v45, %v1695_v45  ;;  %v1756_v39 = vmul.f32 %v1714_v53, %v1714_v53  ;;  %v1793_v24 = vmul.f32 %v1595_v41, %v1580_v57 }
  0xba   : > { %2680 = vst [vmem:[#allocation23_spill] sm:$0xff] %v1635_v27  ;;  %v1810_v57 = vmul.f32 %v1772_v29, %v1772_v29 }
  0xbb   : > { %2681 = vst [vmem:[#allocation24_spill] sm:$0xff] %v1647_v28 }
  0xbc   : > { %429 = vadd.xlane.f32.xlu0 %v428_v3  ;;  %v1611_v3 = vmul.f32 %v1595_v41, %v1494_v63  ;;  %v1669_v63 = vmul.f32 %v1625_v23, %v1625_v23  ;;  %2682 = vst [vmem:[#allocation25_spill] sm:$0xff] %v1685_v34  ;;  %v1699_v23 = vmul.f32 %v1595_v41, %v1550_v10 }
  0xbd   : > { %2686 = vst [vmem:[#allocation29_spill] sm:$0xff] %v1714_v53  ;;  %v1783_v53 = vmul.f32 %v1738_v13, %v1738_v13 }
  0xbe   : > { %v1583_v5 = vpop.xlane.xlu2 %277  ;;  %v1585_v9 = vpop.xlane.xlu1 %274  ;;  %v502_v17 = vmul.f32 %v1611_v3, %v1611_v3  ;;  %2684 = vst [vmem:[#allocation27_spill] sm:$0xff] %v1699_v23  ;;  %v2700_v48 = vsub.f32 %v1292_v2, %v1611_v3 }
  0xbf   : > { %v1587_v22 = vpop.xlane.xlu0 %271  ;;  %2687 = vst [vmem:[#allocation30_spill] sm:$0xff] %v1734_v12 }
  0xc0   : > { %2688 = vst [vmem:[#allocation31_spill] sm:$0xff] %v1738_v13 }
  0xc1   : > { %2690 = vst [vmem:[#allocation33_spill] sm:$0xff] %v1772_v29 }
  0xc2   : > { %2691 = vst [vmem:[#allocation34_spill] sm:$0xff] %v1783_v53  ;;  %v1805_v53 = vmul.f32 %v1595_v41, %v1583_v5 }
  0xc4   : > { %2693 = vst [vmem:[#allocation36_spill] sm:$0xff] %v1805_v53 }
  0xc6   : > { %v1589_v61 = vpop.xlane.xlu2 %286  ;;  %v1591_v56 = vpop.xlane.xlu1 %283 }
  0xc7   : > { %v1593_v49 = vpop.xlane.xlu0 %280 }
  0xc8   : > { %v1868_v42 = vmul.f32 %v1595_v41, %v1593_v49 }
  0xca   : > { %2698 = vst [vmem:[#allocation41_spill] sm:$0xff] %v1868_v42 }
  0xce   : > { %v1601_v46 = vpop.xlane.xlu2 %295  ;;  %v1603_v47 = vpop.xlane.xlu1 %292 }
  0xcf   : > { %v1613_v4 = vpop.xlane.xlu0 %289 }
  0xd0   : > { %2676 = vst [vmem:[#allocation19_spill] sm:$0xff] %v1613_v4  ;;  %v1673_v4 = vmul.f32 %v1595_v41, %v1535_v51  ;;  %v1691_v51 = vmul.f32 %v1647_v28, %v1647_v28  ;;  %v1728_v28 = vmul.f32 %v1685_v34, %v1685_v34  ;;  %v1762_v34 = vmul.f32 %v1595_v41, %v1569_v40 }
  0xd2   : > { %v1718_v10 = vmul.f32 %v1673_v4, %v1673_v4  ;;  %2689 = vst [vmem:[#allocation32_spill] sm:$0xff] %v1762_v34  ;;  %v1799_v30 = vmul.f32 %v1762_v34, %v1762_v34 }
  0xd6   : > { %v1687_v6 = vpop.xlane.xlu1 %301  ;;  %v337_v59 = vpop.xlane.xlu2 %336 }
  0xd7   : > { %2683 = vst [vmem:[#allocation26_spill] sm:$0xff] %v1687_v6  ;;  %v470_v58 = vmul.f32 %v1595_v41, %v337_v59  ;;  %v1702_v27 = vpop.xlane.xlu0 %298  ;;  %v1708_v6 = vmul.f32 %v1659_v16, %v1659_v16  ;;  %v1777_v59 = vmul.f32 %v1734_v12, %v1734_v12 }
  0xd8   : > { %2685 = vst [vmem:[#allocation28_spill] sm:$0xff] %v1702_v27 }
  0xd9   : > { %v534_v27 = vsub.f32 %v470_v58, %v502_v17  ;;  %v1748_v17 = vmul.f32 %v1699_v23, %v1699_v23  ;;  %v1766_v58 = vmul.f32 %v1724_v52, %v1724_v52 }
  0xdb   : > { %v1750_v11 = vadd.f32 1e-05, %v534_v27  ;;  %v1787_v27 = vmul.f32 %v1595_v41, %v1578_v62 }
  0xdd   : > { %1166 = vrsqrt.f32 %v1750_v11  ;;  %2692 = vst [vmem:[#allocation35_spill] sm:$0xff] %v1787_v27  ;;  %v1822_v5 = vmul.f32 %v1787_v27, %v1787_v27  ;;  %vm636_vm3 = vweird.f32 %v1750_v11 }
  0xde   : > { %v343_v25 = vpop.xlane.xlu1 %342  ;;  %v346_v55 = vpop.xlane.xlu2 %345 }
  0xdf   : > { %v472_v19 = vmul.f32 %v1595_v41, %v343_v25  ;;  %v473_v40 = vmul.f32 %v1595_v41, %v346_v55  ;;  %v340_v12 = vpop.xlane.xlu0 %339  ;;  %v1814_v25 = vmul.f32 %v1595_v41, %v1585_v9  ;;  %v1829_v9 = vmul.f32 %v1793_v24, %v1793_v24 }
  0xe0   : > { %v471_v23 = vmul.f32 %v1595_v41, %v340_v12  ;;  %v1843_v12 = vmul.f32 %v1595_v41, %v1587_v22 }
  0xe1   : > { %2694 = vst [vmem:[#allocation37_spill] sm:$0xff] %v1814_v25  ;;  %v536_v55 = vsub.f32 %v472_v19, %v1639_v15  ;;  %v537_v13 = vsub.f32 %v473_v40, %v1663_v0  ;;  %v1839_v40 = vmul.f32 %v1805_v53, %v1805_v53 }
  0xe2   : > { %v535_v31 = vsub.f32 %v471_v23, %v1669_v63  ;;  %2695 = vst [vmem:[#allocation38_spill] sm:$0xff] %v1843_v12 }
  0xe3   : > { %v1167_v34 = vpop.eup %1166  ;;  %v1833_v19 = vadd.f32 1e-05, %v536_v55  ;;  %v1835_v15 = vadd.f32 1e-05, %v537_v13  ;;  %v1852_v55 = vmul.f32 %v1814_v25, %v1814_v25  ;;  %v1856_v13 = vmul.f32 %v1595_v41, %v1589_v61 }
  0xe4   : > { %v631_v23 = vmul.f32 %v1167_v34, %v1750_v11  ;;  %v1846_v63 = vadd.f32 1e-05, %v535_v31  ;;  %v1863_v31 = vmul.f32 %v1595_v41, %v1591_v56  ;;  %v1875_v56 = vmul.f32 %v1843_v12, %v1843_v12 }
  0xe5   : > { %2696 = vst [vmem:[#allocation39_spill] sm:$0xff] %v1856_v13  ;;  %1168 = vrsqrt.f32 %v1833_v19  ;;  %v1882_v49 = vmul.f32 %v1856_v13, %v1856_v13  ;;  %vm637_vm2 = vweird.f32 %v1167_v34  ;;  %vm656_vm5 = vweird.f32 %v1833_v19  ;;  %v1938_v13 = vld [vmem:[%s2621_s2] ss:$0 sm:$0xff] }
  0xe6   : > { %2697 = vst [vmem:[#allocation40_spill] sm:$0xff] %v1863_v31  ;;  %v632_v0 = vmul.f32 %v1167_v34, %v631_v23  ;;  %1170 = vrsqrt.f32 %v1835_v15  ;;  %v352_v62 = vpop.xlane.xlu1 %351  ;;  %v355_v53 = vpop.xlane.xlu2 %354  ;;  %v1890_v29 = vmul.f32 %v1863_v31, %v1863_v31  ;;  %v1897_v23 = vmul.f32 %v1868_v42, %v1868_v42  ;;  %vm638_vm4 = vmor %vm636_vm3, %vm637_vm2 }
  0xe7   : > { %1172 = vrsqrt.f32 %v1846_v63  ;;  %v475_v61 = vmul.f32 %v1595_v41, %v352_v62  ;;  %v476_v27 = vmul.f32 %v1595_v41, %v355_v53  ;;  %v349_v22 = vpop.xlane.xlu0 %348  ;;  %v1916_v31 = vmul.f32 %v1595_v41, %v1601_v46 }
  0xe8   : > { %v633_v25 = vmul.f32 0.5, %v632_v0  ;;  %v474_v43 = vmul.f32 %v1595_v41, %v349_v22  ;;  %2699 = vst [vmem:[#allocation42_spill] sm:$0xff] %v1890_v29  ;;  %vm666_vm6 = vweird.f32 %v1835_v15  ;;  %vm646_vm7 = vweird.f32 %v1846_v63 }
  0xe9   : > { %v539_v53 = vsub.f32 %v475_v61, %v1653_v33  ;;  %v540_v37 = vsub.f32 %v476_v27, %v1708_v6 }
  0xea   : > { %v634_v36 = vsub.f32 1.5, %v633_v25  ;;  %v538_v0 = vsub.f32 %v474_v43, %v1629_v60 }
  0xeb   : > { %v1893_v22 = vpop.eup %1168  ;;  %v1901_v33 = vadd.f32 1e-05, %v539_v53  ;;  %v1903_v6 = vadd.f32 1e-05, %v540_v37  ;;  %v1920_v37 = vmul.f32 %v1595_v41, %v1603_v47 }
  0xec   : > { %v1905_v27 = vpop.eup %1170  ;;  %v635_v61 = vmul.f32 %v1167_v34, %v634_v36  ;;  %v651_v43 = vmul.f32 %v1893_v22, %v1833_v19  ;;  %v1910_v60 = vadd.f32 1e-05, %v538_v0  ;;  %v1925_v36 = vld [vmem:[%s2620_s1] ss:$0 sm:$0xff]  ;;  %vm657_vm8 = vweird.f32 %v1893_v22 }
  0xed   : > { %v1912_v25 = vpop.eup %1172  ;;  %v661_v11 = vmul.f32 %v1905_v27, %v1835_v15  ;;  %1174 = vrsqrt.f32 %v1901_v33  ;;  %vm667_vm9 = vweird.f32 %v1905_v27  ;;  %vm686_vm11 = vweird.f32 %v1901_v33  ;;  %vm658_vm12 = vmor %vm656_vm5, %vm657_vm8 }
  0xee   : > { %v639_v53 = vsel %vm638_vm4, %v1167_v34, %v635_v61  ;;  %v652_v46 = vmul.f32 %v1893_v22, %v651_v43  ;;  %v641_v47 = vmul.f32 %v1912_v25, %v1846_v63  ;;  %v361_v0 = vpop.xlane.xlu1 %360  ;;  %v364_v62 = vpop.xlane.xlu2 %363  ;;  %1176 = vrsqrt.f32 %v1903_v6  ;;  %vm668_vm14 = vmor %vm666_vm6, %vm667_vm9  ;;  %v2704_v63 = vld [vmem:[#allocation22_spill] sm:$0xff] }
  0xef   : > { %v950_v42 = vmul.f32 %v639_v53, %v2700_v48  ;;  %v662_v34 = vmul.f32 %v1905_v27, %v661_v11  ;;  %1178 = vrsqrt.f32 %v1910_v60  ;;  %v478_v44 = vmul.f32 %v1595_v41, %v361_v0  ;;  %v358_v48 = vpop.xlane.xlu0 %357 }
  0xf0   : > { %v653_v61 = vmul.f32 0.5, %v652_v46  ;;  %v642_v43 = vmul.f32 %v1912_v25, %v641_v47  ;;  %v479_v2 = vmul.f32 %v1595_v41, %v364_v62  ;;  %vm647_vm10 = vweird.f32 %v1912_v25 }
  0xf1   : > { %v986_v50 = vmul.f32 %v1925_v36, %v950_v42  ;;  %v663_v12 = vmul.f32 0.5, %v662_v34  ;;  %v542_v62 = vsub.f32 %v478_v44, %v1679_v35  ;;  %v477_v35 = vmul.f32 %v1595_v41, %v358_v48  ;;  %vm648_vm1 = vmor %vm646_vm7, %vm647_vm10 }
  0xf2   : > { %v654_v3 = vsub.f32 1.5, %v653_v61  ;;  %v643_v11 = vmul.f32 0.5, %v642_v43  ;;  %v543_v47 = vsub.f32 %v479_v2, %v1742_v21  ;;  %vm696_vm15 = vweird.f32 %v1903_v6 }
  0xf3   : > { %v1961_v42 = vpop.eup %1174  ;;  %v1022_v53 = vadd.f32 %v1938_v13, %v986_v50  ;;  %v664_v46 = vsub.f32 1.5, %v663_v12  ;;  %v1981_v50 = vadd.f32 1e-05, %v542_v62  ;;  %v2701_v48 = vsub.f32 %v1289_v1, %v1607_v54  ;;  %v2702_v62 = vld [vmem:[#allocation21_spill] sm:$0xff] }
  0xf4   : > { %v655_v0 = vmul.f32 %v1893_v22, %v654_v3  ;;  %v644_v34 = vsub.f32 1.5, %v643_v11  ;;  %v681_v61 = vmul.f32 %v1961_v42, %v1901_v33  ;;  %v1971_v43 = vpop.eup %1176  ;;  %vm687_vm13 = vweird.f32 %v1961_v42  ;;  %v2706_v33 = vld [vmem:[#allocation3_spill] sm:$0xff] }
  0xf5   : > { %1054 = vst.msk [vmem:[%s1957_s25] sm:$0xff] %vm206_vm0, %v1022_v53  ;;  %v665_v44 = vmul.f32 %v1905_v27, %v664_v46  ;;  %v1984_v21 = vpop.eup %1178  ;;  %v691_v3 = vmul.f32 %v1971_v43, %v1903_v6  ;;  %v2006_v46 = vadd.f32 1e-05, %v543_v47  ;;  %v541_v29 = vsub.f32 %v477_v35, %v1691_v51  ;;  %vm688_vm3 = vmor %vm686_vm11, %vm687_vm13 }
  0xf6   : > { %v659_v12 = vsel %vm658_vm12, %v1893_v22, %v655_v0  ;;  %v645_v19 = vmul.f32 %v1912_v25, %v644_v34  ;;  %v682_v2 = vmul.f32 %v1961_v42, %v681_v61  ;;  %v370_v11 = vpop.xlane.xlu1 %369  ;;  %v671_v15 = vmul.f32 %v1984_v21, %v1910_v60 }
  0xf7   : > { %v952_v53 = vmul.f32 %v659_v12, %v2701_v48  ;;  %v669_v22 = vsel %vm668_vm14, %v1905_v27, %v665_v44  ;;  %v2703_v0 = vsub.f32 %v1304_v7, %v2702_v62  ;;  %v692_v54 = vmul.f32 %v1971_v43, %v691_v3  ;;  %v373_v27 = vpop.xlane.xlu2 %372 }
  0xf8   : > { %v649_v61 = vsel %vm648_vm1, %v1912_v25, %v645_v19  ;;  %v683_v1 = vmul.f32 0.5, %v682_v2  ;;  %v2705_v12 = vsub.f32 %v1307_v8, %v2704_v63  ;;  %v672_v47 = vmul.f32 %v1984_v21, %v671_v15  ;;  %v367_v2 = vpop.xlane.xlu0 %366  ;;  %v2707_v63 = vld [vmem:[#allocation20_spill] sm:$0xff] }
  0xf9   : > { %v953_v34 = vmul.f32 %v669_v22, %v2703_v0  ;;  %v988_v44 = vmul.f32 %v1925_v36, %v952_v53  ;;  %v693_v62 = vmul.f32 0.5, %v692_v54  ;;  %1180 = vrsqrt.f32 %v1981_v50 }
  0xfa   : > { %v951_v48 = vmul.f32 %v649_v61, %v2705_v12  ;;  %v684_v22 = vsub.f32 1.5, %v683_v1  ;;  %vm697_vm2 = vweird.f32 %v1971_v43  ;;  %v673_v8 = vmul.f32 0.5, %v672_v47 }
  0xfb   : > { %v989_v7 = vmul.f32 %v1925_v36, %v953_v34  ;;  %v1024_v25 = vadd.f32 %v1938_v13, %v988_v44  ;;  %v694_v35 = vsub.f32 1.5, %v693_v62  ;;  %1182 = vrsqrt.f32 %v2006_v46  ;;  %vm698_vm5 = vmor %vm696_vm15, %vm697_vm2 }
  0xfc   : > { %v987_v19 = vmul.f32 %v1925_v36, %v951_v48  ;;  %v685_v51 = vmul.f32 %v1961_v42, %v684_v22  ;;  %v674_v15 = vsub.f32 1.5, %v673_v8  ;;  %vm677_vm4 = vweird.f32 %v1984_v21  ;;  %v2711_v8 = vld [vmem:[#allocation2_spill] sm:$0xff] }
  0xfd   : > { %v1025_v3 = vadd.f32 %v1938_v13, %v989_v7  ;;  %1056 = vst.msk [vmem:[%s1957_s25 + $0x10] sm:$0xff] %vm206_vm0, %v1024_v25  ;;  %v2035_v0 = vadd.f32 1e-05, %v541_v29  ;;  %v695_v61 = vmul.f32 %v1971_v43, %v694_v35  ;;  %v481_v1 = vmul.f32 %v1595_v41, %v370_v11  ;;  %v2709_v11 = vld [vmem:[#allocation19_spill] sm:$0xff] }
  0xfe   : > { %v1023_v53 = vadd.f32 %v1938_v13, %v987_v19  ;;  %v689_v34 = vsel %vm688_vm3, %v1961_v42, %v685_v51  ;;  %v482_v54 = vmul.f32 %v1595_v41, %v373_v27  ;;  %v379_v44 = vpop.xlane.xlu1 %378  ;;  %v2708_v12 = vsub.f32 %v2706_v33, %v2707_v63 }
  0xff   : > { %1057 = vst.msk [vmem:[%s1957_s25 + $0x18] sm:$0xff] %vm206_vm0, %v1025_v3  ;;  %v675_v29 = vmul.f32 %v1984_v21, %v674_v15  ;;  %vm676_vm6 = vweird.f32 %v1910_v60  ;;  %1184 = vrsqrt.f32 %v2035_v0  ;;  %v2055_v42 = vpop.eup %1180  ;;  %v2059_v27 = vmul.f32 %v1595_v41, %v2709_v11  ;;  %v2712_v3 = vld [vmem:[#allocation18_spill] sm:$0xff] }
 0x100   : > { %1055 = vst.msk [vmem:[%s1957_s25 + $0x8] sm:$0xff] %vm206_vm0, %v1023_v53  ;;  %v955_v48 = vmul.f32 %v689_v34, %v2708_v12  ;;  %v699_v47 = vsel %vm698_vm5, %v1971_v43, %v695_v61  ;;  %vm678_vm7 = vmor %vm676_vm6, %vm677_vm4  ;;  %v545_v6 = vsub.f32 %v481_v1, %v1718_v10  ;;  %v546_v7 = vsub.f32 %v482_v54, %v1766_v58  ;;  %v376_v12 = vpop.xlane.xlu0 %375 }
 0x101   : > { %v2710_v60 = vsub.f32 %v1322_v14, %v1659_v16  ;;  %v679_v25 = vsel %vm678_vm7, %v1984_v21, %v675_v29  ;;  %v711_v19 = vmul.f32 %v2055_v42, %v1981_v50  ;;  %v2073_v43 = vpop.eup %1182  ;;  %v2713_v51 = vsub.f32 %v2711_v8, %v2712_v3  ;;  %v382_v14 = vpop.xlane.xlu2 %381 }
 0x102   : > { %v991_v22 = vmul.f32 %v1925_v36, %v955_v48  ;;  %v2078_v35 = vadd.f32 1e-05, %v545_v6  ;;  %v2080_v58 = vadd.f32 1e-05, %v546_v7  ;;  %v480_v53 = vmul.f32 %v1595_v41, %v367_v2 }
 0x103   : > { %v956_v62 = vmul.f32 %v699_v47, %v2710_v60  ;;  %v954_v10 = vmul.f32 %v679_v25, %v2713_v51  ;;  %v712_v15 = vmul.f32 %v2055_v42, %v711_v19  ;;  %v721_v34 = vmul.f32 %v2073_v43, %v2006_v46 }
 0x104   : > { %v1027_v16 = vadd.f32 %v1938_v13, %v991_v22  ;;  %v2090_v61 = vmul.f32 %v1916_v31, %v1916_v31  ;;  %vm716_vm8 = vweird.f32 %v1981_v50  ;;  %1186 = vrsqrt.f32 %v2078_v35  ;;  %v2714_v50 = vld [vmem:[#allocation4_spill] sm:$0xff] }
 0x105   : > { %v992_v21 = vmul.f32 %v1925_v36, %v956_v62  ;;  %v990_v1 = vmul.f32 %v1925_v36, %v954_v10  ;;  %v1185_v2 = vpop.eup %1184  ;;  %v713_v33 = vmul.f32 0.5, %v712_v15  ;;  %v722_v63 = vmul.f32 %v2073_v43, %v721_v34  ;;  %v2715_v34 = vld [vmem:[#allocation23_spill] sm:$0xff] }
 0x106   : > { %1059 = vst.msk [vmem:[%s1957_s25 + $0x28] sm:$0xff] %vm206_vm0, %v1027_v16  ;;  %1188 = vrsqrt.f32 %v2080_v58  ;;  %vm717_vm9 = vweird.f32 %v2055_v42  ;;  %vm726_vm10 = vweird.f32 %v2006_v46  ;;  %v701_v29 = vmul.f32 %v1185_v2, %v2035_v0  ;;  %v388_v11 = vpop.xlane.xlu1 %387 }
 0x107   : > { %v1028_v54 = vadd.f32 %v1938_v13, %v992_v21  ;;  %v1026_v48 = vadd.f32 %v1938_v13, %v990_v1  ;;  %v714_v47 = vsub.f32 1.5, %v713_v33  ;;  %v723_v6 = vmul.f32 0.5, %v722_v63  ;;  %vm718_vm12 = vmor %vm716_vm8, %vm717_vm9 }
 0x108   : > { %v544_v7 = vsub.f32 %v480_v53, %v1728_v28  ;;  %v484_v22 = vmul.f32 %v1595_v41, %v379_v44  ;;  %vm727_vm11 = vweird.f32 %v2073_v43  ;;  %v702_v60 = vmul.f32 %v1185_v2, %v701_v29 }
 0x109   : > { %1060 = vst.msk [vmem:[%s1957_s25 + $0x30] sm:$0xff] %vm206_vm0, %v1028_v54  ;;  %v485_v62 = vmul.f32 %v1595_v41, %v382_v14  ;;  %v483_v25 = vmul.f32 %v1595_v41, %v376_v12  ;;  %v715_v19 = vmul.f32 %v2055_v42, %v714_v47  ;;  %v724_v8 = vsub.f32 1.5, %v723_v6  ;;  %vm728_vm1 = vmor %vm726_vm10, %vm727_vm11  ;;  %v391_v63 = vpop.xlane.xlu2 %390 }
 0x10a   : > { %1058 = vst.msk [vmem:[%s1957_s25 + $0x20] sm:$0xff] %vm206_vm0, %v1026_v48  ;;  %v2114_v3 = vadd.f32 1e-05, %v544_v7  ;;  %v487_v51 = vmul.f32 %v1595_v41, %v388_v11  ;;  %v1187_v10 = vpop.eup %1186  ;;  %v703_v28 = vmul.f32 0.5, %v702_v60  ;;  %vm706_vm13 = vweird.f32 %v2035_v0 }
 0x10b   : > { %vm707_vm14 = vweird.f32 %v1185_v2  ;;  %v548_v44 = vsub.f32 %v484_v22, %v1748_v17  ;;  %v719_v14 = vsel %vm718_vm12, %v2055_v42, %v715_v19  ;;  %v725_v16 = vmul.f32 %v2073_v43, %v724_v8 }
 0x10c   : > { %v2123_v53 = vpop.eup %1188  ;;  %v741_v21 = vmul.f32 %v1187_v10, %v2078_v35  ;;  %vm746_vm15 = vweird.f32 %v2078_v35  ;;  %v549_v15 = vsub.f32 %v485_v62, %v1799_v30  ;;  %v2716_v1 = vsub.f32 %v2714_v50, %v2715_v34  ;;  %vm708_vm2 = vmor %vm706_vm13, %vm707_vm14  ;;  %v2718_v62 = vld [vmem:[#allocation5_spill] sm:$0xff] }
 0x10d   : > { %v704_v17 = vsub.f32 1.5, %v703_v28  ;;  %v751_v42 = vmul.f32 %v2123_v53, %v2080_v58  ;;  %v547_v33 = vsub.f32 %v483_v25, %v1756_v39  ;;  %v729_v12 = vsel %vm728_vm1, %v2073_v43, %v725_v16  ;;  %v2719_v25 = vld [vmem:[#allocation24_spill] sm:$0xff] }
 0x10e   : > { %v958_v54 = vmul.f32 %v719_v14, %v2716_v1  ;;  %v742_v48 = vmul.f32 %v1187_v10, %v741_v21  ;;  %1190 = vrsqrt.f32 %v2114_v3  ;;  %v551_v30 = vsub.f32 %v487_v51, %v1777_v59  ;;  %v385_v1 = vpop.xlane.xlu0 %384 }
 0x10f   : > { %v2717_v46 = vsub.f32 %v1337_v20, %v1695_v45  ;;  %v705_v47 = vmul.f32 %v1185_v2, %v704_v17  ;;  %v752_v6 = vmul.f32 %v2123_v53, %v751_v42  ;;  %v2151_v43 = vadd.f32 1e-05, %v548_v44 }
 0x110   : > { %v994_v29 = vmul.f32 %v1925_v36, %v958_v54  ;;  %v743_v39 = vmul.f32 0.5, %v742_v48  ;;  %v2153_v7 = vadd.f32 1e-05, %v549_v15  ;;  %v488_v59 = vmul.f32 %v1595_v41, %v391_v63  ;;  %v397_v63 = vpop.xlane.xlu1 %396 }
 0x111   : > { %v959_v11 = vmul.f32 %v729_v12, %v2717_v46  ;;  %v709_v45 = vsel %vm708_vm2, %v1185_v2, %v705_v47  ;;  %v753_v60 = vmul.f32 0.5, %v752_v6  ;;  %v2720_v19 = vsub.f32 %v2718_v62, %v2719_v25 }
 0x112   : > { %v1030_v22 = vadd.f32 %v1938_v13, %v994_v29  ;;  %v744_v0 = vsub.f32 1.5, %v743_v39  ;;  %vm747_vm3 = vweird.f32 %v1187_v10  ;;  %1192 = vrsqrt.f32 %v2151_v43 }
 0x113   : > { %v995_v20 = vmul.f32 %v1925_v36, %v959_v11  ;;  %v957_v8 = vmul.f32 %v709_v45, %v2720_v19  ;;  %v754_v28 = vsub.f32 1.5, %v753_v60  ;;  %vm757_vm4 = vweird.f32 %v2123_v53  ;;  %vm748_vm5 = vmor %vm746_vm15, %vm747_vm3  ;;  %v2723_v45 = vld [vmem:[#allocation34_spill] sm:$0xff] }
 0x114   : > { %1062 = vst.msk [vmem:[%s1957_s25 + $0x40] sm:$0xff] %vm206_vm0, %v1030_v22  ;;  %1194 = vrsqrt.f32 %v2153_v7  ;;  %v2167_v2 = vpop.eup %1190  ;;  %v745_v14 = vmul.f32 %v1187_v10, %v744_v0  ;;  %v2170_v16 = vadd.f32 1e-05, %v547_v33  ;;  %v2172_v21 = vadd.f32 1e-05, %v551_v30 }
 0x115   : > { %v1031_v51 = vadd.f32 %v1938_v13, %v995_v20  ;;  %v993_v44 = vmul.f32 %v1925_v36, %v957_v8  ;;  %v755_v15 = vmul.f32 %v2123_v53, %v754_v28  ;;  %vm756_vm6 = vweird.f32 %v2080_v58 }
 0x116   : > { %v731_v50 = vmul.f32 %v2167_v2, %v2114_v3  ;;  %v552_v34 = vsub.f32 %v488_v59, %v1829_v9  ;;  %v2185_v54 = vmul.f32 %v1920_v37, %v1920_v37  ;;  %v749_v42 = vsel %vm748_vm5, %v1187_v10, %v745_v14  ;;  %vm758_vm7 = vmor %vm756_vm6, %vm757_vm4 }
 0x117   : > { %1063 = vst.msk [vmem:[%s1957_s25 + $0x48] sm:$0xff] %vm206_vm0, %v1031_v51  ;;  %v1029_v17 = vadd.f32 %v1938_v13, %v993_v44  ;;  %1196 = vrsqrt.f32 %v2170_v16  ;;  %v2721_v35 = vsub.f32 %v1331_v18, %v1673_v4  ;;  %v759_v33 = vsel %vm758_vm7, %v2123_v53, %v755_v15  ;;  %v2208_v4 = vpop.xlane.xlu2 %399 }
 0x118   : > { %v732_v9 = vmul.f32 %v2167_v2, %v731_v50  ;;  %1198 = vrsqrt.f32 %v2172_v21  ;;  %v2197_v12 = vpop.eup %1192  ;;  %v2722_v10 = vsub.f32 %v1352_v26, %v1724_v52  ;;  %vm736_vm8 = vweird.f32 %v2114_v3  ;;  %v2724_v3 = vld [vmem:[#allocation6_spill] sm:$0xff] }
 0x119   : > { %v961_v58 = vmul.f32 %v749_v42, %v2721_v35  ;;  %1061 = vst.msk [vmem:[%s1957_s25 + $0x38] sm:$0xff] %vm206_vm0, %v1029_v17  ;;  %v2205_v30 = vadd.f32 1e-05, %v552_v34  ;;  %v486_v18 = vmul.f32 %v1595_v41, %v385_v1  ;;  %v771_v11 = vmul.f32 %v2197_v12, %v2151_v43  ;;  %v2725_v17 = vld [vmem:[#allocation25_spill] sm:$0xff] }
 0x11a   : > { %v962_v48 = vmul.f32 %v759_v33, %v2722_v10  ;;  %v2210_v53 = vpop.eup %1194  ;;  %v733_v46 = vmul.f32 0.5, %v732_v9  ;;  %vm776_vm9 = vweird.f32 %v2151_v43  ;;  %vm786_vm10 = vweird.f32 %v2153_v7  ;;  %v394_v9 = vpop.xlane.xlu0 %393 }
 0x11b   : > { %v997_v29 = vmul.f32 %v1925_v36, %v961_v58  ;;  %v781_v52 = vmul.f32 %v2210_v53, %v2153_v7  ;;  %1200 = vrsqrt.f32 %v2205_v30  ;;  %vm737_vm11 = vweird.f32 %v2167_v2  ;;  %v406_v10 = vpop.xlane.xlu1 %405 }
 0x11c   : > { %v998_v26 = vmul.f32 %v1925_v36, %v962_v48  ;;  %v734_v6 = vsub.f32 1.5, %v733_v46  ;;  %v772_v39 = vmul.f32 %v2197_v12, %v771_v11  ;;  %v550_v60 = vsub.f32 %v486_v18, %v2723_v45  ;;  %vm738_vm14 = vmor %vm736_vm8, %vm737_vm11 }
 0x11d   : > { %v1033_v47 = vadd.f32 %v1938_v13, %v997_v29  ;;  %v2224_v59 = vpop.eup %1196  ;;  %v782_v20 = vmul.f32 %v2210_v53, %v781_v52  ;;  %v490_v62 = vmul.f32 %v1595_v41, %v397_v63  ;;  %vm777_vm12 = vweird.f32 %v2197_v12 }
 0x11e   : > { %v1034_v22 = vadd.f32 %v1938_v13, %v998_v26  ;;  %v2230_v25 = vpop.eup %1198  ;;  %v735_v19 = vmul.f32 %v2167_v2, %v734_v6  ;;  %v773_v8 = vmul.f32 0.5, %v772_v39  ;;  %v761_v0 = vmul.f32 %v2224_v59, %v2170_v16  ;;  %vm778_vm3 = vmor %vm776_vm9, %vm777_vm12  ;;  %v2727_v6 = vld [vmem:[#allocation7_spill] sm:$0xff] }
 0x11f   : > { %1065 = vst.msk [vmem:[%s1957_s25 + $0x58] sm:$0xff] %vm206_vm0, %v1033_v47  ;;  %vm766_vm13 = vweird.f32 %v2170_v16  ;;  %v783_v51 = vmul.f32 0.5, %v782_v20  ;;  %vm787_vm15 = vweird.f32 %v2210_v53  ;;  %v801_v28 = vmul.f32 %v2230_v25, %v2172_v21  ;;  %v409_v46 = vpop.xlane.xlu2 %408  ;;  %v2728_v39 = vld [vmem:[#allocation27_spill] sm:$0xff] }
 0x120   : > { %1066 = vst.msk [vmem:[%s1957_s25 + $0x60] sm:$0xff] %vm206_vm0, %v1034_v22  ;;  %vm806_vm1 = vweird.f32 %v2172_v21  ;;  %v2249_v44 = vadd.f32 1e-05, %v550_v60  ;;  %v739_v14 = vsel %vm738_vm14, %v2167_v2, %v735_v19  ;;  %v774_v15 = vsub.f32 1.5, %v773_v8  ;;  %vm788_vm5 = vmor %vm786_vm10, %vm787_vm15  ;;  %v2736_v21 = vld [vmem:[#allocation30_spill] sm:$0xff] }
 0x121   : > { %v762_v50 = vmul.f32 %v2224_v59, %v761_v0  ;;  %v554_v34 = vsub.f32 %v490_v62, %v1810_v57  ;;  %v2254_v1 = vpop.eup %1200  ;;  %v2726_v42 = vsub.f32 %v2724_v3, %v2725_v17  ;;  %v784_v58 = vsub.f32 1.5, %v783_v51  ;;  %v2733_v3 = vld [vmem:[#allocation29_spill] sm:$0xff] }
 0x122   : > { %v802_v33 = vmul.f32 %v2230_v25, %v801_v28  ;;  %1202 = vrsqrt.f32 %v2249_v44  ;;  %v775_v63 = vmul.f32 %v2197_v12, %v774_v15  ;;  %vm767_vm2 = vweird.f32 %v2224_v59 }
 0x123   : > { %v960_v35 = vmul.f32 %v739_v14, %v2726_v42  ;;  %v763_v2 = vmul.f32 0.5, %v762_v50  ;;  %v811_v57 = vmul.f32 %v2254_v1, %v2205_v30  ;;  %v785_v18 = vmul.f32 %v2210_v53, %v784_v58  ;;  %vm768_vm6 = vmor %vm766_vm13, %vm767_vm2 }
 0x124   : > { %v803_v29 = vmul.f32 0.5, %v802_v33  ;;  %vm807_vm4 = vweird.f32 %v2230_v25  ;;  %v779_v11 = vsel %vm778_vm3, %v2197_v12, %v775_v63  ;;  %v2278_v47 = vadd.f32 1e-05, %v554_v34  ;;  %v2730_v12 = vld [vmem:[#allocation32_spill] sm:$0xff] }
 0x125   : > { %v996_v48 = vmul.f32 %v1925_v36, %v960_v35  ;;  %v764_v26 = vsub.f32 1.5, %v763_v2  ;;  %v812_v52 = vmul.f32 %v2254_v1, %v811_v57  ;;  %v2729_v22 = vsub.f32 %v2727_v6, %v2728_v39  ;;  %vm808_vm8 = vmor %vm806_vm1, %vm807_vm4  ;;  %v2732_v34 = vld [vmem:[#allocation8_spill] sm:$0xff]  ;;  %v2735_v35 = vld [vmem:[#allocation9_spill] sm:$0xff]  ;;  %v415_v6 = vpop.xlane.xlu1 %414 }
 0x126   : > { %v789_v45 = vsel %vm788_vm5, %v2210_v53, %v785_v18  ;;  %v804_v60 = vsub.f32 1.5, %v803_v29  ;;  %v2731_v62 = vsub.f32 %v1367_v32, %v2730_v12  ;;  %1204 = vrsqrt.f32 %v2278_v47  ;;  %v403_v18 = vpop.xlane.xlu0 %402 }
 0x127   : > { %v1032_v43 = vadd.f32 %v1938_v13, %v996_v48  ;;  %v964_v20 = vmul.f32 %v779_v11, %v2729_v22  ;;  %v765_v7 = vmul.f32 %v2224_v59, %v764_v26  ;;  %v813_v8 = vmul.f32 0.5, %v812_v52  ;;  %v418_v22 = vpop.xlane.xlu2 %417 }
 0x128   : > { %v965_v19 = vmul.f32 %v789_v45, %v2731_v62  ;;  %v2290_v0 = vpop.eup %1202  ;;  %v805_v53 = vmul.f32 %v2230_v25, %v804_v60  ;;  %vm817_vm7 = vweird.f32 %v2254_v1  ;;  %v491_v32 = vmul.f32 %v1595_v41, %v2208_v4 }
 0x129   : > { %1064 = vst.msk [vmem:[%s1957_s25 + $0x50] sm:$0xff] %vm206_vm0, %v1032_v43  ;;  %v1000_v51 = vmul.f32 %v1925_v36, %v964_v20  ;;  %v769_v14 = vsel %vm768_vm6, %v2224_v59, %v765_v7  ;;  %v814_v15 = vsub.f32 1.5, %v813_v8  ;;  %v791_v16 = vmul.f32 %v2290_v0, %v2249_v44 }
 0x12a   : > { %v1001_v28 = vmul.f32 %v1925_v36, %v965_v19  ;;  %v2734_v17 = vsub.f32 %v2732_v34, %v2733_v3  ;;  %v809_v42 = vsel %vm808_vm8, %v2230_v25, %v805_v53  ;;  %vm816_vm9 = vweird.f32 %v2205_v30 }
 0x12b   : > { %v1036_v50 = vadd.f32 %v1938_v13, %v1000_v51  ;;  %v2737_v58 = vsub.f32 %v2735_v35, %v2736_v21  ;;  %v815_v63 = vmul.f32 %v2254_v1, %v814_v15  ;;  %v792_v2 = vmul.f32 %v2290_v0, %v791_v16  ;;  %vm818_vm10 = vmor %vm816_vm9, %vm817_vm7  ;;  %v2743_v35 = vld [vmem:[#allocation26_spill] sm:$0xff] }
 0x12c   : > { %v963_v4 = vmul.f32 %v769_v14, %v2734_v17  ;;  %v1037_v59 = vadd.f32 %v1938_v13, %v1001_v28  ;;  %v555_v25 = vsub.f32 %v491_v32, %v1875_v56  ;;  %v489_v30 = vmul.f32 %v1595_v41, %v394_v9  ;;  %v2331_v29 = vpop.eup %1204  ;;  %v2740_v32 = vld [vmem:[#allocation10_spill] sm:$0xff]  ;;  %v2741_v28 = vld [vmem:[#allocation31_spill] sm:$0xff] }
 0x12d   : > { %v967_v33 = vmul.f32 %v809_v42, %v2737_v58  ;;  %1068 = vst.msk [vmem:[%s1957_s25 + $0x70] sm:$0xff] %vm206_vm0, %v1036_v50  ;;  %v493_v48 = vmul.f32 %v1595_v41, %v406_v10  ;;  %v819_v26 = vsel %vm818_vm10, %v2254_v1, %v815_v63  ;;  %v793_v52 = vmul.f32 0.5, %v792_v2 }
 0x12e   : > { %v999_v57 = vmul.f32 %v1925_v36, %v963_v4  ;;  %1069 = vst.msk [vmem:[%s1957_s25 + $0x78] sm:$0xff] %vm206_vm0, %v1037_v59  ;;  %v494_v43 = vmul.f32 %v1595_v41, %v409_v46  ;;  %v2738_v9 = vsub.f32 %v1382_v38, %v1793_v24  ;;  %vm797_vm11 = vweird.f32 %v2290_v0  ;;  %v412_v42 = vpop.xlane.xlu0 %411 }
 0x12f   : > { %v1003_v11 = vmul.f32 %v1925_v36, %v967_v33  ;;  %v831_v39 = vmul.f32 %v2331_v29, %v2278_v47  ;;  %v794_v1 = vsub.f32 1.5, %v793_v52  ;;  %v2346_v45 = vadd.f32 1e-05, %v555_v25  ;;  %v427_v25 = vpop.xlane.xlu2 %426 }
 0x130   : > { %v1035_v56 = vadd.f32 %v1938_v13, %v999_v57  ;;  %v968_v10 = vmul.f32 %v819_v26, %v2738_v9  ;;  %v553_v46 = vsub.f32 %v489_v30, %v1822_v5  ;;  %v557_v38 = vsub.f32 %v493_v48, %v1839_v40  ;;  %v2744_v48 = vld [vmem:[#allocation11_spill] sm:$0xff] }
 0x131   : > { %v1039_v20 = vadd.f32 %v1938_v13, %v1003_v11  ;;  %v832_v24 = vmul.f32 %v2331_v29, %v831_v39  ;;  %v558_v12 = vsub.f32 %v494_v43, %v1897_v23  ;;  %v795_v62 = vmul.f32 %v2290_v0, %v794_v1  ;;  %v2739_v23 = vld [vmem:[#allocation28_spill] sm:$0xff] }
 0x132   : > { %1067 = vst.msk [vmem:[%s1957_s25 + $0x68] sm:$0xff] %vm206_vm0, %v1035_v56  ;;  %v1004_v60 = vmul.f32 %v1925_v36, %v968_v10  ;;  %vm796_vm12 = vweird.f32 %v2249_v44  ;;  %1206 = vrsqrt.f32 %v2346_v45  ;;  %v2360_v5 = vadd.f32 1e-05, %v553_v46 }
 0x133   : > { %1071 = vst.msk [vmem:[%s1957_s25 + $0x88] sm:$0xff] %vm206_vm0, %v1039_v20  ;;  %vm798_vm13 = vmor %vm796_vm12, %vm797_vm11  ;;  %v833_v7 = vmul.f32 0.5, %v832_v24  ;;  %v2365_v40 = vadd.f32 1e-05, %v557_v38  ;;  %v2367_v8 = vadd.f32 1e-05, %v558_v12  ;;  %v2371_v51 = vmul.f32 %v1595_v41, %v2739_v23 }
 0x134   : > { %v1040_v19 = vadd.f32 %v1938_v13, %v1004_v60  ;;  %v799_v44 = vsel %vm798_vm13, %v2290_v0, %v795_v62  ;;  %1208 = vrsqrt.f32 %v2360_v5  ;;  %v492_v53 = vmul.f32 %v1595_v41, %v403_v18  ;;  %v2745_v18 = vld [vmem:[#allocation33_spill] sm:$0xff]  ;;  %v2747_v23 = vld [vmem:[#allocation42_spill] sm:$0xff] }
 0x135   : > { %v2742_v14 = vsub.f32 %v2740_v32, %v2741_v28  ;;  %v834_v16 = vsub.f32 1.5, %v833_v7  ;;  %vm837_vm14 = vweird.f32 %v2331_v29  ;;  %1210 = vrsqrt.f32 %v2365_v40 }
 0x136   : > { %1072 = vst.msk [vmem:[%s1957_s25 + $0x90] sm:$0xff] %vm206_vm0, %v1040_v19  ;;  %v529_v50 = vmul.f32 %v2059_v27, %v2059_v27  ;;  %1212 = vrsqrt.f32 %v2367_v8  ;;  %v556_v0 = vsub.f32 %v492_v53, %v1852_v55  ;;  %v496_v34 = vmul.f32 %v1595_v41, %v415_v6 }
 0x137   : > { %v966_v15 = vmul.f32 %v799_v44, %v2742_v14  ;;  %v835_v17 = vmul.f32 %v2331_v29, %v834_v16  ;;  %vm836_vm15 = vweird.f32 %v2278_v47  ;;  %v497_v4 = vmul.f32 %v1595_v41, %v418_v22  ;;  %v424_v47 = vpop.xlane.xlu1 %423 }
 0x138   : > { %v2392_v59 = vpop.eup %1206  ;;  %v2396_v21 = vmul.f32 %v1595_v41, %v2743_v35  ;;  %v2400_v55 = vmul.f32 %v2371_v51, %v2371_v51  ;;  %vm838_vm1 = vmor %vm836_vm15, %vm837_vm14  ;;  %v2402_v58 = vadd.f32 1e-05, %v556_v0  ;;  %v560_v33 = vsub.f32 %v496_v34, %v1882_v49 }
 0x139   : > { %v1002_v3 = vmul.f32 %v1925_v36, %v966_v15  ;;  %v839_v2 = vsel %vm838_vm1, %v2331_v29, %v835_v17  ;;  %v841_v57 = vmul.f32 %v2392_v59, %v2346_v45  ;;  %vm846_vm2 = vweird.f32 %v2346_v45 }
 0x13a   : > { %v2410_v30 = vpop.eup %1208  ;;  %v2746_v11 = vsub.f32 %v2744_v48, %v2745_v18  ;;  %1214 = vrsqrt.f32 %v2402_v58  ;;  %v2416_v49 = vadd.f32 1e-05, %v560_v33  ;;  %v495_v52 = vmul.f32 %v1595_v41, %v412_v42  ;;  %v2748_v33 = vld [vmem:[#allocation15_spill] sm:$0xff] }
 0x13b   : > { %v1038_v63 = vadd.f32 %v1938_v13, %v1002_v3  ;;  %v2419_v43 = vpop.eup %1210  ;;  %v842_v29 = vmul.f32 %v2392_v59, %v841_v57  ;;  %v821_v6 = vmul.f32 %v2410_v30, %v2360_v5  ;;  %vm826_vm3 = vweird.f32 %v2360_v5  ;;  %v421_v3 = vpop.xlane.xlu0 %420 }
 0x13c   : > { %v970_v26 = vmul.f32 %v839_v2, %v2746_v11  ;;  %v561_v56 = vsub.f32 %v497_v4, %v529_v50  ;;  %v499_v9 = vmul.f32 %v1595_v41, %v424_v47  ;;  %v2428_v10 = vpop.eup %1212  ;;  %v861_v22 = vmul.f32 %v2419_v43, %v2365_v40  ;;  %v2749_v47 = vld [vmem:[#allocation38_spill] sm:$0xff] }
 0x13d   : > { %1070 = vst.msk [vmem:[%s1957_s25 + $0x80] sm:$0xff] %vm206_vm0, %v1038_v63  ;;  %vm866_vm4 = vweird.f32 %v2365_v40  ;;  %1216 = vrsqrt.f32 %v2416_v49  ;;  %v2436_v20 = vmul.f32 %v1595_v41, %v427_v25  ;;  %v843_v1 = vmul.f32 0.5, %v842_v29 }
 0x13e   : > { %v1006_v39 = vmul.f32 %v1925_v36, %v970_v26  ;;  %vm847_vm5 = vweird.f32 %v2392_v59  ;;  %v822_v46 = vmul.f32 %v2410_v30, %v821_v6  ;;  %v871_v60 = vmul.f32 %v2428_v10, %v2367_v8  ;;  %v2751_v26 = vld [vmem:[#allocation12_spill] sm:$0xff] }
 0x13f   : > { %vm876_vm6 = vweird.f32 %v2367_v8  ;;  %vm827_vm7 = vweird.f32 %v2410_v30  ;;  %v862_v38 = vmul.f32 %v2419_v43, %v861_v22  ;;  %v2446_v12 = vadd.f32 1e-05, %v561_v56  ;;  %vm848_vm10 = vmor %vm846_vm2, %vm847_vm5  ;;  %v2754_v56 = vld [vmem:[#allocation13_spill] sm:$0xff] }
 0x140   : > { %v1042_v24 = vadd.f32 %v1938_v13, %v1006_v39  ;;  %v844_v62 = vsub.f32 1.5, %v843_v1  ;;  %v823_v19 = vmul.f32 0.5, %v822_v46  ;;  %v872_v7 = vmul.f32 %v2428_v10, %v871_v60  ;;  %v2450_v53 = vpop.eup %1214  ;;  %vm828_vm13 = vmor %vm826_vm3, %vm827_vm7 }
 0x141   : > { %v559_v44 = vsub.f32 %v495_v52, %v2747_v23  ;;  %v863_v32 = vmul.f32 0.5, %v862_v38  ;;  %vm867_vm8 = vweird.f32 %v2419_v43  ;;  %1218 = vrsqrt.f32 %v2446_v12  ;;  %v2752_v52 = vld [vmem:[#allocation35_spill] sm:$0xff]  ;;  %v2757_v38 = vld [vmem:[#allocation17_spill] sm:$0xff] }
 0x142   : > { %1074 = vst.msk [vmem:[%s1957_s25 + $0xa0] sm:$0xff] %vm206_vm0, %v1042_v24  ;;  %v563_v28 = vsub.f32 %v499_v9, %v2090_v61  ;;  %v845_v14 = vmul.f32 %v2392_v59, %v844_v62  ;;  %v824_v15 = vsub.f32 1.5, %v823_v19  ;;  %v873_v16 = vmul.f32 0.5, %v872_v7  ;;  %vm868_vm14 = vmor %vm866_vm4, %vm867_vm8  ;;  %v2755_v9 = vld [vmem:[#allocation36_spill] sm:$0xff]  ;;  %v2758_v62 = vld [vmem:[#allocation41_spill] sm:$0xff] }
 0x143   : > { %v851_v50 = vmul.f32 %v2450_v53, %v2402_v58  ;;  %vm856_vm9 = vweird.f32 %v2402_v58  ;;  %v2461_v0 = vpop.eup %1216  ;;  %v864_v34 = vsub.f32 1.5, %v863_v32  ;;  %vm877_vm11 = vweird.f32 %v2428_v10 }
 0x144   : > { %vm857_vm12 = vweird.f32 %v2450_v53  ;;  %v2469_v61 = vadd.f32 1e-05, %v559_v44  ;;  %v849_v17 = vsel %vm848_vm10, %v2392_v59, %v845_v14  ;;  %v825_v4 = vmul.f32 %v2410_v30, %v824_v15  ;;  %vm878_vm15 = vmor %vm876_vm6, %vm877_vm11 }
 0x145   : > { %v874_v42 = vsub.f32 1.5, %v873_v16  ;;  %v852_v35 = vmul.f32 %v2450_v53, %v851_v50  ;;  %v2750_v63 = vsub.f32 %v2748_v33, %v2749_v47  ;;  %v865_v2 = vmul.f32 %v2419_v43, %v864_v34  ;;  %vm858_vm2 = vmor %vm856_vm9, %vm857_vm12 }
 0x146   : > { %v891_v57 = vmul.f32 %v2461_v0, %v2416_v49  ;;  %v2484_v59 = vadd.f32 1e-05, %v563_v28  ;;  %v829_v25 = vsel %vm828_vm13, %v2410_v30, %v825_v4  ;;  %1220 = vrsqrt.f32 %v2469_v61  ;;  %v2760_v4 = vld [vmem:[#allocation14_spill] sm:$0xff] }
 0x147   : > { %v971_v45 = vmul.f32 %v849_v17, %v2750_v63  ;;  %v875_v48 = vmul.f32 %v2428_v10, %v874_v42  ;;  %v853_v18 = vmul.f32 0.5, %v852_v35  ;;  %v2493_v5 = vpop.eup %1218  ;;  %v2753_v29 = vsub.f32 %v2751_v26, %v2752_v52  ;;  %v2761_v42 = vld [vmem:[#allocation37_spill] sm:$0xff]  ;;  %v430_v63 = vpop.xlane.xlu0 %429 }
 0x148   : > { %v869_v30 = vsel %vm868_vm14, %v2419_v43, %v865_v2  ;;  %v892_v40 = vmul.f32 %v2461_v0, %v891_v57  ;;  %v2756_v39 = vsub.f32 %v2754_v56, %v2755_v9  ;;  %v901_v60 = vmul.f32 %v2493_v5, %v2446_v12 }
 0x149   : > { %v1007_v11 = vmul.f32 %v1925_v36, %v971_v45  ;;  %v969_v6 = vmul.f32 %v829_v25, %v2753_v29  ;;  %v879_v1 = vsel %vm878_vm15, %v2428_v10, %v875_v48  ;;  %v854_v46 = vsub.f32 1.5, %v853_v18  ;;  %v2763_v18 = vld [vmem:[#allocation16_spill] sm:$0xff] }
 0x14a   : > { %v973_v22 = vmul.f32 %v869_v30, %v2756_v39  ;;  %v2759_v8 = vsub.f32 %v2757_v38, %v2758_v62  ;;  %v893_v7 = vmul.f32 0.5, %v892_v40  ;;  %vm896_vm1 = vweird.f32 %v2416_v49  ;;  %v2764_v49 = vld [vmem:[#allocation39_spill] sm:$0xff] }
 0x14b   : > { %v1043_v24 = vadd.f32 %v1938_v13, %v1007_v11  ;;  %v1005_v43 = vmul.f32 %v1925_v36, %v969_v6  ;;  %v855_v44 = vmul.f32 %v2450_v53, %v854_v46  ;;  %v902_v10 = vmul.f32 %v2493_v5, %v901_v60 }
 0x14c   : > { %v974_v19 = vmul.f32 %v879_v1, %v2759_v8  ;;  %v1009_v23 = vmul.f32 %v1925_v36, %v973_v22  ;;  %v894_v14 = vsub.f32 1.5, %v893_v7  ;;  %vm897_vm3 = vweird.f32 %v2461_v0  ;;  %v1221_v15 = vpop.eup %1220 }
 0x14d   : > { %1075 = vst.msk [vmem:[%s1957_s25 + $0xa8] sm:$0xff] %vm206_vm0, %v1043_v24  ;;  %v1041_v32 = vadd.f32 %v1938_v13, %v1005_v43  ;;  %v859_v50 = vsel %vm858_vm2, %v2450_v53, %v855_v44  ;;  %v903_v34 = vmul.f32 0.5, %v902_v10  ;;  %1222 = vrsqrt.f32 %v2484_v59  ;;  %vm898_vm4 = vmor %vm896_vm1, %vm897_vm3  ;;  %v1231_v24 = vld [vmem:[%s1283_s18 + $0xc8] sm:$0xff]  ;;  %v2766_v43 = vld [vmem:[#allocation40_spill] sm:$0xff] }
 0x14e   : > { %v1010_v28 = vmul.f32 %v1925_v36, %v974_v19  ;;  %v1045_v16 = vadd.f32 %v1938_v13, %v1009_v23  ;;  %v2762_v58 = vsub.f32 %v2760_v4, %v2761_v42  ;;  %v895_v33 = vmul.f32 %v2461_v0, %v894_v14  ;;  %v1232_v10 = vld [vmem:[%s2620_s1] ss:$0 sm:$0xff] }
 0x14f   : > { %1073 = vst.msk [vmem:[%s1957_s25 + $0x98] sm:$0xff] %vm206_vm0, %v1041_v32  ;;  %v881_v47 = vmul.f32 %v1221_v15, %v2469_v61  ;;  %v904_v53 = vsub.f32 1.5, %v903_v34  ;;  %vm906_vm5 = vweird.f32 %v2446_v12  ;;  %vm907_vm6 = vweird.f32 %v2493_v5 }
 0x150   : > { %v1046_v17 = vadd.f32 %v1938_v13, %v1010_v28  ;;  %v972_v35 = vmul.f32 %v859_v50, %v2762_v58  ;;  %1077 = vst.msk [vmem:[%s1957_s25 + $0xb8] sm:$0xff] %vm206_vm0, %v1045_v16  ;;  %v564_v45 = vsub.f32 %v2436_v20, %v2400_v55  ;;  %v899_v57 = vsel %vm898_vm4, %v2461_v0, %v895_v33  ;;  %v1230_v20 = vld [vmem:[%s1283_s18 + $0xd8] sm:$0xff]  ;;  %vm908_vm7 = vmor %vm906_vm5, %vm907_vm6  ;;  %v1234_v50 = vld [vmem:[%s2621_s2] ss:$0 sm:$0xff] }
 0x151   : > { %v882_v25 = vmul.f32 %v1221_v15, %v881_v47  ;;  %v498_v48 = vmul.f32 %v1595_v41, %v421_v3  ;;  %v2765_v11 = vsub.f32 %v2763_v18, %v2764_v49  ;;  %v905_v52 = vmul.f32 %v2493_v5, %v904_v53 }
 0x152   : > { %1078 = vst.msk [vmem:[%s1957_s25 + $0xc0] sm:$0xff] %vm206_vm0, %v1046_v17  ;;  %v1008_v2 = vmul.f32 %v1925_v36, %v972_v35  ;;  %v2557_v29 = vadd.f32 1e-05, %v564_v45  ;;  %v501_v55 = vmul.f32 %v1595_v41, %v430_v63  ;;  %v593_v6 = vsub.f32 %v1230_v20, %v2059_v27 }
 0x153   : > { %v976_v26 = vmul.f32 %v899_v57, %v2765_v11  ;;  %v883_v0 = vmul.f32 0.5, %v882_v25  ;;  %v562_v3 = vsub.f32 %v498_v48, %v2185_v54  ;;  %v1223_v40 = vpop.eup %1222  ;;  %v533_v56 = vmul.f32 %v2396_v21, %v2396_v21 }
 0x154   : > { %v1044_v30 = vadd.f32 %v1938_v13, %v1008_v2  ;;  %v909_v41 = vsel %vm908_vm7, %v2493_v5, %v905_v52  ;;  %1224 = vrsqrt.f32 %v2557_v29  ;;  %vm887_vm8 = vweird.f32 %v1221_v15  ;;  %v1235_v2 = vld [vmem:[%s1283_s18 + $0xf0] sm:$0xff] }
 0x155   : > { %v1012_v9 = vmul.f32 %v1925_v36, %v976_v26  ;;  %v977_v27 = vmul.f32 %v909_v41, %v593_v6  ;;  %v884_v12 = vsub.f32 1.5, %v883_v0  ;;  %v921_v39 = vmul.f32 %v1223_v40, %v2484_v59 }
 0x156   : > { %1076 = vst.msk [vmem:[%s1957_s25 + $0xb0] sm:$0xff] %vm206_vm0, %v1044_v30  ;;  %v2575_v22 = vadd.f32 1e-05, %v562_v3  ;;  %v565_v1 = vsub.f32 %v501_v55, %v533_v56  ;;  %vm886_vm9 = vweird.f32 %v2469_v61  ;;  %v591_v38 = vsub.f32 %v1231_v24, %v2766_v43  ;;  %v1237_v30 = vld [vmem:[%s1283_s18 + $0xf8] sm:$0xff] }
 0x157   : > { %v1048_v54 = vadd.f32 %v1938_v13, %v1012_v9  ;;  %v1013_v46 = vmul.f32 %v1925_v36, %v977_v27  ;;  %v885_v60 = vmul.f32 %v1221_v15, %v884_v12  ;;  %v922_v5 = vmul.f32 %v1223_v40, %v921_v39  ;;  %vm888_vm10 = vmor %vm886_vm9, %vm887_vm8 }
 0x158   : > { %1226 = vrsqrt.f32 %v2575_v22  ;;  %v629_v62 = vadd.f32 1e-05, %v565_v1  ;;  %vm927_vm11 = vweird.f32 %v1223_v40  ;;  %vm926_vm12 = vweird.f32 %v2484_v59 }
 0x159   : > { %1080 = vst.msk [vmem:[%s1957_s25 + $0xd0] sm:$0xff] %vm206_vm0, %v1048_v54  ;;  %v1049_v8 = vadd.f32 %v1938_v13, %v1013_v46  ;;  %v889_v19 = vsel %vm888_vm10, %v1221_v15, %v885_v60  ;;  %v923_v7 = vmul.f32 0.5, %v922_v5  ;;  %v1233_v15 = vld [vmem:[%s1283_s18 + $0xe8] sm:$0xff]  ;;  %vm928_vm13 = vmor %vm926_vm12, %vm927_vm11  ;;  %vm936_vm15 = vweird.f32 %v2557_v29 }
 0x15a   : > { %v1225_v36 = vpop.eup %1224  ;;  %v975_v23 = vmul.f32 %v889_v19, %v591_v38  ;;  %1228 = vrsqrt.f32 %v629_v62  ;;  %v595_v16 = vsub.f32 %v1233_v15, %v1916_v31  ;;  %v596_v57 = vsub.f32 %v1235_v2, %v2371_v51 }
 0x15b   : > { %1081 = vst.msk [vmem:[%s1957_s25 + $0xd8] sm:$0xff] %vm206_vm0, %v1049_v8  ;;  %v924_v61 = vsub.f32 1.5, %v923_v7  ;;  %v931_v44 = vmul.f32 %v1225_v36, %v2557_v29  ;;  %vm937_vm14 = vweird.f32 %v1225_v36  ;;  %vm916_vm3 = vweird.f32 %v2575_v22  ;;  %v1236_v29 = vld [vmem:[%s1283_s18 + $0xe0] sm:$0xff] }
 0x15c   : > { %v1011_v32 = vmul.f32 %v1232_v10, %v975_v23  ;;  %vm938_vm1 = vmor %vm936_vm15, %vm937_vm14  ;;  %v594_v55 = vsub.f32 %v1236_v29, %v1920_v37  ;;  %vm946_vm6 = vweird.f32 %v629_v62  ;;  %v597_v0 = vsub.f32 %v1237_v30, %v2396_v21 }
 0x15d   : > { %v925_v28 = vmul.f32 %v1223_v40, %v924_v61  ;;  %v932_v13 = vmul.f32 %v1225_v36, %v931_v44 }
 0x15e   : > { %v1227_v14 = vpop.eup %1226  ;;  %v1047_v34 = vadd.f32 %v1234_v50, %v1011_v32 }
 0x15f   : > { %v929_v17 = vsel %vm928_vm13, %v1223_v40, %v925_v28  ;;  %v933_v4 = vmul.f32 0.5, %v932_v13  ;;  %v911_v42 = vmul.f32 %v1227_v14, %v2575_v22  ;;  %vm917_vm2 = vweird.f32 %v1227_v14 }
 0x160   : > { %v1229_v58 = vpop.eup %1228  ;;  %1079 = vst.msk [vmem:[%s1957_s25 + $0xc8] sm:$0xff] %vm206_vm0, %v1047_v34  ;;  %v979_v59 = vmul.f32 %v929_v17, %v595_v16  ;;  %vm918_vm5 = vmor %vm916_vm3, %vm917_vm2 }
 0x161   : > { %v934_v35 = vsub.f32 1.5, %v933_v4  ;;  %v912_v33 = vmul.f32 %v1227_v14, %v911_v42  ;;  %v941_v31 = vmul.f32 %v1229_v58, %v629_v62  ;;  %vm947_vm4 = vweird.f32 %v1229_v58 }
 0x162   : > { %v1015_v47 = vmul.f32 %v1232_v10, %v979_v59  ;;  %vm948_vm7 = vmor %vm946_vm6, %vm947_vm4 }
 0x163   : > { %v935_v63 = vmul.f32 %v1225_v36, %v934_v35  ;;  %v913_v53 = vmul.f32 0.5, %v912_v33  ;;  %v942_v45 = vmul.f32 %v1229_v58, %v941_v31 }
 0x164   : > { %v1051_v25 = vadd.f32 %v1234_v50, %v1015_v47 }
 0x165   : > { %v939_v48 = vsel %vm938_vm1, %v1225_v36, %v935_v63  ;;  %v914_v18 = vsub.f32 1.5, %v913_v53  ;;  %v943_v49 = vmul.f32 0.5, %v942_v45 }
 0x166   : > { %1083 = vst.msk [vmem:[%s1957_s25 + $0xe8] sm:$0xff] %vm206_vm0, %v1051_v25  ;;  %v980_v11 = vmul.f32 %v939_v48, %v596_v57 }
 0x167   : > { %v915_v26 = vmul.f32 %v1227_v14, %v914_v18  ;;  %v944_v52 = vsub.f32 1.5, %v943_v49 }
 0x168   : > { %v1016_v51 = vmul.f32 %v1232_v10, %v980_v11 }
 0x169   : > { %v919_v20 = vsel %vm918_vm5, %v1227_v14, %v915_v26  ;;  %v945_v6 = vmul.f32 %v1229_v58, %v944_v52 }
 0x16a   : > { %v1052_v3 = vadd.f32 %v1234_v50, %v1016_v51  ;;  %v978_v40 = vmul.f32 %v919_v20, %v594_v55 }
 0x16b   : > { %v949_v56 = vsel %vm948_vm7, %v1229_v58, %v945_v6 }
 0x16c   : > { %1084 = vst.msk [vmem:[%s1957_s25 + $0xf0] sm:$0xff] %vm206_vm0, %v1052_v3  ;;  %v1014_v9 = vmul.f32 %v1232_v10, %v978_v40  ;;  %v981_v41 = vmul.f32 %v949_v56, %v597_v0 }
 0x16e   : > { %v1050_v27 = vadd.f32 %v1234_v50, %v1014_v9  ;;  %v1017_v37 = vmul.f32 %v1232_v10, %v981_v41 }
 0x170   : > { %1082 = vst.msk [vmem:[%s1957_s25 + $0xe0] sm:$0xff] %vm206_vm0, %v1050_v27  ;;  %v1053_v12 = vadd.f32 %v1234_v50, %v1017_v37 }
 0x172   : > { %1085 = vst.msk [vmem:[%s1957_s25 + $0xf8] sm:$0xff] %vm206_vm0, %v1053_v12 }
 0x173 PF: > { %s13_s12 = sadd.s32 1, %s1244_s12  }
 0x174   : > { %p10_p4 = scmp.ge.s32.totalorder %s13_s12, 4  }
 0x176   :  { %12 = sbr.rel (!%p10_p4) target bundleno = 1 (0x1), region = 62 }

// kernel: _lambda_.18
= control target key start
LH: loop header
LB: loop body
LE: loop exit
PB: predicated region body
PF: predicated region fallthrough
CT: control target
= control target key end

     0   :  { %s494_s12 = smov 0   ;;  %s629_s0 = inlined_call_operand.vmem [shape: f32[288,32], index: 0, kind: input, shape index: {}]   ;;  %s630_s1 = inlined_call_operand.vmem [shape: f32[32,32], index: 1, kind: input, shape index: {}]   ;;  %s631_s2 = inlined_call_operand.vmem [shape: f32[1,32], index: 2, kind: input, shape index: {}]   ;;  %s632_s3 = inlined_call_operand.vmem [shape: f32[288,32], index: 3, kind: output, shape index: {}]  }
   0x1 LB: > { %s418_s13 = sadd.s32 4294967295, %s472_s12   ;;  %p422_p0 = scmp.ge.s32.totalorder %s472_s12, 1  ;;  %s472_s12 = sphi %s494_s12, %s13_s12  }
   0x2   : > { %p138_p1 = scmp.lt.s32.totalorder %s472_s12, 3 }
   0x4   : > { %p139_p2 = pnand %p422_p0, %p138_p1 }
   0x5   : > { %s162_s18 = smul.u32 (!%p139_p2), 18, %s418_s13 }
   0x6   : > { %142 = sbr.rel (%p139_p2) target bundleno = 189 (0xbd), region = 32 }
   0x7   : > { %p163_p3 = scmp.lt.s32.totalorder (!%p139_p2), %s162_s18, 35 }
   0xb   : > { %v195_v0 = vld [vmem:[%s630_s1 + $0x18] sm:$0xff]  ;;  %v194_v1 = vld [vmem:[%s630_s1 + $0x10] sm:$0xff]  ;;  %v193_v2 = vld [vmem:[%s630_s1 + $0x8] sm:$0xff]  ;;  %s634_s18 = smov (!%p163_p3, %s162_s18), 35  ;;  %vm200_vm0 = vcmask 261120  }
   0xc   : > { %446 = vmatpush.msra.mxu2 %v195_v0  ;;  %445 = vmatpush.msra.mxu1 %v195_v0  ;;  %v192_v3 = vld [vmem:[%s630_s1] sm:$0xff]  ;;  %s423_s23 = sshll.u32 %s634_s18, 3 }
   0xd   : > { %447 = vmatpush.msra.mxu3 %v195_v0  ;;  %267 = vmatpush.msra.mxu0 %v195_v0  ;;  %s522_s26 = scalar_lea.vmem %s629_s0, %s423_s23  ;;  %v563_v22 = vld [vmem:[%s631_s2] ss:$0 sm:$0xff]  ;;  %s571_s4 = scalar_lea.vmem %s632_s3, %s423_s23 }
   0xe   : > { %449 = vmatpush.msra.mxu2 %v194_v1  ;;  %448 = vmatpush.msra.mxu1 %v194_v1  ;;  %v183_v4 = vld [vmem:[%s522_s26 + $0x48] sm:$0xff]  ;;  %v178_v5 = vld [vmem:[%s522_s26 + $0x20] sm:$0xff]  ;;  %v188_v6 = vld [vmem:[%s522_s26 + $0x70] sm:$0xff] }
   0xf   : > { %450 = vmatpush.msra.mxu3 %v194_v1  ;;  %268 = vmatpush.msra.mxu0 %v194_v1  ;;  %v174_v7 = vld [vmem:[%s522_s26] sm:$0xff]  ;;  %v184_v8 = vld [vmem:[%s522_s26 + $0x50] sm:$0xff]  ;;  %v179_v9 = vld [vmem:[%s522_s26 + $0x28] sm:$0xff] }
  0x10   : > { %452 = vmatpush.msra.mxu2 %v193_v2  ;;  %451 = vmatpush.msra.mxu1 %v193_v2  ;;  %v189_v10 = vld [vmem:[%s522_s26 + $0x78] sm:$0xff]  ;;  %v175_v11 = vld [vmem:[%s522_s26 + $0x8] sm:$0xff]  ;;  %v180_v13 = vld [vmem:[%s522_s26 + $0x30] sm:$0xff] }
  0x11   : > { %453 = vmatpush.msra.mxu3 %v193_v2  ;;  %269 = vmatpush.msra.mxu0 %v193_v2  ;;  %v185_v12 = vld [vmem:[%s522_s26 + $0x58] sm:$0xff]  ;;  %v190_v14 = vld [vmem:[%s522_s26 + $0x80] sm:$0xff]  ;;  %v176_v15 = vld [vmem:[%s522_s26 + $0x10] sm:$0xff] }
  0x12   : > { %455 = vmatpush.msra.mxu2 %v192_v3  ;;  %454 = vmatpush.msra.mxu1 %v192_v3  ;;  %v186_v16 = vld [vmem:[%s522_s26 + $0x60] sm:$0xff]  ;;  %v181_v17 = vld [vmem:[%s522_s26 + $0x38] sm:$0xff]  ;;  %v191_v18 = vld [vmem:[%s522_s26 + $0x88] sm:$0xff] }
  0x13   : > { %456 = vmatpush.msra.mxu3 %v192_v3  ;;  %270 = vmatpush.msra.mxu0 %v192_v3  ;;  %v177_v19 = vld [vmem:[%s522_s26 + $0x18] sm:$0xff]  ;;  %v187_v20 = vld [vmem:[%s522_s26 + $0x68] sm:$0xff]  ;;  %v182_v21 = vld [vmem:[%s522_s26 + $0x40] sm:$0xff] }
  0x14   : > { %434 = vmatmul.msk.f32.vlgmr.msra.gmra.mxu2 %vm200_vm0, %v183_v4  ;;  %429 = vmatmul.msk.f32.vlgmr.msra.gmra.mxu1 %vm200_vm0, %v178_v5 }
  0x15   : > { %439 = vmatmul.msk.f32.vlgmr.msra.gmra.mxu3 %vm200_vm0, %v188_v6  ;;  %425 = vmatmul.msk.f32.vlgmr.msra.gmra.mxu0 %vm200_vm0, %v174_v7 }
  0x1c   : > { %435 = vmatmul.msk.f32.gmra.mxu2 %vm200_vm0, %v184_v8  ;;  %430 = vmatmul.msk.f32.gmra.mxu1 %vm200_vm0, %v179_v9 }
  0x1d   : > { %440 = vmatmul.msk.f32.gmra.mxu3 %vm200_vm0, %v189_v10  ;;  %426 = vmatmul.msk.f32.gmra.mxu0 %vm200_vm0, %v175_v11 }
  0x24   : > { %436 = vmatmul.msk.f32.gmra.mxu2 %vm200_vm0, %v185_v12  ;;  %431 = vmatmul.msk.f32.gmra.mxu1 %vm200_vm0, %v180_v13 }
  0x25   : > { %441 = vmatmul.msk.f32.gmra.mxu3 %vm200_vm0, %v190_v14  ;;  %427 = vmatmul.msk.f32.gmra.mxu0 %vm200_vm0, %v176_v15 }
  0x2c   : > { %437 = vmatmul.msk.f32.gmra.mxu2 %vm200_vm0, %v186_v16  ;;  %432 = vmatmul.msk.f32.gmra.mxu1 %vm200_vm0, %v181_v17 }
  0x2d   : > { %442 = vmatmul.msk.f32.gmra.mxu3 %vm200_vm0, %v191_v18  ;;  %428 = vmatmul.msk.f32.gmra.mxu0 %vm200_vm0, %v177_v19 }
  0x34   : > { %438 = vmatmul.msk.f32.gmra.mxu2 %vm200_vm0, %v187_v20  ;;  %433 = vmatmul.msk.f32.gmra.mxu1 %vm200_vm0, %v182_v21 }
  0x91   : > { %v284_v23 = vpop.f32.mrf.mxu1 }
  0x92   : > { %v285_v24 = vadd.f32 %v563_v22, %v284_v23  ;;  %v272_v25 = vpop.f32.mrf.mxu0 }
  0x93   : > { %v273_v26 = vadd.f32 %v563_v22, %v272_v25 }
  0x94   : > { %v330_v27 = vmax.f32 %v285_v24, 0.0 }
  0x95   : > { %v326_v28 = vmax.f32 %v273_v26, 0.0 }
  0x96   : > { %348 = vst.msk [vmem:[%s571_s4 + $0x20] sm:$0xff] %vm200_vm0, %v330_v27 }
  0x97   : > { %v299_v29 = vpop.f32.mrf.mxu2  ;;  %344 = vst.msk [vmem:[%s571_s4] sm:$0xff] %vm200_vm0, %v326_v28 }
  0x98   : > { %v300_v30 = vadd.f32 %v563_v22, %v299_v29  ;;  %v314_v31 = vpop.f32.mrf.mxu3 }
  0x99   : > { %v287_v32 = vpop.f32.mrf.mxu1  ;;  %v315_v33 = vadd.f32 %v563_v22, %v314_v31 }
  0x9a   : > { %v335_v34 = vmax.f32 %v300_v30, 0.0  ;;  %v288_v35 = vadd.f32 %v563_v22, %v287_v32  ;;  %v275_v36 = vpop.f32.mrf.mxu0 }
  0x9b   : > { %v340_v37 = vmax.f32 %v315_v33, 0.0  ;;  %v276_v38 = vadd.f32 %v563_v22, %v275_v36 }
  0x9c   : > { %353 = vst.msk [vmem:[%s571_s4 + $0x48] sm:$0xff] %vm200_vm0, %v335_v34  ;;  %v331_v39 = vmax.f32 %v288_v35, 0.0 }
  0x9d   : > { %358 = vst.msk [vmem:[%s571_s4 + $0x70] sm:$0xff] %vm200_vm0, %v340_v37  ;;  %v327_v40 = vmax.f32 %v276_v38, 0.0 }
  0x9e   : > { %349 = vst.msk [vmem:[%s571_s4 + $0x28] sm:$0xff] %vm200_vm0, %v331_v39 }
  0x9f   : > { %v302_v41 = vpop.f32.mrf.mxu2  ;;  %345 = vst.msk [vmem:[%s571_s4 + $0x8] sm:$0xff] %vm200_vm0, %v327_v40 }
  0xa0   : > { %v303_v42 = vadd.f32 %v563_v22, %v302_v41  ;;  %v317_v43 = vpop.f32.mrf.mxu3 }
  0xa1   : > { %v290_v44 = vpop.f32.mrf.mxu1  ;;  %v318_v45 = vadd.f32 %v563_v22, %v317_v43 }
  0xa2   : > { %v336_v46 = vmax.f32 %v303_v42, 0.0  ;;  %v291_v47 = vadd.f32 %v563_v22, %v290_v44  ;;  %v278_v48 = vpop.f32.mrf.mxu0 }
  0xa3   : > { %v341_v49 = vmax.f32 %v318_v45, 0.0  ;;  %v279_v50 = vadd.f32 %v563_v22, %v278_v48 }
  0xa4   : > { %354 = vst.msk [vmem:[%s571_s4 + $0x50] sm:$0xff] %vm200_vm0, %v336_v46  ;;  %v332_v51 = vmax.f32 %v291_v47, 0.0 }
  0xa5   : > { %359 = vst.msk [vmem:[%s571_s4 + $0x78] sm:$0xff] %vm200_vm0, %v341_v49  ;;  %v328_v52 = vmax.f32 %v279_v50, 0.0 }
  0xa6   : > { %350 = vst.msk [vmem:[%s571_s4 + $0x30] sm:$0xff] %vm200_vm0, %v332_v51 }
  0xa7   : > { %v305_v53 = vpop.f32.mrf.mxu2  ;;  %346 = vst.msk [vmem:[%s571_s4 + $0x10] sm:$0xff] %vm200_vm0, %v328_v52 }
  0xa8   : > { %v306_v54 = vadd.f32 %v563_v22, %v305_v53  ;;  %v320_v55 = vpop.f32.mrf.mxu3 }
  0xa9   : > { %v293_v56 = vpop.f32.mrf.mxu1  ;;  %v321_v57 = vadd.f32 %v563_v22, %v320_v55 }
  0xaa   : > { %v337_v58 = vmax.f32 %v306_v54, 0.0  ;;  %v294_v59 = vadd.f32 %v563_v22, %v293_v56  ;;  %v281_v60 = vpop.f32.mrf.mxu0 }
  0xab   : > { %v342_v61 = vmax.f32 %v321_v57, 0.0  ;;  %v282_v62 = vadd.f32 %v563_v22, %v281_v60 }
  0xac   : > { %355 = vst.msk [vmem:[%s571_s4 + $0x58] sm:$0xff] %vm200_vm0, %v337_v58  ;;  %v333_v63 = vmax.f32 %v294_v59, 0.0 }
  0xad   : > { %360 = vst.msk [vmem:[%s571_s4 + $0x80] sm:$0xff] %vm200_vm0, %v342_v61  ;;  %v329_v0 = vmax.f32 %v282_v62, 0.0 }
  0xae   : > { %351 = vst.msk [vmem:[%s571_s4 + $0x38] sm:$0xff] %vm200_vm0, %v333_v63 }
  0xaf   : > { %v308_v1 = vpop.f32.mrf.mxu2  ;;  %347 = vst.msk [vmem:[%s571_s4 + $0x18] sm:$0xff] %vm200_vm0, %v329_v0 }
  0xb0   : > { %v309_v2 = vadd.f32 %v563_v22, %v308_v1  ;;  %v323_v3 = vpop.f32.mrf.mxu3 }
  0xb1   : > { %v296_v4 = vpop.f32.mrf.mxu1  ;;  %v324_v5 = vadd.f32 %v563_v22, %v323_v3 }
  0xb2   : > { %v338_v6 = vmax.f32 %v309_v2, 0.0  ;;  %v297_v7 = vadd.f32 %v563_v22, %v296_v4 }
  0xb3   : > { %v343_v8 = vmax.f32 %v324_v5, 0.0 }
  0xb4   : > { %356 = vst.msk [vmem:[%s571_s4 + $0x60] sm:$0xff] %vm200_vm0, %v338_v6  ;;  %v334_v9 = vmax.f32 %v297_v7, 0.0 }
  0xb5   : > { %361 = vst.msk [vmem:[%s571_s4 + $0x88] sm:$0xff] %vm200_vm0, %v343_v8 }
  0xb6   : > { %352 = vst.msk [vmem:[%s571_s4 + $0x40] sm:$0xff] %vm200_vm0, %v334_v9 }
  0xb7   : > { %v311_v10 = vpop.f32.mrf.mxu2 }
  0xb8   : > { %v312_v11 = vadd.f32 %v563_v22, %v311_v10 }
  0xba   : > { %v339_v12 = vmax.f32 %v312_v11, 0.0 }
  0xbc   : > { %357 = vst.msk [vmem:[%s571_s4 + $0x68] sm:$0xff] %vm200_vm0, %v339_v12 }
  0xbd PF: > { %s13_s12 = sadd.s32 1, %s472_s12  }
  0xbe   : > { %p10_p4 = scmp.ge.s32.totalorder %s13_s12, 4  }
  0xc0   :  { %12 = sbr.rel (!%p10_p4) target bundleno = 1 (0x1), region = 62 }

// kernel: reverse.1
= control target key start
LH: loop header
LB: loop body
LE: loop exit
PB: predicated region body
PF: predicated region fallthrough
CT: control target
= control target key end

     0   :  { %s344_s0 = inlined_call_operand.vmem [shape: f32[2,16,16,7], index: 0, kind: input, shape index: {}]   ;;  %s345_s1 = inlined_call_operand.vmem [shape: f32[2,16,16,7], index: 1, kind: output, shape index: {}]  }
   0x1   :  { %v112_v0 = vld [vmem:[%s344_s0 + $0x60] sm:$0xff]  ;;  %v113_v1 = vld [vmem:[%s344_s0 + $0xd0] sm:$0xff]  ;;  %v138_v14 = vld [vmem:[%s344_s0 + $0x68] sm:$0xff] }
   0x2   :  { %v115_v2 = vld [vmem:[%s344_s0 + $0x50] sm:$0xff]  ;;  %4 = vst [vmem:[%s345_s1] sm:$0xff] %v112_v0  ;;  %v117_v3 = vld [vmem:[%s344_s0 + $0xc0] sm:$0xff]  ;;  %v140_v15 = vld [vmem:[%s344_s0 + $0xd8] sm:$0xff] }
   0x3   :  { %114 = vst [vmem:[%s345_s1 + $0x70] sm:$0xff] %v113_v1  ;;  %v119_v4 = vld [vmem:[%s344_s0 + $0x40] sm:$0xff]  ;;  %v121_v5 = vld [vmem:[%s344_s0 + $0xb0] sm:$0xff]  ;;  %v142_v16 = vld [vmem:[%s344_s0 + $0x58] sm:$0xff] }
   0x4   :  { %116 = vst [vmem:[%s345_s1 + $0x10] sm:$0xff] %v115_v2  ;;  %v123_v6 = vld [vmem:[%s344_s0 + $0x30] sm:$0xff]  ;;  %v125_v7 = vld [vmem:[%s344_s0 + $0xa0] sm:$0xff]  ;;  %v144_v17 = vld [vmem:[%s344_s0 + $0xc8] sm:$0xff] }
   0x5   :  { %118 = vst [vmem:[%s345_s1 + $0x80] sm:$0xff] %v117_v3  ;;  %v127_v8 = vld [vmem:[%s344_s0 + $0x20] sm:$0xff]  ;;  %v129_v9 = vld [vmem:[%s344_s0 + $0x90] sm:$0xff]  ;;  %v146_v18 = vld [vmem:[%s344_s0 + $0x48] sm:$0xff] }
   0x6   :  { %120 = vst [vmem:[%s345_s1 + $0x20] sm:$0xff] %v119_v4  ;;  %v131_v10 = vld [vmem:[%s344_s0 + $0x10] sm:$0xff]  ;;  %v133_v11 = vld [vmem:[%s344_s0 + $0x80] sm:$0xff]  ;;  %v148_v19 = vld [vmem:[%s344_s0 + $0xb8] sm:$0xff] }
   0x7   :  { %122 = vst [vmem:[%s345_s1 + $0x90] sm:$0xff] %v121_v5  ;;  %v49_v12 = vld [vmem:[%s344_s0] sm:$0xff]  ;;  %v136_v13 = vld [vmem:[%s344_s0 + $0x70] sm:$0xff]  ;;  %v150_v20 = vld [vmem:[%s344_s0 + $0x38] sm:$0xff] }
   0x8   :  { %124 = vst [vmem:[%s345_s1 + $0x30] sm:$0xff] %v123_v6  ;;  %v152_v21 = vld [vmem:[%s344_s0 + $0xa8] sm:$0xff]  ;;  %v156_v23 = vld [vmem:[%s344_s0 + $0x98] sm:$0xff] }
   0x9   :  { %126 = vst [vmem:[%s345_s1 + $0xa0] sm:$0xff] %v125_v7  ;;  %v154_v22 = vld [vmem:[%s344_s0 + $0x28] sm:$0xff]  ;;  %v158_v24 = vld [vmem:[%s344_s0 + $0x18] sm:$0xff] }
   0xa   :  { %128 = vst [vmem:[%s345_s1 + $0x40] sm:$0xff] %v127_v8  ;;  %v160_v25 = vld [vmem:[%s344_s0 + $0x88] sm:$0xff]  ;;  %v164_v27 = vld [vmem:[%s344_s0 + $0x78] sm:$0xff] }
   0xb   :  { %130 = vst [vmem:[%s345_s1 + $0xb0] sm:$0xff] %v129_v9  ;;  %v162_v26 = vld [vmem:[%s344_s0 + $0x8] sm:$0xff] }
   0xc   :  { %132 = vst [vmem:[%s345_s1 + $0x50] sm:$0xff] %v131_v10 }
   0xd   :  { %134 = vst [vmem:[%s345_s1 + $0xc0] sm:$0xff] %v133_v11 }
   0xe   :  { %135 = vst [vmem:[%s345_s1 + $0x60] sm:$0xff] %v49_v12 }
   0xf   :  { %137 = vst [vmem:[%s345_s1 + $0xd0] sm:$0xff] %v136_v13 }
  0x10   :  { %139 = vst [vmem:[%s345_s1 + $0x8] sm:$0xff] %v138_v14 }
  0x11   :  { %141 = vst [vmem:[%s345_s1 + $0x78] sm:$0xff] %v140_v15 }
  0x12   :  { %143 = vst [vmem:[%s345_s1 + $0x18] sm:$0xff] %v142_v16 }
  0x13   :  { %145 = vst [vmem:[%s345_s1 + $0x88] sm:$0xff] %v144_v17 }
  0x14   :  { %147 = vst [vmem:[%s345_s1 + $0x28] sm:$0xff] %v146_v18 }
  0x15   :  { %149 = vst [vmem:[%s345_s1 + $0x98] sm:$0xff] %v148_v19 }
  0x16   :  { %151 = vst [vmem:[%s345_s1 + $0x38] sm:$0xff] %v150_v20 }
  0x17   :  { %153 = vst [vmem:[%s345_s1 + $0xa8] sm:$0xff] %v152_v21 }
  0x18   :  { %155 = vst [vmem:[%s345_s1 + $0x48] sm:$0xff] %v154_v22 }
  0x19   :  { %157 = vst [vmem:[%s345_s1 + $0xb8] sm:$0xff] %v156_v23 }
  0x1a   :  { %159 = vst [vmem:[%s345_s1 + $0x58] sm:$0xff] %v158_v24 }
  0x1b   :  { %161 = vst [vmem:[%s345_s1 + $0xc8] sm:$0xff] %v160_v25 }
  0x1c   :  { %163 = vst [vmem:[%s345_s1 + $0x68] sm:$0xff] %v162_v26 }
  0x1d   :  { %165 = vst [vmem:[%s345_s1 + $0xd8] sm:$0xff] %v164_v27 }

// kernel: _lambda_.19
= control target key start
LH: loop header
LB: loop body
LE: loop exit
PB: predicated region body
PF: predicated region fallthrough
CT: control target
= control target key end

     0   :  { %s597_s12 = smov 0   ;;  %s796_s0 = inlined_call_operand.vmem [shape: f32[512,16], index: 0, kind: input, shape index: {}]   ;;  %s797_s1 = inlined_call_operand.vmem [shape: f32[16,32], index: 1, kind: input, shape index: {}]   ;;  %s798_s2 = inlined_call_operand.vmem [shape: f32[1,32], index: 2, kind: input, shape index: {}]   ;;  %s799_s3 = inlined_call_operand.vmem [shape: f32[512,32], index: 3, kind: output, shape index: {}]  }
   0x1 LB: > { %s511_s13 = sadd.s32 4294967295, %s575_s12   ;;  %p515_p0 = scmp.ge.s32.totalorder %s575_s12, 1  ;;  %s575_s12 = sphi %s597_s12, %s13_s12  }
   0x2   : > { %p138_p1 = scmp.lt.s32.totalorder %s575_s12, 3 }
   0x4   : > { %p139_p2 = pnand %p515_p0, %p138_p1 }
   0x5   : > { %s516_s18 = sshll.u32 (!%p139_p2), %s511_s13, 5 }
   0x6   : > { %142 = sbr.rel (%p139_p2) target bundleno = 208 (0xd0), region = 32  ;;  %p163_p3 = scmp.lt.s32.totalorder (!%p139_p2), %s516_s18, 63 }
   0xb   : > { %v207_v0 = vld [vmem:[%s797_s1 + $0x8] sm:$0xff]  ;;  %v206_v1 = vld [vmem:[%s797_s1] sm:$0xff]  ;;  %s801_s18 = smov (!%p163_p3, %s516_s18), 63  ;;  %vm212_vm0 = vcmask 130048   ;;  %vm422_vm1 = vcmask 261120  }
   0xc   : > { %555 = vmatpush.msra.mxu2 %v207_v0  ;;  %556 = vmatpush.msra.mxu3 %v207_v0  ;;  %s517_s19 = sshll.u32 %s801_s18, 3  ;;  %v688_v34 = vld [vmem:[%s798_s2] ss:$0 sm:$0xff] }
   0xd   : > { %323 = vmatpush.msra.mxu0 %v207_v0  ;;  %554 = vmatpush.msra.mxu1 %v207_v0  ;;  %s619_s22 = scalar_lea.vmem %s796_s0, %s517_s19  ;;  %s695_s27 = scalar_lea.vmem %s799_s3, %s517_s19 }
   0xe   : > { %558 = vmatpush.msra.mxu2 %v206_v1  ;;  %559 = vmatpush.msra.mxu3 %v206_v1  ;;  %v190_v2 = vld [vmem:[%s619_s22 + $0x80] sm:$0xff]  ;;  %v191_v6 = vld [vmem:[%s619_s22 + $0x88] sm:$0xff]  ;;  %v192_v10 = vld [vmem:[%s619_s22 + $0x90] sm:$0xff] }
   0xf   : > { %324 = vmatpush.msra.mxu0 %v206_v1  ;;  %557 = vmatpush.msra.mxu1 %v206_v1  ;;  %v198_v3 = vld [vmem:[%s619_s22 + $0xc0] sm:$0xff]  ;;  %v199_v7 = vld [vmem:[%s619_s22 + $0xc8] sm:$0xff]  ;;  %v200_v11 = vld [vmem:[%s619_s22 + $0xd0] sm:$0xff] }
  0x10   : > { %v174_v4 = vld [vmem:[%s619_s22] sm:$0xff]  ;;  %536 = vmatmul.msk.f32.vlgmr.msra.gmra.mxu2 %vm212_vm0, %v190_v2  ;;  %544 = vmatmul.msk.f32.vlgmr.msra.gmra.mxu3 %vm212_vm0, %v198_v3  ;;  %v175_v8 = vld [vmem:[%s619_s22 + $0x8] sm:$0xff]  ;;  %v176_v12 = vld [vmem:[%s619_s22 + $0x10] sm:$0xff] }
  0x11   : > { %v182_v5 = vld [vmem:[%s619_s22 + $0x40] sm:$0xff]  ;;  %520 = vmatmul.msk.f32.vlgmr.msra.gmra.mxu0 %vm212_vm0, %v174_v4  ;;  %v183_v9 = vld [vmem:[%s619_s22 + $0x48] sm:$0xff]  ;;  %v184_v13 = vld [vmem:[%s619_s22 + $0x50] sm:$0xff] }
  0x12   : > { %528 = vmatmul.msk.f32.vlgmr.msra.gmra.mxu1 %vm212_vm0, %v182_v5  ;;  %v193_v14 = vld [vmem:[%s619_s22 + $0x98] sm:$0xff]  ;;  %v194_v18 = vld [vmem:[%s619_s22 + $0xa0] sm:$0xff]  ;;  %v195_v22 = vld [vmem:[%s619_s22 + $0xa8] sm:$0xff] }
  0x13   : > { %v201_v15 = vld [vmem:[%s619_s22 + $0xd8] sm:$0xff]  ;;  %v202_v19 = vld [vmem:[%s619_s22 + $0xe0] sm:$0xff]  ;;  %v203_v23 = vld [vmem:[%s619_s22 + $0xe8] sm:$0xff] }
  0x14   : > { %v177_v16 = vld [vmem:[%s619_s22 + $0x18] sm:$0xff]  ;;  %v178_v20 = vld [vmem:[%s619_s22 + $0x20] sm:$0xff]  ;;  %v179_v24 = vld [vmem:[%s619_s22 + $0x28] sm:$0xff] }
  0x15   : > { %v185_v17 = vld [vmem:[%s619_s22 + $0x58] sm:$0xff]  ;;  %v186_v21 = vld [vmem:[%s619_s22 + $0x60] sm:$0xff]  ;;  %v187_v25 = vld [vmem:[%s619_s22 + $0x68] sm:$0xff] }
  0x16   : > { %v196_v26 = vld [vmem:[%s619_s22 + $0xb0] sm:$0xff]  ;;  %v197_v30 = vld [vmem:[%s619_s22 + $0xb8] sm:$0xff] }
  0x17   : > { %v204_v27 = vld [vmem:[%s619_s22 + $0xf0] sm:$0xff]  ;;  %v205_v31 = vld [vmem:[%s619_s22 + $0xf8] sm:$0xff] }
  0x18   : > { %537 = vmatmul.msk.f32.gmra.mxu2 %vm212_vm0, %v191_v6  ;;  %545 = vmatmul.msk.f32.gmra.mxu3 %vm212_vm0, %v199_v7  ;;  %v180_v28 = vld [vmem:[%s619_s22 + $0x30] sm:$0xff]  ;;  %v181_v32 = vld [vmem:[%s619_s22 + $0x38] sm:$0xff] }
  0x19   : > { %521 = vmatmul.msk.f32.gmra.mxu0 %vm212_vm0, %v175_v8  ;;  %v188_v29 = vld [vmem:[%s619_s22 + $0x70] sm:$0xff]  ;;  %v189_v33 = vld [vmem:[%s619_s22 + $0x78] sm:$0xff] }
  0x1a   : > { %529 = vmatmul.msk.f32.gmra.mxu1 %vm212_vm0, %v183_v9 }
  0x20   : > { %538 = vmatmul.msk.f32.gmra.mxu2 %vm212_vm0, %v192_v10  ;;  %546 = vmatmul.msk.f32.gmra.mxu3 %vm212_vm0, %v200_v11 }
  0x21   : > { %522 = vmatmul.msk.f32.gmra.mxu0 %vm212_vm0, %v176_v12 }
  0x22   : > { %530 = vmatmul.msk.f32.gmra.mxu1 %vm212_vm0, %v184_v13 }
  0x28   : > { %539 = vmatmul.msk.f32.gmra.mxu2 %vm212_vm0, %v193_v14  ;;  %547 = vmatmul.msk.f32.gmra.mxu3 %vm212_vm0, %v201_v15 }
  0x29   : > { %523 = vmatmul.msk.f32.gmra.mxu0 %vm212_vm0, %v177_v16 }
  0x2a   : > { %531 = vmatmul.msk.f32.gmra.mxu1 %vm212_vm0, %v185_v17 }
  0x30   : > { %540 = vmatmul.msk.f32.gmra.mxu2 %vm212_vm0, %v194_v18  ;;  %548 = vmatmul.msk.f32.gmra.mxu3 %vm212_vm0, %v202_v19 }
  0x31   : > { %524 = vmatmul.msk.f32.gmra.mxu0 %vm212_vm0, %v178_v20 }
  0x32   : > { %532 = vmatmul.msk.f32.gmra.mxu1 %vm212_vm0, %v186_v21 }
  0x38   : > { %541 = vmatmul.msk.f32.gmra.mxu2 %vm212_vm0, %v195_v22  ;;  %549 = vmatmul.msk.f32.gmra.mxu3 %vm212_vm0, %v203_v23 }
  0x39   : > { %525 = vmatmul.msk.f32.gmra.mxu0 %vm212_vm0, %v179_v24 }
  0x3a   : > { %533 = vmatmul.msk.f32.gmra.mxu1 %vm212_vm0, %v187_v25 }
  0x40   : > { %542 = vmatmul.msk.f32.gmra.mxu2 %vm212_vm0, %v196_v26  ;;  %550 = vmatmul.msk.f32.gmra.mxu3 %vm212_vm0, %v204_v27 }
  0x41   : > { %526 = vmatmul.msk.f32.gmra.mxu0 %vm212_vm0, %v180_v28 }
  0x42   : > { %534 = vmatmul.msk.f32.gmra.mxu1 %vm212_vm0, %v188_v29 }
  0x48   : > { %543 = vmatmul.msk.f32.gmra.mxu2 %vm212_vm0, %v197_v30  ;;  %551 = vmatmul.msk.f32.gmra.mxu3 %vm212_vm0, %v205_v31 }
  0x49   : > { %527 = vmatmul.msk.f32.gmra.mxu0 %vm212_vm0, %v181_v32 }
  0x4a   : > { %535 = vmatmul.msk.f32.gmra.mxu1 %vm212_vm0, %v189_v33 }
  0x8e   : > { %v326_v35 = vpop.f32.mrf.mxu0 }
  0x8f   : > { %v350_v36 = vpop.f32.mrf.mxu1  ;;  %v327_v37 = vadd.f32 %v688_v34, %v326_v35 }
  0x90   : > { %v351_v38 = vadd.f32 %v688_v34, %v350_v36 }
  0x91   : > { %423 = vst.msk [vmem:[%s695_s27] sm:$0xff] %vm422_vm1, %v327_v37 }
  0x92   : > { %431 = vst.msk [vmem:[%s695_s27 + $0x40] sm:$0xff] %vm422_vm1, %v351_v38 }
  0x93   : > { %v374_v39 = vpop.f32.mrf.mxu2  ;;  %v398_v40 = vpop.f32.mrf.mxu3 }
  0x94   : > { %v375_v41 = vadd.f32 %v688_v34, %v374_v39  ;;  %v399_v42 = vadd.f32 %v688_v34, %v398_v40 }
  0x96   : > { %439 = vst.msk [vmem:[%s695_s27 + $0x80] sm:$0xff] %vm422_vm1, %v375_v41  ;;  %v329_v43 = vpop.f32.mrf.mxu0 }
  0x97   : > { %v353_v44 = vpop.f32.mrf.mxu1  ;;  %447 = vst.msk [vmem:[%s695_s27 + $0xc0] sm:$0xff] %vm422_vm1, %v399_v42  ;;  %v330_v45 = vadd.f32 %v688_v34, %v329_v43 }
  0x98   : > { %v354_v46 = vadd.f32 %v688_v34, %v353_v44 }
  0x99   : > { %424 = vst.msk [vmem:[%s695_s27 + $0x8] sm:$0xff] %vm422_vm1, %v330_v45 }
  0x9a   : > { %432 = vst.msk [vmem:[%s695_s27 + $0x48] sm:$0xff] %vm422_vm1, %v354_v46 }
  0x9b   : > { %v377_v47 = vpop.f32.mrf.mxu2  ;;  %v401_v48 = vpop.f32.mrf.mxu3 }
  0x9c   : > { %v378_v49 = vadd.f32 %v688_v34, %v377_v47  ;;  %v402_v50 = vadd.f32 %v688_v34, %v401_v48 }
  0x9e   : > { %440 = vst.msk [vmem:[%s695_s27 + $0x88] sm:$0xff] %vm422_vm1, %v378_v49  ;;  %v332_v51 = vpop.f32.mrf.mxu0 }
  0x9f   : > { %v356_v52 = vpop.f32.mrf.mxu1  ;;  %448 = vst.msk [vmem:[%s695_s27 + $0xc8] sm:$0xff] %vm422_vm1, %v402_v50  ;;  %v333_v53 = vadd.f32 %v688_v34, %v332_v51 }
  0xa0   : > { %v357_v54 = vadd.f32 %v688_v34, %v356_v52 }
  0xa1   : > { %425 = vst.msk [vmem:[%s695_s27 + $0x10] sm:$0xff] %vm422_vm1, %v333_v53 }
  0xa2   : > { %433 = vst.msk [vmem:[%s695_s27 + $0x50] sm:$0xff] %vm422_vm1, %v357_v54 }
  0xa3   : > { %v380_v55 = vpop.f32.mrf.mxu2  ;;  %v404_v56 = vpop.f32.mrf.mxu3 }
  0xa4   : > { %v381_v57 = vadd.f32 %v688_v34, %v380_v55  ;;  %v405_v58 = vadd.f32 %v688_v34, %v404_v56 }
  0xa6   : > { %441 = vst.msk [vmem:[%s695_s27 + $0x90] sm:$0xff] %vm422_vm1, %v381_v57  ;;  %v335_v59 = vpop.f32.mrf.mxu0 }
  0xa7   : > { %v359_v60 = vpop.f32.mrf.mxu1  ;;  %449 = vst.msk [vmem:[%s695_s27 + $0xd0] sm:$0xff] %vm422_vm1, %v405_v58  ;;  %v336_v61 = vadd.f32 %v688_v34, %v335_v59 }
  0xa8   : > { %v360_v62 = vadd.f32 %v688_v34, %v359_v60 }
  0xa9   : > { %426 = vst.msk [vmem:[%s695_s27 + $0x18] sm:$0xff] %vm422_vm1, %v336_v61 }
  0xaa   : > { %434 = vst.msk [vmem:[%s695_s27 + $0x58] sm:$0xff] %vm422_vm1, %v360_v62 }
  0xab   : > { %v383_v63 = vpop.f32.mrf.mxu2  ;;  %v407_v0 = vpop.f32.mrf.mxu3 }
  0xac   : > { %v384_v1 = vadd.f32 %v688_v34, %v383_v63  ;;  %v408_v2 = vadd.f32 %v688_v34, %v407_v0 }
  0xae   : > { %442 = vst.msk [vmem:[%s695_s27 + $0x98] sm:$0xff] %vm422_vm1, %v384_v1  ;;  %v338_v3 = vpop.f32.mrf.mxu0 }
  0xaf   : > { %v362_v4 = vpop.f32.mrf.mxu1  ;;  %450 = vst.msk [vmem:[%s695_s27 + $0xd8] sm:$0xff] %vm422_vm1, %v408_v2  ;;  %v339_v5 = vadd.f32 %v688_v34, %v338_v3 }
  0xb0   : > { %v363_v6 = vadd.f32 %v688_v34, %v362_v4 }
  0xb1   : > { %427 = vst.msk [vmem:[%s695_s27 + $0x20] sm:$0xff] %vm422_vm1, %v339_v5 }
  0xb2   : > { %435 = vst.msk [vmem:[%s695_s27 + $0x60] sm:$0xff] %vm422_vm1, %v363_v6 }
  0xb3   : > { %v386_v7 = vpop.f32.mrf.mxu2  ;;  %v410_v8 = vpop.f32.mrf.mxu3 }
  0xb4   : > { %v387_v9 = vadd.f32 %v688_v34, %v386_v7  ;;  %v411_v10 = vadd.f32 %v688_v34, %v410_v8 }
  0xb6   : > { %443 = vst.msk [vmem:[%s695_s27 + $0xa0] sm:$0xff] %vm422_vm1, %v387_v9  ;;  %v341_v11 = vpop.f32.mrf.mxu0 }
  0xb7   : > { %v365_v12 = vpop.f32.mrf.mxu1  ;;  %451 = vst.msk [vmem:[%s695_s27 + $0xe0] sm:$0xff] %vm422_vm1, %v411_v10  ;;  %v342_v13 = vadd.f32 %v688_v34, %v341_v11 }
  0xb8   : > { %v366_v14 = vadd.f32 %v688_v34, %v365_v12 }
  0xb9   : > { %428 = vst.msk [vmem:[%s695_s27 + $0x28] sm:$0xff] %vm422_vm1, %v342_v13 }
  0xba   : > { %436 = vst.msk [vmem:[%s695_s27 + $0x68] sm:$0xff] %vm422_vm1, %v366_v14 }
  0xbb   : > { %v389_v15 = vpop.f32.mrf.mxu2  ;;  %v413_v16 = vpop.f32.mrf.mxu3 }
  0xbc   : > { %v390_v17 = vadd.f32 %v688_v34, %v389_v15  ;;  %v414_v18 = vadd.f32 %v688_v34, %v413_v16 }
  0xbe   : > { %444 = vst.msk [vmem:[%s695_s27 + $0xa8] sm:$0xff] %vm422_vm1, %v390_v17  ;;  %v344_v19 = vpop.f32.mrf.mxu0 }
  0xbf   : > { %v368_v20 = vpop.f32.mrf.mxu1  ;;  %452 = vst.msk [vmem:[%s695_s27 + $0xe8] sm:$0xff] %vm422_vm1, %v414_v18  ;;  %v345_v21 = vadd.f32 %v688_v34, %v344_v19 }
  0xc0   : > { %v369_v22 = vadd.f32 %v688_v34, %v368_v20 }
  0xc1   : > { %429 = vst.msk [vmem:[%s695_s27 + $0x30] sm:$0xff] %vm422_vm1, %v345_v21 }
  0xc2   : > { %437 = vst.msk [vmem:[%s695_s27 + $0x70] sm:$0xff] %vm422_vm1, %v369_v22 }
  0xc3   : > { %v392_v23 = vpop.f32.mrf.mxu2  ;;  %v416_v24 = vpop.f32.mrf.mxu3 }
  0xc4   : > { %v393_v25 = vadd.f32 %v688_v34, %v392_v23  ;;  %v417_v26 = vadd.f32 %v688_v34, %v416_v24 }
  0xc6   : > { %445 = vst.msk [vmem:[%s695_s27 + $0xb0] sm:$0xff] %vm422_vm1, %v393_v25  ;;  %v347_v27 = vpop.f32.mrf.mxu0 }
  0xc7   : > { %v371_v28 = vpop.f32.mrf.mxu1  ;;  %453 = vst.msk [vmem:[%s695_s27 + $0xf0] sm:$0xff] %vm422_vm1, %v417_v26  ;;  %v348_v29 = vadd.f32 %v688_v34, %v347_v27 }
  0xc8   : > { %v372_v30 = vadd.f32 %v688_v34, %v371_v28 }
  0xc9   : > { %430 = vst.msk [vmem:[%s695_s27 + $0x38] sm:$0xff] %vm422_vm1, %v348_v29 }
  0xca   : > { %438 = vst.msk [vmem:[%s695_s27 + $0x78] sm:$0xff] %vm422_vm1, %v372_v30 }
  0xcb   : > { %v395_v31 = vpop.f32.mrf.mxu2  ;;  %v419_v32 = vpop.f32.mrf.mxu3 }
  0xcc   : > { %v396_v33 = vadd.f32 %v688_v34, %v395_v31  ;;  %v420_v35 = vadd.f32 %v688_v34, %v419_v32 }
  0xce   : > { %446 = vst.msk [vmem:[%s695_s27 + $0xb8] sm:$0xff] %vm422_vm1, %v396_v33 }
  0xcf   : > { %454 = vst.msk [vmem:[%s695_s27 + $0xf8] sm:$0xff] %vm422_vm1, %v420_v35 }
  0xd0 PF: > { %s13_s12 = sadd.s32 1, %s575_s12  }
  0xd1   : > { %p10_p4 = scmp.ge.s32.totalorder %s13_s12, 4  }
  0xd3   :  { %12 = sbr.rel (!%p10_p4) target bundleno = 1 (0x1), region = 62 }

// kernel: _lambda_.13
= control target key start
LH: loop header
LB: loop body
LE: loop exit
PB: predicated region body
PF: predicated region fallthrough
CT: control target
= control target key end

     0   :  { %s605_s12 = smov 0   ;;  %s810_s0 = inlined_call_operand.vmem [shape: f32[512,32], index: 0, kind: input, shape index: {}]   ;;  %s811_s1 = inlined_call_operand.vmem [shape: f32[32,96], index: 1, kind: input, shape index: {}]   ;;  %s812_s2 = inlined_call_operand.vmem [shape: f32[1,96], index: 2, kind: input, shape index: {}]   ;;  %s813_s3 = inlined_call_operand.vmem [shape: f32[512,96], index: 3, kind: output, shape index: {}]  }
   0x1 LB: > { %s513_s13 = sadd.s32 4294967295, %s583_s12   ;;  %p517_p0 = scmp.ge.s32.totalorder %s583_s12, 1  ;;  %s583_s12 = sphi %s605_s12, %s13_s12  }
   0x2   : > { %p138_p1 = scmp.lt.s32.totalorder %s583_s12, 3 }
   0x4   : > { %p139_p2 = pnand %p517_p0, %p138_p1 }
   0x5   : > { %s518_s18 = sshll.u32 (!%p139_p2), %s513_s13, 5 }
   0x6   : > { %142 = sbr.rel (%p139_p2) target bundleno = 211 (0xd3), region = 32  ;;  %p163_p3 = scmp.lt.s32.totalorder (!%p139_p2), %s518_s18, 63 }
   0xb   : > { %v209_v0 = vld [vmem:[%s811_s1 + $0x18] sm:$0xff]  ;;  %v208_v1 = vld [vmem:[%s811_s1 + $0x10] sm:$0xff]  ;;  %v207_v2 = vld [vmem:[%s811_s1 + $0x8] sm:$0xff]  ;;  %s815_s18 = smov (!%p163_p3, %s518_s18), 63  ;;  %vm214_vm0 = vcmask 261120   ;;  %vm424_vm1 = vcmask 785408  }
   0xc   : > { %557 = vmatpush.msra.mxu2 %v209_v0  ;;  %558 = vmatpush.msra.mxu3 %v209_v0  ;;  %v206_v3 = vld [vmem:[%s811_s1] sm:$0xff]  ;;  %s519_s23 = sshll.u32 %s815_s18, 3 }
   0xd   : > { %323 = vmatpush.msra.mxu0 %v209_v0  ;;  %556 = vmatpush.msra.mxu1 %v209_v0  ;;  %s633_s26 = scalar_lea.vmem %s810_s0, %s519_s23  ;;  %v702_v36 = vld [vmem:[%s812_s2] ss:$0 sm:$0xff]  ;;  %s709_s4 = scalar_lea.vmem %s813_s3, %s519_s23 }
   0xe   : > { %560 = vmatpush.msra.mxu2 %v208_v1  ;;  %561 = vmatpush.msra.mxu3 %v208_v1  ;;  %v190_v4 = vld [vmem:[%s633_s26 + $0x80] sm:$0xff]  ;;  %v191_v8 = vld [vmem:[%s633_s26 + $0x88] sm:$0xff]  ;;  %v192_v12 = vld [vmem:[%s633_s26 + $0x90] sm:$0xff] }
   0xf   : > { %324 = vmatpush.msra.mxu0 %v208_v1  ;;  %559 = vmatpush.msra.mxu1 %v208_v1  ;;  %v198_v5 = vld [vmem:[%s633_s26 + $0xc0] sm:$0xff]  ;;  %v199_v9 = vld [vmem:[%s633_s26 + $0xc8] sm:$0xff]  ;;  %v200_v13 = vld [vmem:[%s633_s26 + $0xd0] sm:$0xff] }
  0x10   : > { %563 = vmatpush.msra.mxu2 %v207_v2  ;;  %564 = vmatpush.msra.mxu3 %v207_v2  ;;  %v174_v6 = vld [vmem:[%s633_s26] sm:$0xff]  ;;  %v175_v10 = vld [vmem:[%s633_s26 + $0x8] sm:$0xff]  ;;  %v176_v14 = vld [vmem:[%s633_s26 + $0x10] sm:$0xff] }
  0x11   : > { %325 = vmatpush.msra.mxu0 %v207_v2  ;;  %562 = vmatpush.msra.mxu1 %v207_v2  ;;  %v182_v7 = vld [vmem:[%s633_s26 + $0x40] sm:$0xff]  ;;  %v183_v11 = vld [vmem:[%s633_s26 + $0x48] sm:$0xff]  ;;  %v184_v15 = vld [vmem:[%s633_s26 + $0x50] sm:$0xff] }
  0x12   : > { %566 = vmatpush.msra.mxu2 %v206_v3  ;;  %567 = vmatpush.msra.mxu3 %v206_v3  ;;  %v193_v16 = vld [vmem:[%s633_s26 + $0x98] sm:$0xff]  ;;  %v194_v20 = vld [vmem:[%s633_s26 + $0xa0] sm:$0xff]  ;;  %v195_v24 = vld [vmem:[%s633_s26 + $0xa8] sm:$0xff] }
  0x13   : > { %538 = vmatmul.msk.f32.vlgmr.msra.gmra.mxu2 %vm214_vm0, %v190_v4  ;;  %546 = vmatmul.msk.f32.vlgmr.msra.gmra.mxu3 %vm214_vm0, %v198_v5  ;;  %v201_v17 = vld [vmem:[%s633_s26 + $0xd8] sm:$0xff]  ;;  %v202_v21 = vld [vmem:[%s633_s26 + $0xe0] sm:$0xff]  ;;  %v203_v25 = vld [vmem:[%s633_s26 + $0xe8] sm:$0xff] }
  0x14   : > { %326 = vmatpush.msra.mxu0 %v206_v3  ;;  %565 = vmatpush.msra.mxu1 %v206_v3  ;;  %v177_v18 = vld [vmem:[%s633_s26 + $0x18] sm:$0xff]  ;;  %v178_v22 = vld [vmem:[%s633_s26 + $0x20] sm:$0xff]  ;;  %v179_v26 = vld [vmem:[%s633_s26 + $0x28] sm:$0xff] }
  0x15   : > { %522 = vmatmul.msk.f32.vlgmr.msra.gmra.mxu0 %vm214_vm0, %v174_v6  ;;  %530 = vmatmul.msk.f32.vlgmr.msra.gmra.mxu1 %vm214_vm0, %v182_v7  ;;  %v185_v19 = vld [vmem:[%s633_s26 + $0x58] sm:$0xff]  ;;  %v186_v23 = vld [vmem:[%s633_s26 + $0x60] sm:$0xff]  ;;  %v187_v27 = vld [vmem:[%s633_s26 + $0x68] sm:$0xff] }
  0x16   : > { %v196_v28 = vld [vmem:[%s633_s26 + $0xb0] sm:$0xff]  ;;  %v197_v32 = vld [vmem:[%s633_s26 + $0xb8] sm:$0xff] }
  0x17   : > { %v204_v29 = vld [vmem:[%s633_s26 + $0xf0] sm:$0xff]  ;;  %v205_v33 = vld [vmem:[%s633_s26 + $0xf8] sm:$0xff] }
  0x18   : > { %v180_v30 = vld [vmem:[%s633_s26 + $0x30] sm:$0xff]  ;;  %v181_v34 = vld [vmem:[%s633_s26 + $0x38] sm:$0xff] }
  0x19   : > { %v188_v31 = vld [vmem:[%s633_s26 + $0x70] sm:$0xff]  ;;  %v189_v35 = vld [vmem:[%s633_s26 + $0x78] sm:$0xff] }
  0x1b   : > { %539 = vmatmul.msk.f32.gmra.mxu2 %vm214_vm0, %v191_v8  ;;  %547 = vmatmul.msk.f32.gmra.mxu3 %vm214_vm0, %v199_v9 }
  0x1d   : > { %523 = vmatmul.msk.f32.gmra.mxu0 %vm214_vm0, %v175_v10  ;;  %531 = vmatmul.msk.f32.gmra.mxu1 %vm214_vm0, %v183_v11 }
  0x23   : > { %540 = vmatmul.msk.f32.gmra.mxu2 %vm214_vm0, %v192_v12  ;;  %548 = vmatmul.msk.f32.gmra.mxu3 %vm214_vm0, %v200_v13 }
  0x25   : > { %524 = vmatmul.msk.f32.gmra.mxu0 %vm214_vm0, %v176_v14  ;;  %532 = vmatmul.msk.f32.gmra.mxu1 %vm214_vm0, %v184_v15 }
  0x2b   : > { %541 = vmatmul.msk.f32.gmra.mxu2 %vm214_vm0, %v193_v16  ;;  %549 = vmatmul.msk.f32.gmra.mxu3 %vm214_vm0, %v201_v17 }
  0x2d   : > { %525 = vmatmul.msk.f32.gmra.mxu0 %vm214_vm0, %v177_v18  ;;  %533 = vmatmul.msk.f32.gmra.mxu1 %vm214_vm0, %v185_v19 }
  0x33   : > { %542 = vmatmul.msk.f32.gmra.mxu2 %vm214_vm0, %v194_v20  ;;  %550 = vmatmul.msk.f32.gmra.mxu3 %vm214_vm0, %v202_v21 }
  0x35   : > { %526 = vmatmul.msk.f32.gmra.mxu0 %vm214_vm0, %v178_v22  ;;  %534 = vmatmul.msk.f32.gmra.mxu1 %vm214_vm0, %v186_v23 }
  0x3b   : > { %543 = vmatmul.msk.f32.gmra.mxu2 %vm214_vm0, %v195_v24  ;;  %551 = vmatmul.msk.f32.gmra.mxu3 %vm214_vm0, %v203_v25 }
  0x3d   : > { %527 = vmatmul.msk.f32.gmra.mxu0 %vm214_vm0, %v179_v26  ;;  %535 = vmatmul.msk.f32.gmra.mxu1 %vm214_vm0, %v187_v27 }
  0x43   : > { %544 = vmatmul.msk.f32.gmra.mxu2 %vm214_vm0, %v196_v28  ;;  %552 = vmatmul.msk.f32.gmra.mxu3 %vm214_vm0, %v204_v29 }
  0x45   : > { %528 = vmatmul.msk.f32.gmra.mxu0 %vm214_vm0, %v180_v30  ;;  %536 = vmatmul.msk.f32.gmra.mxu1 %vm214_vm0, %v188_v31 }
  0x4b   : > { %545 = vmatmul.msk.f32.gmra.mxu2 %vm214_vm0, %v197_v32  ;;  %553 = vmatmul.msk.f32.gmra.mxu3 %vm214_vm0, %v205_v33 }
  0x4d   : > { %529 = vmatmul.msk.f32.gmra.mxu0 %vm214_vm0, %v181_v34  ;;  %537 = vmatmul.msk.f32.gmra.mxu1 %vm214_vm0, %v189_v35 }
  0x92   : > { %v328_v37 = vpop.f32.mrf.mxu0  ;;  %v352_v38 = vpop.f32.mrf.mxu1 }
  0x93   : > { %v329_v39 = vadd.f32 %v702_v36, %v328_v37  ;;  %v353_v40 = vadd.f32 %v702_v36, %v352_v38 }
  0x95   : > { %425 = vst.msk [vmem:[%s709_s4] sm:$0xff] %vm424_vm1, %v329_v39 }
  0x96   : > { %433 = vst.msk [vmem:[%s709_s4 + $0x40] sm:$0xff] %vm424_vm1, %v353_v40  ;;  %v376_v41 = vpop.f32.mrf.mxu2  ;;  %v400_v42 = vpop.f32.mrf.mxu3 }
  0x97   : > { %v377_v43 = vadd.f32 %v702_v36, %v376_v41  ;;  %v401_v44 = vadd.f32 %v702_v36, %v400_v42 }
  0x99   : > { %441 = vst.msk [vmem:[%s709_s4 + $0x80] sm:$0xff] %vm424_vm1, %v377_v43 }
  0x9a   : > { %449 = vst.msk [vmem:[%s709_s4 + $0xc0] sm:$0xff] %vm424_vm1, %v401_v44  ;;  %v331_v45 = vpop.f32.mrf.mxu0  ;;  %v355_v46 = vpop.f32.mrf.mxu1 }
  0x9b   : > { %v332_v47 = vadd.f32 %v702_v36, %v331_v45  ;;  %v356_v48 = vadd.f32 %v702_v36, %v355_v46 }
  0x9d   : > { %426 = vst.msk [vmem:[%s709_s4 + $0x8] sm:$0xff] %vm424_vm1, %v332_v47 }
  0x9e   : > { %434 = vst.msk [vmem:[%s709_s4 + $0x48] sm:$0xff] %vm424_vm1, %v356_v48  ;;  %v379_v49 = vpop.f32.mrf.mxu2  ;;  %v403_v50 = vpop.f32.mrf.mxu3 }
  0x9f   : > { %v380_v51 = vadd.f32 %v702_v36, %v379_v49  ;;  %v404_v52 = vadd.f32 %v702_v36, %v403_v50 }
  0xa1   : > { %442 = vst.msk [vmem:[%s709_s4 + $0x88] sm:$0xff] %vm424_vm1, %v380_v51 }
  0xa2   : > { %450 = vst.msk [vmem:[%s709_s4 + $0xc8] sm:$0xff] %vm424_vm1, %v404_v52  ;;  %v334_v53 = vpop.f32.mrf.mxu0  ;;  %v358_v54 = vpop.f32.mrf.mxu1 }
  0xa3   : > { %v335_v55 = vadd.f32 %v702_v36, %v334_v53  ;;  %v359_v56 = vadd.f32 %v702_v36, %v358_v54 }
  0xa5   : > { %427 = vst.msk [vmem:[%s709_s4 + $0x10] sm:$0xff] %vm424_vm1, %v335_v55 }
  0xa6   : > { %435 = vst.msk [vmem:[%s709_s4 + $0x50] sm:$0xff] %vm424_vm1, %v359_v56  ;;  %v382_v57 = vpop.f32.mrf.mxu2  ;;  %v406_v58 = vpop.f32.mrf.mxu3 }
  0xa7   : > { %v383_v59 = vadd.f32 %v702_v36, %v382_v57  ;;  %v407_v60 = vadd.f32 %v702_v36, %v406_v58 }
  0xa9   : > { %443 = vst.msk [vmem:[%s709_s4 + $0x90] sm:$0xff] %vm424_vm1, %v383_v59 }
  0xaa   : > { %451 = vst.msk [vmem:[%s709_s4 + $0xd0] sm:$0xff] %vm424_vm1, %v407_v60  ;;  %v337_v61 = vpop.f32.mrf.mxu0  ;;  %v361_v62 = vpop.f32.mrf.mxu1 }
  0xab   : > { %v338_v63 = vadd.f32 %v702_v36, %v337_v61  ;;  %v362_v0 = vadd.f32 %v702_v36, %v361_v62 }
  0xad   : > { %428 = vst.msk [vmem:[%s709_s4 + $0x18] sm:$0xff] %vm424_vm1, %v338_v63 }
  0xae   : > { %436 = vst.msk [vmem:[%s709_s4 + $0x58] sm:$0xff] %vm424_vm1, %v362_v0  ;;  %v385_v1 = vpop.f32.mrf.mxu2  ;;  %v409_v2 = vpop.f32.mrf.mxu3 }
  0xaf   : > { %v386_v3 = vadd.f32 %v702_v36, %v385_v1  ;;  %v410_v4 = vadd.f32 %v702_v36, %v409_v2 }
  0xb1   : > { %444 = vst.msk [vmem:[%s709_s4 + $0x98] sm:$0xff] %vm424_vm1, %v386_v3 }
  0xb2   : > { %452 = vst.msk [vmem:[%s709_s4 + $0xd8] sm:$0xff] %vm424_vm1, %v410_v4  ;;  %v340_v5 = vpop.f32.mrf.mxu0  ;;  %v364_v6 = vpop.f32.mrf.mxu1 }
  0xb3   : > { %v341_v7 = vadd.f32 %v702_v36, %v340_v5  ;;  %v365_v8 = vadd.f32 %v702_v36, %v364_v6 }
  0xb5   : > { %429 = vst.msk [vmem:[%s709_s4 + $0x20] sm:$0xff] %vm424_vm1, %v341_v7 }
  0xb6   : > { %437 = vst.msk [vmem:[%s709_s4 + $0x60] sm:$0xff] %vm424_vm1, %v365_v8  ;;  %v388_v9 = vpop.f32.mrf.mxu2  ;;  %v412_v10 = vpop.f32.mrf.mxu3 }
  0xb7   : > { %v389_v11 = vadd.f32 %v702_v36, %v388_v9  ;;  %v413_v12 = vadd.f32 %v702_v36, %v412_v10 }
  0xb9   : > { %445 = vst.msk [vmem:[%s709_s4 + $0xa0] sm:$0xff] %vm424_vm1, %v389_v11 }
  0xba   : > { %453 = vst.msk [vmem:[%s709_s4 + $0xe0] sm:$0xff] %vm424_vm1, %v413_v12  ;;  %v343_v13 = vpop.f32.mrf.mxu0  ;;  %v367_v14 = vpop.f32.mrf.mxu1 }
  0xbb   : > { %v344_v15 = vadd.f32 %v702_v36, %v343_v13  ;;  %v368_v16 = vadd.f32 %v702_v36, %v367_v14 }
  0xbd   : > { %430 = vst.msk [vmem:[%s709_s4 + $0x28] sm:$0xff] %vm424_vm1, %v344_v15 }
  0xbe   : > { %438 = vst.msk [vmem:[%s709_s4 + $0x68] sm:$0xff] %vm424_vm1, %v368_v16  ;;  %v391_v17 = vpop.f32.mrf.mxu2  ;;  %v415_v18 = vpop.f32.mrf.mxu3 }
  0xbf   : > { %v392_v19 = vadd.f32 %v702_v36, %v391_v17  ;;  %v416_v20 = vadd.f32 %v702_v36, %v415_v18 }
  0xc1   : > { %446 = vst.msk [vmem:[%s709_s4 + $0xa8] sm:$0xff] %vm424_vm1, %v392_v19 }
  0xc2   : > { %454 = vst.msk [vmem:[%s709_s4 + $0xe8] sm:$0xff] %vm424_vm1, %v416_v20  ;;  %v346_v21 = vpop.f32.mrf.mxu0  ;;  %v370_v22 = vpop.f32.mrf.mxu1 }
  0xc3   : > { %v347_v23 = vadd.f32 %v702_v36, %v346_v21  ;;  %v371_v24 = vadd.f32 %v702_v36, %v370_v22 }
  0xc5   : > { %431 = vst.msk [vmem:[%s709_s4 + $0x30] sm:$0xff] %vm424_vm1, %v347_v23 }
  0xc6   : > { %439 = vst.msk [vmem:[%s709_s4 + $0x70] sm:$0xff] %vm424_vm1, %v371_v24  ;;  %v394_v25 = vpop.f32.mrf.mxu2  ;;  %v418_v26 = vpop.f32.mrf.mxu3 }
  0xc7   : > { %v395_v27 = vadd.f32 %v702_v36, %v394_v25  ;;  %v419_v28 = vadd.f32 %v702_v36, %v418_v26 }
  0xc9   : > { %447 = vst.msk [vmem:[%s709_s4 + $0xb0] sm:$0xff] %vm424_vm1, %v395_v27 }
  0xca   : > { %455 = vst.msk [vmem:[%s709_s4 + $0xf0] sm:$0xff] %vm424_vm1, %v419_v28  ;;  %v349_v29 = vpop.f32.mrf.mxu0  ;;  %v373_v30 = vpop.f32.mrf.mxu1 }
  0xcb   : > { %v350_v31 = vadd.f32 %v702_v36, %v349_v29  ;;  %v374_v32 = vadd.f32 %v702_v36, %v373_v30 }
  0xcd   : > { %432 = vst.msk [vmem:[%s709_s4 + $0x38] sm:$0xff] %vm424_vm1, %v350_v31 }
  0xce   : > { %440 = vst.msk [vmem:[%s709_s4 + $0x78] sm:$0xff] %vm424_vm1, %v374_v32  ;;  %v397_v33 = vpop.f32.mrf.mxu2  ;;  %v421_v34 = vpop.f32.mrf.mxu3 }
  0xcf   : > { %v398_v35 = vadd.f32 %v702_v36, %v397_v33  ;;  %v422_v37 = vadd.f32 %v702_v36, %v421_v34 }
  0xd1   : > { %448 = vst.msk [vmem:[%s709_s4 + $0xb8] sm:$0xff] %vm424_vm1, %v398_v35 }
  0xd2   : > { %456 = vst.msk [vmem:[%s709_s4 + $0xf8] sm:$0xff] %vm424_vm1, %v422_v37 }
  0xd3 PF: > { %s13_s12 = sadd.s32 1, %s583_s12  }
  0xd4   : > { %p10_p4 = scmp.ge.s32.totalorder %s13_s12, 4  }
  0xd6   :  { %12 = sbr.rel (!%p10_p4) target bundleno = 1 (0x1), region = 62 }

// kernel: _lambda_.14
= control target key start
LH: loop header
LB: loop body
LE: loop exit
PB: predicated region body
PF: predicated region fallthrough
CT: control target
= control target key end

     0   :  { %s5922_s15 = smov 0   ;;  %s9160_s0 = inlined_call_operand.vmem [shape: f32[128,8,8], index: 0, kind: input, shape index: {}]   ;;  %s9161_s1 = inlined_call_operand.vmem [shape: f32[128,8,8], index: 1, kind: input, shape index: {}]   ;;  %s9162_s2 = inlined_call_operand.vmem [shape: f32[128,8,8], index: 2, kind: input, shape index: {}]   ;;  %s9163_s3 = inlined_call_operand.vmem [shape: f32[128,8,8], index: 3, kind: input, shape index: {}]   ;;  %s9164_s4 = inlined_call_operand.vmem [shape: f32[128,8,8], index: 4, kind: output, shape index: {}]  }
   0x1 LB: > { %s5416_s16 = sadd.s32 4294967295, %s5895_s15   ;;  %p5420_p0 = scmp.ge.s32.totalorder %s5895_s15, 1  ;;  %s5895_s15 = sphi %s5922_s15, %s14_s15  }
   0x2   : > { %p196_p1 = scmp.lt.s32.totalorder %s5895_s15, 3 }
   0x4   : > { %p197_p2 = pnand %p5420_p0, %p196_p1 }
   0x6   : > { %200 = sbr.rel (%p197_p2) target bundleno = 813 (0x32d), region = 36 }
   0xb   : > { %s5421_s17 = sshll.u32 %s5416_s16, 6  ;;  %vm523_vm0 = vcmask 64512  }
   0xc   : > { %p238_p3 = scmp.lt.s32.totalorder %s5421_s17, 127 }
   0xe   : > { %s9544_s17 = smov (!%p238_p3, %s5421_s17), 127 }
   0xf   : > { %s5930_s18 = sshll.u32 %s9544_s17, 3 }
  0x10   : > { %s5936_s21 = scalar_lea.vmem %s9161_s1, %s5930_s18  ;;  %s5942_s24 = scalar_lea.vmem %s9160_s0, %s5930_s18 }
  0x11   : > { %v395_v0 = vld [vmem:[%s5936_s21] sm:$0xff]  ;;  %v397_v1 = vld [vmem:[%s5936_s21 + $0x10] sm:$0xff]  ;;  %v396_v6 = vld [vmem:[%s5936_s21 + $0x8] sm:$0xff]  ;;  %s6809_s27 = scalar_lea.vmem %s9162_s2, %s5930_s18  ;;  %s8544_s30 = scalar_lea.vmem %s9163_s3, %s5930_s18 }
  0x12   : > { %v267_v2 = vld [vmem:[%s5942_s24] sm:$0xff]  ;;  %5431 = vmatpush.xpose.msk.msra.mxu0 %vm523_vm0, %v395_v0  ;;  %5435 = vmatpush.xpose.msk.msra.mxu2 %vm523_vm0, %v397_v1  ;;  %v269_v4 = vld [vmem:[%s5942_s24 + $0x10] sm:$0xff]  ;;  %v398_v8 = vld [vmem:[%s5936_s21 + $0x18] sm:$0xff]  ;;  %s8588_s7 = scalar_lea.vmem %s9164_s4, %s5930_s18 }
  0x13   : > { %v331_v3 = vmul.f32 0.35355338, %v267_v2  ;;  %v399_v5 = vld [vmem:[%s5936_s21 + $0x20] sm:$0xff]  ;;  %v333_v7 = vmul.f32 0.35355338, %v269_v4  ;;  %5433 = vmatpush.xpose.msk.msra.mxu1 %vm523_vm0, %v396_v6  ;;  %v401_v9 = vld [vmem:[%s5936_s21 + $0x30] sm:$0xff]  ;;  %5437 = vmatpush.xpose.msk.msra.mxu3 %vm523_vm0, %v398_v8 }
  0x14   : > { %v268_v10 = vld [vmem:[%s5942_s24 + $0x8] sm:$0xff]  ;;  %v270_v12 = vld [vmem:[%s5942_s24 + $0x18] sm:$0xff]  ;;  %v271_v16 = vld [vmem:[%s5942_s24 + $0x20] sm:$0xff] }
  0x15   : > { %v332_v11 = vmul.f32 0.35355338, %v268_v10  ;;  %v400_v13 = vld [vmem:[%s5936_s21 + $0x28] sm:$0xff]  ;;  %5432 = vmatmul.msk.f32.vlgmr.msra.gmra.mxu0 %vm523_vm0, %v331_v3  ;;  %5436 = vmatmul.msk.f32.vlgmr.msra.gmra.mxu2 %vm523_vm0, %v333_v7  ;;  %v334_v14 = vmul.f32 0.35355338, %v270_v12  ;;  %v402_v15 = vld [vmem:[%s5936_s21 + $0x38] sm:$0xff] }
  0x16   : > { %5439 = vmatpush.xpose.msk.msrb.mxu0 %vm523_vm0, %v399_v5  ;;  %5443 = vmatpush.xpose.msk.msrb.mxu2 %vm523_vm0, %v401_v9  ;;  %v273_v17 = vld [vmem:[%s5942_s24 + $0x30] sm:$0xff]  ;;  %v403_v18 = vld [vmem:[%s5936_s21 + $0x40] sm:$0xff]  ;;  %v272_v19 = vld [vmem:[%s5942_s24 + $0x28] sm:$0xff]  ;;  %v335_v24 = vmul.f32 0.35355338, %v271_v16 }
  0x17   : > { %5434 = vmatmul.msk.f32.vlgmr.msra.gmra.mxu1 %vm523_vm0, %v332_v11  ;;  %5445 = vmatpush.xpose.msk.msrb.mxu3 %vm523_vm0, %v402_v15  ;;  %v405_v20 = vld [vmem:[%s5936_s21 + $0x50] sm:$0xff]  ;;  %v406_v21 = vld [vmem:[%s5936_s21 + $0x58] sm:$0xff]  ;;  %v404_v23 = vld [vmem:[%s5936_s21 + $0x48] sm:$0xff]  ;;  %v337_v25 = vmul.f32 0.35355338, %v273_v17 }
  0x18   : > { %5438 = vmatmul.msk.f32.vlgmr.msra.gmra.mxu3 %vm523_vm0, %v334_v14  ;;  %5441 = vmatpush.xpose.msk.msrb.mxu1 %vm523_vm0, %v400_v13  ;;  %v274_v22 = vld [vmem:[%s5942_s24 + $0x38] sm:$0xff]  ;;  %v336_v26 = vmul.f32 0.35355338, %v272_v19  ;;  %v409_v28 = vld [vmem:[%s5936_s21 + $0x70] sm:$0xff]  ;;  %v407_v29 = vld [vmem:[%s5936_s21 + $0x60] sm:$0xff] }
  0x19   : > { %v338_v27 = vmul.f32 0.35355338, %v274_v22  ;;  %v408_v30 = vld [vmem:[%s5936_s21 + $0x68] sm:$0xff]  ;;  %v410_v31 = vld [vmem:[%s5936_s21 + $0x78] sm:$0xff]  ;;  %v275_v32 = vld [vmem:[%s5942_s24 + $0x40] sm:$0xff] }
  0x1a   : > { %5447 = vmatpush.xpose.msk.msra.mxu0 %vm523_vm0, %v403_v18  ;;  %5451 = vmatpush.xpose.msk.msra.mxu2 %vm523_vm0, %v405_v20  ;;  %v277_v33 = vld [vmem:[%s5942_s24 + $0x50] sm:$0xff]  ;;  %v276_v34 = vld [vmem:[%s5942_s24 + $0x48] sm:$0xff]  ;;  %v278_v35 = vld [vmem:[%s5942_s24 + $0x58] sm:$0xff]  ;;  %v339_v36 = vmul.f32 0.35355338, %v275_v32 }
  0x1b   : > { %5453 = vmatpush.xpose.msk.msra.mxu3 %vm523_vm0, %v406_v21  ;;  %v341_v37 = vmul.f32 0.35355338, %v277_v33  ;;  %v340_v38 = vmul.f32 0.35355338, %v276_v34  ;;  %v342_v39 = vmul.f32 0.35355338, %v278_v35 }
  0x1c   : > { %5449 = vmatpush.xpose.msk.msra.mxu1 %vm523_vm0, %v404_v23  ;;  %v413_v40 = vld [vmem:[%s5936_s21 + $0x90] sm:$0xff]  ;;  %v411_v41 = vld [vmem:[%s5936_s21 + $0x80] sm:$0xff]  ;;  %v414_v42 = vld [vmem:[%s5936_s21 + $0x98] sm:$0xff] }
  0x1d   : > { %5440 = vmatmul.msk.f32.vlgmr.msrb.gmra.mxu0 %vm523_vm0, %v335_v24  ;;  %5444 = vmatmul.msk.f32.vlgmr.msrb.gmra.mxu2 %vm523_vm0, %v337_v25  ;;  %v412_v43 = vld [vmem:[%s5936_s21 + $0x88] sm:$0xff]  ;;  %v279_v44 = vld [vmem:[%s5942_s24 + $0x60] sm:$0xff]  ;;  %v281_v45 = vld [vmem:[%s5942_s24 + $0x70] sm:$0xff] }
  0x1e   : > { %5459 = vmatpush.xpose.msk.msrb.mxu2 %vm523_vm0, %v409_v28  ;;  %5455 = vmatpush.xpose.msk.msrb.mxu0 %vm523_vm0, %v407_v29  ;;  %v280_v46 = vld [vmem:[%s5942_s24 + $0x68] sm:$0xff]  ;;  %v282_v47 = vld [vmem:[%s5942_s24 + $0x78] sm:$0xff]  ;;  %v343_v48 = vmul.f32 0.35355338, %v279_v44  ;;  %v345_v49 = vmul.f32 0.35355338, %v281_v45 }
  0x1f   : > { %5442 = vmatmul.msk.f32.vlgmr.msrb.gmra.mxu1 %vm523_vm0, %v336_v26  ;;  %v344_v50 = vmul.f32 0.35355338, %v280_v46  ;;  %v346_v51 = vmul.f32 0.35355338, %v282_v47  ;;  %v417_v52 = vld [vmem:[%s5936_s21 + $0xb0] sm:$0xff]  ;;  %v415_v53 = vld [vmem:[%s5936_s21 + $0xa0] sm:$0xff] }
  0x20   : > { %5446 = vmatmul.msk.f32.vlgmr.msrb.gmra.mxu3 %vm523_vm0, %v338_v27  ;;  %5457 = vmatpush.xpose.msk.msrb.mxu1 %vm523_vm0, %v408_v30  ;;  %v418_v54 = vld [vmem:[%s5936_s21 + $0xb8] sm:$0xff]  ;;  %v416_v55 = vld [vmem:[%s5936_s21 + $0xa8] sm:$0xff]  ;;  %v285_v56 = vld [vmem:[%s5942_s24 + $0x90] sm:$0xff] }
  0x21   : > { %5461 = vmatpush.xpose.msk.msrb.mxu3 %vm523_vm0, %v410_v31  ;;  %v283_v57 = vld [vmem:[%s5942_s24 + $0x80] sm:$0xff]  ;;  %v284_v58 = vld [vmem:[%s5942_s24 + $0x88] sm:$0xff]  ;;  %v286_v59 = vld [vmem:[%s5942_s24 + $0x98] sm:$0xff]  ;;  %v349_v60 = vmul.f32 0.35355338, %v285_v56 }
  0x22   : > { %v347_v61 = vmul.f32 0.35355338, %v283_v57  ;;  %v348_v62 = vmul.f32 0.35355338, %v284_v58  ;;  %v350_v63 = vmul.f32 0.35355338, %v286_v59 }
  0x23   : > { %v421_v0 = vld [vmem:[%s5936_s21 + $0xd0] sm:$0xff]  ;;  %v419_v1 = vld [vmem:[%s5936_s21 + $0xc0] sm:$0xff]  ;;  %v420_v2 = vld [vmem:[%s5936_s21 + $0xc8] sm:$0xff] }
  0x24   : > { %v422_v3 = vld [vmem:[%s5936_s21 + $0xd8] sm:$0xff]  ;;  %v289_v4 = vld [vmem:[%s5942_s24 + $0xb0] sm:$0xff]  ;;  %v287_v5 = vld [vmem:[%s5942_s24 + $0xa0] sm:$0xff] }
  0x25   : > { %5448 = vmatmul.msk.f32.vlgmr.msra.gmra.mxu0 %vm523_vm0, %v339_v36  ;;  %5452 = vmatmul.msk.f32.vlgmr.msra.gmra.mxu2 %vm523_vm0, %v341_v37  ;;  %v288_v6 = vld [vmem:[%s5942_s24 + $0xa8] sm:$0xff]  ;;  %v290_v7 = vld [vmem:[%s5942_s24 + $0xb8] sm:$0xff]  ;;  %v353_v8 = vmul.f32 0.35355338, %v289_v4  ;;  %v351_v9 = vmul.f32 0.35355338, %v287_v5 }
  0x26   : > { %5467 = vmatpush.xpose.msk.msra.mxu2 %vm523_vm0, %v413_v40  ;;  %5463 = vmatpush.xpose.msk.msra.mxu0 %vm523_vm0, %v411_v41  ;;  %v352_v10 = vmul.f32 0.35355338, %v288_v6  ;;  %v354_v11 = vmul.f32 0.35355338, %v290_v7  ;;  %v423_v12 = vld [vmem:[%s5936_s21 + $0xe0] sm:$0xff]  ;;  %v425_v13 = vld [vmem:[%s5936_s21 + $0xf0] sm:$0xff] }
  0x27   : > { %5450 = vmatmul.msk.f32.vlgmr.msra.gmra.mxu1 %vm523_vm0, %v340_v38  ;;  %v424_v14 = vld [vmem:[%s5936_s21 + $0xe8] sm:$0xff]  ;;  %v426_v15 = vld [vmem:[%s5936_s21 + $0xf8] sm:$0xff]  ;;  %v293_v16 = vld [vmem:[%s5942_s24 + $0xd0] sm:$0xff] }
  0x28   : > { %5454 = vmatmul.msk.f32.vlgmr.msra.gmra.mxu3 %vm523_vm0, %v342_v39  ;;  %5465 = vmatpush.xpose.msk.msra.mxu1 %vm523_vm0, %v412_v43  ;;  %v291_v17 = vld [vmem:[%s5942_s24 + $0xc0] sm:$0xff]  ;;  %v292_v18 = vld [vmem:[%s5942_s24 + $0xc8] sm:$0xff]  ;;  %v294_v19 = vld [vmem:[%s5942_s24 + $0xd8] sm:$0xff]  ;;  %v357_v20 = vmul.f32 0.35355338, %v293_v16 }
  0x29   : > { %5469 = vmatpush.xpose.msk.msra.mxu3 %vm523_vm0, %v414_v42  ;;  %v355_v21 = vmul.f32 0.35355338, %v291_v17  ;;  %v356_v22 = vmul.f32 0.35355338, %v292_v18  ;;  %v358_v23 = vmul.f32 0.35355338, %v294_v19 }
  0x2a   : > { %v427_v24 = vld [vmem:[%s5936_s21 + $0x100] sm:$0xff]  ;;  %v429_v25 = vld [vmem:[%s5936_s21 + $0x110] sm:$0xff]  ;;  %v428_v26 = vld [vmem:[%s5936_s21 + $0x108] sm:$0xff] }
  0x2b   : > { %v430_v27 = vld [vmem:[%s5936_s21 + $0x118] sm:$0xff]  ;;  %v295_v28 = vld [vmem:[%s5942_s24 + $0xe0] sm:$0xff]  ;;  %v297_v29 = vld [vmem:[%s5942_s24 + $0xf0] sm:$0xff] }
  0x2c   : > { %v296_v30 = vld [vmem:[%s5942_s24 + $0xe8] sm:$0xff]  ;;  %v298_v31 = vld [vmem:[%s5942_s24 + $0xf8] sm:$0xff]  ;;  %v359_v32 = vmul.f32 0.35355338, %v295_v28  ;;  %v361_v33 = vmul.f32 0.35355338, %v297_v29 }
  0x2d   : > { %5456 = vmatmul.msk.f32.vlgmr.msrb.gmra.mxu0 %vm523_vm0, %v343_v48  ;;  %5460 = vmatmul.msk.f32.vlgmr.msrb.gmra.mxu2 %vm523_vm0, %v345_v49  ;;  %v360_v34 = vmul.f32 0.35355338, %v296_v30  ;;  %v362_v35 = vmul.f32 0.35355338, %v298_v31  ;;  %v431_v36 = vld [vmem:[%s5936_s21 + $0x120] sm:$0xff]  ;;  %v432_v37 = vld [vmem:[%s5936_s21 + $0x128] sm:$0xff] }
  0x2e   : > { %5475 = vmatpush.xpose.msk.msrb.mxu2 %vm523_vm0, %v417_v52  ;;  %5471 = vmatpush.xpose.msk.msrb.mxu0 %vm523_vm0, %v415_v53  ;;  %v433_v38 = vld [vmem:[%s5936_s21 + $0x130] sm:$0xff]  ;;  %v434_v39 = vld [vmem:[%s5936_s21 + $0x138] sm:$0xff]  ;;  %v299_v40 = vld [vmem:[%s5942_s24 + $0x100] sm:$0xff] }
  0x2f   : > { %5458 = vmatmul.msk.f32.vlgmr.msrb.gmra.mxu1 %vm523_vm0, %v344_v50  ;;  %v301_v41 = vld [vmem:[%s5942_s24 + $0x110] sm:$0xff]  ;;  %v300_v42 = vld [vmem:[%s5942_s24 + $0x108] sm:$0xff]  ;;  %v302_v43 = vld [vmem:[%s5942_s24 + $0x118] sm:$0xff]  ;;  %v363_v44 = vmul.f32 0.35355338, %v299_v40 }
  0x30   : > { %5462 = vmatmul.msk.f32.vlgmr.msrb.gmra.mxu3 %vm523_vm0, %v346_v51  ;;  %5473 = vmatpush.xpose.msk.msrb.mxu1 %vm523_vm0, %v416_v55  ;;  %v365_v45 = vmul.f32 0.35355338, %v301_v41  ;;  %v364_v46 = vmul.f32 0.35355338, %v300_v42  ;;  %v366_v47 = vmul.f32 0.35355338, %v302_v43 }
  0x31   : > { %5477 = vmatpush.xpose.msk.msrb.mxu3 %vm523_vm0, %v418_v54  ;;  %v435_v48 = vld [vmem:[%s5936_s21 + $0x140] sm:$0xff]  ;;  %v437_v49 = vld [vmem:[%s5936_s21 + $0x150] sm:$0xff]  ;;  %v436_v50 = vld [vmem:[%s5936_s21 + $0x148] sm:$0xff] }
  0x32   : > { %v438_v51 = vld [vmem:[%s5936_s21 + $0x158] sm:$0xff]  ;;  %v303_v52 = vld [vmem:[%s5942_s24 + $0x120] sm:$0xff]  ;;  %v305_v53 = vld [vmem:[%s5942_s24 + $0x130] sm:$0xff] }
  0x33   : > { %v304_v54 = vld [vmem:[%s5942_s24 + $0x128] sm:$0xff]  ;;  %v306_v55 = vld [vmem:[%s5942_s24 + $0x138] sm:$0xff]  ;;  %v367_v56 = vmul.f32 0.35355338, %v303_v52  ;;  %v369_v57 = vmul.f32 0.35355338, %v305_v53 }
  0x34   : > { %v368_v58 = vmul.f32 0.35355338, %v304_v54  ;;  %v370_v59 = vmul.f32 0.35355338, %v306_v55  ;;  %v449_v29 = vld [vmem:[%s5936_s21 + $0x1b0] sm:$0xff]  ;;  %v319_v30 = vld [vmem:[%s5942_s24 + $0x1a0] sm:$0xff] }
  0x35   : > { %5468 = vmatmul.msk.f32.vlgmr.msra.gmra.mxu2 %vm523_vm0, %v349_v60  ;;  %5464 = vmatmul.msk.f32.vlgmr.msra.gmra.mxu0 %vm523_vm0, %v347_v61  ;;  %v439_v60 = vld [vmem:[%s5936_s21 + $0x160] sm:$0xff]  ;;  %v441_v61 = vld [vmem:[%s5936_s21 + $0x170] sm:$0xff]  ;;  %v383_v31 = vmul.f32 0.35355338, %v319_v30  ;;  %v452_v42 = vld [vmem:[%s5936_s21 + $0x1c8] sm:$0xff] }
  0x36   : > { %5483 = vmatpush.xpose.msk.msra.mxu2 %vm523_vm0, %v421_v0  ;;  %5479 = vmatpush.xpose.msk.msra.mxu0 %vm523_vm0, %v419_v1  ;;  %v307_v0 = vld [vmem:[%s5942_s24 + $0x140] sm:$0xff]  ;;  %v309_v1 = vld [vmem:[%s5942_s24 + $0x150] sm:$0xff]  ;;  %v322_v43 = vld [vmem:[%s5942_s24 + $0x1b8] sm:$0xff] }
  0x37   : > { %5466 = vmatmul.msk.f32.vlgmr.msra.gmra.mxu1 %vm523_vm0, %v348_v62  ;;  %v440_v62 = vld [vmem:[%s5936_s21 + $0x168] sm:$0xff]  ;;  %v371_v4 = vmul.f32 0.35355338, %v307_v0  ;;  %v373_v5 = vmul.f32 0.35355338, %v309_v1  ;;  %v458_v52 = vld [vmem:[%s5936_s21 + $0x1f8] sm:$0xff] }
  0x38   : > { %5470 = vmatmul.msk.f32.vlgmr.msra.gmra.mxu3 %vm523_vm0, %v350_v63  ;;  %5481 = vmatpush.xpose.msk.msra.mxu1 %vm523_vm0, %v420_v2  ;;  %v442_v63 = vld [vmem:[%s5936_s21 + $0x178] sm:$0xff]  ;;  %v308_v2 = vld [vmem:[%s5942_s24 + $0x148] sm:$0xff]  ;;  %v455_v55 = vld [vmem:[%s5936_s21 + $0x1e0] sm:$0xff] }
  0x39   : > { %5485 = vmatpush.xpose.msk.msra.mxu3 %vm523_vm0, %v422_v3  ;;  %v310_v3 = vld [vmem:[%s5942_s24 + $0x158] sm:$0xff]  ;;  %v372_v6 = vmul.f32 0.35355338, %v308_v2  ;;  %v327_v0 = vld [vmem:[%s5942_s24 + $0x1e0] sm:$0xff] }
  0x3a   : > { %v374_v7 = vmul.f32 0.35355338, %v310_v3  ;;  %v391_v3 = vmul.f32 0.35355338, %v327_v0 }
  0x3d   : > { %5476 = vmatmul.msk.f32.vlgmr.msrb.gmra.mxu2 %vm523_vm0, %v353_v8  ;;  %5472 = vmatmul.msk.f32.vlgmr.msrb.gmra.mxu0 %vm523_vm0, %v351_v9  ;;  %v443_v8 = vld [vmem:[%s5936_s21 + $0x180] sm:$0xff]  ;;  %v444_v9 = vld [vmem:[%s5936_s21 + $0x188] sm:$0xff] }
  0x3e   : > { %5487 = vmatpush.xpose.msk.msrb.mxu0 %vm523_vm0, %v423_v12  ;;  %5491 = vmatpush.xpose.msk.msrb.mxu2 %vm523_vm0, %v425_v13  ;;  %v311_v12 = vld [vmem:[%s5942_s24 + $0x160] sm:$0xff]  ;;  %v313_v13 = vld [vmem:[%s5942_s24 + $0x170] sm:$0xff] }
  0x3f   : > { %5474 = vmatmul.msk.f32.vlgmr.msrb.gmra.mxu1 %vm523_vm0, %v352_v10  ;;  %v445_v10 = vld [vmem:[%s5936_s21 + $0x190] sm:$0xff]  ;;  %v375_v16 = vmul.f32 0.35355338, %v311_v12  ;;  %v377_v17 = vmul.f32 0.35355338, %v313_v13 }
  0x40   : > { %5478 = vmatmul.msk.f32.vlgmr.msrb.gmra.mxu3 %vm523_vm0, %v354_v11  ;;  %5489 = vmatpush.xpose.msk.msrb.mxu1 %vm523_vm0, %v424_v14  ;;  %v446_v11 = vld [vmem:[%s5936_s21 + $0x198] sm:$0xff]  ;;  %v312_v14 = vld [vmem:[%s5942_s24 + $0x168] sm:$0xff] }
  0x41   : > { %5493 = vmatpush.xpose.msk.msrb.mxu3 %vm523_vm0, %v426_v15  ;;  %v314_v15 = vld [vmem:[%s5942_s24 + $0x178] sm:$0xff]  ;;  %v376_v18 = vmul.f32 0.35355338, %v312_v14 }
  0x42   : > { %v378_v19 = vmul.f32 0.35355338, %v314_v15 }
  0x45   : > { %5484 = vmatmul.msk.f32.vlgmr.msra.gmra.mxu2 %vm523_vm0, %v357_v20  ;;  %5480 = vmatmul.msk.f32.vlgmr.msra.gmra.mxu0 %vm523_vm0, %v355_v21  ;;  %v315_v20 = vld [vmem:[%s5942_s24 + $0x180] sm:$0xff]  ;;  %v316_v21 = vld [vmem:[%s5942_s24 + $0x188] sm:$0xff] }
  0x46   : > { %5495 = vmatpush.xpose.msk.msra.mxu0 %vm523_vm0, %v427_v24  ;;  %5499 = vmatpush.xpose.msk.msra.mxu2 %vm523_vm0, %v429_v25  ;;  %v447_v24 = vld [vmem:[%s5936_s21 + $0x1a0] sm:$0xff]  ;;  %v317_v25 = vld [vmem:[%s5942_s24 + $0x190] sm:$0xff] }
  0x47   : > { %5482 = vmatmul.msk.f32.vlgmr.msra.gmra.mxu1 %vm523_vm0, %v356_v22  ;;  %v379_v22 = vmul.f32 0.35355338, %v315_v20 }
  0x48   : > { %5486 = vmatmul.msk.f32.vlgmr.msra.gmra.mxu3 %vm523_vm0, %v358_v23  ;;  %5497 = vmatpush.xpose.msk.msra.mxu1 %vm523_vm0, %v428_v26  ;;  %v380_v23 = vmul.f32 0.35355338, %v316_v21  ;;  %v318_v26 = vld [vmem:[%s5942_s24 + $0x198] sm:$0xff] }
  0x49   : > { %5501 = vmatpush.xpose.msk.msra.mxu3 %vm523_vm0, %v430_v27  ;;  %v381_v27 = vmul.f32 0.35355338, %v317_v25  ;;  %v382_v28 = vmul.f32 0.35355338, %v318_v26 }
  0x4d   : > { %5488 = vmatmul.msk.f32.vlgmr.msrb.gmra.mxu0 %vm523_vm0, %v359_v32  ;;  %5492 = vmatmul.msk.f32.vlgmr.msrb.gmra.mxu2 %vm523_vm0, %v361_v33  ;;  %v448_v32 = vld [vmem:[%s5936_s21 + $0x1a8] sm:$0xff]  ;;  %v451_v33 = vld [vmem:[%s5936_s21 + $0x1c0] sm:$0xff] }
  0x4e   : > { %5503 = vmatpush.xpose.msk.msrb.mxu0 %vm523_vm0, %v431_v36  ;;  %5507 = vmatpush.xpose.msk.msrb.mxu2 %vm523_vm0, %v433_v38  ;;  %v450_v36 = vld [vmem:[%s5936_s21 + $0x1b8] sm:$0xff]  ;;  %v320_v38 = vld [vmem:[%s5942_s24 + $0x1a8] sm:$0xff] }
  0x4f   : > { %5490 = vmatmul.msk.f32.vlgmr.msrb.gmra.mxu1 %vm523_vm0, %v360_v34  ;;  %v321_v34 = vld [vmem:[%s5942_s24 + $0x1b0] sm:$0xff]  ;;  %v384_v40 = vmul.f32 0.35355338, %v320_v38 }
  0x50   : > { %5494 = vmatmul.msk.f32.vlgmr.msrb.gmra.mxu3 %vm523_vm0, %v362_v35  ;;  %5505 = vmatpush.xpose.msk.msrb.mxu1 %vm523_vm0, %v432_v37  ;;  %v385_v35 = vmul.f32 0.35355338, %v321_v34  ;;  %v453_v37 = vld [vmem:[%s5936_s21 + $0x1d0] sm:$0xff] }
  0x51   : > { %5509 = vmatpush.xpose.msk.msrb.mxu3 %vm523_vm0, %v434_v39  ;;  %v323_v39 = vld [vmem:[%s5942_s24 + $0x1c0] sm:$0xff] }
  0x52   : > { %v387_v41 = vmul.f32 0.35355338, %v323_v39 }
  0x55   : > { %5496 = vmatmul.msk.f32.vlgmr.msra.gmra.mxu0 %vm523_vm0, %v363_v44  ;;  %5500 = vmatmul.msk.f32.vlgmr.msra.gmra.mxu2 %vm523_vm0, %v365_v45  ;;  %v325_v44 = vld [vmem:[%s5942_s24 + $0x1d0] sm:$0xff]  ;;  %v386_v45 = vmul.f32 0.35355338, %v322_v43 }
  0x56   : > { %5511 = vmatpush.xpose.msk.msra.mxu0 %vm523_vm0, %v435_v48  ;;  %5515 = vmatpush.xpose.msk.msra.mxu2 %vm523_vm0, %v437_v49  ;;  %v324_v48 = vld [vmem:[%s5942_s24 + $0x1c8] sm:$0xff] }
  0x57   : > { %5498 = vmatmul.msk.f32.vlgmr.msra.gmra.mxu1 %vm523_vm0, %v364_v46  ;;  %v389_v46 = vmul.f32 0.35355338, %v325_v44  ;;  %v388_v49 = vmul.f32 0.35355338, %v324_v48 }
  0x58   : > { %5502 = vmatmul.msk.f32.vlgmr.msra.gmra.mxu3 %vm523_vm0, %v366_v47  ;;  %5513 = vmatpush.xpose.msk.msra.mxu1 %vm523_vm0, %v436_v50  ;;  %v454_v47 = vld [vmem:[%s5936_s21 + $0x1d8] sm:$0xff]  ;;  %v456_v50 = vld [vmem:[%s5936_s21 + $0x1e8] sm:$0xff] }
  0x59   : > { %5517 = vmatpush.xpose.msk.msra.mxu3 %vm523_vm0, %v438_v51  ;;  %v326_v51 = vld [vmem:[%s5942_s24 + $0x1d8] sm:$0xff] }
  0x5a   : > { %v390_v53 = vmul.f32 0.35355338, %v326_v51 }
  0x5d   : > { %5504 = vmatmul.msk.f32.vlgmr.msrb.gmra.mxu0 %vm523_vm0, %v367_v56  ;;  %5508 = vmatmul.msk.f32.vlgmr.msrb.gmra.mxu2 %vm523_vm0, %v369_v57  ;;  %v328_v56 = vld [vmem:[%s5942_s24 + $0x1e8] sm:$0xff] }
  0x5e   : > { %5519 = vmatpush.xpose.msk.msrb.mxu0 %vm523_vm0, %v439_v60  ;;  %5523 = vmatpush.xpose.msk.msrb.mxu2 %vm523_vm0, %v441_v61  ;;  %v457_v60 = vld [vmem:[%s5936_s21 + $0x1f0] sm:$0xff]  ;;  %v330_v61 = vld [vmem:[%s5942_s24 + $0x1f8] sm:$0xff] }
  0x5f   : > { %5506 = vmatmul.msk.f32.vlgmr.msrb.gmra.mxu1 %vm523_vm0, %v368_v58 }
  0x60   : > { %5510 = vmatmul.msk.f32.vlgmr.msrb.gmra.mxu3 %vm523_vm0, %v370_v59  ;;  %5521 = vmatpush.xpose.msk.msrb.mxu1 %vm523_vm0, %v440_v62  ;;  %v392_v59 = vmul.f32 0.35355338, %v328_v56  ;;  %v394_v62 = vmul.f32 0.35355338, %v330_v61 }
  0x61   : > { %5525 = vmatpush.xpose.msk.msrb.mxu3 %vm523_vm0, %v442_v63 }
  0x65   : > { %5512 = vmatmul.msk.f32.vlgmr.msra.gmra.mxu0 %vm523_vm0, %v371_v4  ;;  %5516 = vmatmul.msk.f32.vlgmr.msra.gmra.mxu2 %vm523_vm0, %v373_v5 }
  0x66   : > { %5527 = vmatpush.xpose.msk.msra.mxu0 %vm523_vm0, %v443_v8  ;;  %5531 = vmatpush.xpose.msk.msra.mxu2 %vm523_vm0, %v445_v10 }
  0x67   : > { %5514 = vmatmul.msk.f32.vlgmr.msra.gmra.mxu1 %vm523_vm0, %v372_v6  ;;  %v329_v6 = vld [vmem:[%s5942_s24 + $0x1f0] sm:$0xff] }
  0x68   : > { %5518 = vmatmul.msk.f32.vlgmr.msra.gmra.mxu3 %vm523_vm0, %v374_v7  ;;  %5529 = vmatpush.xpose.msk.msra.mxu1 %vm523_vm0, %v444_v9  ;;  %v393_v8 = vmul.f32 0.35355338, %v329_v6 }
  0x69   : > { %5533 = vmatpush.xpose.msk.msra.mxu3 %vm523_vm0, %v446_v11 }
  0x6d   : > { %5520 = vmatmul.msk.f32.vlgmr.msrb.gmra.mxu0 %vm523_vm0, %v375_v16  ;;  %5524 = vmatmul.msk.f32.vlgmr.msrb.gmra.mxu2 %vm523_vm0, %v377_v17 }
  0x6e   : > { %5535 = vmatpush.xpose.msk.msrb.mxu0 %vm523_vm0, %v447_v24  ;;  %5539 = vmatpush.xpose.msk.msrb.mxu2 %vm523_vm0, %v449_v29 }
  0x6f   : > { %5522 = vmatmul.msk.f32.vlgmr.msrb.gmra.mxu1 %vm523_vm0, %v376_v18 }
  0x70   : > { %5526 = vmatmul.msk.f32.vlgmr.msrb.gmra.mxu3 %vm523_vm0, %v378_v19  ;;  %5537 = vmatpush.xpose.msk.msrb.mxu1 %vm523_vm0, %v448_v32 }
  0x71   : > { %5541 = vmatpush.xpose.msk.msrb.mxu3 %vm523_vm0, %v450_v36 }
  0x75   : > { %5528 = vmatmul.msk.f32.vlgmr.msra.gmra.mxu0 %vm523_vm0, %v379_v22  ;;  %5532 = vmatmul.msk.f32.vlgmr.msra.gmra.mxu2 %vm523_vm0, %v381_v27 }
  0x76   : > { %5543 = vmatpush.xpose.msk.msra.mxu0 %vm523_vm0, %v451_v33  ;;  %5547 = vmatpush.xpose.msk.msra.mxu2 %vm523_vm0, %v453_v37 }
  0x77   : > { %5530 = vmatmul.msk.f32.vlgmr.msra.gmra.mxu1 %vm523_vm0, %v380_v23 }
  0x78   : > { %5534 = vmatmul.msk.f32.vlgmr.msra.gmra.mxu3 %vm523_vm0, %v382_v28  ;;  %5545 = vmatpush.xpose.msk.msra.mxu1 %vm523_vm0, %v452_v42 }
  0x79   : > { %5549 = vmatpush.xpose.msk.msra.mxu3 %vm523_vm0, %v454_v47 }
  0x7d   : > { %5536 = vmatmul.msk.f32.vlgmr.msrb.gmra.mxu0 %vm523_vm0, %v383_v31  ;;  %5540 = vmatmul.msk.f32.vlgmr.msrb.gmra.mxu2 %vm523_vm0, %v385_v35 }
  0x7e   : > { %5551 = vmatpush.xpose.msk.msrb.mxu0 %vm523_vm0, %v455_v55  ;;  %5555 = vmatpush.xpose.msk.msrb.mxu2 %vm523_vm0, %v457_v60 }
  0x7f   : > { %5538 = vmatmul.msk.f32.vlgmr.msrb.gmra.mxu1 %vm523_vm0, %v384_v40 }
  0x80   : > { %5542 = vmatmul.msk.f32.vlgmr.msrb.gmra.mxu3 %vm523_vm0, %v386_v45  ;;  %5553 = vmatpush.xpose.msk.msrb.mxu1 %vm523_vm0, %v456_v50 }
  0x81   : > { %5557 = vmatpush.xpose.msk.msrb.mxu3 %vm523_vm0, %v458_v52 }
  0x85   : > { %5544 = vmatmul.msk.f32.vlgmr.msra.gmra.mxu0 %vm523_vm0, %v387_v41  ;;  %5548 = vmatmul.msk.f32.vlgmr.msra.gmra.mxu2 %vm523_vm0, %v389_v46 }
  0x87   : > { %5546 = vmatmul.msk.f32.vlgmr.msra.gmra.mxu1 %vm523_vm0, %v388_v49 }
  0x88   : > { %5550 = vmatmul.msk.f32.vlgmr.msra.gmra.mxu3 %vm523_vm0, %v390_v53 }
  0x8d   : > { %5552 = vmatmul.msk.f32.vlgmr.msrb.gmra.mxu0 %vm523_vm0, %v391_v3  ;;  %5556 = vmatmul.msk.f32.vlgmr.msrb.gmra.mxu2 %vm523_vm0, %v393_v8 }
  0x8f   : > { %5554 = vmatmul.msk.f32.vlgmr.msrb.gmra.mxu1 %vm523_vm0, %v392_v59 }
  0x90   : > { %5558 = vmatmul.msk.f32.vlgmr.msrb.gmra.mxu3 %vm523_vm0, %v394_v62 }
  0x92   : > { %v6188_v54 = vpop.f32.mrf.mxu0 }
  0x93   : > { %v2188_v57 = vsel %vm523_vm0, %v6188_v54, -inf }
  0x94   : > { %v6194_v58 = vpop.f32.mrf.mxu1  ;;  %2189 = vmax.xlane.f32.xlu0 %v2188_v57 }
  0x95   : > { %v2191_v2 = vsel %vm523_vm0, %v6194_v58, -inf }
  0x98   : > { %v6202_v63 = vpop.f32.mrf.mxu2 }
  0x99   : > { %v2194_v1 = vsel %vm523_vm0, %v6202_v63, -inf }
  0x9a   : > { %2195 = vmax.xlane.f32.xlu1 %v2194_v1  ;;  %v6209_v4 = vpop.f32.mrf.mxu0 }
  0x9b   : > { %v6211_v5 = vpop.f32.mrf.mxu3  ;;  %v2200_v7 = vsel %vm523_vm0, %v6209_v4, -inf }
  0x9c   : > { %2192 = vmax.xlane.f32.xlu0 %v2191_v2  ;;  %2201 = vmax.xlane.f32.xlu2 %v2200_v7  ;;  %v6217_v9 = vpop.f32.mrf.mxu1  ;;  %v2197_v10 = vsel %vm523_vm0, %v6211_v5, -inf }
  0x9d   : > { %v2203_v13 = vsel %vm523_vm0, %v6217_v9, -inf }
  0xa0   : > { %v6222_v11 = vpop.f32.mrf.mxu2 }
  0xa1   : > { %v2206_v12 = vsel %vm523_vm0, %v6222_v11, -inf }
  0xa2   : > { %2198 = vmax.xlane.f32.xlu1 %v2197_v10  ;;  %v6230_v15 = vpop.f32.mrf.mxu0 }
  0xa3   : > { %v6228_v14 = vpop.f32.mrf.mxu3  ;;  %v2212_v20 = vsel %vm523_vm0, %v6230_v15, -inf }
  0xa4   : > { %2207 = vmax.xlane.f32.xlu0 %v2206_v12  ;;  %2204 = vmax.xlane.f32.xlu2 %v2203_v13  ;;  %v6232_v16 = vpop.f32.mrf.mxu1  ;;  %v2209_v17 = vsel %vm523_vm0, %v6228_v14, -inf }
  0xa5   : > { %v2215_v19 = vsel %vm523_vm0, %v6232_v16, -inf }
  0xa8   : > { %v6236_v18 = vpop.f32.mrf.mxu2 }
  0xa9   : > { %v2218_v23 = vsel %vm523_vm0, %v6236_v18, -inf }
  0xaa   : > { %2210 = vmax.xlane.f32.xlu1 %v2209_v17  ;;  %v6244_v22 = vpop.f32.mrf.mxu0 }
  0xab   : > { %v6242_v21 = vpop.f32.mrf.mxu3  ;;  %v2224_v26 = vsel %vm523_vm0, %v6244_v22, -inf }
  0xac   : > { %2216 = vmax.xlane.f32.xlu0 %v2215_v19  ;;  %2213 = vmax.xlane.f32.xlu2 %v2212_v20  ;;  %v2221_v25 = vsel %vm523_vm0, %v6242_v21, -inf  ;;  %v6256_v28 = vpop.f32.mrf.mxu1 }
  0xad   : > { %v2227_v29 = vsel %vm523_vm0, %v6256_v28, -inf }
  0xb0   : > { %v6248_v24 = vpop.f32.mrf.mxu2 }
  0xb1   : > { %v2230_v31 = vsel %vm523_vm0, %v6248_v24, -inf }
  0xb2   : > { %2219 = vmax.xlane.f32.xlu1 %v2218_v23  ;;  %v6260_v30 = vpop.f32.mrf.mxu0 }
  0xb3   : > { %v6254_v27 = vpop.f32.mrf.mxu3  ;;  %v2236_v36 = vsel %vm523_vm0, %v6260_v30, -inf }
  0xb4   : > { %2222 = vmax.xlane.f32.xlu2 %v2221_v25  ;;  %2225 = vmax.xlane.f32.xlu0 %v2224_v26  ;;  %v2233_v32 = vsel %vm523_vm0, %v6254_v27, -inf  ;;  %v6268_v34 = vpop.f32.mrf.mxu1 }
  0xb5   : > { %v2239_v43 = vsel %vm523_vm0, %v6268_v34, -inf }
  0xb8   : > { %v6266_v33 = vpop.f32.mrf.mxu2 }
  0xb9   : > { %v2242_v38 = vsel %vm523_vm0, %v6266_v33, -inf }
  0xba   : > { %2228 = vmax.xlane.f32.xlu1 %v2227_v29  ;;  %v6274_v37 = vpop.f32.mrf.mxu0 }
  0xbb   : > { %v6270_v35 = vpop.f32.mrf.mxu3  ;;  %v2248_v49 = vsel %vm523_vm0, %v6274_v37, -inf }
  0xbc   : > { %2231 = vmax.xlane.f32.xlu2 %v2230_v31  ;;  %2234 = vmax.xlane.f32.xlu0 %v2233_v32  ;;  %v2245_v39 = vsel %vm523_vm0, %v6270_v35, -inf  ;;  %v6282_v41 = vpop.f32.mrf.mxu1 }
  0xbd   : > { %v2251_v44 = vsel %vm523_vm0, %v6282_v41, -inf }
  0xc0   : > { %v6280_v40 = vpop.f32.mrf.mxu2 }
  0xc1   : > { %v2254_v51 = vsel %vm523_vm0, %v6280_v40, -inf }
  0xc2   : > { %2237 = vmax.xlane.f32.xlu1 %v2236_v36  ;;  %v6292_v46 = vpop.f32.mrf.mxu0 }
  0xc3   : > { %v6284_v42 = vpop.f32.mrf.mxu3  ;;  %v2260_v53 = vsel %vm523_vm0, %v6292_v46, -inf }
  0xc4   : > { %2243 = vmax.xlane.f32.xlu2 %v2242_v38  ;;  %2246 = vmax.xlane.f32.xlu0 %v2245_v39  ;;  %v2257_v45 = vsel %vm523_vm0, %v6284_v42, -inf  ;;  %v6296_v48 = vpop.f32.mrf.mxu1 }
  0xc5   : > { %v2263_v55 = vsel %vm523_vm0, %v6296_v48, -inf }
  0xc8   : > { %v6294_v47 = vpop.f32.mrf.mxu2 }
  0xc9   : > { %v2266_v50 = vsel %vm523_vm0, %v6294_v47, -inf }
  0xca   : > { %2240 = vmax.xlane.f32.xlu1 %v2239_v43  ;;  %v6304_v52 = vpop.f32.mrf.mxu0 }
  0xcb   : > { %v2272_v56 = vsel %vm523_vm0, %v6304_v52, -inf  ;;  %v6312_v57 = vpop.f32.mrf.mxu3 }
  0xcc   : > { %2252 = vmax.xlane.f32.xlu2 %v2251_v44  ;;  %2258 = vmax.xlane.f32.xlu0 %v2257_v45  ;;  %v6314_v59 = vpop.f32.mrf.mxu1  ;;  %v2269_v62 = vsel %vm523_vm0, %v6312_v57, -inf }
  0xcd   : > { %v2275_v7 = vsel %vm523_vm0, %v6314_v59, -inf }
  0xd0   : > { %v6316_v60 = vpop.f32.mrf.mxu2 }
  0xd1   : > { %v2278_v0 = vsel %vm523_vm0, %v6316_v60, -inf }
  0xd2   : > { %2249 = vmax.xlane.f32.xlu1 %v2248_v49  ;;  %v6318_v61 = vpop.f32.mrf.mxu0 }
  0xd3   : > { %v2284_v1 = vsel %vm523_vm0, %v6318_v61, -inf  ;;  %v6326_v2 = vpop.f32.mrf.mxu3 }
  0xd4   : > { %2255 = vmax.xlane.f32.xlu2 %v2254_v51  ;;  %2267 = vmax.xlane.f32.xlu0 %v2266_v50  ;;  %v6328_v3 = vpop.f32.mrf.mxu1  ;;  %v2281_v19 = vsel %vm523_vm0, %v6326_v2, -inf }
  0xd5   : > { %v2287_v8 = vsel %vm523_vm0, %v6328_v3, -inf }
  0xd8   : > { %v6330_v6 = vpop.f32.mrf.mxu2 }
  0xd9   : > { %v2290_v10 = vsel %vm523_vm0, %v6330_v6, -inf }
  0xda   : > { %2261 = vmax.xlane.f32.xlu1 %v2260_v53  ;;  %v6338_v12 = vpop.f32.mrf.mxu0 }
  0xdb   : > { %v6340_v13 = vpop.f32.mrf.mxu3  ;;  %v2296_v31 = vsel %vm523_vm0, %v6338_v12, -inf }
  0xdc   : > { %2264 = vmax.xlane.f32.xlu2 %v2263_v55  ;;  %2273 = vmax.xlane.f32.xlu0 %v2272_v56  ;;  %v6342_v17 = vpop.f32.mrf.mxu1  ;;  %v2293_v20 = vsel %vm523_vm0, %v6340_v13, -inf }
  0xdd   : > { %9223 = vst [vmem:[#allocation2_spill] sm:$0xff] %v6342_v17  ;;  %v2299_v23 = vsel %vm523_vm0, %v6342_v17, -inf }
  0xe0   : > { %v6350_v25 = vpop.f32.mrf.mxu2 }
  0xe1   : > { %9224 = vst [vmem:[#allocation3_spill] sm:$0xff] %v6350_v25  ;;  %v2302_v44 = vsel %vm523_vm0, %v6350_v25, -inf }
  0xe2   : > { %2270 = vmax.xlane.f32.xlu1 %v2269_v62  ;;  %v6352_v26 = vpop.f32.mrf.mxu0 }
  0xe3   : > { %9225 = vst [vmem:[#allocation4_spill] sm:$0xff] %v6352_v26  ;;  %v6354_v29 = vpop.f32.mrf.mxu3  ;;  %v2308_v36 = vsel %vm523_vm0, %v6352_v26, -inf }
  0xe4   : > { %2279 = vmax.xlane.f32.xlu0 %v2278_v0  ;;  %2285 = vmax.xlane.f32.xlu2 %v2284_v1  ;;  %v2305_v32 = vsel %vm523_vm0, %v6354_v29, -inf  ;;  %v6362_v38 = vpop.f32.mrf.mxu1 }
  0xe5   : > { %9226 = vst [vmem:[#allocation5_spill] sm:$0xff] %v6362_v38  ;;  %v2311_v56 = vsel %vm523_vm0, %v6362_v38, -inf }
  0xe8   : > { %v6364_v39 = vpop.f32.mrf.mxu2 }
  0xe9   : > { %9227 = vst [vmem:[#allocation6_spill] sm:$0xff] %v6364_v39  ;;  %v2314_v45 = vsel %vm523_vm0, %v6364_v39, -inf }
  0xea   : > { %2276 = vmax.xlane.f32.xlu1 %v2275_v7  ;;  %v6366_v43 = vpop.f32.mrf.mxu0 }
  0xeb   : > { %9228 = vst [vmem:[#allocation7_spill] sm:$0xff] %v6366_v43  ;;  %v2320_v49 = vsel %vm523_vm0, %v6366_v43, -inf  ;;  %v6374_v50 = vpop.f32.mrf.mxu3 }
  0xec   : > { %2288 = vmax.xlane.f32.xlu0 %v2287_v8  ;;  %2291 = vmax.xlane.f32.xlu2 %v2290_v10  ;;  %9229 = vst [vmem:[#allocation8_spill] sm:$0xff] %v6374_v50  ;;  %v6376_v51 = vpop.f32.mrf.mxu1 }
  0xed   : > { %9230 = vst [vmem:[#allocation9_spill] sm:$0xff] %v6376_v51  ;;  %v2323_v62 = vsel %vm523_vm0, %v6376_v51, -inf }
  0xf0   : > { %v6378_v53 = vpop.f32.mrf.mxu2 }
  0xf1   : > { %9231 = vst [vmem:[#allocation10_spill] sm:$0xff] %v6378_v53  ;;  %v2326_v0 = vsel %vm523_vm0, %v6378_v53, -inf }
  0xf2   : > { %2282 = vmax.xlane.f32.xlu1 %v2281_v19  ;;  %v6388_v1 = vpop.f32.mrf.mxu0 }
  0xf3   : > { %9232 = vst [vmem:[#allocation11_spill] sm:$0xff] %v6388_v1  ;;  %v6390_v7 = vpop.f32.mrf.mxu3 }
  0xf4   : > { %2294 = vmax.xlane.f32.xlu0 %v2293_v20  ;;  %2300 = vmax.xlane.f32.xlu2 %v2299_v23  ;;  %9233 = vst [vmem:[#allocation12_spill] sm:$0xff] %v6390_v7  ;;  %v6394_v10 = vpop.f32.mrf.mxu1  ;;  %v2317_v23 = vsel %vm523_vm0, %v6374_v50, -inf }
  0xf5   : > { %9234 = vst [vmem:[#allocation13_spill] sm:$0xff] %v6394_v10 }
  0xfa   : > { %2297 = vmax.xlane.f32.xlu1 %v2296_v31  ;;  %v2329_v31 = vsel %vm523_vm0, %v6390_v7, -inf }
  0xfc   : > { %2306 = vmax.xlane.f32.xlu2 %v2305_v32  ;;  %2309 = vmax.xlane.f32.xlu0 %v2308_v36  ;;  %v2335_v32 = vsel %vm523_vm0, %v6394_v10, -inf  ;;  %v6404_v36 = vpop.f32.mrf.mxu2 }
  0xfd   : > { %9235 = vst [vmem:[#allocation14_spill] sm:$0xff] %v6404_v36 }
 0x102   : > { %2303 = vmax.xlane.f32.xlu1 %v2302_v44  ;;  %v6406_v44 = vpop.f32.mrf.mxu0 }
 0x103   : > { %9236 = vst [vmem:[#allocation15_spill] sm:$0xff] %v6406_v44 }
 0x104   : > { %2315 = vmax.xlane.f32.xlu0 %v2314_v45  ;;  %2321 = vmax.xlane.f32.xlu2 %v2320_v49  ;;  %v6408_v49 = vpop.f32.mrf.mxu3 }
 0x105   : > { %9237 = vst [vmem:[#allocation16_spill] sm:$0xff] %v6408_v49  ;;  %v2341_v10 = vsel %vm523_vm0, %v6408_v49, -inf  ;;  %v2338_v49 = vsel %vm523_vm0, %v6404_v36, -inf }
 0x107   : > { %v6380_v55 = vpop.xlane.xlu0 %2189 }
 0x10a   : > { %2312 = vmax.xlane.f32.xlu1 %v2311_v56  ;;  %v6426_v53 = vpop.f32.mrf.mxu0 }
 0x10b   : > { %9240 = vst [vmem:[#allocation19_spill] sm:$0xff] %v6426_v53 }
 0x10c   : > { %2324 = vmax.xlane.f32.xlu0 %v2323_v62  ;;  %2327 = vmax.xlane.f32.xlu2 %v2326_v0  ;;  %v2332_v0 = vsel %vm523_vm0, %v6388_v1, -inf }
 0x10d   : > { %v6392_v8 = vpop.xlane.xlu1 %2195 }
 0x10f   : > { %v2193_v19 = vpop.xlane.xlu0 %2192  ;;  %v6396_v20 = vpop.xlane.xlu2 %2201 }
 0x112   : > { %2318 = vmax.xlane.f32.xlu1 %v2317_v23  ;;  %v2344_v23 = vsel %vm523_vm0, %v6406_v44, -inf }
 0x114   : > { %2330 = vmax.xlane.f32.xlu0 %v2329_v31  ;;  %2336 = vmax.xlane.f32.xlu2 %v2335_v32  ;;  %v6420_v31 = vpop.f32.mrf.mxu1  ;;  %v6422_v32 = vpop.f32.mrf.mxu2 }
 0x115   : > { %v2199_v45 = vpop.xlane.xlu1 %2198  ;;  %9238 = vst [vmem:[#allocation17_spill] sm:$0xff] %v6420_v31  ;;  %v2350_v44 = vsel %vm523_vm0, %v6422_v32, -inf }
 0x116   : > { %9239 = vst [vmem:[#allocation18_spill] sm:$0xff] %v6422_v32  ;;  %v2347_v32 = vsel %vm523_vm0, %v6420_v31, -inf }
 0x117   : > { %v6410_v56 = vpop.xlane.xlu0 %2207  ;;  %v6412_v62 = vpop.xlane.xlu2 %2204 }
 0x11a   : > { %2333 = vmax.xlane.f32.xlu1 %v2332_v0  ;;  %v2356_v0 = vsel %vm523_vm0, %v6426_v53, -inf }
 0x11c   : > { %2342 = vmax.xlane.f32.xlu2 %v2341_v10  ;;  %2345 = vmax.xlane.f32.xlu0 %v2344_v23  ;;  %v6436_v10 = vpop.f32.mrf.mxu3  ;;  %v6438_v23 = vpop.f32.mrf.mxu1 }
 0x11d   : > { %v6424_v7 = vpop.xlane.xlu1 %2210  ;;  %9241 = vst [vmem:[#allocation20_spill] sm:$0xff] %v6436_v10  ;;  %v6442_v39 = vpop.f32.mrf.mxu2 }
 0x11e   : > { %9242 = vst [vmem:[#allocation21_spill] sm:$0xff] %v6438_v23 }
 0x11f   : > { %v6428_v43 = vpop.xlane.xlu0 %2216  ;;  %v2214_v1 = vpop.xlane.xlu2 %2213  ;;  %9243 = vst [vmem:[#allocation22_spill] sm:$0xff] %v6442_v39 }
 0x122   : > { %2339 = vmax.xlane.f32.xlu1 %v2338_v49  ;;  %v2359_v49 = vsel %vm523_vm0, %v6438_v23, -inf  ;;  %v2380_v23 = vsub.f32 %v6188_v54, %v6380_v55 }
 0x124   : > { %2351 = vmax.xlane.f32.xlu0 %v2350_v44  ;;  %2357 = vmax.xlane.f32.xlu2 %v2356_v0  ;;  %v2362_v44 = vsel %vm523_vm0, %v6442_v39, -inf  ;;  %v2381_v0 = vsub.f32 %v6194_v58, %v2193_v19  ;;  %v6455_v53 = vpop.f32.mrf.mxu3  ;;  %v6459_v17 = vpop.f32.mrf.mxu1  ;;  %v2353_v58 = vsel %vm523_vm0, %v6436_v10, -inf }
 0x125   : > { %v6440_v51 = vpop.xlane.xlu1 %2219  ;;  %9244 = vst [vmem:[#allocation23_spill] sm:$0xff] %v6455_v53  ;;  %v2365_v19 = vsel %vm523_vm0, %v6455_v53, -inf }
 0x126   : > { %v2446_v38 = vmul.f32 1.442695, %v2381_v0  ;;  %9245 = vst [vmem:[#allocation24_spill] sm:$0xff] %v6459_v17  ;;  %v2444_v0 = vmul.f32 1.442695, %v2380_v23 }
 0x127   : > { %v6444_v26 = vpop.xlane.xlu2 %2222  ;;  %v6446_v36 = vpop.xlane.xlu0 %2225 }
 0x128   : > { %5633 = vpow2.f32 %v2446_v38 }
 0x129   : > { %5635 = vpow2.f32 %v2444_v0 }
 0x12a   : > { %2348 = vmax.xlane.f32.xlu1 %v2347_v32  ;;  %v2371_v32 = vsel %vm523_vm0, %v6459_v17, -inf }
 0x12c   : > { %2360 = vmax.xlane.f32.xlu0 %v2359_v49  ;;  %2363 = vmax.xlane.f32.xlu2 %v2362_v44  ;;  %v2383_v49 = vsub.f32 %v6211_v5, %v2199_v45  ;;  %v6474_v44 = vpop.f32.mrf.mxu0  ;;  %v6478_v55 = vpop.f32.mrf.mxu3  ;;  %v2384_v5 = vsub.f32 %v6209_v4, %v6396_v20  ;;  %v2382_v45 = vsub.f32 %v6202_v63, %v6392_v8 }
 0x12d   : > { %v6457_v50 = vpop.xlane.xlu1 %2228  ;;  %v2368_v38 = vsel %vm523_vm0, %v6474_v44, -inf  ;;  %v2377_v23 = vsel %vm523_vm0, %v6478_v55, -inf }
 0x12e   : > { %v2450_v54 = vmul.f32 1.442695, %v2383_v49  ;;  %v6486_v17 = vpop.eup %5633  ;;  %v6497_v49 = vpop.f32.mrf.mxu2  ;;  %v2448_v4 = vmul.f32 1.442695, %v2382_v45  ;;  %v2390_v45 = vsub.f32 %v6236_v18, %v6440_v51 }
 0x12f   : > { %v6461_v25 = vpop.xlane.xlu2 %2231  ;;  %v6463_v31 = vpop.xlane.xlu0 %2234 }
 0x130   : > { %5637 = vpow2.f32 %v2450_v54  ;;  %v6501_v63 = vpop.eup %5635 }
 0x132   : > { %2354 = vmax.xlane.f32.xlu1 %v2353_v58  ;;  %v2388_v58 = vsub.f32 %v6230_v15, %v2214_v1  ;;  %v2374_v15 = vsel %vm523_vm0, %v6497_v49, -inf }
 0x134   : > { %2366 = vmax.xlane.f32.xlu0 %v2365_v19  ;;  %2372 = vmax.xlane.f32.xlu2 %v2371_v32  ;;  %v2575_v19 = vsel %vm523_vm0, %v6486_v17, 0.0  ;;  %v2452_v32 = vmul.f32 1.442695, %v2384_v5  ;;  %v2460_v0 = vmul.f32 1.442695, %v2388_v58  ;;  %v2385_v5 = vsub.f32 %v6217_v9, %v6412_v62 }
 0x135   : > { %v6476_v39 = vpop.xlane.xlu1 %2237  ;;  %v2572_v58 = vsel %vm523_vm0, %v6501_v63, 0.0  ;;  %v2464_v9 = vmul.f32 1.442695, %v2390_v45 }
 0x136   : > { %v6509_v1 = vpop.eup %5637  ;;  %5639 = vpow2.f32 %v2452_v32  ;;  %v2454_v32 = vmul.f32 1.442695, %v2385_v5  ;;  %v2393_v5 = vsub.f32 %v6256_v28, %v6457_v50 }
 0x137   : > { %v6480_v10 = vpop.xlane.xlu2 %2243  ;;  %v6482_v53 = vpop.xlane.xlu0 %2246  ;;  %5641 = vpow2.f32 %v2448_v4 }
 0x138   : > { %5643 = vpow2.f32 %v2460_v0  ;;  %v2389_v0 = vsub.f32 %v6232_v16, %v6428_v43 }
 0x13a   : > { %2369 = vmax.xlane.f32.xlu1 %v2368_v38  ;;  %v2386_v38 = vsub.f32 %v6222_v11, %v6410_v56 }
 0x13c   : > { %2576 = vadd.xlane.f32.xlu0 %v2575_v19  ;;  %2378 = vmax.xlane.f32.xlu2 %v2377_v23  ;;  %v2581_v23 = vsel %vm523_vm0, %v6509_v1, 0.0  ;;  %v2456_v19 = vmul.f32 1.442695, %v2386_v38  ;;  %v6523_v56 = vpop.eup %5639 }
 0x13d   : > { %v6499_v20 = vpop.xlane.xlu1 %2240  ;;  %v6525_v62 = vpop.eup %5641  ;;  %v2584_v38 = vsel %vm523_vm0, %v6523_v56, 0.0 }
 0x13e   : > { %v6531_v51 = vpop.eup %5643  ;;  %5645 = vpow2.f32 %v2456_v19 }
 0x13f   : > { %v6503_v8 = vpop.xlane.xlu2 %2252  ;;  %v6505_v54 = vpop.xlane.xlu0 %2258  ;;  %5647 = vpow2.f32 %v2454_v32  ;;  %v2596_v45 = vsel %vm523_vm0, %v6531_v51, 0.0 }
 0x140   : > { %5649 = vpow2.f32 %v2464_v9  ;;  %v2391_v9 = vsub.f32 %v6242_v21, %v6444_v26 }
 0x142   : > { %2375 = vmax.xlane.f32.xlu1 %v2374_v15  ;;  %v2387_v15 = vsub.f32 %v6228_v14, %v6424_v7  ;;  %v2470_v7 = vmul.f32 1.442695, %v2393_v5 }
 0x144   : > { %2582 = vadd.xlane.f32.xlu0 %v2581_v23  ;;  %2573 = vadd.xlane.f32.xlu2 %v2572_v58  ;;  %v2578_v23 = vsel %vm523_vm0, %v6525_v62, 0.0  ;;  %v2462_v58 = vmul.f32 1.442695, %v2389_v0  ;;  %v2458_v16 = vmul.f32 1.442695, %v2387_v15  ;;  %v6547_v14 = vpop.eup %5645  ;;  %v2392_v0 = vsub.f32 %v6244_v22, %v6446_v36 }
 0x145   : > { %v6521_v11 = vpop.xlane.xlu1 %2249  ;;  %v6549_v19 = vpop.eup %5647  ;;  %v2590_v15 = vsel %vm523_vm0, %v6547_v14, 0.0 }
 0x146   : > { %v6555_v50 = vpop.eup %5649  ;;  %5651 = vpow2.f32 %v2462_v58  ;;  %v2468_v21 = vmul.f32 1.442695, %v2392_v0 }
 0x147   : > { %v6527_v4 = vpop.xlane.xlu2 %2255  ;;  %v6529_v18 = vpop.xlane.xlu0 %2267  ;;  %5653 = vpow2.f32 %v2458_v16  ;;  %v2602_v5 = vsel %vm523_vm0, %v6555_v50, 0.0 }
 0x148   : > { %5655 = vpow2.f32 %v2470_v7  ;;  %v2396_v7 = vsub.f32 %v6260_v30, %v6476_v39 }
 0x14a   : > { %2585 = vadd.xlane.f32.xlu1 %v2584_v38  ;;  %v2395_v38 = vsub.f32 %v6254_v27, %v6463_v31 }
 0x14c   : > { %2597 = vadd.xlane.f32.xlu0 %v2596_v45  ;;  %2579 = vadd.xlane.f32.xlu2 %v2578_v23  ;;  %v2587_v45 = vsel %vm523_vm0, %v6549_v19, 0.0  ;;  %v2466_v23 = vmul.f32 1.442695, %v2391_v9  ;;  %v6571_v22 = vpop.eup %5651  ;;  %v2474_v36 = vmul.f32 1.442695, %v2395_v38  ;;  %v2394_v9 = vsub.f32 %v6248_v24, %v6461_v25 }
 0x14d   : > { %v6545_v43 = vpop.xlane.xlu1 %2261  ;;  %v6573_v58 = vpop.eup %5653  ;;  %v2599_v0 = vsel %vm523_vm0, %v6571_v22, 0.0 }
 0x14e   : > { %v6579_v31 = vpop.eup %5655  ;;  %5657 = vpow2.f32 %v2466_v23  ;;  %v2472_v30 = vmul.f32 1.442695, %v2394_v9 }
 0x14f   : > { %v6551_v32 = vpop.xlane.xlu2 %2264  ;;  %v6553_v28 = vpop.xlane.xlu0 %2273  ;;  %5659 = vpow2.f32 %v2468_v21  ;;  %v2611_v38 = vsel %vm523_vm0, %v6579_v31, 0.0 }
 0x150   : > { %5661 = vpow2.f32 %v2474_v36  ;;  %v2398_v36 = vsub.f32 %v6266_v33, %v6480_v10 }
 0x152   : > { %2591 = vadd.xlane.f32.xlu1 %v2590_v15  ;;  %v2400_v15 = vsub.f32 %v6274_v37, %v6521_v11 }
 0x154   : > { %2603 = vadd.xlane.f32.xlu0 %v2602_v5  ;;  %2588 = vadd.xlane.f32.xlu2 %v2587_v45  ;;  %v2593_v5 = vsel %vm523_vm0, %v6573_v58, 0.0  ;;  %v2476_v45 = vmul.f32 1.442695, %v2396_v7  ;;  %v6595_v24 = vpop.eup %5657  ;;  %v2484_v25 = vmul.f32 1.442695, %v2400_v15  ;;  %v2397_v7 = vsub.f32 %v6268_v34, %v6499_v20 }
 0x155   : > { %v6569_v26 = vpop.xlane.xlu1 %2270  ;;  %v6597_v23 = vpop.eup %5659  ;;  %v2605_v9 = vsel %vm523_vm0, %v6595_v24, 0.0 }
 0x156   : > { %v6603_v11 = vpop.eup %5661  ;;  %5663 = vpow2.f32 %v2476_v45  ;;  %v2478_v33 = vmul.f32 1.442695, %v2397_v7 }
 0x157   : > { %v6575_v16 = vpop.xlane.xlu0 %2279  ;;  %v6577_v27 = vpop.xlane.xlu2 %2285  ;;  %5665 = vpow2.f32 %v2472_v30  ;;  %v2617_v15 = vsel %vm523_vm0, %v6603_v11, 0.0 }
 0x158   : > { %5667 = vpow2.f32 %v2484_v25  ;;  %v2401_v25 = vsub.f32 %v6282_v41, %v6503_v8 }
 0x15a   : > { %2600 = vadd.xlane.f32.xlu1 %v2599_v0  ;;  %v2402_v0 = vsub.f32 %v6280_v40, %v6527_v4 }
 0x15c   : > { %2612 = vadd.xlane.f32.xlu0 %v2611_v38  ;;  %2594 = vadd.xlane.f32.xlu2 %v2593_v5  ;;  %v2608_v38 = vsel %vm523_vm0, %v6597_v23, 0.0  ;;  %v2480_v5 = vmul.f32 1.442695, %v2398_v36  ;;  %v6619_v34 = vpop.eup %5663  ;;  %v2488_v20 = vmul.f32 1.442695, %v2402_v0  ;;  %v2399_v36 = vsub.f32 %v6270_v35, %v6482_v53 }
 0x15d   : > { %v6593_v39 = vpop.xlane.xlu1 %2276  ;;  %v6621_v45 = vpop.eup %5665  ;;  %v2620_v7 = vsel %vm523_vm0, %v6619_v34, 0.0 }
 0x15e   : > { %v6627_v4 = vpop.eup %5667  ;;  %5669 = vpow2.f32 %v2480_v5  ;;  %v2482_v41 = vmul.f32 1.442695, %v2399_v36 }
 0x15f   : > { %v6599_v21 = vpop.xlane.xlu0 %2288  ;;  %v6601_v37 = vpop.xlane.xlu2 %2291  ;;  %5671 = vpow2.f32 %v2478_v33  ;;  %v2632_v0 = vsel %vm523_vm0, %v6627_v4, 0.0 }
 0x160   : > { %5673 = vpow2.f32 %v2488_v20  ;;  %v2403_v20 = vsub.f32 %v6284_v42, %v6505_v54 }
 0x162   : > { %2606 = vadd.xlane.f32.xlu1 %v2605_v9  ;;  %v2405_v9 = vsub.f32 %v6296_v48, %v6551_v32 }
 0x164   : > { %2618 = vadd.xlane.f32.xlu0 %v2617_v15  ;;  %2609 = vadd.xlane.f32.xlu2 %v2608_v38  ;;  %v2614_v15 = vsel %vm523_vm0, %v6621_v45, 0.0  ;;  %v2486_v38 = vmul.f32 1.442695, %v2401_v25  ;;  %v6643_v53 = vpop.eup %5669  ;;  %v2494_v8 = vmul.f32 1.442695, %v2405_v9  ;;  %v2404_v25 = vsub.f32 %v6292_v46, %v6545_v43 }
 0x165   : > { %v6617_v10 = vpop.xlane.xlu1 %2282  ;;  %v6645_v5 = vpop.eup %5671  ;;  %v2626_v36 = vsel %vm523_vm0, %v6643_v53, 0.0 }
 0x166   : > { %v6651_v32 = vpop.eup %5673  ;;  %5675 = vpow2.f32 %v2486_v38  ;;  %v2492_v42 = vmul.f32 1.442695, %v2404_v25 }
 0x167   : > { %v6623_v30 = vpop.xlane.xlu0 %2294  ;;  %v6625_v40 = vpop.xlane.xlu2 %2300  ;;  %9246 = vst [vmem:[#allocation25_spill] sm:$0xff] %v6651_v32  ;;  %5677 = vpow2.f32 %v2482_v41  ;;  %v2638_v9 = vsel %vm523_vm0, %v6651_v32, 0.0 }
 0x168   : > { %5679 = vpow2.f32 %v2494_v8  ;;  %v2408_v8 = vsub.f32 %v6304_v52, %v6553_v28 }
 0x16a   : > { %2621 = vadd.xlane.f32.xlu1 %v2620_v7  ;;  %v2407_v7 = vsub.f32 %v6312_v57, %v6569_v26 }
 0x16c   : > { %2633 = vadd.xlane.f32.xlu0 %v2632_v0  ;;  %2615 = vadd.xlane.f32.xlu2 %v2614_v15  ;;  %v2623_v0 = vsel %vm523_vm0, %v6645_v5, 0.0  ;;  %v2490_v15 = vmul.f32 1.442695, %v2403_v20  ;;  %v6667_v46 = vpop.eup %5675  ;;  %v2498_v43 = vmul.f32 1.442695, %v2407_v7  ;;  %v2406_v20 = vsub.f32 %v6294_v47, %v6529_v18 }
 0x16d   : > { %v6641_v35 = vpop.xlane.xlu1 %2297  ;;  %v6669_v38 = vpop.eup %5677  ;;  %v2635_v25 = vsel %vm523_vm0, %v6667_v46, 0.0 }
 0x16e   : > { %v6675_v26 = vpop.eup %5679  ;;  %5681 = vpow2.f32 %v2490_v15  ;;  %v2496_v52 = vmul.f32 1.442695, %v2406_v20 }
 0x16f   : > { %v6647_v33 = vpop.xlane.xlu2 %2306  ;;  %v6649_v48 = vpop.xlane.xlu0 %2309  ;;  %9247 = vst [vmem:[#allocation26_spill] sm:$0xff] %v6675_v26  ;;  %5683 = vpow2.f32 %v2492_v42  ;;  %v2647_v7 = vsel %vm523_vm0, %v6675_v26, 0.0 }
 0x170   : > { %5685 = vpow2.f32 %v2498_v43  ;;  %v2410_v43 = vsub.f32 %v6316_v60, %v6575_v16 }
 0x172   : > { %2627 = vadd.xlane.f32.xlu1 %v2626_v36  ;;  %v2412_v36 = vsub.f32 %v6318_v61, %v6577_v27 }
 0x174   : > { %2639 = vadd.xlane.f32.xlu0 %v2638_v9  ;;  %2624 = vadd.xlane.f32.xlu2 %v2623_v0  ;;  %v2629_v9 = vsel %vm523_vm0, %v6669_v38, 0.0  ;;  %v2500_v0 = vmul.f32 1.442695, %v2408_v8  ;;  %v6691_v18 = vpop.eup %5681  ;;  %v2508_v28 = vmul.f32 1.442695, %v2412_v36  ;;  %v2409_v8 = vsub.f32 %v6314_v59, %v6593_v39 }
 0x175   : > { %v6665_v54 = vpop.xlane.xlu1 %2303  ;;  %9248 = vst [vmem:[#allocation27_spill] sm:$0xff] %v6691_v18  ;;  %v6693_v15 = vpop.eup %5683  ;;  %v2641_v20 = vsel %vm523_vm0, %v6691_v18, 0.0 }
 0x176   : > { %9249 = vst [vmem:[#allocation28_spill] sm:$0xff] %v6693_v15  ;;  %v6699_v27 = vpop.eup %5685  ;;  %5687 = vpow2.f32 %v2500_v0  ;;  %v2502_v60 = vmul.f32 1.442695, %v2409_v8 }
 0x177   : > { %v6671_v41 = vpop.xlane.xlu0 %2315  ;;  %v6673_v57 = vpop.xlane.xlu2 %2321  ;;  %9250 = vst [vmem:[#allocation29_spill] sm:$0xff] %v6699_v27  ;;  %5689 = vpow2.f32 %v2496_v52  ;;  %v2653_v36 = vsel %vm523_vm0, %v6699_v27, 0.0 }
 0x178   : > { %5691 = vpow2.f32 %v2508_v28  ;;  %v2413_v28 = vsub.f32 %v6328_v3, %v6599_v21 }
 0x17a   : > { %2636 = vadd.xlane.f32.xlu1 %v2635_v25  ;;  %v2414_v25 = vsub.f32 %v6330_v6, %v6601_v37 }
 0x17c   : > { %2648 = vadd.xlane.f32.xlu0 %v2647_v7  ;;  %2630 = vadd.xlane.f32.xlu2 %v2629_v9  ;;  %v2644_v7 = vsel %vm523_vm0, %v6693_v15, 0.0  ;;  %v2504_v9 = vmul.f32 1.442695, %v2410_v43  ;;  %v6715_v59 = vpop.eup %5687  ;;  %v2512_v39 = vmul.f32 1.442695, %v2414_v25  ;;  %v2411_v43 = vsub.f32 %v6326_v2, %v6617_v10 }
 0x17d   : > { %v6689_v47 = vpop.xlane.xlu1 %2312  ;;  %9251 = vst [vmem:[#allocation30_spill] sm:$0xff] %v6715_v59  ;;  %v6717_v0 = vpop.eup %5689  ;;  %v2656_v8 = vsel %vm523_vm0, %v6715_v59, 0.0 }
 0x17e   : > { %9252 = vst [vmem:[#allocation31_spill] sm:$0xff] %v6717_v0  ;;  %v6723_v37 = vpop.eup %5691  ;;  %5693 = vpow2.f32 %v2504_v9  ;;  %v2506_v3 = vmul.f32 1.442695, %v2411_v43 }
 0x17f   : > { %v6695_v42 = vpop.xlane.xlu0 %2324  ;;  %v6697_v61 = vpop.xlane.xlu2 %2327  ;;  %9253 = vst [vmem:[#allocation32_spill] sm:$0xff] %v6723_v37  ;;  %5695 = vpow2.f32 %v2502_v60  ;;  %v2668_v25 = vsel %vm523_vm0, %v6723_v37, 0.0 }
 0x180   : > { %5697 = vpow2.f32 %v2512_v39  ;;  %v2415_v39 = vsub.f32 %v6340_v13, %v6623_v30 }
 0x182   : > { %2642 = vadd.xlane.f32.xlu1 %v2641_v20  ;;  %v2416_v20 = vsub.f32 %v6338_v12, %v6641_v35 }
 0x184   : > { %2654 = vadd.xlane.f32.xlu0 %v2653_v36  ;;  %2645 = vadd.xlane.f32.xlu2 %v2644_v7  ;;  %v2650_v36 = vsel %vm523_vm0, %v6717_v0, 0.0  ;;  %v2510_v7 = vmul.f32 1.442695, %v2413_v28  ;;  %v6739_v2 = vpop.eup %5693  ;;  %v2516_v10 = vmul.f32 1.442695, %v2416_v20  ;;  %v2419_v28 = vsub.f32 %v6354_v29, %v6647_v33 }
 0x185   : > { %v6713_v16 = vpop.xlane.xlu1 %2318  ;;  %9254 = vst [vmem:[#allocation33_spill] sm:$0xff] %v6739_v2  ;;  %v6741_v9 = vpop.eup %5695  ;;  %v2662_v43 = vsel %vm523_vm0, %v6739_v2, 0.0 }
 0x186   : > { %9255 = vst [vmem:[#allocation34_spill] sm:$0xff] %v6741_v9  ;;  %v6747_v35 = vpop.eup %5697  ;;  %5699 = vpow2.f32 %v2510_v7  ;;  %v2514_v7 = vmul.f32 1.442695, %v2415_v39  ;;  %v2522_v13 = vmul.f32 1.442695, %v2419_v28  ;;  %v9262_v28 = vld [vmem:[#allocation5_spill] sm:$0xff] }
 0x187   : > { %v6719_v52 = vpop.xlane.xlu0 %2330  ;;  %v6721_v6 = vpop.xlane.xlu2 %2336  ;;  %9256 = vst [vmem:[#allocation35_spill] sm:$0xff] %v6747_v35  ;;  %5701 = vpow2.f32 %v2506_v3 }
 0x188   : > { %5703 = vpow2.f32 %v2516_v10 }
 0x189   : > { %5705 = vpow2.f32 %v2514_v7 }
 0x18a   : > { %2657 = vadd.xlane.f32.xlu1 %v2656_v8  ;;  %v9257_v8 = vld [vmem:[#allocation3_spill] sm:$0xff]  ;;  %5707 = vpow2.f32 %v2522_v13 }
 0x18b   : > { %v2418_v20 = vsub.f32 %v9257_v8, %v6665_v54  ;;  %v9261_v8 = vld [vmem:[#allocation2_spill] sm:$0xff] }
 0x18c   : > { %2669 = vadd.xlane.f32.xlu0 %v2668_v25  ;;  %2651 = vadd.xlane.f32.xlu2 %v2650_v36  ;;  %v2674_v25 = vsel %vm523_vm0, %v6747_v35, 0.0  ;;  %v2659_v36 = vsel %vm523_vm0, %v6741_v9, 0.0  ;;  %v6763_v29 = vpop.eup %5699  ;;  %v2417_v39 = vsub.f32 %v9261_v8, %v6625_v40 }
 0x18d   : > { %v6737_v21 = vpop.xlane.xlu1 %2333  ;;  %9258 = vst [vmem:[#allocation3_spill] sm:$0xff] %v6763_v29  ;;  %v2520_v33 = vmul.f32 1.442695, %v2418_v20  ;;  %v6765_v3 = vpop.eup %5701  ;;  %v9263_v20 = vld [vmem:[#allocation8_spill] sm:$0xff] }
 0x18e   : > { %9259 = vst [vmem:[#allocation36_spill] sm:$0xff] %v6765_v3  ;;  %v2423_v2 = vsub.f32 %v9263_v20, %v6713_v16  ;;  %v2665_v7 = vsel %vm523_vm0, %v6765_v3, 0.0  ;;  %v2518_v35 = vmul.f32 1.442695, %v2417_v39  ;;  %v9267_v39 = vld [vmem:[#allocation4_spill] sm:$0xff] }
 0x18f   : > { %v6743_v60 = vpop.xlane.xlu2 %2342  ;;  %v6745_v12 = vpop.xlane.xlu0 %2345  ;;  %5709 = vpow2.f32 %v2520_v33 }
 0x190   : > { %v2530_v33 = vmul.f32 1.442695, %v2423_v2  ;;  %5711 = vpow2.f32 %v2518_v35  ;;  %v9269_v2 = vld [vmem:[#allocation9_spill] sm:$0xff] }
 0x191   : > { %v2425_v3 = vsub.f32 %v9269_v2, %v6695_v42  ;;  %v9270_v42 = vld [vmem:[#allocation7_spill] sm:$0xff] }
 0x192   : > { %2663 = vadd.xlane.f32.xlu1 %v2662_v43  ;;  %v6771_v43 = vpop.eup %5703 }
 0x193   : > { %9260 = vst [vmem:[#allocation37_spill] sm:$0xff] %v6771_v43  ;;  %v2680_v9 = vsel %vm523_vm0, %v6771_v43, 0.0  ;;  %v6787_v13 = vpop.eup %5705  ;;  %v2534_v2 = vmul.f32 1.442695, %v2425_v3  ;;  %v9276_v3 = vld [vmem:[#allocation13_spill] sm:$0xff]  ;;  %v9278_v43 = vld [vmem:[#allocation16_spill] sm:$0xff] }
 0x194   : > { %2675 = vadd.xlane.f32.xlu0 %v2674_v25  ;;  %2660 = vadd.xlane.f32.xlu2 %v2659_v36  ;;  %v2421_v25 = vsub.f32 %v9262_v28, %v6689_v47  ;;  %v2671_v36 = vsel %vm523_vm0, %v6763_v29, 0.0  ;;  %9264 = vst [vmem:[#allocation2_spill] sm:$0xff] %v6787_v13  ;;  %v6789_v8 = vpop.eup %5707  ;;  %v2431_v59 = vsub.f32 %v9278_v43, %v6743_v60  ;;  %v9282_v43 = vld [vmem:[#allocation18_spill] sm:$0xff] }
 0x195   : > { %v6761_v30 = vpop.xlane.xlu1 %2339  ;;  %9265 = vst [vmem:[#allocation5_spill] sm:$0xff] %v6789_v8 }
 0x196   : > { %v2526_v40 = vmul.f32 1.442695, %v2421_v25  ;;  %v9268_v25 = vld [vmem:[#allocation6_spill] sm:$0xff] }
 0x197   : > { %v6767_v10 = vpop.xlane.xlu0 %2351  ;;  %v6769_v54 = vpop.xlane.xlu2 %2357  ;;  %v2422_v20 = vsub.f32 %v9268_v25, %v6671_v41  ;;  %v460_v25 = vld [vmem:[%s6809_s27 + $0x8] sm:$0xff] }
 0x198   : > { %5713 = vpow2.f32 %v2526_v40  ;;  %3829 = vmatpush.msra.mxu1 %v460_v25  ;;  %v9277_v25 = vld [vmem:[#allocation11_spill] sm:$0xff] }
 0x199   : > { %5715 = vpow2.f32 %v2530_v33  ;;  %v2528_v40 = vmul.f32 1.442695, %v2422_v20  ;;  %v2424_v33 = vsub.f32 %v9270_v42, %v6673_v57 }
 0x19a   : > { %2672 = vadd.xlane.f32.xlu1 %v2671_v36  ;;  %v6795_v36 = vpop.eup %5709 }
 0x19b   : > { %9266 = vst [vmem:[#allocation8_spill] sm:$0xff] %v6795_v36  ;;  %v2686_v41 = vsel %vm523_vm0, %v6795_v36, 0.0  ;;  %v2532_v42 = vmul.f32 1.442695, %v2424_v33  ;;  %v2429_v36 = vsub.f32 %v9276_v3, %v6721_v6  ;;  %v9279_v6 = vld [vmem:[#allocation15_spill] sm:$0xff] }
 0x19c   : > { %2681 = vadd.xlane.f32.xlu0 %v2680_v9  ;;  %2666 = vadd.xlane.f32.xlu2 %v2665_v7  ;;  %v2420_v9 = vsub.f32 %v9267_v39, %v6649_v48  ;;  %v2677_v7 = vsel %vm523_vm0, %v6787_v13, 0.0  ;;  %v2689_v48 = vsel %vm523_vm0, %v6789_v8, 0.0  ;;  %v9272_v13 = vld [vmem:[#allocation10_spill] sm:$0xff]  ;;  %v2432_v33 = vsub.f32 %v9279_v6, %v6745_v12 }
 0x19d   : > { %v6785_v47 = vpop.xlane.xlu1 %2348  ;;  %v2426_v29 = vsub.f32 %v9272_v13, %v6697_v61  ;;  %v2546_v12 = vmul.f32 1.442695, %v2431_v59 }
 0x19e   : > { %v2524_v35 = vmul.f32 1.442695, %v2420_v9  ;;  %v9274_v9 = vld [vmem:[#allocation12_spill] sm:$0xff]  ;;  %v2548_v6 = vmul.f32 1.442695, %v2432_v33 }
 0x19f   : > { %v6791_v16 = vpop.xlane.xlu0 %2360  ;;  %v6793_v28 = vpop.xlane.xlu2 %2363  ;;  %v2536_v13 = vmul.f32 1.442695, %v2426_v29  ;;  %v2542_v29 = vmul.f32 1.442695, %v2429_v36  ;;  %v9284_v36 = vld [vmem:[#allocation19_spill] sm:$0xff] }
 0x1a0   : > { %5717 = vpow2.f32 %v2524_v35 }
 0x1a1   : > { %5719 = vpow2.f32 %v2528_v40 }
 0x1a2   : > { %2678 = vadd.xlane.f32.xlu1 %v2677_v7  ;;  %v6820_v7 = vpop.eup %5711  ;;  %5721 = vpow2.f32 %v2534_v2 }
 0x1a3   : > { %9271 = vst [vmem:[#allocation4_spill] sm:$0xff] %v6820_v7  ;;  %v6824_v8 = vpop.eup %5713  ;;  %v2683_v61 = vsel %vm523_vm0, %v6820_v7, 0.0  ;;  %5723 = vpow2.f32 %v2532_v42  ;;  %v2436_v42 = vsub.f32 %v9284_v36, %v6769_v54  ;;  %v9286_v54 = vld [vmem:[#allocation17_spill] sm:$0xff] }
 0x1a4   : > { %2690 = vadd.xlane.f32.xlu0 %v2689_v48  ;;  %2687 = vadd.xlane.f32.xlu2 %v2686_v41  ;;  %9273 = vst [vmem:[#allocation6_spill] sm:$0xff] %v6824_v8  ;;  %v2427_v48 = vsub.f32 %v9274_v9, %v6719_v52  ;;  %v6832_v57 = vpop.eup %5715  ;;  %v2428_v52 = vsub.f32 %v9277_v25, %v6737_v21  ;;  %v2695_v40 = vsel %vm523_vm0, %v6824_v8, 0.0  ;;  %v9280_v21 = vld [vmem:[#allocation14_spill] sm:$0xff]  ;;  %5725 = vpow2.f32 %v2536_v13 }
 0x1a5   : > { %v6817_v39 = vpop.xlane.xlu1 %2354  ;;  %9275 = vst [vmem:[#allocation9_spill] sm:$0xff] %v6832_v57  ;;  %v2701_v35 = vsel %vm523_vm0, %v6832_v57, 0.0  ;;  %v2430_v2 = vsub.f32 %v9280_v21, %v6761_v30  ;;  %v2433_v21 = vsub.f32 %v9286_v54, %v6785_v47  ;;  %v2556_v33 = vmul.f32 1.442695, %v2436_v42  ;;  %v461_v57 = vld [vmem:[%s6809_s27 + $0x10] sm:$0xff]  ;;  %v463_v8 = vld [vmem:[%s6809_s27 + $0x20] sm:$0xff] }
 0x1a6   : > { %v2538_v9 = vmul.f32 1.442695, %v2427_v48  ;;  %v6852_v3 = vpop.eup %5717  ;;  %v2540_v60 = vmul.f32 1.442695, %v2428_v52  ;;  %v459_v52 = vld [vmem:[%s6809_s27] sm:$0xff]  ;;  %3852 = vmatpush.msra.mxu2 %v461_v57 }
 0x1a7   : > { %v6828_v41 = vpop.xlane.xlu0 %2366  ;;  %v6830_v20 = vpop.xlane.xlu2 %2372  ;;  %9281 = vst [vmem:[#allocation7_spill] sm:$0xff] %v6852_v3  ;;  %v2544_v13 = vmul.f32 1.442695, %v2430_v2  ;;  %3806 = vmatpush.msra.mxu0 %v459_v52 }
 0x1a8   : > { %v6856_v25 = vpop.eup %5719  ;;  %5727 = vpow2.f32 %v2538_v9  ;;  %v462_v9 = vld [vmem:[%s6809_s27 + $0x18] sm:$0xff] }
 0x1a9   : > { %9283 = vst [vmem:[#allocation10_spill] sm:$0xff] %v6856_v25  ;;  %v2698_v2 = vsel %vm523_vm0, %v6856_v25, 0.0  ;;  %3875 = vmatpush.msra.mxu3 %v462_v9  ;;  %3898 = vmatpush.msrb.mxu0 %v463_v8 }
 0x1aa   : > { %2684 = vadd.xlane.f32.xlu1 %v2683_v61  ;;  %v2434_v61 = vsub.f32 %v9282_v43, %v6767_v10  ;;  %v2692_v10 = vsel %vm523_vm0, %v6852_v3, 0.0 }
 0x1ac   : > { %2702 = vadd.xlane.f32.xlu0 %v2701_v35  ;;  %2696 = vadd.xlane.f32.xlu2 %v2695_v40  ;;  %v6864_v40 = vpop.eup %5721  ;;  %v2552_v59 = vmul.f32 1.442695, %v2434_v61 }
 0x1ad   : > { %v6850_v48 = vpop.xlane.xlu1 %2369  ;;  %9285 = vst [vmem:[#allocation12_spill] sm:$0xff] %v6864_v40  ;;  %v6873_v43 = vpop.eup %5723 }
 0x1ae   : > { %9287 = vst [vmem:[#allocation13_spill] sm:$0xff] %v6873_v43  ;;  %v6879_v36 = vpop.eup %5725 }
 0x1af   : > { %v6860_v35 = vpop.xlane.xlu0 %2576  ;;  %v6862_v30 = vpop.xlane.xlu2 %2378  ;;  %9288 = vst [vmem:[#allocation11_spill] sm:$0xff] %v6879_v36  ;;  %v2710_v25 = vsel %vm523_vm0, %v6879_v36, 0.0 }
 0x1b0   : > { %5729 = vrcp.f32 %v6860_v35  ;;  %vm2784_vm2 = vweird.f32 %v6860_v35 }
 0x1b1   : > { %5731 = vpow2.f32 %v2542_v29  ;;  %v2707_v29 = vsel %vm523_vm0, %v6864_v40, 0.0 }
 0x1b2   : > { %5733 = vpow2.f32 %v2540_v60  ;;  %2693 = vadd.xlane.f32.xlu1 %v2692_v10  ;;  %v6881_v60 = vpop.eup %5727  ;;  %v9291_v10 = vld [vmem:[#allocation21_spill] sm:$0xff] }
 0x1b3   : > { %5735 = vpow2.f32 %v2546_v12  ;;  %9289 = vst [vmem:[#allocation16_spill] sm:$0xff] %v6881_v60  ;;  %v2550_v12 = vmul.f32 1.442695, %v2433_v21  ;;  %v2437_v52 = vsub.f32 %v9291_v10, %v6791_v16  ;;  %v2713_v16 = vsel %vm523_vm0, %v6881_v60, 0.0  ;;  %v9296_v10 = vld [vmem:[#allocation22_spill] sm:$0xff] }
 0x1b4   : > { %5737 = vpow2.f32 %v2548_v6  ;;  %2708 = vadd.xlane.f32.xlu0 %v2707_v29  ;;  %2699 = vadd.xlane.f32.xlu2 %v2698_v2  ;;  %v2438_v40 = vsub.f32 %v9296_v10, %v6793_v28  ;;  %v2790_v60 = vand.u32 2147483648, %v6860_v35  ;;  %v2788_v28 = vand.u32 2147483647, %v6860_v35 }
 0x1b5   : > { %5739 = vpow2.f32 %v2544_v13  ;;  %v6883_v47 = vpop.xlane.xlu1 %2375 }
 0x1b6   : > { %v5730_v61 = vpop.eup %5729  ;;  %5741 = vpow2.f32 %v2552_v59  ;;  %v9294_v59 = vld [vmem:[#allocation20_spill] sm:$0xff]  ;;  %v2791_v57 = vor.u32 1.1754944e-38, %v2790_v60  ;;  %vm2789_vm4 = vcmp.eq.f32.partialorder %v2788_v28, 8.507059e+37  ;;  %v2442_v37 = vsub.f32 %v6497_v49, %v6883_v47 }
 0x1b7   : > { %v6885_v42 = vpop.eup %5731  ;;  %5743 = vpow2.f32 %v2556_v33  ;;  %v2780_v9 = vmul.f32 %v5730_v61, %v6860_v35  ;;  %v6890_v54 = vpop.xlane.xlu0 %2582  ;;  %v2435_v21 = vsub.f32 %v9294_v59, %v6817_v39  ;;  %v2704_v39 = vsel %vm523_vm0, %v6873_v43, 0.0  ;;  %v9304_v28 = vld [vmem:[#allocation24_spill] sm:$0xff] }
 0x1b8   : > { %9290 = vst [vmem:[#allocation15_spill] sm:$0xff] %v6885_v42  ;;  %v6892_v6 = vpop.xlane.xlu2 %2573  ;;  %v6894_v29 = vpop.eup %5733  ;;  %5745 = vrcp.f32 %v6890_v54  ;;  %vm2785_vm1 = vweird.f32 %v5730_v61  ;;  %vm2814_vm7 = vweird.f32 %v6890_v54 }
 0x1b9   : > { %9292 = vst [vmem:[#allocation14_spill] sm:$0xff] %v6894_v29  ;;  %v6897_v13 = vpop.eup %5735  ;;  %v2781_v33 = vsub.f32 1.0, %v2780_v9  ;;  %5747 = vrcp.f32 %v6892_v6  ;;  %v2558_v9 = vmul.f32 1.442695, %v2437_v52  ;;  %v2554_v10 = vmul.f32 1.442695, %v2435_v21  ;;  %vm6928_vm3 = vmor %vm2784_vm2, %vm2785_vm1 }
 0x1ba   : > { %9293 = vst [vmem:[#allocation18_spill] sm:$0xff] %v6897_v13  ;;  %v6904_v2 = vpop.eup %5737  ;;  %5749 = vpow2.f32 %v2550_v12  ;;  %2714 = vadd.xlane.f32.xlu1 %v2713_v16  ;;  %v2725_v7 = vsel %vm523_vm0, %v6897_v13, 0.0  ;;  %vm2769_vm9 = vweird.f32 %v6892_v6 }
 0x1bb   : > { %9295 = vst [vmem:[#allocation19_spill] sm:$0xff] %v6904_v2  ;;  %v6912_v59 = vpop.eup %5739  ;;  %v2782_v3 = vmul.f32 %v5730_v61, %v2781_v33  ;;  %v2560_v33 = vmul.f32 1.442695, %v2438_v40 }
 0x1bc   : > { %9297 = vst [vmem:[#allocation17_spill] sm:$0xff] %v6912_v59  ;;  %v6917_v12 = vpop.eup %5741  ;;  %2711 = vadd.xlane.f32.xlu0 %v2710_v25  ;;  %2705 = vadd.xlane.f32.xlu2 %v2704_v39  ;;  %v2719_v25 = vsel %vm523_vm0, %v6885_v42, 0.0  ;;  %v9303_v42 = vld [vmem:[#allocation23_spill] sm:$0xff] }
 0x1bd   : > { %9298 = vst [vmem:[#allocation21_spill] sm:$0xff] %v6917_v12  ;;  %v6920_v16 = vpop.eup %5743  ;;  %v2783_v36 = vadd.f32 %v5730_v61, %v2782_v3  ;;  %v6923_v43 = vpop.xlane.xlu1 %2585  ;;  %v2716_v3 = vsel %vm523_vm0, %v6894_v29, 0.0  ;;  %v2439_v0 = vsub.f32 %v9303_v42, %v6828_v41  ;;  %v2722_v41 = vsel %vm523_vm0, %v6912_v59, 0.0 }
 0x1be   : > { %9299 = vst [vmem:[#allocation20_spill] sm:$0xff] %v6920_v16  ;;  %v6925_v52 = vpop.eup %5745  ;;  %5751 = vrcp.f32 %v6923_v43  ;;  %v6964_v42 = vsel %vm523_vm0, %v6917_v12, 0.0  ;;  %v2443_v59 = vsub.f32 %v6478_v55, %v6862_v30  ;;  %vm2829_vm2 = vweird.f32 %v6923_v43 }
 0x1bf   : > { %v6937_v35 = vpop.eup %5747  ;;  %5753 = vpow2.f32 %v2558_v9  ;;  %v2787_v8 = vsel %vm6928_vm3, %v5730_v61, %v2783_v36  ;;  %v2810_v40 = vmul.f32 %v6925_v52, %v6890_v54  ;;  %v6943_v21 = vpop.xlane.xlu0 %2597  ;;  %v6957_v61 = vsel %vm523_vm0, %v6904_v2, 0.0 }
 0x1c0   : > { %v6945_v39 = vpop.xlane.xlu2 %2579  ;;  %v6947_v27 = vpop.eup %5749  ;;  %v2765_v9 = vmul.f32 %v6937_v35, %v6892_v6  ;;  %5755 = vpow2.f32 %v2554_v10  ;;  %v2792_v36 = vsel %vm2789_vm4, %v2791_v57, %v2787_v8  ;;  %v2441_v10 = vsub.f32 %v9304_v28, %v6830_v20 }
 0x1c1   : > { %9302 = vst [vmem:[#allocation22_spill] sm:$0xff] %v6947_v27  ;;  %v2811_v60 = vsub.f32 1.0, %v2810_v40  ;;  %5757 = vrcp.f32 %v6945_v39  ;;  %v6971_v57 = vsel %vm523_vm0, %v6920_v16, 0.0  ;;  %v2793_v2 = vmul.f32 %v6486_v17, %v2792_v36 }
 0x1c2   : > { %v2766_v29 = vsub.f32 1.0, %v2765_v9  ;;  %2720 = vadd.xlane.f32.xlu1 %v2719_v25  ;;  %5759 = vpow2.f32 %v2560_v33  ;;  %v2562_v25 = vmul.f32 1.442695, %v2439_v0  ;;  %v2731_v20 = vsel %vm523_vm0, %v6947_v27, 0.0 }
 0x1c3   : > { %v2812_v8 = vmul.f32 %v6925_v52, %v2811_v60  ;;  %v2440_v60 = vsub.f32 %v6474_v44, %v6850_v48  ;;  %vm2815_vm5 = vweird.f32 %v6925_v52  ;;  %vm2770_vm6 = vweird.f32 %v6937_v35  ;;  %5560 = vmatmul.msk.f32.vlgmr.msra.gmra.mxu1 %vm523_vm0, %v2793_v2  ;;  %v464_v44 = vld [vmem:[%s6809_s27 + $0x28] sm:$0xff]  ;;  %v465_v48 = vld [vmem:[%s6809_s27 + $0x30] sm:$0xff] }
 0x1c4   : > { %v6973_v40 = vpop.eup %5751  ;;  %v2767_v9 = vmul.f32 %v6937_v35, %v2766_v29  ;;  %2717 = vadd.xlane.f32.xlu0 %v2716_v3  ;;  %2726 = vadd.xlane.f32.xlu2 %v2725_v7  ;;  %5761 = vrcp.f32 %v6943_v21  ;;  %v2566_v36 = vmul.f32 1.442695, %v2441_v10  ;;  %v2820_v28 = vand.u32 2147483648, %v6890_v54  ;;  %vm7005_vm8 = vmor %vm2814_vm7, %vm2815_vm5 }
 0x1c5   : > { %v6979_v33 = vpop.eup %5753  ;;  %v6986_v0 = vpop.xlane.xlu1 %2591  ;;  %v2813_v17 = vadd.f32 %v6925_v52, %v2812_v8  ;;  %v2825_v3 = vmul.f32 %v6973_v40, %v6923_v43  ;;  %v2775_v8 = vand.u32 2147483648, %v6892_v6  ;;  %3921 = vmatpush.msrb.mxu1 %v464_v44  ;;  %3944 = vmatpush.msrb.mxu2 %v465_v48  ;;  %v2818_v16 = vand.u32 2147483647, %v6890_v54  ;;  %vm7024_vm10 = vmor %vm2769_vm9, %vm2770_vm6 }
 0x1c6   : > { %9305 = vst [vmem:[#allocation23_spill] sm:$0xff] %v6979_v33  ;;  %v2768_v29 = vadd.f32 %v6937_v35, %v2767_v9  ;;  %5763 = vrcp.f32 %v6986_v0  ;;  %v6996_v7 = vpop.eup %5755  ;;  %v2773_v10 = vand.u32 2147483647, %v6892_v6  ;;  %v7016_v44 = vsel %vm523_vm0, %v6979_v33, 0.0 }
 0x1c7   : > { %v7001_v9 = vpop.eup %5757  ;;  %v7012_v12 = vpop.xlane.xlu0 %2603  ;;  %5765 = vpow2.f32 %v2562_v25  ;;  %v2564_v27 = vmul.f32 1.442695, %v2440_v60  ;;  %v2817_v33 = vsel %vm7005_vm8, %v6925_v52, %v2813_v17  ;;  %v2826_v55 = vsub.f32 1.0, %v2825_v3 }
 0x1c8   : > { %v7018_v48 = vpop.eup %5759  ;;  %v2795_v6 = vmul.f32 %v7001_v9, %v6945_v39  ;;  %v7030_v13 = vpop.xlane.xlu2 %2588  ;;  %v2772_v25 = vsel %vm7024_vm10, %v6937_v35, %v2768_v29  ;;  %v2737_v30 = vsel %vm523_vm0, %v6996_v7, 0.0  ;;  %v2821_v26 = vor.u32 1.1754944e-38, %v2820_v28 }
 0x1c9   : > { %v2776_v15 = vor.u32 1.1754944e-38, %v2775_v8  ;;  %vm2819_vm11 = vcmp.eq.f32.partialorder %v2818_v16, 8.507059e+37  ;;  %vm2774_vm12 = vcmp.eq.f32.partialorder %v2773_v10, 8.507059e+37  ;;  %5767 = vrcp.f32 %v7030_v13 }
 0x1ca   : > { %2723 = vadd.xlane.f32.xlu1 %v2722_v41  ;;  %v7040_v60 = vpop.eup %5761  ;;  %v2796_v18 = vsub.f32 1.0, %v2795_v6  ;;  %v2746_v52 = vsel %vm523_vm0, %v7018_v48, 0.0  ;;  %5769 = vpow2.f32 %v2566_v36  ;;  %v2822_v35 = vsel %vm2819_vm11, %v2821_v26, %v2817_v33 }
 0x1cb   : > { %v2777_v41 = vsel %vm2774_vm12, %v2776_v15, %v2772_v25  ;;  %5771 = vpow2.f32 %v2564_v27  ;;  %v2570_v47 = vmul.f32 1.442695, %v2443_v59  ;;  %v2827_v17 = vmul.f32 %v6973_v40, %v2826_v55  ;;  %v467_v59 = vld [vmem:[%s6809_s27 + $0x40] sm:$0xff] }
 0x1cc   : > { %v7044_v32 = vpop.eup %5763  ;;  %2738 = vadd.xlane.f32.xlu0 %v2737_v30  ;;  %2732 = vadd.xlane.f32.xlu2 %v2731_v20  ;;  %v2797_v49 = vmul.f32 %v7001_v9, %v2796_v18  ;;  %v2885_v16 = vmul.f32 %v7040_v60, %v6943_v21  ;;  %v2568_v20 = vmul.f32 1.442695, %v2442_v37  ;;  %v2833_v28 = vand.u32 2147483647, %v6923_v43  ;;  %v469_v30 = vld [vmem:[%s6809_s27 + $0x50] sm:$0xff] }
 0x1cd   : > { %v7053_v29 = vpop.xlane.xlu1 %2600  ;;  %v7055_v3 = vpop.eup %5765  ;;  %v2855_v26 = vmul.f32 %v7044_v32, %v6986_v0  ;;  %5773 = vrcp.f32 %v7012_v12  ;;  %vm2800_vm13 = vweird.f32 %v7001_v9  ;;  %v2778_v15 = vmul.f32 %v6501_v63, %v2777_v41 }
 0x1ce   : > { %v2798_v18 = vadd.f32 %v7001_v9, %v2797_v49  ;;  %v2823_v27 = vmul.f32 %v6509_v1, %v2822_v35  ;;  %v2835_v33 = vand.u32 2147483648, %v6923_v43  ;;  %vm2799_vm14 = vweird.f32 %v6945_v39 }
 0x1cf   : > { %v2805_v37 = vand.u32 2147483648, %v6945_v39  ;;  %5775 = vrcp.f32 %v7053_v29  ;;  %v7070_v36 = vpop.eup %5767  ;;  %v2828_v8 = vadd.f32 %v6973_v40, %v2827_v17  ;;  %vm2830_vm15 = vweird.f32 %v6973_v40  ;;  %5559 = vmatmul.msk.f32.vlgmr.msra.gmra.mxu0 %vm523_vm0, %v2778_v15  ;;  %v7077_v1 = vpop.xlane.xlu0 %2612  ;;  %vm7083_vm1 = vmor %vm2799_vm14, %vm2800_vm13 }
 0x1d0   : > { %v2886_v2 = vsub.f32 1.0, %v2885_v16  ;;  %v2803_v63 = vand.u32 2147483647, %v6945_v39  ;;  %5562 = vmatmul.msk.f32.vlgmr.msra.gmra.mxu3 %vm523_vm0, %v2823_v27  ;;  %v7079_v10 = vpop.eup %5769  ;;  %5777 = vpow2.f32 %v2570_v47  ;;  %v2856_v6 = vsub.f32 1.0, %v2855_v26  ;;  %3990 = vmatpush.msra.mxu0 %v467_v59  ;;  %vm7109_vm4 = vmor %vm2829_vm2, %vm2830_vm15  ;;  %v466_v16 = vld [vmem:[%s6809_s27 + $0x38] sm:$0xff] }
 0x1d1   : > { %v2840_v25 = vmul.f32 %v7070_v36, %v7030_v13  ;;  %v2749_v39 = vsel %vm523_vm0, %v7055_v3, 0.0  ;;  %v7092_v55 = vpop.eup %5771  ;;  %5779 = vpow2.f32 %v2568_v20  ;;  %vm7095_vm3 = vcmp.eq.f32.partialorder %v2833_v28, 8.507059e+37  ;;  %v468_v20 = vld [vmem:[%s6809_s27 + $0x48] sm:$0xff]  ;;  %3967 = vmatpush.msrb.mxu3 %v466_v16 }
 0x1d2   : > { %2729 = vadd.xlane.f32.xlu1 %v6957_v61  ;;  %v2802_v35 = vsel %vm7083_vm1, %v7001_v9, %v2798_v18  ;;  %v7102_v61 = vpop.xlane.xlu2 %2594  ;;  %v2836_v49 = vor.u32 1.1754944e-38, %v2835_v33  ;;  %vm2889_vm5 = vweird.f32 %v6943_v21  ;;  %v2806_v47 = vor.u32 1.1754944e-38, %v2805_v37  ;;  %4013 = vmatpush.msra.mxu1 %v468_v20 }
 0x1d3   : > { %v7105_v41 = vpop.eup %5773  ;;  %v2841_v17 = vsub.f32 1.0, %v2840_v25  ;;  %v2832_v9 = vsel %vm7109_vm4, %v6973_v40, %v2828_v8  ;;  %vm2804_vm6 = vcmp.eq.f32.partialorder %v2803_v63, 8.507059e+37  ;;  %v2895_v26 = vand.u32 2147483648, %v6943_v21 }
 0x1d4   : > { %2735 = vadd.xlane.f32.xlu2 %v6964_v42  ;;  %2747 = vadd.xlane.f32.xlu0 %v2746_v52  ;;  %v2887_v42 = vmul.f32 %v7040_v60, %v2886_v2  ;;  %v2893_v52 = vand.u32 2147483647, %v6943_v21  ;;  %v2807_v18 = vsel %vm2804_vm6, %v2806_v47, %v2802_v35  ;;  %v2857_v15 = vmul.f32 %v7044_v32, %v2856_v6 }
 0x1d5   : > { %v7121_v28 = vpop.eup %5775  ;;  %v2842_v27 = vmul.f32 %v7070_v36, %v2841_v17  ;;  %vm2890_vm7 = vweird.f32 %v7040_v60  ;;  %v2863_v40 = vand.u32 2147483647, %v6986_v0  ;;  %v2915_v59 = vmul.f32 %v7105_v41, %v7012_v12  ;;  %v7138_v2 = vpop.xlane.xlu1 %2606 }
 0x1d6   : > { %5781 = vrcp.f32 %v7102_v61  ;;  %v7131_v33 = vpop.eup %5777  ;;  %v2837_v37 = vsel %vm7095_vm3, %v2836_v49, %v2832_v9  ;;  %vm2844_vm8 = vweird.f32 %v7030_v13  ;;  %vm2845_vm9 = vweird.f32 %v7070_v36  ;;  %vm7174_vm13 = vmor %vm2889_vm5, %vm2890_vm7 }
 0x1d7   : > { %v2843_v8 = vadd.f32 %v7070_v36, %v2842_v27  ;;  %v7140_v63 = vpop.eup %5779  ;;  %v2850_v54 = vand.u32 2147483648, %v7030_v13  ;;  %v2900_v6 = vmul.f32 %v7121_v28, %v7053_v29  ;;  %5783 = vrcp.f32 %v7077_v1  ;;  %vm7161_vm12 = vmor %vm2844_vm8, %vm2845_vm9 }
 0x1d8   : > { %v2808_v25 = vmul.f32 %v6525_v62, %v2807_v18  ;;  %v2888_v35 = vadd.f32 %v7040_v60, %v2887_v42  ;;  %v2858_v43 = vadd.f32 %v7044_v32, %v2857_v15  ;;  %vm2860_vm10 = vweird.f32 %v7044_v32 }
 0x1d9   : > { %v2848_v49 = vand.u32 2147483647, %v7030_v13  ;;  %vm7152_vm11 = vcmp.eq.f32.partialorder %v2893_v52, 8.507059e+37  ;;  %v2865_v17 = vand.u32 2147483648, %v6986_v0  ;;  %v2916_v9 = vsub.f32 1.0, %v2915_v59 }
 0x1da   : > { %2750 = vadd.xlane.f32.xlu1 %v2749_v39  ;;  %5561 = vmatmul.msk.f32.vlgmr.msra.gmra.mxu2 %vm523_vm0, %v2808_v25  ;;  %v2838_v42 = vmul.f32 %v6523_v56, %v2837_v37  ;;  %v7167_v39 = vpop.xlane.xlu0 %2618  ;;  %v2896_v13 = vor.u32 1.1754944e-38, %v2895_v26  ;;  %vm2859_vm14 = vweird.f32 %v6986_v0  ;;  %v2847_v16 = vsel %vm7161_vm12, %v7070_v36, %v2843_v8 }
 0x1db   : > { %5785 = vrcp.f32 %v7138_v2  ;;  %4036 = vmatpush.msra.mxu2 %v469_v30  ;;  %vm7188_vm15 = vmor %vm2859_vm14, %vm2860_vm10  ;;  %vm7192_vm1 = vcmp.eq.f32.partialorder %v2863_v40, 8.507059e+37  ;;  %v2923_v0 = vand.u32 2147483647, %v7012_v12  ;;  %v2851_v36 = vor.u32 1.1754944e-38, %v2850_v54 }
 0x1dc   : > { %2741 = vadd.xlane.f32.xlu2 %v6971_v57  ;;  %2744 = vadd.xlane.f32.xlu0 %v7016_v44  ;;  %v7184_v56 = vpop.eup %5781  ;;  %v2901_v20 = vsub.f32 1.0, %v2900_v6  ;;  %v7198_v44 = vpop.xlane.xlu2 %2609  ;;  %v2892_v26 = vsel %vm7174_vm13, %v7040_v60, %v2888_v35  ;;  %v2862_v18 = vsel %vm7188_vm15, %v7044_v32, %v2858_v43  ;;  %vm2849_vm2 = vcmp.eq.f32.partialorder %v2848_v49, 8.507059e+37 }
 0x1dd   : > { %5563 = vmatmul.msk.f32.vlgmr.msrb.gmra.mxu0 %vm523_vm0, %v2838_v42  ;;  %v2870_v15 = vmul.f32 %v7184_v56, %v7102_v61  ;;  %v7208_v27 = vpop.eup %5783  ;;  %v2866_v40 = vor.u32 1.1754944e-38, %v2865_v17  ;;  %v2917_v59 = vmul.f32 %v7105_v41, %v2916_v9  ;;  %v2925_v37 = vand.u32 2147483648, %v7012_v12  ;;  %v7232_v17 = vpop.xlane.xlu1 %2621 }
 0x1de   : > { %v2852_v8 = vsel %vm2849_vm2, %v2851_v36, %v2847_v16  ;;  %vm2919_vm3 = vweird.f32 %v7012_v12  ;;  %v2908_v60 = vand.u32 2147483647, %v7053_v29  ;;  %5787 = vrcp.f32 %v7198_v44 }
 0x1df   : > { %v2871_v54 = vsub.f32 1.0, %v2870_v15  ;;  %v2897_v32 = vsel %vm7152_vm11, %v2896_v13, %v2892_v26  ;;  %v2867_v6 = vsel %vm7192_vm1, %v2866_v40, %v2862_v18  ;;  %vm2920_vm4 = vweird.f32 %v7105_v41  ;;  %v470_v15 = vld [vmem:[%s6809_s27 + $0x58] sm:$0xff]  ;;  %v472_v40 = vld [vmem:[%s6809_s27 + $0x68] sm:$0xff] }
 0x1e0   : > { %v2902_v25 = vmul.f32 %v7121_v28, %v2901_v20  ;;  %vm7223_vm5 = vcmp.eq.f32.partialorder %v2923_v0, 8.507059e+37  ;;  %v2960_v43 = vmul.f32 %v7208_v27, %v7077_v1  ;;  %5789 = vrcp.f32 %v7167_v39  ;;  %vm7251_vm9 = vmor %vm2919_vm3, %vm2920_vm4  ;;  %4059 = vmatpush.msra.mxu3 %v470_v15 }
 0x1e1   : > { %v7221_v30 = vpop.eup %5785  ;;  %v2872_v49 = vmul.f32 %v7184_v56, %v2871_v54  ;;  %v2853_v47 = vmul.f32 %v6549_v19, %v2852_v8  ;;  %v2918_v9 = vadd.f32 %v7105_v41, %v2917_v59  ;;  %v2926_v62 = vor.u32 1.1754944e-38, %v2925_v37  ;;  %v471_v59 = vld [vmem:[%s6809_s27 + $0x60] sm:$0xff] }
 0x1e2   : > { %vm2904_vm6 = vweird.f32 %v7053_v29  ;;  %v2910_v42 = vand.u32 2147483648, %v7053_v29  ;;  %vm7237_vm7 = vcmp.eq.f32.partialorder %v2908_v60, 8.507059e+37  ;;  %vm2875_vm8 = vweird.f32 %v7184_v56  ;;  %v7259_v20 = vpop.xlane.xlu0 %2633  ;;  %4082 = vmatpush.msrb.mxu0 %v471_v59 }
 0x1e3   : > { %v2873_v13 = vadd.f32 %v7184_v56, %v2872_v49  ;;  %v2878_v19 = vand.u32 2147483647, %v7102_v61  ;;  %v2930_v16 = vmul.f32 %v7221_v30, %v7138_v2  ;;  %5564 = vmatmul.msk.f32.vlgmr.msrb.gmra.mxu1 %vm523_vm0, %v2853_v47  ;;  %v2880_v57 = vand.u32 2147483648, %v7102_v61 }
 0x1e4   : > { %v2868_v0 = vmul.f32 %v6547_v14, %v2867_v6  ;;  %v2898_v36 = vmul.f32 %v6531_v51, %v2897_v32  ;;  %5791 = vrcp.f32 %v7232_v17  ;;  %v7261_v26 = vpop.eup %5787  ;;  %v2903_v18 = vadd.f32 %v7121_v28, %v2902_v25  ;;  %4105 = vmatpush.msrb.mxu1 %v472_v40 }
 0x1e5   : > { %vm2905_vm10 = vweird.f32 %v7121_v28  ;;  %v2961_v12 = vsub.f32 1.0, %v2960_v43  ;;  %vm2874_vm11 = vweird.f32 %v7102_v61  ;;  %v2911_v37 = vor.u32 1.1754944e-38, %v2910_v42  ;;  %v7281_v61 = vpop.xlane.xlu2 %2615  ;;  %v7345_v8 = vpop.xlane.xlu1 %2627  ;;  %v474_v43 = vld [vmem:[%s6809_s27 + $0x78] sm:$0xff] }
 0x1e6   : > { %v2968_v14 = vand.u32 2147483647, %v7077_v1  ;;  %v2970_v51 = vand.u32 2147483648, %v7077_v1  ;;  %vm7273_vm12 = vmor %vm2874_vm11, %vm2875_vm8  ;;  %v2945_v60 = vmul.f32 %v7261_v26, %v7198_v44  ;;  %5565 = vmatmul.msk.f32.vlgmr.msrb.gmra.mxu2 %vm523_vm0, %v2868_v0  ;;  %5567 = vmatmul.msk.f32.vlgmr.msra.gmra.mxu0 %vm523_vm0, %v2898_v36  ;;  %v7283_v54 = vpop.eup %5789  ;;  %v2922_v32 = vsel %vm7251_vm9, %v7105_v41, %v2918_v9 }
 0x1e7   : > { %vm2964_vm13 = vweird.f32 %v7077_v1  ;;  %v2877_v6 = vsel %vm7273_vm12, %v7184_v56, %v2873_v13  ;;  %v2931_v25 = vsub.f32 1.0, %v2930_v16  ;;  %5793 = vrcp.f32 %v7259_v20  ;;  %vm7297_vm14 = vmor %vm2904_vm6, %vm2905_vm10  ;;  %v475_v1 = vld [vmem:[%s6809_s27 + $0x80] sm:$0xff] }
 0x1e8   : > { %vm2879_vm15 = vcmp.eq.f32.partialorder %v2878_v19, 8.507059e+37  ;;  %v2881_v41 = vor.u32 1.1754944e-38, %v2880_v57  ;;  %v2940_v49 = vand.u32 2147483648, %v7138_v2  ;;  %v2946_v47 = vsub.f32 1.0, %v2945_v60  ;;  %4174 = vmatpush.msra.mxu0 %v475_v1 }
 0x1e9   : > { %v2907_v56 = vsel %vm7297_vm14, %v7121_v28, %v2903_v18  ;;  %v2962_v9 = vmul.f32 %v7208_v27, %v2961_v12  ;;  %v2938_v42 = vand.u32 2147483647, %v7138_v2  ;;  %5795 = vrcp.f32 %v7281_v61 }
 0x1ea   : > { %v7308_v29 = vpop.eup %5791  ;;  %v2927_v13 = vsel %vm7223_vm5, %v2926_v62, %v2922_v32  ;;  %v7312_v19 = vor.u32 1.1754944e-38, %v2970_v51  ;;  %v2882_v16 = vsel %vm2879_vm15, %v2881_v41, %v2877_v6  ;;  %v2990_v21 = vmul.f32 %v7283_v54, %v7167_v39 }
 0x1eb   : > { %vm2965_vm1 = vweird.f32 %v7208_v27  ;;  %vm7317_vm2 = vcmp.eq.f32.partialorder %v2968_v14, 8.507059e+37  ;;  %v2932_v57 = vmul.f32 %v7221_v30, %v2931_v25  ;;  %vm2934_vm3 = vweird.f32 %v7138_v2  ;;  %v473_v25 = vld [vmem:[%s6809_s27 + $0x70] sm:$0xff] }
 0x1ec   : > { %v2947_v0 = vmul.f32 %v7261_v26, %v2946_v47  ;;  %v2912_v35 = vsel %vm7237_vm7, %v2911_v37, %v2907_v56  ;;  %v7326_v62 = vor.u32 1.1754944e-38, %v2940_v49  ;;  %v2998_v36 = vand.u32 2147483647, %v7167_v39  ;;  %vm7360_vm8 = vmor %vm2964_vm13, %vm2965_vm1  ;;  %4128 = vmatpush.msrb.mxu2 %v473_v25 }
 0x1ed   : > { %v3005_v18 = vmul.f32 %v7308_v29, %v7232_v17  ;;  %v7331_v12 = vpop.eup %5793  ;;  %v2963_v15 = vadd.f32 %v7208_v27, %v2962_v9  ;;  %vm7334_vm4 = vcmp.eq.f32.partialorder %v2938_v42, 8.507059e+37  ;;  %v3000_v59 = vand.u32 2147483648, %v7167_v39  ;;  %v7370_v9 = vpop.xlane.xlu0 %2639 }
 0x1ee   : > { %v2758_v52 = vsel %vm523_vm0, %v7140_v63, 0.0  ;;  %v2883_v37 = vmul.f32 %v6573_v58, %v2882_v16  ;;  %vm2935_vm5 = vweird.f32 %v7221_v30  ;;  %v2991_v14 = vsub.f32 1.0, %v2990_v21  ;;  %v7443_v41 = vpop.xlane.xlu1 %2636 }
 0x1ef   : > { %vm2949_vm6 = vweird.f32 %v7198_v44  ;;  %v2953_v51 = vand.u32 2147483647, %v7198_v44  ;;  %2759 = vadd.xlane.f32.xlu1 %v2758_v52  ;;  %v7347_v60 = vpop.eup %5795  ;;  %v2933_v32 = vadd.f32 %v7221_v30, %v2932_v57  ;;  %v2948_v6 = vadd.f32 %v7261_v26, %v2947_v0  ;;  %vm7385_vm10 = vmor %vm2934_vm3, %vm2935_vm5 }
 0x1f0   : > { %vm2950_vm7 = vweird.f32 %v7261_v26  ;;  %5566 = vmatmul.msk.f32.vlgmr.msrb.gmra.mxu3 %vm523_vm0, %v2883_v37  ;;  %v2913_v58 = vmul.f32 %v6571_v22, %v2912_v35  ;;  %vm2994_vm9 = vweird.f32 %v7167_v39  ;;  %v3006_v49 = vsub.f32 1.0, %v3005_v18  ;;  %v7395_v35 = vpop.xlane.xlu2 %2624 }
 0x1f1   : > { %v3065_v47 = vmul.f32 %v7331_v12, %v7259_v20  ;;  %v2975_v56 = vmul.f32 %v7347_v60, %v7281_v61  ;;  %v2928_v22 = vmul.f32 %v6555_v50, %v2927_v13  ;;  %4151 = vmatpush.msrb.mxu3 %v474_v43  ;;  %v2967_v42 = vsel %vm7360_vm8, %v7208_v27, %v2963_v15  ;;  %vm7404_vm11 = vmor %vm2949_vm6, %vm2950_vm7 }
 0x1f2   : > { %v2955_v16 = vand.u32 2147483648, %v7198_v44  ;;  %5568 = vmatmul.msk.f32.vlgmr.msra.gmra.mxu1 %vm523_vm0, %v2913_v58  ;;  %v2761_v21 = vsel %vm523_vm0, %v7131_v33, 0.0  ;;  %5797 = vrcp.f32 %v7345_v8  ;;  %v2992_v27 = vmul.f32 %v7283_v54, %v2991_v14 }
 0x1f3   : > { %v7390_v13 = vor.u32 1.1754944e-38, %v3000_v59  ;;  %v2976_v57 = vsub.f32 1.0, %v2975_v56  ;;  %5569 = vmatmul.msk.f32.vlgmr.msra.gmra.mxu2 %vm523_vm0, %v2928_v22  ;;  %2762 = vadd.xlane.f32.xlu2 %v2761_v21  ;;  %v2752_v0 = vsel %vm523_vm0, %v7092_v55, 0.0  ;;  %v2937_v2 = vsel %vm7385_vm10, %v7221_v30, %v2933_v32 }
 0x1f4   : > { %v3013_v15 = vand.u32 2147483647, %v7232_v17  ;;  %v3015_v59 = vand.u32 2147483648, %v7232_v17  ;;  %2753 = vadd.xlane.f32.xlu0 %v2752_v0  ;;  %5799 = vrcp.f32 %v7370_v9  ;;  %v2972_v52 = vsel %vm7317_vm2, %v7312_v19, %v2967_v42  ;;  %v479_v0 = vld [vmem:[%s6809_s27 + $0xa0] sm:$0xff] }
 0x1f5   : > { %v2952_v30 = vsel %vm7404_vm11, %v7261_v26, %v2948_v6  ;;  %v3007_v44 = vmul.f32 %v7308_v29, %v3006_v49  ;;  %v3066_v37 = vsub.f32 1.0, %v3065_v47  ;;  %vm7418_vm12 = vcmp.eq.f32.partialorder %v2998_v36, 8.507059e+37  ;;  %v7467_v50 = vpop.xlane.xlu0 %2648 }
 0x1f6   : > { %vm2954_vm13 = vcmp.eq.f32.partialorder %v2953_v51, 8.507059e+37  ;;  %v2956_v32 = vor.u32 1.1754944e-38, %v2955_v16  ;;  %v2977_v58 = vmul.f32 %v7347_v60, %v2976_v57  ;;  %5801 = vrcp.f32 %v7395_v35  ;;  %v477_v57 = vld [vmem:[%s6809_s27 + $0x90] sm:$0xff] }
 0x1f7   : > { %v2942_v19 = vsel %vm7334_vm4, %v7326_v62, %v2937_v2  ;;  %v2993_v28 = vadd.f32 %v7283_v54, %v2992_v27  ;;  %vm2995_vm14 = vweird.f32 %v7283_v54  ;;  %vm3009_vm15 = vweird.f32 %v7232_v17  ;;  %v476_v27 = vld [vmem:[%s6809_s27 + $0x88] sm:$0xff]  ;;  %4220 = vmatpush.msra.mxu2 %v477_v57 }
 0x1f8   : > { %v7430_v26 = vpop.eup %5797  ;;  %v2957_v36 = vsel %vm2954_vm13, %v2956_v32, %v2952_v30  ;;  %vm7432_vm1 = vcmp.eq.f32.partialorder %v3013_v15, 8.507059e+37  ;;  %v3016_v6 = vor.u32 1.1754944e-38, %v3015_v59  ;;  %vm3069_vm2 = vweird.f32 %v7259_v20  ;;  %vm7451_vm5 = vmor %vm2994_vm9, %vm2995_vm14  ;;  %4197 = vmatpush.msra.mxu1 %v476_v27  ;;  %v7508_v30 = vpop.xlane.xlu2 %2630  ;;  %v9390_v15 = vld [vmem:[#allocation25_spill] sm:$0xff] }
 0x1f9   : > { %v3073_v25 = vand.u32 2147483647, %v7259_v20  ;;  %v3075_v62 = vand.u32 2147483648, %v7259_v20  ;;  %v3008_v40 = vadd.f32 %v7308_v29, %v3007_v44  ;;  %vm3010_vm3 = vweird.f32 %v7308_v29 }
 0x1fa   : > { %v3067_v43 = vmul.f32 %v7331_v12, %v3066_v37  ;;  %vm2980_vm4 = vweird.f32 %v7347_v60  ;;  %v7445_v49 = vpop.eup %5799  ;;  %v2978_v56 = vadd.f32 %v7347_v60, %v2977_v58  ;;  %v3035_v22 = vmul.f32 %v7430_v26, %v7345_v8  ;;  %vm7478_vm7 = vmor %vm3009_vm15, %vm3010_vm3 }
 0x1fb   : > { %v2755_v1 = vsel %vm523_vm0, %v7079_v10, 0.0  ;;  %v2943_v42 = vmul.f32 %v6595_v24, %v2942_v19  ;;  %v2997_v16 = vsel %vm7451_vm5, %v7283_v54, %v2993_v28  ;;  %vm2979_vm6 = vweird.f32 %v7281_v61 }
 0x1fc   : > { %v2985_v39 = vand.u32 2147483648, %v7281_v61  ;;  %2756 = vadd.xlane.f32.xlu1 %v2755_v1  ;;  %v2958_v21 = vmul.f32 %v6597_v23, %v2957_v36  ;;  %v7472_v2 = vpop.eup %5801  ;;  %vm3070_vm8 = vweird.f32 %v7331_v12  ;;  %vm7483_vm9 = vcmp.eq.f32.partialorder %v3073_v25, 8.507059e+37  ;;  %vm7498_vm10 = vmor %vm2979_vm6, %vm2980_vm4 }
 0x1fd   : > { %v2983_v23 = vand.u32 2147483647, %v7281_v61  ;;  %5570 = vmatmul.msk.f32.vlgmr.msra.gmra.mxu3 %vm523_vm0, %v2943_v42  ;;  %v2973_v18 = vmul.f32 %v6579_v31, %v2972_v52  ;;  %5803 = vrcp.f32 %v7443_v41  ;;  %v3012_v17 = vsel %vm7478_vm7, %v7308_v29, %v3008_v40  ;;  %vm7528_vm14 = vmor %vm3069_vm2, %vm3070_vm8 }
 0x1fe   : > { %v3045_v59 = vand.u32 2147483648, %v7345_v8  ;;  %v3095_v31 = vmul.f32 %v7445_v49, %v7370_v9  ;;  %v3020_v52 = vmul.f32 %v7472_v2, %v7395_v35  ;;  %5571 = vmatmul.msk.f32.vlgmr.msrb.gmra.mxu0 %vm523_vm0, %v2958_v21  ;;  %v3068_v29 = vadd.f32 %v7331_v12, %v3067_v43 }
 0x1ff   : > { %v2982_v61 = vsel %vm7498_vm10, %v7347_v60, %v2978_v56  ;;  %v3036_v44 = vsub.f32 1.0, %v3035_v22  ;;  %5572 = vmatmul.msk.f32.vlgmr.msrb.gmra.mxu1 %vm523_vm0, %v2973_v18  ;;  %5805 = vrcp.f32 %v7467_v50  ;;  %4266 = vmatpush.msrb.mxu0 %v479_v0  ;;  %v3002_v37 = vsel %vm7418_vm12, %v7390_v13, %v2997_v16  ;;  %v7548_v22 = vpop.xlane.xlu1 %2642  ;;  %v7568_v0 = vpop.xlane.xlu0 %2654  ;;  %v478_v18 = vld [vmem:[%s6809_s27 + $0x98] sm:$0xff] }
 0x200   : > { %v3076_v32 = vor.u32 1.1754944e-38, %v3075_v62  ;;  %v2986_v58 = vor.u32 1.1754944e-38, %v2985_v39  ;;  %v3021_v19 = vsub.f32 1.0, %v3020_v52  ;;  %vm2984_vm11 = vcmp.eq.f32.partialorder %v2983_v23, 8.507059e+37  ;;  %4243 = vmatpush.msra.mxu3 %v478_v18  ;;  %v482_v18 = vld [vmem:[%s6809_s27 + $0xb8] sm:$0xff] }
 0x201   : > { %vm3039_vm13 = vweird.f32 %v7345_v8  ;;  %v3043_v28 = vand.u32 2147483647, %v7345_v8  ;;  %5807 = vrcp.f32 %v7508_v30  ;;  %v3017_v60 = vsel %vm7432_vm1, %v3016_v6, %v3012_v17  ;;  %v480_v17 = vld [vmem:[%s6809_s27 + $0xa8] sm:$0xff] }
 0x202   : > { %v2987_v13 = vsel %vm2984_vm11, %v2986_v58, %v2982_v61  ;;  %v3096_v36 = vsub.f32 1.0, %v3095_v31  ;;  %v3022_v25 = vmul.f32 %v7472_v2, %v3021_v19  ;;  %v3072_v40 = vsel %vm7528_vm14, %v7331_v12, %v3068_v29  ;;  %4289 = vmatpush.msrb.mxu1 %v480_v17  ;;  %v481_v29 = vld [vmem:[%s6809_s27 + $0xb0] sm:$0xff]  ;;  %v483_v17 = vld [vmem:[%s6809_s27 + $0xc0] sm:$0xff] }
 0x203   : > { %v7533_v62 = vpop.eup %5803  ;;  %v3037_v51 = vmul.f32 %v7430_v26, %v3036_v44  ;;  %v7539_v6 = vor.u32 1.1754944e-38, %v3045_v59  ;;  %v3103_v20 = vand.u32 2147483647, %v7370_v9  ;;  %vm3099_vm12 = vweird.f32 %v7370_v9  ;;  %v7602_v44 = vpop.xlane.xlu2 %2645 }
 0x204   : > { %v3105_v43 = vand.u32 2147483648, %v7370_v9  ;;  %vm3024_vm15 = vweird.f32 %v7395_v35  ;;  %v3030_v47 = vand.u32 2147483648, %v7395_v35  ;;  %v3080_v56 = vmul.f32 %v7533_v62, %v7443_v41 }
 0x205   : > { %v7550_v12 = vpop.eup %5805  ;;  %vm7552_vm1 = vcmp.eq.f32.partialorder %v3043_v28, 8.507059e+37  ;;  %v3023_v42 = vadd.f32 %v7472_v2, %v3022_v25  ;;  %vm3025_vm2 = vweird.f32 %v7472_v2  ;;  %v3028_v16 = vand.u32 2147483647, %v7395_v35 }
 0x206   : > { %v2988_v39 = vmul.f32 %v6621_v45, %v2987_v13  ;;  %v7562_v21 = vsel %vm7483_vm9, %v3076_v32, %v3072_v40  ;;  %vm3040_vm3 = vweird.f32 %v7430_v26  ;;  %v3097_v27 = vmul.f32 %v7445_v49, %v3096_v36  ;;  %vm7587_vm5 = vmor %vm3024_vm15, %vm3025_vm2 }
 0x207   : > { %v3140_v57 = vmul.f32 %v7550_v12, %v7467_v50  ;;  %v7570_v24 = vpop.eup %5807  ;;  %v3038_v23 = vadd.f32 %v7430_v26, %v3037_v51  ;;  %v3003_v45 = vmul.f32 %v6603_v11, %v3002_v37  ;;  %v3018_v54 = vmul.f32 %v6619_v34, %v3017_v60  ;;  %vm7608_vm7 = vmor %vm3039_vm13, %vm3040_vm3 }
 0x208   : > { %5573 = vmatmul.msk.f32.vlgmr.msrb.gmra.mxu2 %vm523_vm0, %v2988_v39  ;;  %5809 = vrcp.f32 %v7548_v22  ;;  %vm7579_vm4 = vcmp.eq.f32.partialorder %v3103_v20, 8.507059e+37  ;;  %v3106_v59 = vor.u32 1.1754944e-38, %v3105_v43  ;;  %v3031_v11 = vor.u32 1.1754944e-38, %v3030_v47 }
 0x209   : > { %v3081_v52 = vsub.f32 1.0, %v3080_v56  ;;  %v3050_v34 = vmul.f32 %v7570_v24, %v7508_v30  ;;  %vm3100_vm6 = vweird.f32 %v7445_v49  ;;  %v3027_v61 = vsel %vm7587_vm5, %v7472_v2, %v3023_v42  ;;  %5574 = vmatmul.msk.f32.vlgmr.msrb.gmra.mxu3 %vm523_vm0, %v3003_v45  ;;  %5575 = vmatmul.msk.f32.vlgmr.msra.gmra.mxu0 %vm523_vm0, %v3018_v54  ;;  %v7653_v42 = vpop.xlane.xlu1 %2657  ;;  %v7672_v54 = vpop.xlane.xlu0 %2669 }
 0x20a   : > { %v3090_v35 = vand.u32 2147483648, %v7443_v41  ;;  %5811 = vrcp.f32 %v7568_v0  ;;  %v3098_v2 = vadd.f32 %v7445_v49, %v3097_v27  ;;  %v3088_v32 = vand.u32 2147483647, %v7443_v41  ;;  %4312 = vmatpush.msrb.mxu2 %v481_v29  ;;  %vm7628_vm9 = vmor %vm3099_vm12, %vm3100_vm6  ;;  %4335 = vmatpush.msrb.mxu3 %v482_v18 }
 0x20b   : > { %v3141_v58 = vsub.f32 1.0, %v3140_v57  ;;  %v3051_v19 = vsub.f32 1.0, %v3050_v34  ;;  %v3042_v28 = vsel %vm7608_vm7, %v7430_v26, %v3038_v23  ;;  %vm3029_vm8 = vcmp.eq.f32.partialorder %v3028_v16, 8.507059e+37  ;;  %4358 = vmatpush.msra.mxu0 %v483_v17  ;;  %v7717_v37 = vpop.xlane.xlu2 %2651  ;;  %v486_v34 = vld [vmem:[%s6809_s27 + $0xd8] sm:$0xff] }
 0x20c   : > { %v3148_v60 = vand.u32 2147483647, %v7467_v50  ;;  %v3150_v8 = vand.u32 2147483648, %v7467_v50  ;;  %v3032_v14 = vsel %vm3029_vm8, %v3031_v11, %v3027_v61  ;;  %v3082_v13 = vmul.f32 %v7533_v62, %v3081_v52  ;;  %v484_v52 = vld [vmem:[%s6809_s27 + $0xc8] sm:$0xff] }
 0x20d   : > { %v3052_v36 = vmul.f32 %v7570_v24, %v3051_v19  ;;  %5813 = vrcp.f32 %v7602_v44  ;;  %vm3084_vm10 = vweird.f32 %v7443_v41  ;;  %v3091_v40 = vor.u32 1.1754944e-38, %v3090_v35  ;;  %v485_v41 = vld [vmem:[%s6809_s27 + $0xd0] sm:$0xff] }
 0x20e   : > { %v7622_v25 = vpop.eup %5809  ;;  %vm3144_vm11 = vweird.f32 %v7467_v50  ;;  %vm3054_vm13 = vweird.f32 %v7508_v30  ;;  %v3047_v51 = vsel %vm7552_vm1, %v7539_v6, %v3042_v28  ;;  %v3102_v20 = vsel %vm7628_vm9, %v7445_v49, %v3098_v2 }
 0x20f   : > { %vm7641_vm14 = vcmp.eq.f32.partialorder %v3088_v32, 8.507059e+37  ;;  %v3142_v43 = vmul.f32 %v7550_v12, %v3141_v58  ;;  %v3110_v47 = vmul.f32 %v7622_v25, %v7548_v22  ;;  %vm3085_vm12 = vweird.f32 %v7533_v62 }
 0x210   : > { %v7648_v56 = vpop.eup %5811  ;;  %v3151_v1 = vor.u32 1.1754944e-38, %v3150_v8  ;;  %v3058_v6 = vand.u32 2147483647, %v7508_v30  ;;  %v3033_v49 = vmul.f32 %v6645_v5, %v3032_v14  ;;  %v3083_v16 = vadd.f32 %v7533_v62, %v3082_v13  ;;  %vm7682_vm3 = vmor %vm3084_vm10, %vm3085_vm12 }
 0x211   : > { %vm7656_vm15 = vcmp.eq.f32.partialorder %v3148_v60, 8.507059e+37  ;;  %v3053_v27 = vadd.f32 %v7570_v24, %v3052_v36  ;;  %vm3055_vm1 = vweird.f32 %v7570_v24  ;;  %v3060_v57 = vand.u32 2147483648, %v7508_v30  ;;  %v7778_v18 = vpop.xlane.xlu0 %2675 }
 0x212   : > { %v7665_v23 = vsel %vm7579_vm4, %v3106_v59, %v3102_v20  ;;  %vm3145_vm2 = vweird.f32 %v7550_v12  ;;  %v3170_v5 = vmul.f32 %v7648_v56, %v7568_v0  ;;  %5576 = vmatmul.msk.f32.vlgmr.msra.gmra.mxu1 %vm523_vm0, %v3033_v49  ;;  %v3048_v45 = vmul.f32 %v6643_v53, %v3047_v51  ;;  %vm7695_vm4 = vmor %vm3054_vm13, %vm3055_vm1 }
 0x213   : > { %v7676_v31 = vpop.eup %5813  ;;  %v3143_v59 = vadd.f32 %v7550_v12, %v3142_v43  ;;  %v3111_v11 = vsub.f32 1.0, %v3110_v47  ;;  %v3078_v53 = vmul.f32 %v6627_v4, %v7562_v21  ;;  %5815 = vrcp.f32 %v7653_v42  ;;  %4381 = vmatpush.msra.mxu1 %v484_v52  ;;  %vm7723_vm6 = vmor %vm3144_vm11, %vm3145_vm2  ;;  %v7759_v43 = vpop.xlane.xlu1 %2663 }
 0x214   : > { %vm7699_vm5 = vcmp.eq.f32.partialorder %v3058_v6, 8.507059e+37  ;;  %v3118_v29 = vand.u32 2147483647, %v7548_v22  ;;  %v3120_v4 = vand.u32 2147483648, %v7548_v22  ;;  %v3125_v21 = vmul.f32 %v7676_v31, %v7602_v44  ;;  %5577 = vmatmul.msk.f32.vlgmr.msra.gmra.mxu2 %vm523_vm0, %v3048_v45 }
 0x215   : > { %v3087_v30 = vsel %vm7682_vm3, %v7533_v62, %v3083_v16  ;;  %v3057_v61 = vsel %vm7695_vm4, %v7570_v24, %v3053_v27  ;;  %v3180_v35 = vand.u32 2147483648, %v7568_v0  ;;  %5579 = vmatmul.msk.f32.vlgmr.msrb.gmra.mxu0 %vm523_vm0, %v3078_v53  ;;  %5817 = vrcp.f32 %v7672_v54  ;;  %4404 = vmatpush.msra.mxu2 %v485_v41  ;;  %v488_v41 = vld [vmem:[%s6809_s27 + $0xe8] sm:$0xff] }
 0x216   : > { %v3061_v62 = vor.u32 1.1754944e-38, %v3060_v57  ;;  %vm3114_vm7 = vweird.f32 %v7548_v22  ;;  %v3171_v24 = vsub.f32 1.0, %v3170_v5  ;;  %v3126_v32 = vsub.f32 1.0, %v3125_v21 }
 0x217   : > { %v3147_v58 = vsel %vm7723_vm6, %v7550_v12, %v3143_v59  ;;  %v3112_v19 = vmul.f32 %v7622_v25, %v3111_v11  ;;  %v3133_v28 = vand.u32 2147483647, %v7602_v44  ;;  %v3135_v60 = vand.u32 2147483648, %v7602_v44 }
 0x218   : > { %v3092_v50 = vsel %vm7641_vm14, %v3091_v40, %v3087_v30  ;;  %v3062_v8 = vsel %vm7699_vm5, %v3061_v62, %v3057_v61  ;;  %vm3174_vm8 = vweird.f32 %v7568_v0  ;;  %v3178_v14 = vand.u32 2147483647, %v7568_v0  ;;  %v7811_v30 = vpop.xlane.xlu2 %2660 }
 0x219   : > { %5819 = vrcp.f32 %v7717_v37  ;;  %v7741_v13 = vpop.eup %5815  ;;  %vm7743_vm9 = vcmp.eq.f32.partialorder %v3118_v29, 8.507059e+37  ;;  %v3121_v36 = vor.u32 1.1754944e-38, %v3120_v4  ;;  %v7747_v26 = vor.u32 1.1754944e-38, %v3180_v35  ;;  %v487_v29 = vld [vmem:[%s6809_s27 + $0xe0] sm:$0xff] }
 0x21a   : > { %v3127_v40 = vmul.f32 %v7676_v31, %v3126_v32  ;;  %vm3129_vm10 = vweird.f32 %v7602_v44  ;;  %v7753_v51 = vsel %vm7656_vm15, %v3151_v1, %v3147_v58  ;;  %vm3115_vm11 = vweird.f32 %v7622_v25  ;;  %4450 = vmatpush.msrb.mxu0 %v487_v29  ;;  %v491_v29 = vld [vmem:[%s6809_s27 + $0x100] sm:$0xff] }
 0x21b   : > { %v3172_v20 = vmul.f32 %v7648_v56, %v3171_v24  ;;  %v3185_v9 = vmul.f32 %v7741_v13, %v7653_v42  ;;  %v7761_v47 = vpop.eup %5817  ;;  %v3113_v6 = vadd.f32 %v7622_v25, %v3112_v19  ;;  %vm7764_vm13 = vcmp.eq.f32.partialorder %v3133_v28, 8.507059e+37  ;;  %vm7784_vm15 = vmor %vm3114_vm7, %vm3115_vm11  ;;  %v495_v44 = vld [vmem:[%s6809_s27 + $0x120] sm:$0xff] }
 0x21c   : > { %v3136_v16 = vor.u32 1.1754944e-38, %v3135_v60  ;;  %v3063_v1 = vmul.f32 %v6669_v38, %v3062_v8  ;;  %v3093_v39 = vmul.f32 %v6667_v46, %v3092_v50  ;;  %vm7770_vm14 = vcmp.eq.f32.partialorder %v3178_v14, 8.507059e+37  ;;  %v9406_v46 = vld [vmem:[#allocation28_spill] sm:$0xff] }
 0x21d   : > { %vm3130_vm12 = vweird.f32 %v7676_v31  ;;  %v3186_v57 = vsub.f32 1.0, %v3185_v9  ;;  %v3195_v5 = vand.u32 2147483648, %v7653_v42  ;;  %v3245_v45 = vmul.f32 %v7761_v47, %v7672_v54 }
 0x21e   : > { %v3128_v38 = vadd.f32 %v7676_v31, %v3127_v40  ;;  %v3193_v17 = vand.u32 2147483647, %v7653_v42  ;;  %5578 = vmatmul.msk.f32.vlgmr.msra.gmra.mxu3 %vm523_vm0, %v3063_v1  ;;  %5580 = vmatmul.msk.f32.vlgmr.msrb.gmra.mxu1 %vm523_vm0, %v3093_v39  ;;  %v3108_v59 = vmul.f32 %v9390_v15, %v7665_v23  ;;  %5821 = vrcp.f32 %v7759_v43  ;;  %vm7817_vm2 = vmor %vm3129_vm10, %vm3130_vm12 }
 0x21f   : > { %v7795_v11 = vpop.eup %5819  ;;  %v3173_v22 = vadd.f32 %v7648_v56, %v3172_v20  ;;  %vm3175_vm1 = vweird.f32 %v7648_v56  ;;  %v3246_v53 = vsub.f32 1.0, %v3245_v45  ;;  %v3253_v52 = vand.u32 2147483647, %v7672_v54  ;;  %4427 = vmatpush.msra.mxu3 %v486_v34  ;;  %v489_v34 = vld [vmem:[%s6809_s27 + $0xf0] sm:$0xff]  ;;  %4473 = vmatpush.msrb.mxu1 %v488_v41 }
 0x220   : > { %v3117_v4 = vsel %vm7784_vm15, %v7622_v25, %v3113_v6  ;;  %v3255_v23 = vand.u32 2147483648, %v7672_v54  ;;  %v3155_v21 = vmul.f32 %v7795_v11, %v7717_v37  ;;  %5581 = vmatmul.msk.f32.vlgmr.msrb.gmra.mxu2 %vm523_vm0, %v3108_v59  ;;  %5823 = vrcp.f32 %v7778_v18  ;;  %vm7830_vm5 = vmor %vm3174_vm8, %vm3175_vm1  ;;  %v9401_v6 = vld [vmem:[#allocation27_spill] sm:$0xff] }
 0x221   : > { %v3187_v25 = vmul.f32 %v7741_v13, %v3186_v57  ;;  %vm3189_vm3 = vweird.f32 %v7653_v42  ;;  %v7823_v35 = vor.u32 1.1754944e-38, %v3195_v5  ;;  %vm3249_vm4 = vweird.f32 %v7672_v54  ;;  %v7889_v57 = vpop.xlane.xlu1 %2672  ;;  %4496 = vmatpush.msrb.mxu2 %v489_v34  ;;  %v9421_v42 = vld [vmem:[#allocation31_spill] sm:$0xff] }
 0x222   : > { %v3132_v2 = vsel %vm7817_vm2, %v7676_v31, %v3128_v38  ;;  %v3247_v62 = vmul.f32 %v7761_v47, %v3246_v53  ;;  %v3156_v24 = vsub.f32 1.0, %v3155_v21  ;;  %v3163_v32 = vand.u32 2147483647, %v7717_v37  ;;  %v9407_v53 = vld [vmem:[#allocation26_spill] sm:$0xff] }
 0x223   : > { %v3122_v58 = vsel %vm7743_vm9, %v3121_v36, %v3117_v4  ;;  %v3177_v0 = vsel %vm7830_vm5, %v7648_v56, %v3173_v22  ;;  %v3165_v19 = vand.u32 2147483648, %v7717_v37  ;;  %5825 = vrcp.f32 %v7811_v30 }
 0x224   : > { %v7846_v28 = vpop.eup %5821  ;;  %vm3190_vm6 = vweird.f32 %v7741_v13  ;;  %vm7849_vm7 = vcmp.eq.f32.partialorder %v3193_v17, 8.507059e+37  ;;  %vm7853_vm8 = vcmp.eq.f32.partialorder %v3253_v52, 8.507059e+37  ;;  %v3256_v50 = vor.u32 1.1754944e-38, %v3255_v23  ;;  %v7903_v17 = vpop.xlane.xlu0 %2681 }
 0x225   : > { %v3157_v8 = vmul.f32 %v7795_v11, %v3156_v24  ;;  %vm3159_vm9 = vweird.f32 %v7717_v37  ;;  %v3137_v56 = vsel %vm7764_vm13, %v3136_v16, %v3132_v2  ;;  %v3188_v14 = vadd.f32 %v7741_v13, %v3187_v25  ;;  %vm7882_vm13 = vmor %vm3189_vm3, %vm3190_vm6  ;;  %v7936_v25 = vpop.xlane.xlu2 %2666 }
 0x226   : > { %vm3250_vm10 = vweird.f32 %v7761_v47  ;;  %v3215_v12 = vmul.f32 %v7846_v28, %v7759_v43  ;;  %v7865_v36 = vpop.eup %5823  ;;  %v7870_v40 = vsel %vm7770_vm14, %v7747_v26, %v3177_v0  ;;  %v3248_v20 = vadd.f32 %v7761_v47, %v3247_v62 }
 0x227   : > { %vm7873_vm11 = vcmp.eq.f32.partialorder %v3163_v32, 8.507059e+37  ;;  %v3123_v49 = vmul.f32 %v9401_v6, %v3122_v58  ;;  %v3166_v1 = vor.u32 1.1754944e-38, %v3165_v19  ;;  %v3225_v26 = vand.u32 2147483648, %v7759_v43  ;;  %vm7893_vm14 = vmor %vm3249_vm4, %vm3250_vm10 }
 0x228   : > { %v3216_v39 = vsub.f32 1.0, %v3215_v12  ;;  %v3275_v27 = vmul.f32 %v7865_v36, %v7778_v18  ;;  %v3158_v5 = vadd.f32 %v7795_v11, %v3157_v8  ;;  %vm3160_vm12 = vweird.f32 %v7795_v11 }
 0x229   : > { %vm3219_vm15 = vweird.f32 %v7759_v43  ;;  %v3223_v45 = vand.u32 2147483647, %v7759_v43  ;;  %5582 = vmatmul.msk.f32.vlgmr.msrb.gmra.mxu3 %vm523_vm0, %v3123_v49  ;;  %v3138_v38 = vmul.f32 %v9406_v46, %v3137_v56  ;;  %v7905_v54 = vpop.eup %5825  ;;  %v3192_v15 = vsel %vm7882_vm13, %v7741_v13, %v3188_v14  ;;  %vm7928_vm1 = vmor %vm3159_vm9, %vm3160_vm12 }
 0x22a   : > { %v3276_v59 = vsub.f32 1.0, %v3275_v27  ;;  %v3283_v22 = vand.u32 2147483647, %v7778_v18  ;;  %v3153_v52 = vmul.f32 %v9407_v53, %v7753_v51  ;;  %v3252_v4 = vsel %vm7893_vm14, %v7761_v47, %v3248_v20 }
 0x22b   : > { %v3217_v23 = vmul.f32 %v7846_v28, %v3216_v39  ;;  %v3200_v21 = vmul.f32 %v7905_v54, %v7811_v30  ;;  %5583 = vmatmul.msk.f32.vlgmr.msra.gmra.mxu0 %vm523_vm0, %v3138_v38  ;;  %5827 = vrcp.f32 %v7889_v57  ;;  %v3226_v51 = vor.u32 1.1754944e-38, %v3225_v26 }
 0x22c   : > { %v3277_v47 = vmul.f32 %v7865_v36, %v3276_v59  ;;  %vm3279_vm2 = vweird.f32 %v7778_v18  ;;  %v3285_v61 = vand.u32 2147483648, %v7778_v18  ;;  %5584 = vmatmul.msk.f32.vlgmr.msra.gmra.mxu1 %vm523_vm0, %v3153_v52  ;;  %v3162_v37 = vsel %vm7928_vm1, %v7795_v11, %v3158_v5  ;;  %4542 = vmatpush.msra.mxu0 %v491_v29  ;;  %v8006_v38 = vpop.xlane.xlu0 %2690 }
 0x22d   : > { %vm7941_vm3 = vcmp.eq.f32.partialorder %v3223_v45, 8.507059e+37  ;;  %v3201_v2 = vsub.f32 1.0, %v3200_v21  ;;  %v3210_v62 = vand.u32 2147483648, %v7811_v30  ;;  %5829 = vrcp.f32 %v7903_v17  ;;  %v9422_v45 = vld [vmem:[#allocation29_spill] sm:$0xff]  ;;  %v8028_v29 = vpop.xlane.xlu2 %2687  ;;  %v493_v21 = vld [vmem:[%s6809_s27 + $0x110] sm:$0xff] }
 0x22e   : > { %v3197_v24 = vsel %vm7849_vm7, %v7823_v35, %v3192_v15  ;;  %v3257_v32 = vsel %vm7853_vm8, %v3256_v50, %v3252_v4  ;;  %vm3204_vm4 = vweird.f32 %v7811_v30  ;;  %v3208_v11 = vand.u32 2147483647, %v7811_v30  ;;  %v9414_v50 = vld [vmem:[#allocation32_spill] sm:$0xff]  ;;  %v490_v4 = vld [vmem:[%s6809_s27 + $0xf8] sm:$0xff] }
 0x22f   : > { %v3218_v58 = vadd.f32 %v7846_v28, %v3217_v23  ;;  %vm3220_vm5 = vweird.f32 %v7846_v28  ;;  %vm3280_vm6 = vweird.f32 %v7865_v36  ;;  %vm7957_vm9 = vcmp.eq.f32.partialorder %v3283_v22, 8.507059e+37  ;;  %v492_v23 = vld [vmem:[%s6809_s27 + $0x108] sm:$0xff]  ;;  %4519 = vmatpush.msrb.mxu3 %v490_v4 }
 0x230   : > { %v3167_v35 = vsel %vm7873_vm11, %v3166_v1, %v3162_v37  ;;  %v3278_v19 = vadd.f32 %v7865_v36, %v3277_v47  ;;  %v3202_v31 = vmul.f32 %v7905_v54, %v3201_v2  ;;  %5831 = vrcp.f32 %v7936_v25  ;;  %vm7974_vm7 = vmor %vm3219_vm15, %vm3220_vm5  ;;  %v7987_v1 = vpop.xlane.xlu1 %2678  ;;  %4565 = vmatpush.msra.mxu1 %v492_v23 }
 0x231   : > { %v7966_v60 = vpop.eup %5827  ;;  %v7969_v8 = vmul.f32 %v9414_v50, %v3257_v32  ;;  %v3286_v56 = vor.u32 1.1754944e-38, %v3285_v61  ;;  %v3211_v14 = vor.u32 1.1754944e-38, %v3210_v62  ;;  %v3270_v12 = vand.u32 2147483648, %v7889_v57  ;;  %vm7998_vm11 = vmor %vm3279_vm2, %vm3280_vm6 }
 0x232   : > { %vm3205_vm8 = vweird.f32 %v7905_v54  ;;  %vm7979_vm10 = vcmp.eq.f32.partialorder %v3208_v11, 8.507059e+37  ;;  %v3260_v6 = vmul.f32 %v7966_v60, %v7889_v57  ;;  %v3268_v49 = vand.u32 2147483647, %v7889_v57 }
 0x233   : > { %v3313_v16 = vand.u32 2147483647, %v7903_v17  ;;  %v7989_v43 = vpop.eup %5829  ;;  %v3222_v39 = vsel %vm7974_vm7, %v7846_v28, %v3218_v58  ;;  %v3315_v27 = vand.u32 2147483648, %v7903_v17  ;;  %v3168_v5 = vmul.f32 %v9421_v42, %v3167_v35  ;;  %vm8039_vm12 = vmor %vm3204_vm4, %vm3205_vm8  ;;  %v9428_v58 = vld [vmem:[#allocation35_spill] sm:$0xff]  ;;  %v9457_v42 = vld [vmem:[#allocation36_spill] sm:$0xff] }
 0x234   : > { %v3183_v46 = vmul.f32 %v9422_v45, %v7870_v40  ;;  %v3282_v28 = vsel %vm7998_vm11, %v7865_v36, %v3278_v19  ;;  %v3203_v15 = vadd.f32 %v7905_v54, %v3202_v31  ;;  %v3261_v18 = vsub.f32 1.0, %v3260_v6  ;;  %v9423_v36 = vld [vmem:[#allocation30_spill] sm:$0xff] }
 0x235   : > { %v3305_v59 = vmul.f32 %v7989_v43, %v7903_v17  ;;  %vm3264_vm13 = vweird.f32 %v7889_v57  ;;  %v8015_v22 = vor.u32 1.1754944e-38, %v3270_v12  ;;  %vm3309_vm14 = vweird.f32 %v7903_v17  ;;  %5585 = vmatmul.msk.f32.vlgmr.msra.gmra.mxu2 %vm523_vm0, %v3168_v5  ;;  %v8162_v61 = vpop.xlane.xlu2 %2696 }
 0x236   : > { %5586 = vmatmul.msk.f32.vlgmr.msra.gmra.mxu3 %vm523_vm0, %v3183_v46  ;;  %v3198_v40 = vmul.f32 %v9423_v36, %v3197_v24  ;;  %5833 = vrcp.f32 %v7987_v1  ;;  %v8022_v53 = vpop.eup %5831  ;;  %v3227_v52 = vsel %vm7941_vm3, %v3226_v51, %v3222_v39  ;;  %v3240_v34 = vand.u32 2147483648, %v7936_v25  ;;  %4588 = vmatpush.msra.mxu2 %v493_v21  ;;  %v9440_v36 = vld [vmem:[#allocation33_spill] sm:$0xff] }
 0x237   : > { %v3306_v41 = vsub.f32 1.0, %v3305_v59  ;;  %5835 = vrcp.f32 %v8006_v38  ;;  %v3287_v13 = vsel %vm7957_vm9, %v3286_v56, %v3282_v28  ;;  %v3262_v51 = vmul.f32 %v7966_v60, %v3261_v18  ;;  %v9439_v18 = vld [vmem:[#allocation34_spill] sm:$0xff]  ;;  %v494_v21 = vld [vmem:[%s6809_s27 + $0x118] sm:$0xff] }
 0x238   : > { %vm8044_vm15 = vcmp.eq.f32.partialorder %v3313_v16, 8.507059e+37  ;;  %v3230_v37 = vmul.f32 %v8022_v53, %v7936_v25  ;;  %5587 = vmatmul.msk.f32.vlgmr.msrb.gmra.mxu0 %vm523_vm0, %v3198_v40  ;;  %v3207_v30 = vsel %vm8039_vm12, %v7905_v54, %v3203_v15  ;;  %v3316_v62 = vor.u32 1.1754944e-38, %v3315_v27  ;;  %v8104_v27 = vpop.xlane.xlu1 %2684  ;;  %4611 = vmatpush.msra.mxu3 %v494_v21 }
 0x239   : > { %v3307_v2 = vmul.f32 %v7989_v43, %v3306_v41  ;;  %vm3234_vm1 = vweird.f32 %v7936_v25  ;;  %v3238_v24 = vand.u32 2147483647, %v7936_v25  ;;  %vm3310_vm2 = vweird.f32 %v7989_v43  ;;  %4634 = vmatpush.msrb.mxu0 %v495_v44  ;;  %v8130_v41 = vpop.xlane.xlu0 %2702 }
 0x23a   : > { %v3231_v32 = vsub.f32 1.0, %v3230_v37  ;;  %v3300_v11 = vand.u32 2147483648, %v7987_v1  ;;  %5837 = vrcp.f32 %v8028_v29  ;;  %v8062_v0 = vmul.f32 %v9428_v58, %v3287_v13  ;;  %vm8083_vm5 = vmor %vm3309_vm14, %vm3310_vm2  ;;  %v497_v13 = vld [vmem:[%s6809_s27 + $0x130] sm:$0xff]  ;;  %v9445_v37 = vld [vmem:[#allocation37_spill] sm:$0xff] }
 0x23b   : > { %vm3265_vm3 = vweird.f32 %v7966_v60  ;;  %v3308_v54 = vadd.f32 %v7989_v43, %v3307_v2  ;;  %v3241_v35 = vor.u32 1.1754944e-38, %v3240_v34  ;;  %v3212_v31 = vsel %vm7979_vm10, %v3211_v14, %v3207_v30 }
 0x23c   : > { %v8066_v19 = vpop.eup %5833  ;;  %v3263_v50 = vadd.f32 %v7966_v60, %v3262_v51  ;;  %vm8071_vm4 = vcmp.eq.f32.partialorder %v3268_v49, 8.507059e+37  ;;  %v3232_v12 = vmul.f32 %v8022_v53, %v3231_v32  ;;  %v3298_v20 = vand.u32 2147483647, %v7987_v1  ;;  %vm8110_vm10 = vmor %vm3264_vm13, %vm3265_vm3 }
 0x23d   : > { %v8077_v6 = vpop.eup %5835  ;;  %vm3235_vm6 = vweird.f32 %v8022_v53  ;;  %vm8088_vm9 = vcmp.eq.f32.partialorder %v3238_v24, 8.507059e+37  ;;  %v3290_v9 = vmul.f32 %v8066_v19, %v7987_v1  ;;  %vm3294_vm7 = vweird.f32 %v7987_v1 }
 0x23e   : > { %v3358_v49 = vand.u32 2147483647, %v8006_v38  ;;  %v3312_v17 = vsel %vm8083_vm5, %v7989_v43, %v3308_v54  ;;  %v8099_v39 = vor.u32 1.1754944e-38, %v3300_v11  ;;  %v3350_v26 = vmul.f32 %v8077_v6, %v8006_v38  ;;  %vm8147_vm12 = vmor %vm3234_vm1, %vm3235_vm6 }
 0x23f   : > { %vm3354_vm8 = vweird.f32 %v8006_v38  ;;  %v3233_v5 = vadd.f32 %v8022_v53, %v3232_v12  ;;  %v3291_v43 = vsub.f32 1.0, %v3290_v9  ;;  %v3360_v45 = vand.u32 2147483648, %v8006_v38  ;;  %v9450_v12 = vld [vmem:[#allocation3_spill] sm:$0xff] }
 0x240   : > { %vm3339_vm11 = vweird.f32 %v8028_v29  ;;  %v8117_v46 = vpop.eup %5837  ;;  %v3267_v28 = vsel %vm8110_vm10, %v7966_v60, %v3263_v50  ;;  %vm8122_vm14 = vcmp.eq.f32.partialorder %v3298_v20, 8.507059e+37  ;;  %v3351_v15 = vsub.f32 1.0, %v3350_v26  ;;  %5591 = vmatmul.msk.f32.vlgmr.msra.gmra.mxu0 %vm523_vm0, %v7969_v8  ;;  %v496_v60 = vld [vmem:[%s6809_s27 + $0x128] sm:$0xff]  ;;  %v8258_v8 = vpop.xlane.xlu2 %2699 }
 0x241   : > { %v3213_v59 = vmul.f32 %v9439_v18, %v3212_v31  ;;  %v3228_v40 = vmul.f32 %v9440_v36, %v3227_v52  ;;  %v3317_v34 = vsel %vm8044_vm15, %v3316_v62, %v3312_v17  ;;  %v3292_v4 = vmul.f32 %v8066_v19, %v3291_v43  ;;  %v9458_v36 = vld [vmem:[#allocation2_spill] sm:$0xff] }
 0x242   : > { %vm8135_vm13 = vcmp.eq.f32.partialorder %v3358_v49, 8.507059e+37  ;;  %v3335_v23 = vmul.f32 %v8117_v46, %v8028_v29  ;;  %vm3295_vm15 = vweird.f32 %v8066_v19  ;;  %v3352_v52 = vmul.f32 %v8077_v6, %v3351_v15 }
 0x243   : > { %vm3355_vm2 = vweird.f32 %v8077_v6  ;;  %5588 = vmatmul.msk.f32.vlgmr.msrb.gmra.mxu1 %vm523_vm0, %v3213_v59  ;;  %5589 = vmatmul.msk.f32.vlgmr.msrb.gmra.mxu2 %vm523_vm0, %v3228_v40  ;;  %5839 = vrcp.f32 %v8104_v27  ;;  %v3237_v25 = vsel %vm8147_vm12, %v8022_v53, %v3233_v5  ;;  %v3293_v47 = vadd.f32 %v8066_v19, %v3292_v4  ;;  %vm8175_vm1 = vmor %vm3294_vm7, %vm3295_vm15 }
 0x244   : > { %v3336_v51 = vsub.f32 1.0, %v3335_v23  ;;  %5841 = vrcp.f32 %v8130_v41  ;;  %4680 = vmatpush.msrb.mxu2 %v497_v13  ;;  %v3318_v44 = vmul.f32 %v9445_v37, %v3317_v34  ;;  %v3353_v30 = vadd.f32 %v8077_v6, %v3352_v52  ;;  %v498_v23 = vld [vmem:[%s6809_s27 + $0x138] sm:$0xff]  ;;  %4657 = vmatpush.msrb.mxu1 %v496_v60 }
 0x245   : > { %v3343_v2 = vand.u32 2147483647, %v8028_v29  ;;  %v3345_v62 = vand.u32 2147483648, %v8028_v29  ;;  %v3272_v53 = vsel %vm8071_vm4, %v8015_v22, %v3267_v28  ;;  %vm3340_vm3 = vweird.f32 %v8117_v46  ;;  %vm8191_vm4 = vmor %vm3354_vm8, %vm3355_vm2  ;;  %v9459_v52 = vld [vmem:[#allocation5_spill] sm:$0xff] }
 0x246   : > { %v3337_v32 = vmul.f32 %v8117_v46, %v3336_v51  ;;  %v3328_v11 = vand.u32 2147483647, %v8104_v27  ;;  %v3242_v58 = vsel %vm8088_vm9, %v3241_v35, %v3237_v25  ;;  %v3297_v22 = vsel %vm8175_vm1, %v8066_v19, %v3293_v47  ;;  %vm8205_vm5 = vmor %vm3339_vm11, %vm3340_vm3  ;;  %v9460_v47 = vld [vmem:[#allocation8_spill] sm:$0xff] }
 0x247   : > { %v3330_v54 = vand.u32 2147483648, %v8104_v27  ;;  %5843 = vrcp.f32 %v8162_v61  ;;  %v3357_v35 = vsel %vm8191_vm4, %v8077_v6, %v3353_v30  ;;  %v3361_v31 = vor.u32 1.1754944e-38, %v3360_v45  ;;  %v8215_v6 = vpop.xlane.xlu1 %2693 }
 0x248   : > { %v3338_v50 = vadd.f32 %v8117_v46, %v3337_v32  ;;  %v3420_v19 = vand.u32 2147483648, %v8130_v41  ;;  %v3273_v38 = vmul.f32 %v9450_v12, %v3272_v53  ;;  %vm8209_vm6 = vcmp.eq.f32.partialorder %v3343_v2, 8.507059e+37  ;;  %5595 = vmatmul.msk.f32.vlgmr.msrb.gmra.mxu0 %vm523_vm0, %v3318_v44  ;;  %v9477_v2 = vld [vmem:[#allocation9_spill] sm:$0xff]  ;;  %v9478_v53 = vld [vmem:[#allocation7_spill] sm:$0xff] }
 0x249   : > { %v5840_v56 = vpop.eup %5839  ;;  %v3346_v14 = vor.u32 1.1754944e-38, %v3345_v62  ;;  %vm3324_vm9 = vweird.f32 %v8104_v27  ;;  %v3302_v29 = vsel %vm8122_vm14, %v8099_v39, %v3297_v22  ;;  %vm8226_vm7 = vcmp.eq.f32.partialorder %v3328_v11, 8.507059e+37 }
 0x24a   : > { %v8217_v9 = vpop.eup %5841  ;;  %v3342_v49 = vsel %vm8205_vm5, %v8117_v46, %v3338_v50  ;;  %v3320_v17 = vmul.f32 %v5840_v56, %v8104_v27  ;;  %v3243_v5 = vmul.f32 %v9457_v42, %v3242_v58  ;;  %v3362_v43 = vsel %vm8135_vm13, %v3361_v31, %v3357_v35  ;;  %v8240_v46 = vpop.xlane.xlu0 %2708 }
 0x24b   : > { %v3331_v45 = vor.u32 1.1754944e-38, %v3330_v54  ;;  %v3410_v28 = vmul.f32 %v8217_v9, %v8130_v41  ;;  %vm3414_vm8 = vweird.f32 %v8130_v41  ;;  %v3418_v39 = vand.u32 2147483647, %v8130_v41  ;;  %5592 = vmatmul.msk.f32.vlgmr.msra.gmra.mxu1 %vm523_vm0, %v3273_v38  ;;  %5593 = vmatmul.msk.f32.vlgmr.msra.gmra.mxu2 %vm523_vm0, %v8062_v0 }
 0x24c   : > { %v3347_v57 = vsel %vm8209_vm6, %v3346_v14, %v3342_v49  ;;  %v3321_v15 = vsub.f32 1.0, %v3320_v17  ;;  %v8244_v18 = vor.u32 1.1754944e-38, %v3420_v19  ;;  %5590 = vmatmul.msk.f32.vlgmr.msrb.gmra.mxu3 %vm523_vm0, %v3243_v5  ;;  %5845 = vrcp.f32 %v8215_v6  ;;  %v9467_v19 = vld [vmem:[#allocation4_spill] sm:$0xff] }
 0x24d   : > { %v8248_v59 = vpop.eup %5843  ;;  %v3303_v40 = vmul.f32 %v9458_v36, %v3302_v29  ;;  %v3411_v34 = vsub.f32 1.0, %v3410_v28  ;;  %v3388_v4 = vand.u32 2147483647, %v8162_v61  ;;  %v3390_v0 = vand.u32 2147483648, %v8162_v61  ;;  %4703 = vmatpush.msrb.mxu3 %v498_v23  ;;  %v500_v28 = vld [vmem:[%s6809_s27 + $0x148] sm:$0xff]  ;;  %v8359_v23 = vpop.xlane.xlu2 %2705 }
 0x24e   : > { %v3322_v21 = vmul.f32 %v5840_v56, %v3321_v15  ;;  %vm3325_vm10 = vweird.f32 %v5840_v56  ;;  %v3380_v13 = vmul.f32 %v8248_v59, %v8162_v61  ;;  %5847 = vrcp.f32 %v8240_v46  ;;  %4749 = vmatpush.msra.mxu1 %v500_v28  ;;  %v503_v28 = vld [vmem:[%s6809_s27 + $0x160] sm:$0xff] }
 0x24f   : > { %v8261_v25 = vmul.f32 %v9459_v52, %v3362_v43  ;;  %v3348_v51 = vmul.f32 %v9460_v47, %v3347_v57  ;;  %v3412_v37 = vmul.f32 %v8217_v9, %v3411_v34  ;;  %v3373_v44 = vand.u32 2147483647, %v8215_v6  ;;  %vm3326_vm12 = vmor %vm3324_vm9, %vm3325_vm10  ;;  %v8296_v31 = vpop.xlane.xlu1 %2714 }
 0x250   : > { %v3323_v30 = vadd.f32 %v5840_v56, %v3322_v21  ;;  %vm3415_vm11 = vweird.f32 %v8217_v9  ;;  %vm8267_vm14 = vcmp.eq.f32.partialorder %v3418_v39, 8.507059e+37  ;;  %v3381_v62 = vsub.f32 1.0, %v3380_v13  ;;  %v501_v39 = vld [vmem:[%s6809_s27 + $0x150] sm:$0xff]  ;;  %v9476_v13 = vld [vmem:[#allocation6_spill] sm:$0xff] }
 0x251   : > { %vm3384_vm13 = vweird.f32 %v8162_v61  ;;  %vm8275_vm15 = vcmp.eq.f32.partialorder %v3388_v4, 8.507059e+37  ;;  %v3391_v24 = vor.u32 1.1754944e-38, %v3390_v0  ;;  %v3375_v32 = vand.u32 2147483648, %v8215_v6  ;;  %vm8305_vm4 = vmor %vm3414_vm8, %vm3415_vm11  ;;  %4772 = vmatpush.msra.mxu2 %v501_v39  ;;  %v9486_v39 = vld [vmem:[#allocation12_spill] sm:$0xff] }
 0x252   : > { %5849 = vrcp.f32 %v8258_v8  ;;  %v8281_v11 = vpop.eup %5845  ;;  %v3327_v58 = vsel %vm3326_vm12, %v5840_v56, %v3323_v30  ;;  %v3413_v22 = vadd.f32 %v8217_v9, %v3412_v37  ;;  %v3382_v1 = vmul.f32 %v8248_v59, %v3381_v62 }
 0x253   : > { %vm3385_vm2 = vweird.f32 %v8248_v59  ;;  %v3332_v27 = vsel %vm8226_vm7, %v3331_v45, %v3327_v58  ;;  %v3365_v54 = vmul.f32 %v8281_v11, %v8215_v6  ;;  %vm3369_vm1 = vweird.f32 %v8215_v6  ;;  %5597 = vmatmul.msk.f32.vlgmr.msrb.gmra.mxu2 %vm523_vm0, %v3348_v51  ;;  %v499_v45 = vld [vmem:[%s6809_s27 + $0x140] sm:$0xff] }
 0x254   : > { %vm8291_vm3 = vcmp.eq.f32.partialorder %v3373_v44, 8.507059e+37  ;;  %v8298_v50 = vpop.eup %5847  ;;  %v3333_v56 = vmul.f32 %v9467_v19, %v3332_v27  ;;  %v3383_v38 = vadd.f32 %v8248_v59, %v3382_v1  ;;  %v3448_v20 = vand.u32 2147483647, %v8240_v46  ;;  %5594 = vmatmul.msk.f32.vlgmr.msra.gmra.mxu3 %vm523_vm0, %v3303_v40  ;;  %vm8315_vm5 = vmor %vm3384_vm13, %vm3385_vm2  ;;  %4726 = vmatpush.msra.mxu0 %v499_v45  ;;  %v502_v40 = vld [vmem:[%s6809_s27 + $0x158] sm:$0xff]  ;;  %v504_v45 = vld [vmem:[%s6809_s27 + $0x168] sm:$0xff] }
 0x255   : > { %v3450_v16 = vand.u32 2147483648, %v8240_v46  ;;  %v3366_v41 = vsub.f32 1.0, %v3365_v54  ;;  %v3376_v29 = vor.u32 1.1754944e-38, %v3375_v32  ;;  %v3440_v49 = vmul.f32 %v8298_v50, %v8240_v46  ;;  %4795 = vmatpush.msra.mxu3 %v502_v40  ;;  %v505_v40 = vld [vmem:[%s6809_s27 + $0x170] sm:$0xff] }
 0x256   : > { %v3403_v17 = vand.u32 2147483647, %v8258_v8  ;;  %v3417_v26 = vsel %vm8305_vm4, %v8217_v9, %v3413_v22  ;;  %v3387_v61 = vsel %vm8315_vm5, %v8248_v59, %v3383_v38  ;;  %vm3444_vm6 = vweird.f32 %v8240_v46  ;;  %5596 = vmatmul.msk.f32.vlgmr.msrb.gmra.mxu1 %vm523_vm0, %v3333_v56  ;;  %v8336_v9 = vpop.xlane.xlu0 %2711  ;;  %4818 = vmatpush.msrb.mxu0 %v503_v28 }
 0x257   : > { %5851 = vrcp.f32 %v8296_v31  ;;  %v3367_v5 = vmul.f32 %v8281_v11, %v3366_v41  ;;  %vm3370_vm9 = vweird.f32 %v8281_v11  ;;  %v3441_v43 = vsub.f32 1.0, %v3440_v49  ;;  %v8394_v22 = vpop.xlane.xlu1 %2720  ;;  %v9483_v41 = vld [vmem:[#allocation10_spill] sm:$0xff]  ;;  %4841 = vmatpush.msrb.mxu1 %v504_v45  ;;  %4864 = vmatpush.msrb.mxu2 %v505_v40  ;;  %v9500_v40 = vld [vmem:[#allocation15_spill] sm:$0xff] }
 0x258   : > { %v8331_v42 = vpop.eup %5849  ;;  %vm3399_vm7 = vweird.f32 %v8258_v8  ;;  %v3392_v57 = vsel %vm8275_vm15, %v3391_v24, %v3387_v61  ;;  %vm8343_vm8 = vcmp.eq.f32.partialorder %v3448_v20, 8.507059e+37  ;;  %v3451_v59 = vor.u32 1.1754944e-38, %v3450_v16  ;;  %vm3371_vm11 = vmor %vm3369_vm1, %vm3370_vm9 }
 0x259   : > { %v3395_v36 = vmul.f32 %v8331_v42, %v8258_v8  ;;  %v3422_v34 = vsel %vm8267_vm14, %v8244_v18, %v3417_v26  ;;  %v3368_v4 = vadd.f32 %v8281_v11, %v3367_v5  ;;  %v3442_v0 = vmul.f32 %v8298_v50, %v3441_v43  ;;  %v8437_v43 = vpop.xlane.xlu2 %2726 }
 0x25a   : > { %vm8355_vm10 = vcmp.eq.f32.partialorder %v3403_v17, 8.507059e+37  ;;  %vm3445_vm13 = vweird.f32 %v8298_v50  ;;  %v3405_v21 = vand.u32 2147483648, %v8258_v8  ;;  %5853 = vrcp.f32 %v8336_v9  ;;  %v508_v17 = vld [vmem:[%s6809_s27 + $0x188] sm:$0xff] }
 0x25b   : > { %v3396_v18 = vsub.f32 1.0, %v3395_v36  ;;  %v3393_v52 = vmul.f32 %v9476_v13, %v3392_v57  ;;  %v3372_v47 = vsel %vm3371_vm11, %v8281_v11, %v3368_v4  ;;  %v3443_v51 = vadd.f32 %v8298_v50, %v3442_v0  ;;  %vm8387_vm12 = vmor %vm3444_vm6, %vm3445_vm13 }
 0x25c   : > { %v3478_v37 = vand.u32 2147483647, %v8296_v31  ;;  %v3377_v6 = vsel %vm8291_vm3, %v3376_v29, %v3372_v47  ;;  %vm3400_vm14 = vweird.f32 %v8331_v42  ;;  %5855 = vrcp.f32 %v8359_v23  ;;  %5598 = vmatmul.msk.f32.vlgmr.msrb.gmra.mxu3 %vm523_vm0, %v8261_v25 }
 0x25d   : > { %v8372_v44 = vpop.eup %5851  ;;  %v3397_v30 = vmul.f32 %v8331_v42, %v3396_v18  ;;  %v3423_v62 = vmul.f32 %v9477_v2, %v3422_v34  ;;  %v3378_v24 = vmul.f32 %v9478_v53, %v3377_v6  ;;  %v3480_v58 = vand.u32 2147483648, %v8296_v31  ;;  %vm3401_vm15 = vmor %vm3399_vm7, %vm3400_vm14  ;;  %v506_v34 = vld [vmem:[%s6809_s27 + $0x178] sm:$0xff] }
 0x25e   : > { %v3470_v11 = vmul.f32 %v8372_v44, %v8296_v31  ;;  %v3447_v25 = vsel %vm8387_vm12, %v8298_v50, %v3443_v51  ;;  %v3463_v27 = vand.u32 2147483647, %v8336_v9  ;;  %v3465_v46 = vand.u32 2147483648, %v8336_v9  ;;  %5600 = vmatmul.msk.f32.vlgmr.msra.gmra.mxu1 %vm523_vm0, %v3393_v52  ;;  %v8424_v16 = vpop.xlane.xlu0 %2717  ;;  %4887 = vmatpush.msrb.mxu3 %v506_v34 }
 0x25f   : > { %v3398_v1 = vadd.f32 %v8331_v42, %v3397_v30  ;;  %v3406_v54 = vor.u32 1.1754944e-38, %v3405_v21  ;;  %vm3474_vm2 = vweird.f32 %v8296_v31  ;;  %vm8406_vm1 = vcmp.eq.f32.partialorder %v3478_v37, 8.507059e+37  ;;  %5599 = vmatmul.msk.f32.vlgmr.msra.gmra.mxu0 %vm523_vm0, %v3378_v24  ;;  %v8475_v51 = vpop.xlane.xlu1 %2723  ;;  %4933 = vmatpush.msra.mxu1 %v508_v17 }
 0x260   : > { %v3471_v35 = vsub.f32 1.0, %v3470_v11  ;;  %v8411_v50 = vpop.eup %5853  ;;  %vm3475_vm3 = vweird.f32 %v8372_v44  ;;  %vm3459_vm4 = vweird.f32 %v8336_v9  ;;  %5857 = vrcp.f32 %v8394_v22 }
 0x261   : > { %v3402_v56 = vsel %vm3401_vm15, %v8331_v42, %v3398_v1  ;;  %v3452_v8 = vsel %vm8343_vm8, %v3451_v59, %v3447_v25  ;;  %v3455_v20 = vmul.f32 %v8411_v50, %v8336_v9  ;;  %v3481_v49 = vor.u32 1.1754944e-38, %v3480_v58  ;;  %vm8446_vm9 = vmor %vm3474_vm2, %vm3475_vm3  ;;  %v9491_v9 = vld [vmem:[#allocation16_spill] sm:$0xff]  ;;  %v9492_v25 = vld [vmem:[#allocation11_spill] sm:$0xff] }
 0x262   : > { %v3407_v12 = vsel %vm8355_vm10, %v3406_v54, %v3402_v56  ;;  %v3472_v38 = vmul.f32 %v8372_v44, %v3471_v35  ;;  %v8426_v14 = vpop.eup %5855  ;;  %vm8429_vm5 = vcmp.eq.f32.partialorder %v3463_v27, 8.507059e+37  ;;  %v3466_v26 = vor.u32 1.1754944e-38, %v3465_v46 }
 0x263   : > { %v3408_v29 = vmul.f32 %v9483_v41, %v3407_v12  ;;  %v3456_v42 = vsub.f32 1.0, %v3455_v20  ;;  %v3425_v5 = vmul.f32 %v8426_v14, %v8359_v23  ;;  %vm3429_vm6 = vweird.f32 %v8359_v23  ;;  %v9497_v12 = vld [vmem:[#allocation13_spill] sm:$0xff] }
 0x264   : > { %v3473_v61 = vadd.f32 %v8372_v44, %v3472_v38  ;;  %v3453_v57 = vmul.f32 %v9486_v39, %v3452_v8  ;;  %v3433_v59 = vand.u32 2147483647, %v8359_v23  ;;  %v3435_v36 = vand.u32 2147483648, %v8359_v23  ;;  %5602 = vmatmul.msk.f32.vlgmr.msra.gmra.mxu3 %vm523_vm0, %v3423_v62 }
 0x265   : > { %5859 = vrcp.f32 %v8424_v16  ;;  %5601 = vmatmul.msk.f32.vlgmr.msra.gmra.mxu2 %vm523_vm0, %v3408_v29  ;;  %v3457_v4 = vmul.f32 %v8411_v50, %v3456_v42  ;;  %vm3460_vm7 = vweird.f32 %v8411_v50  ;;  %v3426_v0 = vsub.f32 1.0, %v3425_v5  ;;  %v510_v42 = vld [vmem:[%s6809_s27 + $0x198] sm:$0xff]  ;;  %v509_v5 = vld [vmem:[%s6809_s27 + $0x190] sm:$0xff] }
 0x266   : > { %v3477_v31 = vsel %vm8446_vm9, %v8372_v44, %v3473_v61  ;;  %v8462_v60 = vpop.eup %5857  ;;  %vm3430_vm8 = vweird.f32 %v8426_v14  ;;  %vm3504_vm10 = vweird.f32 %v8394_v22  ;;  %v3508_v18 = vand.u32 2147483647, %v8394_v22  ;;  %5604 = vmatmul.msk.f32.vlgmr.msrb.gmra.mxu1 %vm523_vm0, %v3453_v57  ;;  %vm3461_vm11 = vmor %vm3459_vm4, %vm3460_vm7  ;;  %v8506_v35 = vpop.xlane.xlu0 %2738  ;;  %4979 = vmatpush.msra.mxu3 %v510_v42 }
 0x267   : > { %5861 = vrcp.f32 %v8437_v43  ;;  %v3482_v21 = vsel %vm8406_vm1, %v3481_v49, %v3477_v31  ;;  %v3458_v13 = vadd.f32 %v8411_v50, %v3457_v4  ;;  %v3427_v52 = vmul.f32 %v8426_v14, %v3426_v0  ;;  %vm3431_vm14 = vmor %vm3429_vm6, %vm3430_vm8  ;;  %v8533_v49 = vpop.xlane.xlu2 %2732  ;;  %4956 = vmatpush.msra.mxu2 %v509_v5  ;;  %v9509_v5 = vld [vmem:[#allocation17_spill] sm:$0xff] }
 0x268   : > { %v3500_v47 = vmul.f32 %v8462_v60, %v8394_v22  ;;  %vm8481_vm13 = vcmp.eq.f32.partialorder %v3433_v59, 8.507059e+37  ;;  %v3436_v44 = vor.u32 1.1754944e-38, %v3435_v36  ;;  %v3510_v6 = vand.u32 2147483648, %v8394_v22  ;;  %v507_v22 = vld [vmem:[%s6809_s27 + $0x180] sm:$0xff]  ;;  %v8562_v36 = vpop.f32.mrf.mxu0 }
 0x269   : > { %v3493_v30 = vand.u32 2147483647, %v8424_v16  ;;  %v3462_v2 = vsel %vm3461_vm11, %v8411_v50, %v3458_v13  ;;  %v3428_v62 = vadd.f32 %v8426_v14, %v3427_v52  ;;  %v3495_v24 = vand.u32 2147483648, %v8424_v16  ;;  %4910 = vmatpush.msra.mxu0 %v507_v22 }
 0x26a   : > { %v3501_v53 = vsub.f32 1.0, %v3500_v47  ;;  %v3483_v11 = vmul.f32 %v9491_v9, %v3482_v21  ;;  %v3467_v58 = vsel %vm8429_vm5, %v3466_v26, %v3462_v2  ;;  %vm3505_vm12 = vweird.f32 %v8462_v60 }
 0x26b   : > { %v8490_v32 = vpop.eup %5859  ;;  %5863 = vrcp.f32 %v8475_v51  ;;  %v3468_v1 = vmul.f32 %v9492_v25, %v3467_v58  ;;  %v3432_v27 = vsel %vm3431_vm14, %v8426_v14, %v3428_v62  ;;  %vm8512_vm15 = vcmp.eq.f32.partialorder %v3508_v18, 8.507059e+37  ;;  %vm8527_vm1 = vmor %vm3504_vm10, %vm3505_vm12  ;;  %v3831_v18 = vpop.f32.mrf.mxu1  ;;  %v514_v14 = vld [vmem:[%s6809_s27 + $0x1b8] sm:$0xff] }
 0x26c   : > { %v3502_v46 = vmul.f32 %v8462_v60, %v3501_v53  ;;  %v3485_v54 = vmul.f32 %v8490_v32, %v8424_v16  ;;  %v3437_v23 = vsel %vm8481_vm13, %v3436_v44, %v3432_v27  ;;  %v3511_v56 = vor.u32 1.1754944e-38, %v3510_v6  ;;  %5606 = vmatmul.msk.f32.vlgmr.msrb.gmra.mxu3 %vm523_vm0, %v3483_v11  ;;  %v8600_v62 = vpop.xlane.xlu1 %2729  ;;  %v9503_v53 = vld [vmem:[#allocation14_spill] sm:$0xff] }
 0x26d   : > { %v8508_v19 = vpop.eup %5861  ;;  %vm8516_vm2 = vcmp.eq.f32.partialorder %v3493_v30, 8.507059e+37  ;;  %v3438_v38 = vmul.f32 %v9497_v12, %v3437_v23  ;;  %5605 = vmatmul.msk.f32.vlgmr.msrb.gmra.mxu2 %vm523_vm0, %v3468_v1  ;;  %vm3489_vm3 = vweird.f32 %v8424_v16  ;;  %v3496_v26 = vor.u32 1.1754944e-38, %v3495_v24  ;;  %5071 = vmatpush.msrb.mxu3 %v514_v14 }
 0x26e   : > { %v3503_v20 = vadd.f32 %v8462_v60, %v3502_v46  ;;  %v3486_v41 = vsub.f32 1.0, %v3485_v54  ;;  %v3530_v29 = vmul.f32 %v8508_v19, %v8437_v43  ;;  %v3538_v61 = vand.u32 2147483647, %v8437_v43  ;;  %v8607_v58 = vpop.xlane.xlu0 %2747  ;;  %v9506_v46 = vld [vmem:[#allocation18_spill] sm:$0xff] }
 0x26f   : > { %5865 = vrcp.f32 %v8506_v35  ;;  %vm3490_vm4 = vweird.f32 %v8490_v32  ;;  %5603 = vmatmul.msk.f32.vlgmr.msrb.gmra.mxu0 %vm523_vm0, %v3438_v38  ;;  %vm3534_vm5 = vweird.f32 %v8437_v43  ;;  %vm3535_vm6 = vweird.f32 %v8508_v19  ;;  %v8621_v50 = vpop.xlane.xlu2 %2735 }
 0x270   : > { %v3507_v45 = vsel %vm8527_vm1, %v8462_v60, %v3503_v20  ;;  %v3487_v28 = vmul.f32 %v8490_v32, %v3486_v41  ;;  %v3531_v39 = vsub.f32 1.0, %v3530_v29  ;;  %v3540_v59 = vand.u32 2147483648, %v8437_v43  ;;  %v3725_v60 = vld [vmem:[%s8544_s30 + $0x8] sm:$0xff]  ;;  %vm3491_vm9 = vmor %vm3489_vm3, %vm3490_vm4  ;;  %v513_v41 = vld [vmem:[%s6809_s27 + $0x1b0] sm:$0xff]  ;;  %v8651_v42 = vpop.f32.mrf.mxu0 }
 0x271   : > { %v8555_v57 = vpop.eup %5863  ;;  %v3512_v15 = vsel %vm8512_vm15, %v3511_v56, %v3507_v45  ;;  %vm8574_vm7 = vcmp.eq.f32.partialorder %v3538_v61, 8.507059e+37  ;;  %v3523_v13 = vand.u32 2147483647, %v8475_v51  ;;  %v3525_v52 = vand.u32 2147483648, %v8475_v51  ;;  %vm3536_vm10 = vmor %vm3534_vm5, %vm3535_vm6  ;;  %v512_v56 = vld [vmem:[%s6809_s27 + $0x1a8] sm:$0xff]  ;;  %5048 = vmatpush.msrb.mxu2 %v513_v41 }
 0x272   : > { %v3513_v34 = vmul.f32 %v9500_v40, %v3512_v15  ;;  %v3488_v31 = vadd.f32 %v8490_v32, %v3487_v28  ;;  %v3532_v4 = vmul.f32 %v8508_v19, %v3531_v39  ;;  %v3515_v0 = vmul.f32 %v8555_v57, %v8475_v51  ;;  %5025 = vmatpush.msrb.mxu1 %v512_v56  ;;  %v521_v56 = vld [vmem:[%s6809_s27 + $0x1f0] sm:$0xff] }
 0x273   : > { %5867 = vrcp.f32 %v8533_v49  ;;  %vm3519_vm8 = vweird.f32 %v8475_v51  ;;  %v3541_v30 = vor.u32 1.1754944e-38, %v3540_v59  ;;  %vm3520_vm11 = vweird.f32 %v8555_v57 }
 0x274   : > { %v3492_v47 = vsel %vm3491_vm9, %v8490_v32, %v3488_v31  ;;  %v3533_v37 = vadd.f32 %v8508_v19, %v3532_v4  ;;  %v3516_v44 = vsub.f32 1.0, %v3515_v0  ;;  %5608 = vmatmul.msk.f32.vlgmr.msra.gmra.mxu1 %vm523_vm0, %v3513_v34  ;;  %v3832_v2 = vadd.f32 %v3831_v18, %v3725_v60  ;;  %vm3521_vm14 = vmor %vm3519_vm8, %vm3520_vm11  ;;  %v3724_v4 = vld [vmem:[%s8544_s30] sm:$0xff] }
 0x275   : > { %v8591_v16 = vpop.eup %5865  ;;  %v3497_v6 = vsel %vm8516_vm2, %v3496_v26, %v3492_v47  ;;  %vm8611_vm13 = vcmp.eq.f32.partialorder %v3523_v13, 8.507059e+37  ;;  %v3526_v1 = vor.u32 1.1754944e-38, %v3525_v52  ;;  %v3598_v27 = vand.u32 2147483647, %v8506_v35  ;;  %v8680_v13 = vpop.xlane.xlu1 %2750 }
 0x276   : > { %v3498_v24 = vmul.f32 %v9503_v53, %v3497_v6  ;;  %v3537_v32 = vsel %vm3536_vm10, %v8508_v19, %v3533_v37  ;;  %v3517_v9 = vmul.f32 %v8555_v57, %v3516_v44  ;;  %v3590_v11 = vmul.f32 %v8591_v16, %v8506_v35  ;;  %5261 = vst.msk [vmem:[%s8588_s7 + $0x8] sm:$0xff] %vm523_vm0, %v3832_v2  ;;  %v8711_v25 = vpop.xlane.xlu0 %2744 }
 0x277   : > { %v3542_v43 = vsel %vm8574_vm7, %v3541_v30, %v3537_v32  ;;  %5869 = vrcp.f32 %v8600_v62  ;;  %v3600_v12 = vand.u32 2147483648, %v8506_v35  ;;  %v3568_v38 = vand.u32 2147483647, %v8533_v49  ;;  %v3877_v32 = vpop.f32.mrf.mxu3 }
 0x278   : > { %v3543_v54 = vmul.f32 %v9506_v46, %v3542_v43  ;;  %v3518_v19 = vadd.f32 %v8555_v57, %v3517_v9  ;;  %v3591_v23 = vsub.f32 1.0, %v3590_v11  ;;  %5607 = vmatmul.msk.f32.vlgmr.msra.gmra.mxu0 %vm523_vm0, %v3498_v24  ;;  %v3570_v20 = vand.u32 2147483648, %v8533_v49  ;;  %v3727_v24 = vld [vmem:[%s8544_s30 + $0x18] sm:$0xff]  ;;  %v8699_v9 = vpop.xlane.xlu2 %2741 }
 0x279   : > { %v8625_v8 = vpop.eup %5867  ;;  %5871 = vrcp.f32 %v8607_v58  ;;  %vm3595_vm12 = vweird.f32 %v8591_v16  ;;  %vm3594_vm15 = vweird.f32 %v8506_v35  ;;  %vm8646_vm2 = vcmp.eq.f32.partialorder %v3598_v27, 8.507059e+37  ;;  %v9521_v35 = vld [vmem:[#allocation19_spill] sm:$0xff] }
 0x27a   : > { %v3522_v29 = vsel %vm3521_vm14, %v8555_v57, %v3518_v19  ;;  %v3592_v17 = vmul.f32 %v8591_v16, %v3591_v23  ;;  %v3560_v51 = vmul.f32 %v8625_v8, %v8533_v49  ;;  %5610 = vmatmul.msk.f32.vlgmr.msra.gmra.mxu3 %vm523_vm0, %v3543_v54  ;;  %v3553_v22 = vand.u32 2147483647, %v8600_v62  ;;  %vm3596_vm1 = vmor %vm3594_vm15, %vm3595_vm12 }
 0x27b   : > { %v3527_v26 = vsel %vm8611_vm13, %v3526_v1, %v3522_v29  ;;  %v3555_v57 = vand.u32 2147483648, %v8600_v62  ;;  %v3601_v15 = vor.u32 1.1754944e-38, %v3600_v12  ;;  %vm3564_vm3 = vweird.f32 %v8533_v49  ;;  %v9514_v1 = vld [vmem:[#allocation22_spill] sm:$0xff] }
 0x27c   : > { %v3528_v45 = vmul.f32 %v9509_v5, %v3527_v26  ;;  %v3593_v28 = vadd.f32 %v8591_v16, %v3592_v17  ;;  %v3561_v39 = vsub.f32 1.0, %v3560_v51  ;;  %vm8657_vm4 = vcmp.eq.f32.partialorder %v3568_v38, 8.507059e+37  ;;  %v8729_v38 = vpop.f32.mrf.mxu1  ;;  %v517_v17 = vld [vmem:[%s6809_s27 + $0x1d0] sm:$0xff]  ;;  %v518_v51 = vld [vmem:[%s6809_s27 + $0x1d8] sm:$0xff] }
 0x27d   : > { %5873 = vrcp.f32 %v8621_v50  ;;  %v8662_v59 = vpop.eup %5869  ;;  %vm3565_vm5 = vweird.f32 %v8625_v8  ;;  %v3571_v31 = vor.u32 1.1754944e-38, %v3570_v20  ;;  %vm3549_vm6 = vweird.f32 %v8600_v62  ;;  %v8731_v20 = vpop.f32.mrf.mxu0  ;;  %5163 = vmatpush.msra.mxu3 %v518_v51 }
 0x27e   : > { %v3597_v40 = vsel %vm3596_vm1, %v8591_v16, %v3593_v28  ;;  %v3562_v34 = vmul.f32 %v8625_v8, %v3561_v39  ;;  %5609 = vmatmul.msk.f32.vlgmr.msra.gmra.mxu2 %vm523_vm0, %v3528_v45  ;;  %v3545_v18 = vmul.f32 %v8662_v59, %v8600_v62  ;;  %vm8676_vm9 = vcmp.eq.f32.partialorder %v3553_v22, 8.507059e+37  ;;  %v8686_v16 = vpop.f32.mrf.mxu2  ;;  %vm3566_vm7 = vmor %vm3564_vm3, %vm3565_vm5  ;;  %v511_v62 = vld [vmem:[%s6809_s27 + $0x1a0] sm:$0xff] }
 0x27f   : > { %v8669_v0 = vpop.eup %5871  ;;  %v3602_v60 = vsel %vm8646_vm2, %v3601_v15, %v3597_v40  ;;  %v3556_v37 = vor.u32 1.1754944e-38, %v3555_v57  ;;  %vm3639_vm8 = vweird.f32 %v8607_v58  ;;  %v3643_v30 = vand.u32 2147483647, %v8607_v58  ;;  %5002 = vmatpush.msrb.mxu0 %v511_v62  ;;  %5140 = vmatpush.msra.mxu2 %v517_v17  ;;  %v3728_v15 = vld [vmem:[%s8544_s30 + $0x20] sm:$0xff]  ;;  %v8786_v21 = vpop.f32.mrf.mxu3 }
 0x280   : > { %v3603_v52 = vmul.f32 %v6996_v7, %v3602_v60  ;;  %v3563_v47 = vadd.f32 %v8625_v8, %v3562_v34  ;;  %v3635_v44 = vmul.f32 %v8669_v0, %v8607_v58  ;;  %v3546_v6 = vsub.f32 1.0, %v3545_v18 }
 0x281   : > { %v3809_v7 = vadd.f32 %v8562_v36, %v3724_v4  ;;  %vm3550_vm10 = vweird.f32 %v8662_v59  ;;  %5875 = vrcp.f32 %v8680_v13  ;;  %v3645_v43 = vand.u32 2147483648, %v8607_v58 }
 0x282   : > { %v3567_v2 = vsel %vm3566_vm7, %v8625_v8, %v3563_v47  ;;  %v3636_v53 = vsub.f32 1.0, %v3635_v44  ;;  %5614 = vmatmul.msk.f32.vlgmr.msrb.gmra.mxu3 %vm523_vm0, %v3603_v52  ;;  %v3547_v36 = vmul.f32 %v8662_v59, %v3546_v6  ;;  %vm3579_vm11 = vweird.f32 %v8621_v50  ;;  %vm8723_vm13 = vmor %vm3549_vm6, %vm3550_vm10  ;;  %v515_v6 = vld [vmem:[%s6809_s27 + $0x1c0] sm:$0xff] }
 0x283   : > { %v8702_v49 = vpop.eup %5873  ;;  %v3572_v11 = vsel %vm8657_vm4, %v3571_v31, %v3567_v2  ;;  %5260 = vst.msk [vmem:[%s8588_s7] sm:$0xff] %vm523_vm0, %v3809_v7  ;;  %v3583_v19 = vand.u32 2147483647, %v8621_v50  ;;  %vm3640_vm14 = vweird.f32 %v8669_v0  ;;  %v3585_v8 = vand.u32 2147483648, %v8621_v50  ;;  %v8776_v31 = vpop.xlane.xlu1 %2759  ;;  %5094 = vmatpush.msra.mxu0 %v515_v6 }
 0x284   : > { %v3573_v27 = vmul.f32 %v9514_v1, %v3572_v11  ;;  %v3637_v46 = vmul.f32 %v8669_v0, %v3636_v53  ;;  %v3575_v54 = vmul.f32 %v8702_v49, %v8621_v50  ;;  %v3548_v23 = vadd.f32 %v8662_v59, %v3547_v36  ;;  %vm8759_vm15 = vmor %vm3639_vm8, %vm3640_vm14  ;;  %v8822_v1 = vpop.f32.mrf.mxu1 }
 0x285   : > { %v3878_v12 = vadd.f32 %v3877_v32, %v3727_v24  ;;  %v3658_v29 = vand.u32 2147483647, %v8680_v13  ;;  %5877 = vrcp.f32 %v8711_v25  ;;  %vm8743_vm12 = vcmp.eq.f32.partialorder %v3643_v30, 8.507059e+37  ;;  %v516_v30 = vld [vmem:[%s6809_s27 + $0x1c8] sm:$0xff]  ;;  %v522_v24 = vld [vmem:[%s6809_s27 + $0x1f8] sm:$0xff] }
 0x286   : > { %v3638_v14 = vadd.f32 %v8669_v0, %v3637_v46  ;;  %v3576_v41 = vsub.f32 1.0, %v3575_v54  ;;  %5612 = vmatmul.msk.f32.vlgmr.msrb.gmra.mxu1 %vm523_vm0, %v3573_v27  ;;  %v3552_v26 = vsel %vm8723_vm13, %v8662_v59, %v3548_v23  ;;  %v3660_v22 = vand.u32 2147483648, %v8680_v13  ;;  %5255 = vmatpush.msrb.mxu3 %v522_v24  ;;  %v8824_v27 = vpop.f32.mrf.mxu0  ;;  %v9528_v46 = vld [vmem:[#allocation21_spill] sm:$0xff] }
 0x287   : > { %5263 = vst.msk [vmem:[%s8588_s7 + $0x18] sm:$0xff] %vm523_vm0, %v3878_v12  ;;  %5879 = vrcp.f32 %v8699_v9  ;;  %v8751_v5 = vpop.eup %5875  ;;  %v3557_v45 = vsel %vm8676_vm9, %v3556_v37, %v3552_v26  ;;  %v3646_v39 = vor.u32 1.1754944e-38, %v3645_v43  ;;  %vm3580_vm2 = vweird.f32 %v8702_v49  ;;  %5117 = vmatpush.msra.mxu1 %v516_v30  ;;  %v3726_v43 = vld [vmem:[%s8544_s30 + $0x10] sm:$0xff]  ;;  %v520_v12 = vld [vmem:[%s6809_s27 + $0x1e8] sm:$0xff]  ;;  %v8870_v58 = vpop.f32.mrf.mxu3  ;;  %v3732_v30 = vld [vmem:[%s8544_s30 + $0x40] sm:$0xff] }
 0x288   : > { %v3577_v57 = vmul.f32 %v8702_v49, %v3576_v41  ;;  %v3558_v59 = vmul.f32 %v9521_v35, %v3557_v45  ;;  %v3642_v40 = vsel %vm8759_vm15, %v8669_v0, %v3638_v14  ;;  %vm8770_vm1 = vcmp.eq.f32.partialorder %v3583_v19, 8.507059e+37  ;;  %v8784_v0 = vpop.f32.mrf.mxu2  ;;  %vm8790_vm5 = vmor %vm3579_vm11, %vm3580_vm2 }
 0x289   : > { %v3650_v34 = vmul.f32 %v8751_v5, %v8680_v13  ;;  %v3586_v60 = vor.u32 1.1754944e-38, %v3585_v8  ;;  %vm3654_vm3 = vweird.f32 %v8680_v13  ;;  %vm8780_vm4 = vcmp.eq.f32.partialorder %v3658_v29, 8.507059e+37  ;;  %v519_v8 = vld [vmem:[%s6809_s27 + $0x1e0] sm:$0xff]  ;;  %5209 = vmatpush.msrb.mxu1 %v520_v12 }
 0x28a   : > { %v3578_v4 = vadd.f32 %v8702_v49, %v3577_v57  ;;  %v3661_v37 = vor.u32 1.1754944e-38, %v3660_v22  ;;  %vm3624_vm6 = vweird.f32 %v8711_v25  ;;  %v3901_v44 = vadd.f32 %v8651_v42, %v3728_v15  ;;  %5611 = vmatmul.msk.f32.vlgmr.msrb.gmra.mxu0 %vm523_vm0, %v3558_v59  ;;  %v8808_v42 = vpop.xlane.xlu2 %2762  ;;  %v8852_v22 = vpop.xlane.xlu0 %2753 }
 0x28b   : > { %v3651_v47 = vsub.f32 1.0, %v3650_v34  ;;  %v8799_v7 = vpop.eup %5877  ;;  %v3647_v50 = vsel %vm8743_vm12, %v3646_v39, %v3642_v40  ;;  %v3628_v53 = vand.u32 2147483647, %v8711_v25  ;;  %5881 = vrcp.f32 %v8776_v31  ;;  %5186 = vmatpush.msrb.mxu0 %v519_v8  ;;  %v3729_v40 = vld [vmem:[%s8544_s30 + $0x28] sm:$0xff] }
 0x28c   : > { %v3582_v2 = vsel %vm8790_vm5, %v8702_v49, %v3578_v4  ;;  %vm3655_vm9 = vweird.f32 %v8751_v5  ;;  %v3620_v49 = vmul.f32 %v8799_v7, %v8711_v25  ;;  %5264 = vst.msk [vmem:[%s8588_s7 + $0x20] sm:$0xff] %vm523_vm0, %v3901_v44  ;;  %v3630_v19 = vand.u32 2147483648, %v8711_v25 }
 0x28d   : > { %v8811_v32 = vpop.eup %5879  ;;  %v3587_v11 = vsel %vm8770_vm1, %v3586_v60, %v3582_v2  ;;  %v3652_v36 = vmul.f32 %v8751_v5, %v3651_v47  ;;  %vm3609_vm7 = vweird.f32 %v8699_v9  ;;  %v3648_v14 = vmul.f32 %v7018_v48, %v3647_v50  ;;  %vm3656_vm8 = vmor %vm3654_vm3, %vm3655_vm9  ;;  %v4107_v47 = vpop.f32.mrf.mxu1  ;;  %v9533_v50 = vld [vmem:[#allocation23_spill] sm:$0xff] }
 0x28e   : > { %v3588_v54 = vmul.f32 %v9528_v46, %v3587_v11  ;;  %v3605_v23 = vmul.f32 %v8811_v32, %v8699_v9  ;;  %v3621_v29 = vsub.f32 1.0, %v3620_v49  ;;  %v3613_v62 = vand.u32 2147483647, %v8699_v9  ;;  %v9534_v49 = vld [vmem:[#allocation20_spill] sm:$0xff] }
 0x28f   : > { %v3653_v41 = vadd.f32 %v8751_v5, %v3652_v36  ;;  %v3615_v51 = vand.u32 2147483648, %v8699_v9  ;;  %v3855_v26 = vadd.f32 %v8686_v16, %v3726_v43  ;;  %5883 = vrcp.f32 %v8808_v42  ;;  %v3730_v36 = vld [vmem:[%s8544_s30 + $0x30] sm:$0xff] }
 0x290   : > { %v3606_v17 = vsub.f32 1.0, %v3605_v23  ;;  %5613 = vmatmul.msk.f32.vlgmr.msrb.gmra.mxu2 %vm523_vm0, %v3588_v54  ;;  %v3622_v61 = vmul.f32 %v8799_v7, %v3621_v29  ;;  %vm3625_vm10 = vweird.f32 %v8799_v7  ;;  %vm8848_vm11 = vcmp.eq.f32.partialorder %v3628_v53, 8.507059e+37  ;;  %v8862_v39 = vpop.f32.mrf.mxu2 }
 0x291   : > { %v3657_v48 = vsel %vm3656_vm8, %v8751_v5, %v3653_v41  ;;  %5232 = vmatpush.msrb.mxu2 %v521_v56  ;;  %v8854_v45 = vpop.eup %5881  ;;  %v3631_v28 = vor.u32 1.1754944e-38, %v3630_v19  ;;  %vm3610_vm13 = vweird.f32 %v8811_v32  ;;  %5262 = vst.msk [vmem:[%s8588_s7 + $0x10] sm:$0xff] %vm523_vm0, %v3855_v26  ;;  %v3703_v59 = vand.u32 2147483647, %v8776_v31  ;;  %vm3626_vm14 = vmor %vm3624_vm6, %vm3625_vm10  ;;  %v3731_v41 = vld [vmem:[%s8544_s30 + $0x38] sm:$0xff]  ;;  %v3736_v26 = vld [vmem:[%s8544_s30 + $0x60] sm:$0xff] }
 0x292   : > { %v3662_v16 = vsel %vm8780_vm4, %v3661_v37, %v3657_v48  ;;  %v3607_v5 = vmul.f32 %v8811_v32, %v3606_v17  ;;  %v3623_v15 = vadd.f32 %v8799_v7, %v3622_v61  ;;  %v3695_v35 = vmul.f32 %v8854_v45, %v8776_v31  ;;  %vm3611_vm15 = vmor %vm3609_vm7, %vm3610_vm13  ;;  %v3737_v48 = vld [vmem:[%s8544_s30 + $0x68] sm:$0xff] }
 0x293   : > { %v3663_v57 = vmul.f32 %v7055_v3, %v3662_v16  ;;  %vm8877_vm12 = vcmp.eq.f32.partialorder %v3613_v62, 8.507059e+37  ;;  %v3616_v4 = vor.u32 1.1754944e-38, %v3615_v51  ;;  %5885 = vrcp.f32 %v8852_v22 }
 0x294   : > { %v3608_v34 = vadd.f32 %v8811_v32, %v3607_v5  ;;  %v3627_v60 = vsel %vm3626_vm14, %v8799_v7, %v3623_v15  ;;  %v3696_v18 = vsub.f32 1.0, %v3695_v35  ;;  %v3705_v25 = vand.u32 2147483648, %v8776_v31  ;;  %v8898_v7 = vpop.xlane.xlu1 %2756 }
 0x295   : > { %v3718_v52 = vand.u32 2147483647, %v8808_v42  ;;  %5618 = vmatmul.msk.f32.vlgmr.msra.gmra.mxu3 %vm523_vm0, %v3663_v57  ;;  %v8890_v37 = vpop.eup %5883  ;;  %v3632_v44 = vsel %vm8848_vm11, %v3631_v28, %v3627_v60  ;;  %vm3700_vm2 = vweird.f32 %v8854_v45  ;;  %v3924_v9 = vadd.f32 %v8729_v38, %v3729_v40  ;;  %v3735_v28 = vld [vmem:[%s8544_s30 + $0x58] sm:$0xff]  ;;  %v4153_v40 = vpop.f32.mrf.mxu3  ;;  %v3738_v60 = vld [vmem:[%s8544_s30 + $0x70] sm:$0xff] }
 0x296   : > { %v3612_v6 = vsel %vm3611_vm15, %v8811_v32, %v3608_v34  ;;  %v3633_v2 = vmul.f32 %v9533_v50, %v3632_v44  ;;  %v3697_v24 = vmul.f32 %v8854_v45, %v3696_v18  ;;  %v3710_v11 = vmul.f32 %v8890_v37, %v8808_v42  ;;  %v4176_v32 = vpop.f32.mrf.mxu0  ;;  %v4199_v34 = vpop.f32.mrf.mxu1 }
 0x297   : > { %v3617_v53 = vsel %vm8877_vm12, %v3616_v4, %v3612_v6  ;;  %vm3699_vm1 = vweird.f32 %v8776_v31  ;;  %vm8909_vm3 = vcmp.eq.f32.partialorder %v3703_v59, 8.507059e+37  ;;  %v3720_v46 = vand.u32 2147483648, %v8808_v42  ;;  %5265 = vst.msk [vmem:[%s8588_s7 + $0x28] sm:$0xff] %vm523_vm0, %v3924_v9  ;;  %v3733_v31 = vld [vmem:[%s8544_s30 + $0x48] sm:$0xff]  ;;  %v3740_v59 = vld [vmem:[%s8544_s30 + $0x80] sm:$0xff] }
 0x298   : > { %v3618_v43 = vmul.f32 %v9534_v49, %v3617_v53  ;;  %5617 = vmatmul.msk.f32.vlgmr.msra.gmra.mxu2 %vm523_vm0, %v3648_v14  ;;  %v3698_v54 = vadd.f32 %v8854_v45, %v3697_v24  ;;  %v3711_v19 = vsub.f32 1.0, %v3710_v11  ;;  %v3993_v23 = vadd.f32 %v8731_v20, %v3732_v30  ;;  %5616 = vmatmul.msk.f32.vlgmr.msra.gmra.mxu1 %vm523_vm0, %v3633_v2  ;;  %vm8926_vm4 = vmor %vm3699_vm1, %vm3700_vm2  ;;  %v4130_v29 = vpop.f32.mrf.mxu2  ;;  %v3744_v9 = vld [vmem:[%s8544_s30 + $0xa0] sm:$0xff]  ;;  %v3742_v53 = vld [vmem:[%s8544_s30 + $0x90] sm:$0xff] }
 0x299   : > { %5887 = vrcp.f32 %v8898_v7  ;;  %v8922_v56 = vpop.eup %5885  ;;  %v3706_v12 = vor.u32 1.1754944e-38, %v3705_v25  ;;  %vm3714_vm5 = vweird.f32 %v8808_v42  ;;  %vm8931_vm6 = vcmp.eq.f32.partialorder %v3718_v52, 8.507059e+37  ;;  %v3739_v52 = vld [vmem:[%s8544_s30 + $0x78] sm:$0xff] }
 0x29a   : > { %v3947_v14 = vadd.f32 %v8784_v0, %v3730_v36  ;;  %5615 = vmatmul.msk.f32.vlgmr.msra.gmra.mxu0 %vm523_vm0, %v3618_v43  ;;  %v3702_v62 = vsel %vm8926_vm4, %v8854_v45, %v3698_v54  ;;  %v3712_v17 = vmul.f32 %v8890_v37, %v3711_v19  ;;  %vm3715_vm9 = vweird.f32 %v8890_v37  ;;  %5268 = vst.msk [vmem:[%s8588_s7 + $0x40] sm:$0xff] %vm523_vm0, %v3993_v23  ;;  %v3734_v0 = vld [vmem:[%s8544_s30 + $0x50] sm:$0xff]  ;;  %v3745_v43 = vld [vmem:[%s8544_s30 + $0xa8] sm:$0xff]  ;;  %v3743_v19 = vld [vmem:[%s8544_s30 + $0x98] sm:$0xff] }
 0x29b   : > { %v3665_v51 = vmul.f32 %v8922_v56, %v8852_v22  ;;  %v3707_v61 = vsel %vm8909_vm3, %v3706_v12, %v3702_v62  ;;  %v3721_v13 = vor.u32 1.1754944e-38, %v3720_v46  ;;  %v3673_v45 = vand.u32 2147483647, %v8852_v22  ;;  %vm3716_vm7 = vmor %vm3714_vm5, %vm3715_vm9  ;;  %v3748_v62 = vld [vmem:[%s8544_s30 + $0xc0] sm:$0xff] }
 0x29c   : > { %5266 = vst.msk [vmem:[%s8588_s7 + $0x30] sm:$0xff] %vm523_vm0, %v3947_v14  ;;  %v4016_v16 = vadd.f32 %v8822_v1, %v3733_v31  ;;  %v3713_v5 = vadd.f32 %v8890_v37, %v3712_v17  ;;  %v3675_v15 = vand.u32 2147483648, %v8852_v22  ;;  %v3970_v35 = vadd.f32 %v8786_v21, %v3731_v41 }
 0x29d   : > { %v3666_v57 = vsub.f32 1.0, %v3665_v51  ;;  %v3708_v3 = vmul.f32 %v7140_v63, %v3707_v61  ;;  %v4039_v1 = vadd.f32 %v8862_v39, %v3734_v0  ;;  %v4085_v4 = vadd.f32 %v8824_v27, %v3736_v26 }
 0x29e   : > { %5269 = vst.msk [vmem:[%s8588_s7 + $0x48] sm:$0xff] %vm523_vm0, %v4016_v16  ;;  %v4108_v21 = vadd.f32 %v4107_v47, %v3737_v48  ;;  %v3717_v25 = vsel %vm3716_vm7, %v8890_v37, %v3713_v5  ;;  %vm3670_vm8 = vweird.f32 %v8922_v56  ;;  %v4062_v42 = vadd.f32 %v8870_v58, %v3735_v28  ;;  %v3741_v37 = vld [vmem:[%s8544_s30 + $0x88] sm:$0xff]  ;;  %v4268_v30 = vpop.f32.mrf.mxu0  ;;  %v3752_v5 = vld [vmem:[%s8544_s30 + $0xe0] sm:$0xff] }
 0x29f   : > { %v5888_v18 = vpop.eup %5887  ;;  %v3667_v63 = vmul.f32 %v8922_v56, %v3666_v57  ;;  %5267 = vst.msk [vmem:[%s8588_s7 + $0x38] sm:$0xff] %vm523_vm0, %v3970_v35  ;;  %v3722_v39 = vsel %vm8931_vm6, %v3721_v13, %v3717_v25  ;;  %v4177_v47 = vadd.f32 %v4176_v32, %v3740_v59  ;;  %vm3669_vm10 = vweird.f32 %v8852_v22  ;;  %v3749_v48 = vld [vmem:[%s8544_s30 + $0xc8] sm:$0xff]  ;;  %v3750_v35 = vld [vmem:[%s8544_s30 + $0xd0] sm:$0xff]  ;;  %v3751_v59 = vld [vmem:[%s8544_s30 + $0xd8] sm:$0xff] }
 0x2a0   : > { %v3680_v27 = vmul.f32 %v5888_v18, %v8898_v7  ;;  %5270 = vst.msk [vmem:[%s8588_s7 + $0x50] sm:$0xff] %vm523_vm0, %v4039_v1  ;;  %5621 = vmatmul.msk.f32.vlgmr.msrb.gmra.mxu2 %vm523_vm0, %v3708_v3  ;;  %v3723_v44 = vmul.f32 %v7131_v33, %v3722_v39  ;;  %v4131_v58 = vadd.f32 %v4130_v29, %v3738_v60  ;;  %vm8993_vm11 = vmor %vm3669_vm10, %vm3670_vm8  ;;  %vm3674_vm13 = vcmp.eq.f32.partialorder %v3673_v45, 8.507059e+37  ;;  %v4222_v24 = vpop.f32.mrf.mxu2 }
 0x2a1   : > { %v3668_v6 = vadd.f32 %v8922_v56, %v3667_v63  ;;  %5272 = vst.msk [vmem:[%s8588_s7 + $0x60] sm:$0xff] %vm523_vm0, %v4085_v4  ;;  %v3676_v2 = vor.u32 1.1754944e-38, %v3675_v15  ;;  %v4154_v22 = vadd.f32 %v4153_v40, %v3739_v52  ;;  %v3688_v36 = vand.u32 2147483647, %v8898_v7  ;;  %v4245_v8 = vpop.f32.mrf.mxu3  ;;  %v3756_v4 = vld [vmem:[%s8544_s30 + $0x100] sm:$0xff] }
 0x2a2   : > { %v3681_v33 = vsub.f32 1.0, %v3680_v27  ;;  %5273 = vst.msk [vmem:[%s8588_s7 + $0x68] sm:$0xff] %vm523_vm0, %v4108_v21  ;;  %v3690_v32 = vand.u32 2147483648, %v8898_v7  ;;  %5622 = vmatmul.msk.f32.vlgmr.msrb.gmra.mxu3 %vm523_vm0, %v3723_v44  ;;  %v4200_v49 = vadd.f32 %v4199_v34, %v3741_v37  ;;  %vm3685_vm14 = vweird.f32 %v5888_v18  ;;  %v3753_v21 = vld [vmem:[%s8544_s30 + $0xe8] sm:$0xff]  ;;  %v3760_v52 = vld [vmem:[%s8544_s30 + $0x120] sm:$0xff] }
 0x2a3   : > { %v3672_v11 = vsel %vm8993_vm11, %v8922_v56, %v3668_v6  ;;  %5271 = vst.msk [vmem:[%s8588_s7 + $0x58] sm:$0xff] %vm523_vm0, %v4062_v42  ;;  %v4269_v54 = vadd.f32 %v4268_v30, %v3744_v9  ;;  %v4223_v31 = vadd.f32 %v4222_v24, %v3742_v53  ;;  %v4291_v56 = vpop.f32.mrf.mxu1  ;;  %vm3684_vm12 = vweird.f32 %v8898_v7  ;;  %v3746_v7 = vld [vmem:[%s8544_s30 + $0xb0] sm:$0xff]  ;;  %v3757_v27 = vld [vmem:[%s8544_s30 + $0x108] sm:$0xff]  ;;  %v3755_v30 = vld [vmem:[%s8544_s30 + $0xf8] sm:$0xff] }
 0x2a4   : > { %v3677_v38 = vsel %vm3674_vm13, %v3676_v2, %v3672_v11  ;;  %v3682_v46 = vmul.f32 %v5888_v18, %v3681_v33  ;;  %5276 = vst.msk [vmem:[%s8588_s7 + $0x80] sm:$0xff] %vm523_vm0, %v4177_v47  ;;  %v4292_v20 = vadd.f32 %v4291_v56, %v3745_v43  ;;  %vm3686_vm15 = vmor %vm3684_vm12, %vm3685_vm14  ;;  %v3691_v14 = vor.u32 1.1754944e-38, %v3690_v32  ;;  %v3754_v42 = vld [vmem:[%s8544_s30 + $0xf0] sm:$0xff]  ;;  %v3761_v53 = vld [vmem:[%s8544_s30 + $0x128] sm:$0xff] }
 0x2a5   : > { %v3678_v23 = vmul.f32 %v7092_v55, %v3677_v38  ;;  %5274 = vst.msk [vmem:[%s8588_s7 + $0x70] sm:$0xff] %vm523_vm0, %v4131_v58  ;;  %v4246_v55 = vadd.f32 %v4245_v8, %v3743_v19  ;;  %vm3689_vm2 = vcmp.eq.f32.partialorder %v3688_v36, 8.507059e+37  ;;  %v3758_v9 = vld [vmem:[%s8544_s30 + $0x110] sm:$0xff]  ;;  %v3759_v32 = vld [vmem:[%s8544_s30 + $0x118] sm:$0xff]  ;;  %v3764_v19 = vld [vmem:[%s8544_s30 + $0x140] sm:$0xff] }
 0x2a6   : > { %v3683_v12 = vadd.f32 %v5888_v18, %v3682_v46  ;;  %5275 = vst.msk [vmem:[%s8588_s7 + $0x78] sm:$0xff] %vm523_vm0, %v4154_v22  ;;  %v3762_v36 = vld [vmem:[%s8544_s30 + $0x130] sm:$0xff]  ;;  %v3763_v8 = vld [vmem:[%s8544_s30 + $0x138] sm:$0xff] }
 0x2a7   : > { %5619 = vmatmul.msk.f32.vlgmr.msrb.gmra.mxu0 %vm523_vm0, %v3678_v23  ;;  %5277 = vst.msk [vmem:[%s8588_s7 + $0x88] sm:$0xff] %vm523_vm0, %v4200_v49 }
 0x2a8   : > { %v3687_v41 = vsel %vm3686_vm15, %v5888_v18, %v3683_v12  ;;  %5280 = vst.msk [vmem:[%s8588_s7 + $0xa0] sm:$0xff] %vm523_vm0, %v4269_v54  ;;  %v4314_v51 = vpop.f32.mrf.mxu2  ;;  %v4360_v26 = vpop.f32.mrf.mxu0  ;;  %v3765_v54 = vld [vmem:[%s8544_s30 + $0x148] sm:$0xff] }
 0x2a9   : > { %v3692_v29 = vsel %vm3689_vm2, %v3691_v14, %v3687_v41  ;;  %5278 = vst.msk [vmem:[%s8588_s7 + $0x90] sm:$0xff] %vm523_vm0, %v4223_v31  ;;  %v4315_v0 = vadd.f32 %v4314_v51, %v3746_v7  ;;  %v4361_v61 = vadd.f32 %v4360_v26, %v3748_v62  ;;  %v3767_v62 = vld [vmem:[%s8544_s30 + $0x158] sm:$0xff] }
 0x2aa   : > { %v3693_v17 = vmul.f32 %v7079_v10, %v3692_v29  ;;  %5281 = vst.msk [vmem:[%s8588_s7 + $0xa8] sm:$0xff] %vm523_vm0, %v4292_v20  ;;  %v3747_v10 = vld [vmem:[%s8544_s30 + $0xb8] sm:$0xff]  ;;  %v3766_v29 = vld [vmem:[%s8544_s30 + $0x150] sm:$0xff] }
 0x2ab   : > { %5279 = vst.msk [vmem:[%s8588_s7 + $0x98] sm:$0xff] %vm523_vm0, %v4246_v55  ;;  %v4383_v13 = vpop.f32.mrf.mxu1  ;;  %v3769_v55 = vld [vmem:[%s8544_s30 + $0x168] sm:$0xff] }
 0x2ac   : > { %5620 = vmatmul.msk.f32.vlgmr.msrb.gmra.mxu1 %vm523_vm0, %v3693_v17  ;;  %5282 = vst.msk [vmem:[%s8588_s7 + $0xb0] sm:$0xff] %vm523_vm0, %v4315_v0  ;;  %v4384_v45 = vadd.f32 %v4383_v13, %v3749_v48  ;;  %v4337_v16 = vpop.f32.mrf.mxu3  ;;  %v3768_v48 = vld [vmem:[%s8544_s30 + $0x160] sm:$0xff] }
 0x2ad   : > { %5284 = vst.msk [vmem:[%s8588_s7 + $0xc0] sm:$0xff] %vm523_vm0, %v4361_v61  ;;  %v4338_v28 = vadd.f32 %v4337_v16, %v3747_v10  ;;  %v3771_v10 = vld [vmem:[%s8544_s30 + $0x178] sm:$0xff]  ;;  %v3773_v16 = vld [vmem:[%s8544_s30 + $0x188] sm:$0xff] }
 0x2ae   : > { %5285 = vst.msk [vmem:[%s8588_s7 + $0xc8] sm:$0xff] %vm523_vm0, %v4384_v45  ;;  %v3770_v45 = vld [vmem:[%s8544_s30 + $0x170] sm:$0xff] }
 0x2af   : > { %5283 = vst.msk [vmem:[%s8588_s7 + $0xb8] sm:$0xff] %vm523_vm0, %v4338_v28 }
 0x2b5   : > { %v4452_v57 = vpop.f32.mrf.mxu0 }
 0x2b6   : > { %v4453_v15 = vadd.f32 %v4452_v57, %v3752_v5 }
 0x2b8   : > { %5288 = vst.msk [vmem:[%s8588_s7 + $0xe0] sm:$0xff] %vm523_vm0, %v4453_v15  ;;  %v4406_v40 = vpop.f32.mrf.mxu2 }
 0x2b9   : > { %v4429_v34 = vpop.f32.mrf.mxu3  ;;  %v4407_v3 = vadd.f32 %v4406_v40, %v3750_v35  ;;  %v3772_v40 = vld [vmem:[%s8544_s30 + $0x180] sm:$0xff] }
 0x2ba   : > { %v4430_v1 = vadd.f32 %v4429_v34, %v3751_v59 }
 0x2bb   : > { %5286 = vst.msk [vmem:[%s8588_s7 + $0xd0] sm:$0xff] %vm523_vm0, %v4407_v3 }
 0x2bc   : > { %5287 = vst.msk [vmem:[%s8588_s7 + $0xd8] sm:$0xff] %vm523_vm0, %v4430_v1  ;;  %v3775_v1 = vld [vmem:[%s8544_s30 + $0x198] sm:$0xff] }
 0x2bd   : > { %v4544_v60 = vpop.f32.mrf.mxu0 }
 0x2be   : > { %v4545_v18 = vadd.f32 %v4544_v60, %v3756_v4  ;;  %v3774_v60 = vld [vmem:[%s8544_s30 + $0x190] sm:$0xff] }
 0x2c0   : > { %v4475_v25 = vpop.f32.mrf.mxu1  ;;  %5292 = vst.msk [vmem:[%s8588_s7 + $0x100] sm:$0xff] %vm523_vm0, %v4545_v18  ;;  %v3777_v18 = vld [vmem:[%s8544_s30 + $0x1a8] sm:$0xff] }
 0x2c1   : > { %v4476_v63 = vadd.f32 %v4475_v25, %v3753_v21 }
 0x2c3   : > { %5289 = vst.msk [vmem:[%s8588_s7 + $0xe8] sm:$0xff] %vm523_vm0, %v4476_v63 }
 0x2c5   : > { %v4636_v47 = vpop.f32.mrf.mxu0 }
 0x2c6   : > { %v4498_v39 = vpop.f32.mrf.mxu2  ;;  %v4637_v44 = vadd.f32 %v4636_v47, %v3760_v52  ;;  %v3779_v52 = vld [vmem:[%s8544_s30 + $0x1b8] sm:$0xff]  ;;  %v3776_v47 = vld [vmem:[%s8544_s30 + $0x1a0] sm:$0xff] }
 0x2c7   : > { %v4499_v37 = vadd.f32 %v4498_v39, %v3754_v42 }
 0x2c8   : > { %v4567_v6 = vpop.f32.mrf.mxu1  ;;  %5296 = vst.msk [vmem:[%s8588_s7 + $0x120] sm:$0xff] %vm523_vm0, %v4637_v44 }
 0x2c9   : > { %5290 = vst.msk [vmem:[%s8588_s7 + $0xf0] sm:$0xff] %vm523_vm0, %v4499_v37  ;;  %v4568_v58 = vadd.f32 %v4567_v6, %v3757_v27 }
 0x2cb   : > { %5293 = vst.msk [vmem:[%s8588_s7 + $0x108] sm:$0xff] %vm523_vm0, %v4568_v58  ;;  %v3778_v58 = vld [vmem:[%s8544_s30 + $0x1b0] sm:$0xff] }
 0x2ce   : > { %v4590_v50 = vpop.f32.mrf.mxu2 }
 0x2cf   : > { %v4521_v2 = vpop.f32.mrf.mxu3  ;;  %v4591_v33 = vadd.f32 %v4590_v50, %v3758_v9  ;;  %v3781_v50 = vld [vmem:[%s8544_s30 + $0x1c8] sm:$0xff] }
 0x2d0   : > { %v4522_v22 = vadd.f32 %v4521_v2, %v3755_v30  ;;  %v3780_v2 = vld [vmem:[%s8544_s30 + $0x1c0] sm:$0xff] }
 0x2d1   : > { %5294 = vst.msk [vmem:[%s8588_s7 + $0x110] sm:$0xff] %vm523_vm0, %v4591_v33 }
 0x2d2   : > { %5291 = vst.msk [vmem:[%s8588_s7 + $0xf8] sm:$0xff] %vm523_vm0, %v4522_v22  ;;  %v3783_v22 = vld [vmem:[%s8544_s30 + $0x1d8] sm:$0xff] }
 0x2d3   : > { %v4659_v24 = vpop.f32.mrf.mxu1 }
 0x2d4   : > { %v4660_v11 = vadd.f32 %v4659_v24, %v3761_v53 }
 0x2d6   : > { %5297 = vst.msk [vmem:[%s8588_s7 + $0x128] sm:$0xff] %vm523_vm0, %v4660_v11  ;;  %v4682_v49 = vpop.f32.mrf.mxu2 }
 0x2d7   : > { %v4613_v43 = vpop.f32.mrf.mxu3  ;;  %v4683_v38 = vadd.f32 %v4682_v49, %v3762_v36  ;;  %v3782_v49 = vld [vmem:[%s8544_s30 + $0x1d0] sm:$0xff] }
 0x2d8   : > { %v4614_v46 = vadd.f32 %v4613_v43, %v3759_v32 }
 0x2d9   : > { %5298 = vst.msk [vmem:[%s8588_s7 + $0x130] sm:$0xff] %vm523_vm0, %v4683_v38 }
 0x2da   : > { %5295 = vst.msk [vmem:[%s8588_s7 + $0x118] sm:$0xff] %vm523_vm0, %v4614_v46  ;;  %v3786_v46 = vld [vmem:[%s8544_s30 + $0x1f0] sm:$0xff] }
 0x2db   : > { %v4751_v23 = vpop.f32.mrf.mxu1 }
 0x2dc   : > { %v4728_v31 = vpop.f32.mrf.mxu0  ;;  %v4752_v56 = vadd.f32 %v4751_v23, %v3765_v54  ;;  %v3784_v54 = vld [vmem:[%s8544_s30 + $0x1e0] sm:$0xff] }
 0x2dd   : > { %v4729_v12 = vadd.f32 %v4728_v31, %v3764_v19 }
 0x2de   : > { %5301 = vst.msk [vmem:[%s8588_s7 + $0x148] sm:$0xff] %vm523_vm0, %v4752_v56  ;;  %v3787_v56 = vld [vmem:[%s8544_s30 + $0x1f8] sm:$0xff] }
 0x2df   : > { %v4705_v20 = vpop.f32.mrf.mxu3  ;;  %5300 = vst.msk [vmem:[%s8588_s7 + $0x140] sm:$0xff] %vm523_vm0, %v4729_v12 }
 0x2e0   : > { %v4706_v14 = vadd.f32 %v4705_v20, %v3763_v8  ;;  %v3785_v20 = vld [vmem:[%s8544_s30 + $0x1e8] sm:$0xff] }
 0x2e2   : > { %5299 = vst.msk [vmem:[%s8588_s7 + $0x138] sm:$0xff] %vm523_vm0, %v4706_v14 }
 0x2e3   : > { %v4843_v41 = vpop.f32.mrf.mxu1 }
 0x2e4   : > { %v4844_v7 = vadd.f32 %v4843_v41, %v3769_v55 }
 0x2e6   : > { %5305 = vst.msk [vmem:[%s8588_s7 + $0x168] sm:$0xff] %vm523_vm0, %v4844_v7 }
 0x2e7   : > { %v4797_v51 = vpop.f32.mrf.mxu3 }
 0x2e8   : > { %v4774_v17 = vpop.f32.mrf.mxu2  ;;  %v4798_v26 = vadd.f32 %v4797_v51, %v3767_v62 }
 0x2e9   : > { %v4775_v0 = vadd.f32 %v4774_v17, %v3766_v29 }
 0x2ea   : > { %5303 = vst.msk [vmem:[%s8588_s7 + $0x158] sm:$0xff] %vm523_vm0, %v4798_v26 }
 0x2eb   : > { %5302 = vst.msk [vmem:[%s8588_s7 + $0x150] sm:$0xff] %vm523_vm0, %v4775_v0 }
 0x2ec   : > { %v4820_v61 = vpop.f32.mrf.mxu0 }
 0x2ed   : > { %v4821_v13 = vadd.f32 %v4820_v61, %v3768_v48 }
 0x2ef   : > { %5304 = vst.msk [vmem:[%s8588_s7 + $0x160] sm:$0xff] %vm523_vm0, %v4821_v13  ;;  %v4889_v28 = vpop.f32.mrf.mxu3 }
 0x2f0   : > { %v4866_v5 = vpop.f32.mrf.mxu2  ;;  %v4890_v57 = vadd.f32 %v4889_v28, %v3771_v10 }
 0x2f1   : > { %v4935_v15 = vpop.f32.mrf.mxu1  ;;  %v4867_v35 = vadd.f32 %v4866_v5, %v3770_v45 }
 0x2f2   : > { %v4936_v59 = vadd.f32 %v4935_v15, %v3773_v16  ;;  %5307 = vst.msk [vmem:[%s8588_s7 + $0x178] sm:$0xff] %vm523_vm0, %v4890_v57 }
 0x2f3   : > { %5306 = vst.msk [vmem:[%s8588_s7 + $0x170] sm:$0xff] %vm523_vm0, %v4867_v35 }
 0x2f4   : > { %5309 = vst.msk [vmem:[%s8588_s7 + $0x188] sm:$0xff] %vm523_vm0, %v4936_v59 }
 0x2f5   : > { %v4912_v34 = vpop.f32.mrf.mxu0 }
 0x2f6   : > { %v4913_v3 = vadd.f32 %v4912_v34, %v3772_v40 }
 0x2f8   : > { %5308 = vst.msk [vmem:[%s8588_s7 + $0x180] sm:$0xff] %vm523_vm0, %v4913_v3 }
 0x2fd   : > { %v4981_v4 = vpop.f32.mrf.mxu3 }
 0x2fe   : > { %v4982_v21 = vadd.f32 %v4981_v4, %v3775_v1 }
 0x300   : > { %5311 = vst.msk [vmem:[%s8588_s7 + $0x198] sm:$0xff] %vm523_vm0, %v4982_v21 }
 0x301   : > { %v4958_v25 = vpop.f32.mrf.mxu2 }
 0x302   : > { %v4959_v63 = vadd.f32 %v4958_v25, %v3774_v60 }
 0x303   : > { %v5027_v42 = vpop.f32.mrf.mxu1 }
 0x304   : > { %v5028_v39 = vadd.f32 %v5027_v42, %v3777_v18  ;;  %5310 = vst.msk [vmem:[%s8588_s7 + $0x190] sm:$0xff] %vm523_vm0, %v4959_v63 }
 0x305   : > { %v5073_v27 = vpop.f32.mrf.mxu3 }
 0x306   : > { %5313 = vst.msk [vmem:[%s8588_s7 + $0x1a8] sm:$0xff] %vm523_vm0, %v5028_v39  ;;  %v5074_v37 = vadd.f32 %v5073_v27, %v3779_v52 }
 0x307   : > { %v5004_v44 = vpop.f32.mrf.mxu0 }
 0x308   : > { %5315 = vst.msk [vmem:[%s8588_s7 + $0x1b8] sm:$0xff] %vm523_vm0, %v5074_v37  ;;  %v5005_v6 = vadd.f32 %v5004_v44, %v3776_v47 }
 0x30a   : > { %5312 = vst.msk [vmem:[%s8588_s7 + $0x1a0] sm:$0xff] %vm523_vm0, %v5005_v6 }
 0x313   : > { %v5050_v9 = vpop.f32.mrf.mxu2 }
 0x314   : > { %v5051_v30 = vadd.f32 %v5050_v9, %v3778_v58 }
 0x315   : > { %v5119_v33 = vpop.f32.mrf.mxu1 }
 0x316   : > { %5314 = vst.msk [vmem:[%s8588_s7 + $0x1b0] sm:$0xff] %vm523_vm0, %v5051_v30  ;;  %v5120_v24 = vadd.f32 %v5119_v33, %v3781_v50 }
 0x317   : > { %v5096_v53 = vpop.f32.mrf.mxu0 }
 0x318   : > { %v5097_v11 = vadd.f32 %v5096_v53, %v3780_v2  ;;  %v5165_v36 = vpop.f32.mrf.mxu3  ;;  %5317 = vst.msk [vmem:[%s8588_s7 + $0x1c8] sm:$0xff] %vm523_vm0, %v5120_v24 }
 0x319   : > { %v5166_v32 = vadd.f32 %v5165_v36, %v3783_v22 }
 0x31a   : > { %5316 = vst.msk [vmem:[%s8588_s7 + $0x1c0] sm:$0xff] %vm523_vm0, %v5097_v11 }
 0x31b   : > { %5319 = vst.msk [vmem:[%s8588_s7 + $0x1d8] sm:$0xff] %vm523_vm0, %v5166_v32  ;;  %v5142_v43 = vpop.f32.mrf.mxu2 }
 0x31c   : > { %v5143_v38 = vadd.f32 %v5142_v43, %v3782_v49 }
 0x31e   : > { %5318 = vst.msk [vmem:[%s8588_s7 + $0x1d0] sm:$0xff] %vm523_vm0, %v5143_v38 }
 0x323   : > { %v5234_v19 = vpop.f32.mrf.mxu2 }
 0x324   : > { %v5188_v23 = vpop.f32.mrf.mxu0  ;;  %v5235_v31 = vadd.f32 %v5234_v19, %v3786_v46 }
 0x325   : > { %v5189_v8 = vadd.f32 %v5188_v23, %v3784_v54  ;;  %v5257_v12 = vpop.f32.mrf.mxu3 }
 0x326   : > { %5322 = vst.msk [vmem:[%s8588_s7 + $0x1f0] sm:$0xff] %vm523_vm0, %v5235_v31  ;;  %v5258_v14 = vadd.f32 %v5257_v12, %v3787_v56 }
 0x327   : > { %5320 = vst.msk [vmem:[%s8588_s7 + $0x1e0] sm:$0xff] %vm523_vm0, %v5189_v8 }
 0x328   : > { %5323 = vst.msk [vmem:[%s8588_s7 + $0x1f8] sm:$0xff] %vm523_vm0, %v5258_v14 }
 0x329   : > { %v5211_v55 = vpop.f32.mrf.mxu1 }
 0x32a   : > { %v5212_v41 = vadd.f32 %v5211_v55, %v3785_v20 }
 0x32c   : > { %5321 = vst.msk [vmem:[%s8588_s7 + $0x1e8] sm:$0xff] %vm523_vm0, %v5212_v41 }
 0x32d PF: > { %s14_s15 = sadd.s32 1, %s5895_s15  }
 0x32e   : > { %p11_p4 = scmp.ge.s32.totalorder %s14_s15, 4  }
 0x330   :  { %13 = sbr.rel (!%p11_p4) target bundleno = 1 (0x1), region = 75 }

// kernel: _lambda_.20
= control target key start
LH: loop header
LB: loop body
LE: loop exit
PB: predicated region body
PF: predicated region fallthrough
CT: control target
= control target key end

     0   :  { %s753_s15 = smov 0   ;;  %s1005_s0 = inlined_call_operand.vmem [shape: f32[512,64], index: 0, kind: input, shape index: {}]   ;;  %s1006_s1 = inlined_call_operand.vmem [shape: f32[64,32], index: 1, kind: input, shape index: {}]   ;;  %s1007_s2 = inlined_call_operand.vmem [shape: f32[1,32], index: 2, kind: input, shape index: {}]   ;;  %s1008_s3 = inlined_call_operand.vmem [shape: f32[512,32], index: 3, kind: input, shape index: {}]   ;;  %s1009_s4 = inlined_call_operand.vmem [shape: f32[512,32], index: 4, kind: output, shape index: {}]  }
   0x1 LB: > { %s642_s16 = sadd.s32 4294967295, %s726_s15   ;;  %p646_p0 = scmp.ge.s32.totalorder %s726_s15, 1  ;;  %s726_s15 = sphi %s753_s15, %s14_s15  }
   0x2   : > { %p174_p1 = scmp.lt.s32.totalorder %s726_s15, 3 }
   0x4   : > { %p175_p2 = pnand %p646_p0, %p174_p1 }
   0x5   : > { %s647_s21 = sshll.u32 (!%p175_p2), %s642_s16, 5 }
   0x6   : > { %178 = sbr.rel (%p175_p2) target bundleno = 221 (0xdd), region = 36  ;;  %p206_p3 = scmp.lt.s32.totalorder (!%p175_p2), %s647_s21, 63 }
   0xb   : > { %v262_v0 = vld [vmem:[%s1006_s1 + $0x38] sm:$0xff]  ;;  %v261_v1 = vld [vmem:[%s1006_s1 + $0x30] sm:$0xff]  ;;  %v260_v2 = vld [vmem:[%s1006_s1 + $0x28] sm:$0xff]  ;;  %s1011_s21 = smov (!%p206_p3, %s647_s21), 63  ;;  %vm267_vm0 = vcmask 523264   ;;  %vm541_vm1 = vcmask 261120  }
   0xc   : > { %688 = vmatpush.msra.mxu2 %v262_v0  ;;  %689 = vmatpush.msra.mxu3 %v262_v0  ;;  %v259_v3 = vld [vmem:[%s1006_s1 + $0x20] sm:$0xff]  ;;  %v258_v4 = vld [vmem:[%s1006_s1 + $0x18] sm:$0xff]  ;;  %s776_s28 = sshll.u32 %s1011_s21, 3  ;;  %v257_v5 = vld [vmem:[%s1006_s1 + $0x10] sm:$0xff] }
   0xd   : > { %372 = vmatpush.msra.mxu0 %v262_v0  ;;  %687 = vmatpush.msra.mxu1 %v262_v0  ;;  %v256_v6 = vld [vmem:[%s1006_s1 + $0x8] sm:$0xff]  ;;  %s788_s9 = scalar_lea.vmem %s1005_s0, %s776_s28  ;;  %v255_v7 = vld [vmem:[%s1006_s1] sm:$0xff]  ;;  %s861_s14 = scalar_lea.vmem %s1008_s3, %s776_s28 }
   0xe   : > { %691 = vmatpush.msra.mxu2 %v261_v1  ;;  %692 = vmatpush.msra.mxu3 %v261_v1  ;;  %v239_v8 = vld [vmem:[%s788_s9 + $0x80] sm:$0xff]  ;;  %v240_v12 = vld [vmem:[%s788_s9 + $0x88] sm:$0xff]  ;;  %v241_v16 = vld [vmem:[%s788_s9 + $0x90] sm:$0xff]  ;;  %s876_s20 = scalar_lea.vmem %s1009_s4, %s776_s28 }
   0xf   : > { %373 = vmatpush.msra.mxu0 %v261_v1  ;;  %690 = vmatpush.msra.mxu1 %v261_v1  ;;  %v247_v9 = vld [vmem:[%s788_s9 + $0xc0] sm:$0xff]  ;;  %v248_v13 = vld [vmem:[%s788_s9 + $0xc8] sm:$0xff]  ;;  %v249_v17 = vld [vmem:[%s788_s9 + $0xd0] sm:$0xff] }
  0x10   : > { %694 = vmatpush.msra.mxu2 %v260_v2  ;;  %695 = vmatpush.msra.mxu3 %v260_v2  ;;  %v223_v10 = vld [vmem:[%s788_s9] sm:$0xff]  ;;  %v224_v14 = vld [vmem:[%s788_s9 + $0x8] sm:$0xff]  ;;  %v225_v18 = vld [vmem:[%s788_s9 + $0x10] sm:$0xff] }
  0x11   : > { %374 = vmatpush.msra.mxu0 %v260_v2  ;;  %693 = vmatpush.msra.mxu1 %v260_v2  ;;  %v231_v11 = vld [vmem:[%s788_s9 + $0x40] sm:$0xff]  ;;  %v232_v15 = vld [vmem:[%s788_s9 + $0x48] sm:$0xff]  ;;  %v233_v19 = vld [vmem:[%s788_s9 + $0x50] sm:$0xff] }
  0x12   : > { %697 = vmatpush.msra.mxu2 %v259_v3  ;;  %698 = vmatpush.msra.mxu3 %v259_v3  ;;  %v242_v20 = vld [vmem:[%s788_s9 + $0x98] sm:$0xff]  ;;  %v243_v24 = vld [vmem:[%s788_s9 + $0xa0] sm:$0xff]  ;;  %v244_v28 = vld [vmem:[%s788_s9 + $0xa8] sm:$0xff] }
  0x13   : > { %375 = vmatpush.msra.mxu0 %v259_v3  ;;  %696 = vmatpush.msra.mxu1 %v259_v3  ;;  %v250_v21 = vld [vmem:[%s788_s9 + $0xd8] sm:$0xff]  ;;  %v251_v25 = vld [vmem:[%s788_s9 + $0xe0] sm:$0xff]  ;;  %v252_v29 = vld [vmem:[%s788_s9 + $0xe8] sm:$0xff] }
  0x14   : > { %700 = vmatpush.msra.mxu2 %v258_v4  ;;  %701 = vmatpush.msra.mxu3 %v258_v4  ;;  %v226_v22 = vld [vmem:[%s788_s9 + $0x18] sm:$0xff]  ;;  %v227_v26 = vld [vmem:[%s788_s9 + $0x20] sm:$0xff]  ;;  %v228_v30 = vld [vmem:[%s788_s9 + $0x28] sm:$0xff] }
  0x15   : > { %376 = vmatpush.msra.mxu0 %v258_v4  ;;  %699 = vmatpush.msra.mxu1 %v258_v4  ;;  %v234_v23 = vld [vmem:[%s788_s9 + $0x58] sm:$0xff]  ;;  %v235_v27 = vld [vmem:[%s788_s9 + $0x60] sm:$0xff]  ;;  %v236_v31 = vld [vmem:[%s788_s9 + $0x68] sm:$0xff] }
  0x16   : > { %703 = vmatpush.msra.mxu2 %v257_v5  ;;  %704 = vmatpush.msra.mxu3 %v257_v5  ;;  %v245_v32 = vld [vmem:[%s788_s9 + $0xb0] sm:$0xff]  ;;  %v246_v36 = vld [vmem:[%s788_s9 + $0xb8] sm:$0xff]  ;;  %v866_v40 = vld [vmem:[%s1007_s2] ss:$0 sm:$0xff] }
  0x17   : > { %377 = vmatpush.msra.mxu0 %v257_v5  ;;  %702 = vmatpush.msra.mxu1 %v257_v5  ;;  %v253_v33 = vld [vmem:[%s788_s9 + $0xf0] sm:$0xff]  ;;  %v254_v37 = vld [vmem:[%s788_s9 + $0xf8] sm:$0xff]  ;;  %v477_v42 = vld [vmem:[%s861_s14] sm:$0xff] }
  0x18   : > { %706 = vmatpush.msra.mxu2 %v256_v6  ;;  %707 = vmatpush.msra.mxu3 %v256_v6  ;;  %v229_v34 = vld [vmem:[%s788_s9 + $0x30] sm:$0xff]  ;;  %v230_v38 = vld [vmem:[%s788_s9 + $0x38] sm:$0xff]  ;;  %v485_v44 = vld [vmem:[%s861_s14 + $0x40] sm:$0xff] }
  0x19   : > { %378 = vmatpush.msra.mxu0 %v256_v6  ;;  %705 = vmatpush.msra.mxu1 %v256_v6  ;;  %v237_v35 = vld [vmem:[%s788_s9 + $0x70] sm:$0xff]  ;;  %v238_v39 = vld [vmem:[%s788_s9 + $0x78] sm:$0xff]  ;;  %v493_v50 = vld [vmem:[%s861_s14 + $0x80] sm:$0xff] }
  0x1a   : > { %709 = vmatpush.msra.mxu2 %v255_v7  ;;  %710 = vmatpush.msra.mxu3 %v255_v7  ;;  %v501_v52 = vld [vmem:[%s861_s14 + $0xc0] sm:$0xff]  ;;  %v478_v58 = vld [vmem:[%s861_s14 + $0x8] sm:$0xff] }
  0x1b   : > { %669 = vmatmul.msk.f32.vlgmr.msra.gmra.mxu2 %vm267_vm0, %v239_v8  ;;  %677 = vmatmul.msk.f32.vlgmr.msra.gmra.mxu3 %vm267_vm0, %v247_v9  ;;  %v486_v60 = vld [vmem:[%s861_s14 + $0x48] sm:$0xff] }
  0x1c   : > { %379 = vmatpush.msra.mxu0 %v255_v7  ;;  %708 = vmatpush.msra.mxu1 %v255_v7  ;;  %v494_v2 = vld [vmem:[%s861_s14 + $0x88] sm:$0xff] }
  0x1d   : > { %653 = vmatmul.msk.f32.vlgmr.msra.gmra.mxu0 %vm267_vm0, %v223_v10  ;;  %661 = vmatmul.msk.f32.vlgmr.msra.gmra.mxu1 %vm267_vm0, %v231_v11  ;;  %v502_v4 = vld [vmem:[%s861_s14 + $0xc8] sm:$0xff]  ;;  %v479_v10 = vld [vmem:[%s861_s14 + $0x10] sm:$0xff] }
  0x23   : > { %670 = vmatmul.msk.f32.gmra.mxu2 %vm267_vm0, %v240_v12  ;;  %678 = vmatmul.msk.f32.gmra.mxu3 %vm267_vm0, %v248_v13  ;;  %v487_v12 = vld [vmem:[%s861_s14 + $0x50] sm:$0xff] }
  0x25   : > { %654 = vmatmul.msk.f32.gmra.mxu0 %vm267_vm0, %v224_v14  ;;  %662 = vmatmul.msk.f32.gmra.mxu1 %vm267_vm0, %v232_v15 }
  0x2b   : > { %671 = vmatmul.msk.f32.gmra.mxu2 %vm267_vm0, %v241_v16  ;;  %679 = vmatmul.msk.f32.gmra.mxu3 %vm267_vm0, %v249_v17 }
  0x2d   : > { %655 = vmatmul.msk.f32.gmra.mxu0 %vm267_vm0, %v225_v18  ;;  %663 = vmatmul.msk.f32.gmra.mxu1 %vm267_vm0, %v233_v19  ;;  %v495_v18 = vld [vmem:[%s861_s14 + $0x90] sm:$0xff] }
  0x33   : > { %672 = vmatmul.msk.f32.gmra.mxu2 %vm267_vm0, %v242_v20  ;;  %680 = vmatmul.msk.f32.gmra.mxu3 %vm267_vm0, %v250_v21  ;;  %v503_v20 = vld [vmem:[%s861_s14 + $0xd0] sm:$0xff] }
  0x35   : > { %656 = vmatmul.msk.f32.gmra.mxu0 %vm267_vm0, %v226_v22  ;;  %664 = vmatmul.msk.f32.gmra.mxu1 %vm267_vm0, %v234_v23 }
  0x3b   : > { %673 = vmatmul.msk.f32.gmra.mxu2 %vm267_vm0, %v243_v24  ;;  %681 = vmatmul.msk.f32.gmra.mxu3 %vm267_vm0, %v251_v25 }
  0x3d   : > { %657 = vmatmul.msk.f32.gmra.mxu0 %vm267_vm0, %v227_v26  ;;  %665 = vmatmul.msk.f32.gmra.mxu1 %vm267_vm0, %v235_v27  ;;  %v480_v26 = vld [vmem:[%s861_s14 + $0x18] sm:$0xff] }
  0x43   : > { %674 = vmatmul.msk.f32.gmra.mxu2 %vm267_vm0, %v244_v28  ;;  %682 = vmatmul.msk.f32.gmra.mxu3 %vm267_vm0, %v252_v29  ;;  %v488_v28 = vld [vmem:[%s861_s14 + $0x58] sm:$0xff] }
  0x45   : > { %658 = vmatmul.msk.f32.gmra.mxu0 %vm267_vm0, %v228_v30  ;;  %666 = vmatmul.msk.f32.gmra.mxu1 %vm267_vm0, %v236_v31 }
  0x4b   : > { %675 = vmatmul.msk.f32.gmra.mxu2 %vm267_vm0, %v245_v32  ;;  %683 = vmatmul.msk.f32.gmra.mxu3 %vm267_vm0, %v253_v33 }
  0x4d   : > { %659 = vmatmul.msk.f32.gmra.mxu0 %vm267_vm0, %v229_v34  ;;  %667 = vmatmul.msk.f32.gmra.mxu1 %vm267_vm0, %v237_v35  ;;  %v496_v34 = vld [vmem:[%s861_s14 + $0x98] sm:$0xff] }
  0x53   : > { %676 = vmatmul.msk.f32.gmra.mxu2 %vm267_vm0, %v246_v36  ;;  %684 = vmatmul.msk.f32.gmra.mxu3 %vm267_vm0, %v254_v37  ;;  %v504_v36 = vld [vmem:[%s861_s14 + $0xd8] sm:$0xff] }
  0x55   : > { %660 = vmatmul.msk.f32.gmra.mxu0 %vm267_vm0, %v230_v38  ;;  %668 = vmatmul.msk.f32.gmra.mxu1 %vm267_vm0, %v238_v39 }
  0x9a   : > { %v381_v41 = vpop.f32.mrf.mxu0  ;;  %v405_v43 = vpop.f32.mrf.mxu1 }
  0x9b   : > { %v382_v45 = vadd.f32 %v866_v40, %v381_v41  ;;  %v406_v46 = vadd.f32 %v866_v40, %v405_v43  ;;  %v481_v43 = vld [vmem:[%s861_s14 + $0x20] sm:$0xff] }
  0x9d   : > { %v509_v47 = vadd.f32 %v477_v42, %v382_v45  ;;  %v517_v48 = vadd.f32 %v485_v44, %v406_v46  ;;  %v489_v45 = vld [vmem:[%s861_s14 + $0x60] sm:$0xff] }
  0x9e   : > { %v429_v49 = vpop.f32.mrf.mxu2  ;;  %v453_v51 = vpop.f32.mrf.mxu3 }
  0x9f   : > { %542 = vst.msk [vmem:[%s876_s20] sm:$0xff] %vm541_vm1, %v509_v47  ;;  %v430_v53 = vadd.f32 %v866_v40, %v429_v49  ;;  %v454_v54 = vadd.f32 %v866_v40, %v453_v51  ;;  %v497_v51 = vld [vmem:[%s861_s14 + $0xa0] sm:$0xff] }
  0xa0   : > { %550 = vst.msk [vmem:[%s876_s20 + $0x40] sm:$0xff] %vm541_vm1, %v517_v48 }
  0xa1   : > { %v525_v55 = vadd.f32 %v493_v50, %v430_v53  ;;  %v533_v56 = vadd.f32 %v501_v52, %v454_v54  ;;  %v505_v53 = vld [vmem:[%s861_s14 + $0xe0] sm:$0xff] }
  0xa2   : > { %v384_v57 = vpop.f32.mrf.mxu0  ;;  %v408_v59 = vpop.f32.mrf.mxu1 }
  0xa3   : > { %558 = vst.msk [vmem:[%s876_s20 + $0x80] sm:$0xff] %vm541_vm1, %v525_v55  ;;  %v385_v61 = vadd.f32 %v866_v40, %v384_v57  ;;  %v409_v62 = vadd.f32 %v866_v40, %v408_v59  ;;  %v482_v59 = vld [vmem:[%s861_s14 + $0x28] sm:$0xff] }
  0xa4   : > { %566 = vst.msk [vmem:[%s876_s20 + $0xc0] sm:$0xff] %vm541_vm1, %v533_v56 }
  0xa5   : > { %v510_v63 = vadd.f32 %v478_v58, %v385_v61  ;;  %v518_v0 = vadd.f32 %v486_v60, %v409_v62  ;;  %v490_v61 = vld [vmem:[%s861_s14 + $0x68] sm:$0xff] }
  0xa6   : > { %v432_v1 = vpop.f32.mrf.mxu2  ;;  %v456_v3 = vpop.f32.mrf.mxu3 }
  0xa7   : > { %543 = vst.msk [vmem:[%s876_s20 + $0x8] sm:$0xff] %vm541_vm1, %v510_v63  ;;  %v433_v5 = vadd.f32 %v866_v40, %v432_v1  ;;  %v457_v6 = vadd.f32 %v866_v40, %v456_v3  ;;  %v498_v3 = vld [vmem:[%s861_s14 + $0xa8] sm:$0xff] }
  0xa8   : > { %551 = vst.msk [vmem:[%s876_s20 + $0x48] sm:$0xff] %vm541_vm1, %v518_v0 }
  0xa9   : > { %v526_v7 = vadd.f32 %v494_v2, %v433_v5  ;;  %v534_v8 = vadd.f32 %v502_v4, %v457_v6  ;;  %v506_v5 = vld [vmem:[%s861_s14 + $0xe8] sm:$0xff] }
  0xaa   : > { %v387_v9 = vpop.f32.mrf.mxu0  ;;  %v411_v11 = vpop.f32.mrf.mxu1 }
  0xab   : > { %559 = vst.msk [vmem:[%s876_s20 + $0x88] sm:$0xff] %vm541_vm1, %v526_v7  ;;  %v388_v13 = vadd.f32 %v866_v40, %v387_v9  ;;  %v412_v14 = vadd.f32 %v866_v40, %v411_v11  ;;  %v483_v11 = vld [vmem:[%s861_s14 + $0x30] sm:$0xff] }
  0xac   : > { %567 = vst.msk [vmem:[%s876_s20 + $0xc8] sm:$0xff] %vm541_vm1, %v534_v8 }
  0xad   : > { %v511_v15 = vadd.f32 %v479_v10, %v388_v13  ;;  %v519_v16 = vadd.f32 %v487_v12, %v412_v14  ;;  %v491_v13 = vld [vmem:[%s861_s14 + $0x70] sm:$0xff] }
  0xae   : > { %v435_v17 = vpop.f32.mrf.mxu2  ;;  %v459_v19 = vpop.f32.mrf.mxu3 }
  0xaf   : > { %544 = vst.msk [vmem:[%s876_s20 + $0x10] sm:$0xff] %vm541_vm1, %v511_v15  ;;  %v436_v21 = vadd.f32 %v866_v40, %v435_v17  ;;  %v460_v22 = vadd.f32 %v866_v40, %v459_v19  ;;  %v499_v19 = vld [vmem:[%s861_s14 + $0xb0] sm:$0xff] }
  0xb0   : > { %552 = vst.msk [vmem:[%s876_s20 + $0x50] sm:$0xff] %vm541_vm1, %v519_v16 }
  0xb1   : > { %v527_v23 = vadd.f32 %v495_v18, %v436_v21  ;;  %v535_v24 = vadd.f32 %v503_v20, %v460_v22  ;;  %v507_v21 = vld [vmem:[%s861_s14 + $0xf0] sm:$0xff] }
  0xb2   : > { %v390_v25 = vpop.f32.mrf.mxu0  ;;  %v414_v27 = vpop.f32.mrf.mxu1 }
  0xb3   : > { %560 = vst.msk [vmem:[%s876_s20 + $0x90] sm:$0xff] %vm541_vm1, %v527_v23  ;;  %v391_v29 = vadd.f32 %v866_v40, %v390_v25  ;;  %v415_v30 = vadd.f32 %v866_v40, %v414_v27  ;;  %v484_v27 = vld [vmem:[%s861_s14 + $0x38] sm:$0xff] }
  0xb4   : > { %568 = vst.msk [vmem:[%s876_s20 + $0xd0] sm:$0xff] %vm541_vm1, %v535_v24 }
  0xb5   : > { %v512_v31 = vadd.f32 %v480_v26, %v391_v29  ;;  %v520_v32 = vadd.f32 %v488_v28, %v415_v30  ;;  %v492_v29 = vld [vmem:[%s861_s14 + $0x78] sm:$0xff] }
  0xb6   : > { %v438_v33 = vpop.f32.mrf.mxu2  ;;  %v462_v35 = vpop.f32.mrf.mxu3 }
  0xb7   : > { %545 = vst.msk [vmem:[%s876_s20 + $0x18] sm:$0xff] %vm541_vm1, %v512_v31  ;;  %v439_v37 = vadd.f32 %v866_v40, %v438_v33  ;;  %v463_v38 = vadd.f32 %v866_v40, %v462_v35  ;;  %v500_v35 = vld [vmem:[%s861_s14 + $0xb8] sm:$0xff] }
  0xb8   : > { %553 = vst.msk [vmem:[%s876_s20 + $0x58] sm:$0xff] %vm541_vm1, %v520_v32 }
  0xb9   : > { %v528_v39 = vadd.f32 %v496_v34, %v439_v37  ;;  %v536_v41 = vadd.f32 %v504_v36, %v463_v38  ;;  %v508_v37 = vld [vmem:[%s861_s14 + $0xf8] sm:$0xff] }
  0xba   : > { %v393_v42 = vpop.f32.mrf.mxu0  ;;  %v417_v44 = vpop.f32.mrf.mxu1 }
  0xbb   : > { %561 = vst.msk [vmem:[%s876_s20 + $0x98] sm:$0xff] %vm541_vm1, %v528_v39  ;;  %v394_v46 = vadd.f32 %v866_v40, %v393_v42  ;;  %v418_v47 = vadd.f32 %v866_v40, %v417_v44 }
  0xbc   : > { %569 = vst.msk [vmem:[%s876_s20 + $0xd8] sm:$0xff] %vm541_vm1, %v536_v41 }
  0xbd   : > { %v513_v48 = vadd.f32 %v481_v43, %v394_v46  ;;  %v521_v49 = vadd.f32 %v489_v45, %v418_v47 }
  0xbe   : > { %v441_v50 = vpop.f32.mrf.mxu2  ;;  %v465_v52 = vpop.f32.mrf.mxu3 }
  0xbf   : > { %546 = vst.msk [vmem:[%s876_s20 + $0x20] sm:$0xff] %vm541_vm1, %v513_v48  ;;  %v442_v54 = vadd.f32 %v866_v40, %v441_v50  ;;  %v466_v55 = vadd.f32 %v866_v40, %v465_v52 }
  0xc0   : > { %554 = vst.msk [vmem:[%s876_s20 + $0x60] sm:$0xff] %vm541_vm1, %v521_v49 }
  0xc1   : > { %v529_v56 = vadd.f32 %v497_v51, %v442_v54  ;;  %v537_v57 = vadd.f32 %v505_v53, %v466_v55 }
  0xc2   : > { %v396_v58 = vpop.f32.mrf.mxu0  ;;  %v420_v60 = vpop.f32.mrf.mxu1 }
  0xc3   : > { %562 = vst.msk [vmem:[%s876_s20 + $0xa0] sm:$0xff] %vm541_vm1, %v529_v56  ;;  %v397_v62 = vadd.f32 %v866_v40, %v396_v58  ;;  %v421_v63 = vadd.f32 %v866_v40, %v420_v60 }
  0xc4   : > { %570 = vst.msk [vmem:[%s876_s20 + $0xe0] sm:$0xff] %vm541_vm1, %v537_v57 }
  0xc5   : > { %v514_v0 = vadd.f32 %v482_v59, %v397_v62  ;;  %v522_v1 = vadd.f32 %v490_v61, %v421_v63 }
  0xc6   : > { %v444_v2 = vpop.f32.mrf.mxu2  ;;  %v468_v4 = vpop.f32.mrf.mxu3 }
  0xc7   : > { %547 = vst.msk [vmem:[%s876_s20 + $0x28] sm:$0xff] %vm541_vm1, %v514_v0  ;;  %v445_v6 = vadd.f32 %v866_v40, %v444_v2  ;;  %v469_v7 = vadd.f32 %v866_v40, %v468_v4 }
  0xc8   : > { %555 = vst.msk [vmem:[%s876_s20 + $0x68] sm:$0xff] %vm541_vm1, %v522_v1 }
  0xc9   : > { %v530_v8 = vadd.f32 %v498_v3, %v445_v6  ;;  %v538_v9 = vadd.f32 %v506_v5, %v469_v7 }
  0xca   : > { %v399_v10 = vpop.f32.mrf.mxu0  ;;  %v423_v12 = vpop.f32.mrf.mxu1 }
  0xcb   : > { %563 = vst.msk [vmem:[%s876_s20 + $0xa8] sm:$0xff] %vm541_vm1, %v530_v8  ;;  %v400_v14 = vadd.f32 %v866_v40, %v399_v10  ;;  %v424_v15 = vadd.f32 %v866_v40, %v423_v12 }
  0xcc   : > { %571 = vst.msk [vmem:[%s876_s20 + $0xe8] sm:$0xff] %vm541_vm1, %v538_v9 }
  0xcd   : > { %v515_v16 = vadd.f32 %v483_v11, %v400_v14  ;;  %v523_v17 = vadd.f32 %v491_v13, %v424_v15 }
  0xce   : > { %v447_v18 = vpop.f32.mrf.mxu2  ;;  %v471_v20 = vpop.f32.mrf.mxu3 }
  0xcf   : > { %548 = vst.msk [vmem:[%s876_s20 + $0x30] sm:$0xff] %vm541_vm1, %v515_v16  ;;  %v448_v22 = vadd.f32 %v866_v40, %v447_v18  ;;  %v472_v23 = vadd.f32 %v866_v40, %v471_v20 }
  0xd0   : > { %556 = vst.msk [vmem:[%s876_s20 + $0x70] sm:$0xff] %vm541_vm1, %v523_v17 }
  0xd1   : > { %v531_v24 = vadd.f32 %v499_v19, %v448_v22  ;;  %v539_v25 = vadd.f32 %v507_v21, %v472_v23 }
  0xd2   : > { %v402_v26 = vpop.f32.mrf.mxu0  ;;  %v426_v28 = vpop.f32.mrf.mxu1 }
  0xd3   : > { %564 = vst.msk [vmem:[%s876_s20 + $0xb0] sm:$0xff] %vm541_vm1, %v531_v24  ;;  %v403_v30 = vadd.f32 %v866_v40, %v402_v26  ;;  %v427_v31 = vadd.f32 %v866_v40, %v426_v28 }
  0xd4   : > { %572 = vst.msk [vmem:[%s876_s20 + $0xf0] sm:$0xff] %vm541_vm1, %v539_v25 }
  0xd5   : > { %v516_v32 = vadd.f32 %v484_v27, %v403_v30  ;;  %v524_v33 = vadd.f32 %v492_v29, %v427_v31 }
  0xd6   : > { %v450_v34 = vpop.f32.mrf.mxu2  ;;  %v474_v36 = vpop.f32.mrf.mxu3 }
  0xd7   : > { %549 = vst.msk [vmem:[%s876_s20 + $0x38] sm:$0xff] %vm541_vm1, %v516_v32  ;;  %v451_v38 = vadd.f32 %v866_v40, %v450_v34  ;;  %v475_v39 = vadd.f32 %v866_v40, %v474_v36 }
  0xd8   : > { %557 = vst.msk [vmem:[%s876_s20 + $0x78] sm:$0xff] %vm541_vm1, %v524_v33 }
  0xd9   : > { %v532_v41 = vadd.f32 %v500_v35, %v451_v38  ;;  %v540_v42 = vadd.f32 %v508_v37, %v475_v39 }
  0xdb   : > { %565 = vst.msk [vmem:[%s876_s20 + $0xb8] sm:$0xff] %vm541_vm1, %v532_v41 }
  0xdc   : > { %573 = vst.msk [vmem:[%s876_s20 + $0xf8] sm:$0xff] %vm541_vm1, %v540_v42 }
  0xdd PF: > { %s14_s15 = sadd.s32 1, %s726_s15  }
  0xde   : > { %p11_p4 = scmp.ge.s32.totalorder %s14_s15, 4  }
  0xe0   :  { %13 = sbr.rel (!%p11_p4) target bundleno = 1 (0x1), region = 69 }

// kernel: _lambda_.16
= control target key start
LH: loop header
LB: loop body
LE: loop exit
PB: predicated region body
PF: predicated region fallthrough
CT: control target
= control target key end

     0   :  { %s604_s12 = smov 0   ;;  %s809_s0 = inlined_call_operand.vmem [shape: f32[512,32], index: 0, kind: input, shape index: {}]   ;;  %s810_s1 = inlined_call_operand.vmem [shape: f32[32,32], index: 1, kind: input, shape index: {}]   ;;  %s811_s2 = inlined_call_operand.vmem [shape: f32[1,32], index: 2, kind: input, shape index: {}]   ;;  %s812_s3 = inlined_call_operand.vmem [shape: f32[512,32], index: 3, kind: output, shape index: {}]  }
   0x1 LB: > { %s512_s13 = sadd.s32 4294967295, %s582_s12   ;;  %p516_p0 = scmp.ge.s32.totalorder %s582_s12, 1  ;;  %s582_s12 = sphi %s604_s12, %s13_s12  }
   0x2   : > { %p138_p1 = scmp.lt.s32.totalorder %s582_s12, 3 }
   0x4   : > { %p139_p2 = pnand %p516_p0, %p138_p1 }
   0x5   : > { %s517_s18 = sshll.u32 (!%p139_p2), %s512_s13, 5 }
   0x6   : > { %142 = sbr.rel (%p139_p2) target bundleno = 211 (0xd3), region = 32  ;;  %p163_p3 = scmp.lt.s32.totalorder (!%p139_p2), %s517_s18, 63 }
   0xb   : > { %v209_v0 = vld [vmem:[%s810_s1 + $0x18] sm:$0xff]  ;;  %v208_v1 = vld [vmem:[%s810_s1 + $0x10] sm:$0xff]  ;;  %v207_v2 = vld [vmem:[%s810_s1 + $0x8] sm:$0xff]  ;;  %s814_s18 = smov (!%p163_p3, %s517_s18), 63  ;;  %vm214_vm0 = vcmask 261120  }
   0xc   : > { %556 = vmatpush.msra.mxu2 %v209_v0  ;;  %557 = vmatpush.msra.mxu3 %v209_v0  ;;  %v206_v3 = vld [vmem:[%s810_s1] sm:$0xff]  ;;  %s518_s23 = sshll.u32 %s814_s18, 3 }
   0xd   : > { %323 = vmatpush.msra.mxu0 %v209_v0  ;;  %555 = vmatpush.msra.mxu1 %v209_v0  ;;  %s632_s26 = scalar_lea.vmem %s809_s0, %s518_s23  ;;  %v701_v36 = vld [vmem:[%s811_s2] ss:$0 sm:$0xff]  ;;  %s708_s4 = scalar_lea.vmem %s812_s3, %s518_s23 }
   0xe   : > { %559 = vmatpush.msra.mxu2 %v208_v1  ;;  %560 = vmatpush.msra.mxu3 %v208_v1  ;;  %v190_v4 = vld [vmem:[%s632_s26 + $0x80] sm:$0xff]  ;;  %v191_v8 = vld [vmem:[%s632_s26 + $0x88] sm:$0xff]  ;;  %v192_v12 = vld [vmem:[%s632_s26 + $0x90] sm:$0xff] }
   0xf   : > { %324 = vmatpush.msra.mxu0 %v208_v1  ;;  %558 = vmatpush.msra.mxu1 %v208_v1  ;;  %v198_v5 = vld [vmem:[%s632_s26 + $0xc0] sm:$0xff]  ;;  %v199_v9 = vld [vmem:[%s632_s26 + $0xc8] sm:$0xff]  ;;  %v200_v13 = vld [vmem:[%s632_s26 + $0xd0] sm:$0xff] }
  0x10   : > { %562 = vmatpush.msra.mxu2 %v207_v2  ;;  %563 = vmatpush.msra.mxu3 %v207_v2  ;;  %v174_v6 = vld [vmem:[%s632_s26] sm:$0xff]  ;;  %v175_v10 = vld [vmem:[%s632_s26 + $0x8] sm:$0xff]  ;;  %v176_v14 = vld [vmem:[%s632_s26 + $0x10] sm:$0xff] }
  0x11   : > { %325 = vmatpush.msra.mxu0 %v207_v2  ;;  %561 = vmatpush.msra.mxu1 %v207_v2  ;;  %v182_v7 = vld [vmem:[%s632_s26 + $0x40] sm:$0xff]  ;;  %v183_v11 = vld [vmem:[%s632_s26 + $0x48] sm:$0xff]  ;;  %v184_v15 = vld [vmem:[%s632_s26 + $0x50] sm:$0xff] }
  0x12   : > { %565 = vmatpush.msra.mxu2 %v206_v3  ;;  %566 = vmatpush.msra.mxu3 %v206_v3  ;;  %v193_v16 = vld [vmem:[%s632_s26 + $0x98] sm:$0xff]  ;;  %v194_v20 = vld [vmem:[%s632_s26 + $0xa0] sm:$0xff]  ;;  %v195_v24 = vld [vmem:[%s632_s26 + $0xa8] sm:$0xff] }
  0x13   : > { %537 = vmatmul.msk.f32.vlgmr.msra.gmra.mxu2 %vm214_vm0, %v190_v4  ;;  %545 = vmatmul.msk.f32.vlgmr.msra.gmra.mxu3 %vm214_vm0, %v198_v5  ;;  %v201_v17 = vld [vmem:[%s632_s26 + $0xd8] sm:$0xff]  ;;  %v202_v21 = vld [vmem:[%s632_s26 + $0xe0] sm:$0xff]  ;;  %v203_v25 = vld [vmem:[%s632_s26 + $0xe8] sm:$0xff] }
  0x14   : > { %326 = vmatpush.msra.mxu0 %v206_v3  ;;  %564 = vmatpush.msra.mxu1 %v206_v3  ;;  %v177_v18 = vld [vmem:[%s632_s26 + $0x18] sm:$0xff]  ;;  %v178_v22 = vld [vmem:[%s632_s26 + $0x20] sm:$0xff]  ;;  %v179_v26 = vld [vmem:[%s632_s26 + $0x28] sm:$0xff] }
  0x15   : > { %521 = vmatmul.msk.f32.vlgmr.msra.gmra.mxu0 %vm214_vm0, %v174_v6  ;;  %529 = vmatmul.msk.f32.vlgmr.msra.gmra.mxu1 %vm214_vm0, %v182_v7  ;;  %v185_v19 = vld [vmem:[%s632_s26 + $0x58] sm:$0xff]  ;;  %v186_v23 = vld [vmem:[%s632_s26 + $0x60] sm:$0xff]  ;;  %v187_v27 = vld [vmem:[%s632_s26 + $0x68] sm:$0xff] }
  0x16   : > { %v196_v28 = vld [vmem:[%s632_s26 + $0xb0] sm:$0xff]  ;;  %v197_v32 = vld [vmem:[%s632_s26 + $0xb8] sm:$0xff] }
  0x17   : > { %v204_v29 = vld [vmem:[%s632_s26 + $0xf0] sm:$0xff]  ;;  %v205_v33 = vld [vmem:[%s632_s26 + $0xf8] sm:$0xff] }
  0x18   : > { %v180_v30 = vld [vmem:[%s632_s26 + $0x30] sm:$0xff]  ;;  %v181_v34 = vld [vmem:[%s632_s26 + $0x38] sm:$0xff] }
  0x19   : > { %v188_v31 = vld [vmem:[%s632_s26 + $0x70] sm:$0xff]  ;;  %v189_v35 = vld [vmem:[%s632_s26 + $0x78] sm:$0xff] }
  0x1b   : > { %538 = vmatmul.msk.f32.gmra.mxu2 %vm214_vm0, %v191_v8  ;;  %546 = vmatmul.msk.f32.gmra.mxu3 %vm214_vm0, %v199_v9 }
  0x1d   : > { %522 = vmatmul.msk.f32.gmra.mxu0 %vm214_vm0, %v175_v10  ;;  %530 = vmatmul.msk.f32.gmra.mxu1 %vm214_vm0, %v183_v11 }
  0x23   : > { %539 = vmatmul.msk.f32.gmra.mxu2 %vm214_vm0, %v192_v12  ;;  %547 = vmatmul.msk.f32.gmra.mxu3 %vm214_vm0, %v200_v13 }
  0x25   : > { %523 = vmatmul.msk.f32.gmra.mxu0 %vm214_vm0, %v176_v14  ;;  %531 = vmatmul.msk.f32.gmra.mxu1 %vm214_vm0, %v184_v15 }
  0x2b   : > { %540 = vmatmul.msk.f32.gmra.mxu2 %vm214_vm0, %v193_v16  ;;  %548 = vmatmul.msk.f32.gmra.mxu3 %vm214_vm0, %v201_v17 }
  0x2d   : > { %524 = vmatmul.msk.f32.gmra.mxu0 %vm214_vm0, %v177_v18  ;;  %532 = vmatmul.msk.f32.gmra.mxu1 %vm214_vm0, %v185_v19 }
  0x33   : > { %541 = vmatmul.msk.f32.gmra.mxu2 %vm214_vm0, %v194_v20  ;;  %549 = vmatmul.msk.f32.gmra.mxu3 %vm214_vm0, %v202_v21 }
  0x35   : > { %525 = vmatmul.msk.f32.gmra.mxu0 %vm214_vm0, %v178_v22  ;;  %533 = vmatmul.msk.f32.gmra.mxu1 %vm214_vm0, %v186_v23 }
  0x3b   : > { %542 = vmatmul.msk.f32.gmra.mxu2 %vm214_vm0, %v195_v24  ;;  %550 = vmatmul.msk.f32.gmra.mxu3 %vm214_vm0, %v203_v25 }
  0x3d   : > { %526 = vmatmul.msk.f32.gmra.mxu0 %vm214_vm0, %v179_v26  ;;  %534 = vmatmul.msk.f32.gmra.mxu1 %vm214_vm0, %v187_v27 }
  0x43   : > { %543 = vmatmul.msk.f32.gmra.mxu2 %vm214_vm0, %v196_v28  ;;  %551 = vmatmul.msk.f32.gmra.mxu3 %vm214_vm0, %v204_v29 }
  0x45   : > { %527 = vmatmul.msk.f32.gmra.mxu0 %vm214_vm0, %v180_v30  ;;  %535 = vmatmul.msk.f32.gmra.mxu1 %vm214_vm0, %v188_v31 }
  0x4b   : > { %544 = vmatmul.msk.f32.gmra.mxu2 %vm214_vm0, %v197_v32  ;;  %552 = vmatmul.msk.f32.gmra.mxu3 %vm214_vm0, %v205_v33 }
  0x4d   : > { %528 = vmatmul.msk.f32.gmra.mxu0 %vm214_vm0, %v181_v34  ;;  %536 = vmatmul.msk.f32.gmra.mxu1 %vm214_vm0, %v189_v35 }
  0x92   : > { %v328_v37 = vpop.f32.mrf.mxu0  ;;  %v352_v38 = vpop.f32.mrf.mxu1 }
  0x93   : > { %v329_v39 = vadd.f32 %v701_v36, %v328_v37  ;;  %v353_v40 = vadd.f32 %v701_v36, %v352_v38 }
  0x95   : > { %424 = vst.msk [vmem:[%s708_s4] sm:$0xff] %vm214_vm0, %v329_v39 }
  0x96   : > { %432 = vst.msk [vmem:[%s708_s4 + $0x40] sm:$0xff] %vm214_vm0, %v353_v40  ;;  %v376_v41 = vpop.f32.mrf.mxu2  ;;  %v400_v42 = vpop.f32.mrf.mxu3 }
  0x97   : > { %v377_v43 = vadd.f32 %v701_v36, %v376_v41  ;;  %v401_v44 = vadd.f32 %v701_v36, %v400_v42 }
  0x99   : > { %440 = vst.msk [vmem:[%s708_s4 + $0x80] sm:$0xff] %vm214_vm0, %v377_v43 }
  0x9a   : > { %448 = vst.msk [vmem:[%s708_s4 + $0xc0] sm:$0xff] %vm214_vm0, %v401_v44  ;;  %v331_v45 = vpop.f32.mrf.mxu0  ;;  %v355_v46 = vpop.f32.mrf.mxu1 }
  0x9b   : > { %v332_v47 = vadd.f32 %v701_v36, %v331_v45  ;;  %v356_v48 = vadd.f32 %v701_v36, %v355_v46 }
  0x9d   : > { %425 = vst.msk [vmem:[%s708_s4 + $0x8] sm:$0xff] %vm214_vm0, %v332_v47 }
  0x9e   : > { %433 = vst.msk [vmem:[%s708_s4 + $0x48] sm:$0xff] %vm214_vm0, %v356_v48  ;;  %v379_v49 = vpop.f32.mrf.mxu2  ;;  %v403_v50 = vpop.f32.mrf.mxu3 }
  0x9f   : > { %v380_v51 = vadd.f32 %v701_v36, %v379_v49  ;;  %v404_v52 = vadd.f32 %v701_v36, %v403_v50 }
  0xa1   : > { %441 = vst.msk [vmem:[%s708_s4 + $0x88] sm:$0xff] %vm214_vm0, %v380_v51 }
  0xa2   : > { %449 = vst.msk [vmem:[%s708_s4 + $0xc8] sm:$0xff] %vm214_vm0, %v404_v52  ;;  %v334_v53 = vpop.f32.mrf.mxu0  ;;  %v358_v54 = vpop.f32.mrf.mxu1 }
  0xa3   : > { %v335_v55 = vadd.f32 %v701_v36, %v334_v53  ;;  %v359_v56 = vadd.f32 %v701_v36, %v358_v54 }
  0xa5   : > { %426 = vst.msk [vmem:[%s708_s4 + $0x10] sm:$0xff] %vm214_vm0, %v335_v55 }
  0xa6   : > { %434 = vst.msk [vmem:[%s708_s4 + $0x50] sm:$0xff] %vm214_vm0, %v359_v56  ;;  %v382_v57 = vpop.f32.mrf.mxu2  ;;  %v406_v58 = vpop.f32.mrf.mxu3 }
  0xa7   : > { %v383_v59 = vadd.f32 %v701_v36, %v382_v57  ;;  %v407_v60 = vadd.f32 %v701_v36, %v406_v58 }
  0xa9   : > { %442 = vst.msk [vmem:[%s708_s4 + $0x90] sm:$0xff] %vm214_vm0, %v383_v59 }
  0xaa   : > { %450 = vst.msk [vmem:[%s708_s4 + $0xd0] sm:$0xff] %vm214_vm0, %v407_v60  ;;  %v337_v61 = vpop.f32.mrf.mxu0  ;;  %v361_v62 = vpop.f32.mrf.mxu1 }
  0xab   : > { %v338_v63 = vadd.f32 %v701_v36, %v337_v61  ;;  %v362_v0 = vadd.f32 %v701_v36, %v361_v62 }
  0xad   : > { %427 = vst.msk [vmem:[%s708_s4 + $0x18] sm:$0xff] %vm214_vm0, %v338_v63 }
  0xae   : > { %435 = vst.msk [vmem:[%s708_s4 + $0x58] sm:$0xff] %vm214_vm0, %v362_v0  ;;  %v385_v1 = vpop.f32.mrf.mxu2  ;;  %v409_v2 = vpop.f32.mrf.mxu3 }
  0xaf   : > { %v386_v3 = vadd.f32 %v701_v36, %v385_v1  ;;  %v410_v4 = vadd.f32 %v701_v36, %v409_v2 }
  0xb1   : > { %443 = vst.msk [vmem:[%s708_s4 + $0x98] sm:$0xff] %vm214_vm0, %v386_v3 }
  0xb2   : > { %451 = vst.msk [vmem:[%s708_s4 + $0xd8] sm:$0xff] %vm214_vm0, %v410_v4  ;;  %v340_v5 = vpop.f32.mrf.mxu0  ;;  %v364_v6 = vpop.f32.mrf.mxu1 }
  0xb3   : > { %v341_v7 = vadd.f32 %v701_v36, %v340_v5  ;;  %v365_v8 = vadd.f32 %v701_v36, %v364_v6 }
  0xb5   : > { %428 = vst.msk [vmem:[%s708_s4 + $0x20] sm:$0xff] %vm214_vm0, %v341_v7 }
  0xb6   : > { %436 = vst.msk [vmem:[%s708_s4 + $0x60] sm:$0xff] %vm214_vm0, %v365_v8  ;;  %v388_v9 = vpop.f32.mrf.mxu2  ;;  %v412_v10 = vpop.f32.mrf.mxu3 }
  0xb7   : > { %v389_v11 = vadd.f32 %v701_v36, %v388_v9  ;;  %v413_v12 = vadd.f32 %v701_v36, %v412_v10 }
  0xb9   : > { %444 = vst.msk [vmem:[%s708_s4 + $0xa0] sm:$0xff] %vm214_vm0, %v389_v11 }
  0xba   : > { %452 = vst.msk [vmem:[%s708_s4 + $0xe0] sm:$0xff] %vm214_vm0, %v413_v12  ;;  %v343_v13 = vpop.f32.mrf.mxu0  ;;  %v367_v14 = vpop.f32.mrf.mxu1 }
  0xbb   : > { %v344_v15 = vadd.f32 %v701_v36, %v343_v13  ;;  %v368_v16 = vadd.f32 %v701_v36, %v367_v14 }
  0xbd   : > { %429 = vst.msk [vmem:[%s708_s4 + $0x28] sm:$0xff] %vm214_vm0, %v344_v15 }
  0xbe   : > { %437 = vst.msk [vmem:[%s708_s4 + $0x68] sm:$0xff] %vm214_vm0, %v368_v16  ;;  %v391_v17 = vpop.f32.mrf.mxu2  ;;  %v415_v18 = vpop.f32.mrf.mxu3 }
  0xbf   : > { %v392_v19 = vadd.f32 %v701_v36, %v391_v17  ;;  %v416_v20 = vadd.f32 %v701_v36, %v415_v18 }
  0xc1   : > { %445 = vst.msk [vmem:[%s708_s4 + $0xa8] sm:$0xff] %vm214_vm0, %v392_v19 }
  0xc2   : > { %453 = vst.msk [vmem:[%s708_s4 + $0xe8] sm:$0xff] %vm214_vm0, %v416_v20  ;;  %v346_v21 = vpop.f32.mrf.mxu0  ;;  %v370_v22 = vpop.f32.mrf.mxu1 }
  0xc3   : > { %v347_v23 = vadd.f32 %v701_v36, %v346_v21  ;;  %v371_v24 = vadd.f32 %v701_v36, %v370_v22 }
  0xc5   : > { %430 = vst.msk [vmem:[%s708_s4 + $0x30] sm:$0xff] %vm214_vm0, %v347_v23 }
  0xc6   : > { %438 = vst.msk [vmem:[%s708_s4 + $0x70] sm:$0xff] %vm214_vm0, %v371_v24  ;;  %v394_v25 = vpop.f32.mrf.mxu2  ;;  %v418_v26 = vpop.f32.mrf.mxu3 }
  0xc7   : > { %v395_v27 = vadd.f32 %v701_v36, %v394_v25  ;;  %v419_v28 = vadd.f32 %v701_v36, %v418_v26 }
  0xc9   : > { %446 = vst.msk [vmem:[%s708_s4 + $0xb0] sm:$0xff] %vm214_vm0, %v395_v27 }
  0xca   : > { %454 = vst.msk [vmem:[%s708_s4 + $0xf0] sm:$0xff] %vm214_vm0, %v419_v28  ;;  %v349_v29 = vpop.f32.mrf.mxu0  ;;  %v373_v30 = vpop.f32.mrf.mxu1 }
  0xcb   : > { %v350_v31 = vadd.f32 %v701_v36, %v349_v29  ;;  %v374_v32 = vadd.f32 %v701_v36, %v373_v30 }
  0xcd   : > { %431 = vst.msk [vmem:[%s708_s4 + $0x38] sm:$0xff] %vm214_vm0, %v350_v31 }
  0xce   : > { %439 = vst.msk [vmem:[%s708_s4 + $0x78] sm:$0xff] %vm214_vm0, %v374_v32  ;;  %v397_v33 = vpop.f32.mrf.mxu2  ;;  %v421_v34 = vpop.f32.mrf.mxu3 }
  0xcf   : > { %v398_v35 = vadd.f32 %v701_v36, %v397_v33  ;;  %v422_v37 = vadd.f32 %v701_v36, %v421_v34 }
  0xd1   : > { %447 = vst.msk [vmem:[%s708_s4 + $0xb8] sm:$0xff] %vm214_vm0, %v398_v35 }
  0xd2   : > { %455 = vst.msk [vmem:[%s708_s4 + $0xf8] sm:$0xff] %vm214_vm0, %v422_v37 }
  0xd3 PF: > { %s13_s12 = sadd.s32 1, %s582_s12  }
  0xd4   : > { %p10_p4 = scmp.ge.s32.totalorder %s13_s12, 4  }
  0xd6   :  { %12 = sbr.rel (!%p10_p4) target bundleno = 1 (0x1), region = 62 }

// kernel: _lambda_.22
= control target key start
LH: loop header
LB: loop body
LE: loop exit
PB: predicated region body
PF: predicated region fallthrough
CT: control target
= control target key end

     0   :  { %s956_s12 = smov 0   ;;  %s1325_s0 = inlined_call_operand.vmem [shape: f32[512,32], index: 0, kind: input, shape index: {}]   ;;  %s1326_s1 = inlined_call_operand.vmem [shape: f32[32,128], index: 1, kind: input, shape index: {}]   ;;  %s1327_s2 = inlined_call_operand.vmem [shape: f32[1,128], index: 2, kind: input, shape index: {}]   ;;  %s1328_s3 = inlined_call_operand.vmem [shape: f32[512,128], index: 3, kind: output, shape index: {}]  }
   0x1 LB: > { %s800_s13 = sadd.s32 4294967295, %s934_s12   ;;  %p804_p0 = scmp.ge.s32.totalorder %s934_s12, 1  ;;  %s934_s12 = sphi %s956_s12, %s13_s12  }
   0x2   : > { %p138_p1 = scmp.lt.s32.totalorder %s934_s12, 3 }
   0x4   : > { %p139_p2 = pnand %p804_p0, %p138_p1 }
   0x5   : > { %s805_s18 = sshll.u32 (!%p139_p2), %s800_s13, 5 }
   0x6   : > { %142 = sbr.rel (%p139_p2) target bundleno = 244 (0xf4), region = 32  ;;  %p163_p3 = scmp.lt.s32.totalorder (!%p139_p2), %s805_s18, 63 }
   0xb   : > { %v209_v0 = vld [vmem:[%s1326_s1 + $0x18] sm:$0xff]  ;;  %v208_v1 = vld [vmem:[%s1326_s1 + $0x10] sm:$0xff]  ;;  %v207_v2 = vld [vmem:[%s1326_s1 + $0x8] sm:$0xff]  ;;  %s1330_s18 = smov (!%p163_p3, %s805_s18), 63  ;;  %vm214_vm0 = vcmask 261120  }
   0xc   : > { %323 = vmatpush.msra.mxu0 %v209_v0  ;;  %843 = vmatpush.msra.mxu1 %v209_v0  ;;  %v206_v3 = vld [vmem:[%s1326_s1] sm:$0xff]  ;;  %s806_s23 = sshll.u32 %s1330_s18, 3 }
   0xd   : > { %844 = vmatpush.msra.mxu2 %v209_v0  ;;  %845 = vmatpush.msra.mxu3 %v209_v0  ;;  %s984_s26 = scalar_lea.vmem %s1325_s0, %s806_s23  ;;  %v1053_v36 = vld [vmem:[%s1327_s2] ss:$0 sm:$0xff]  ;;  %s1092_s4 = scalar_lea.vmem %s1328_s3, %s806_s23 }
   0xe   : > { %324 = vmatpush.msra.mxu0 %v208_v1  ;;  %846 = vmatpush.msra.mxu1 %v208_v1  ;;  %v174_v4 = vld [vmem:[%s984_s26] sm:$0xff]  ;;  %v175_v8 = vld [vmem:[%s984_s26 + $0x8] sm:$0xff]  ;;  %v176_v12 = vld [vmem:[%s984_s26 + $0x10] sm:$0xff] }
   0xf   : > { %847 = vmatpush.msra.mxu2 %v208_v1  ;;  %848 = vmatpush.msra.mxu3 %v208_v1  ;;  %v182_v5 = vld [vmem:[%s984_s26 + $0x40] sm:$0xff]  ;;  %v183_v9 = vld [vmem:[%s984_s26 + $0x48] sm:$0xff]  ;;  %v184_v13 = vld [vmem:[%s984_s26 + $0x50] sm:$0xff] }
  0x10   : > { %325 = vmatpush.msra.mxu0 %v207_v2  ;;  %849 = vmatpush.msra.mxu1 %v207_v2  ;;  %v190_v6 = vld [vmem:[%s984_s26 + $0x80] sm:$0xff]  ;;  %v191_v10 = vld [vmem:[%s984_s26 + $0x88] sm:$0xff]  ;;  %v192_v14 = vld [vmem:[%s984_s26 + $0x90] sm:$0xff] }
  0x11   : > { %850 = vmatpush.msra.mxu2 %v207_v2  ;;  %851 = vmatpush.msra.mxu3 %v207_v2  ;;  %v198_v7 = vld [vmem:[%s984_s26 + $0xc0] sm:$0xff]  ;;  %v199_v11 = vld [vmem:[%s984_s26 + $0xc8] sm:$0xff]  ;;  %v200_v15 = vld [vmem:[%s984_s26 + $0xd0] sm:$0xff] }
  0x12   : > { %326 = vmatpush.msra.mxu0 %v206_v3  ;;  %852 = vmatpush.msra.mxu1 %v206_v3  ;;  %v177_v16 = vld [vmem:[%s984_s26 + $0x18] sm:$0xff]  ;;  %v178_v20 = vld [vmem:[%s984_s26 + $0x20] sm:$0xff]  ;;  %v179_v24 = vld [vmem:[%s984_s26 + $0x28] sm:$0xff] }
  0x13   : > { %853 = vmatpush.msra.mxu2 %v206_v3  ;;  %854 = vmatpush.msra.mxu3 %v206_v3  ;;  %v185_v17 = vld [vmem:[%s984_s26 + $0x58] sm:$0xff]  ;;  %v186_v21 = vld [vmem:[%s984_s26 + $0x60] sm:$0xff]  ;;  %v187_v25 = vld [vmem:[%s984_s26 + $0x68] sm:$0xff] }
  0x14   : > { %809 = vmatmul.msk.f32.vlgmr.msra.gmra.mxu0 %vm214_vm0, %v174_v4  ;;  %817 = vmatmul.msk.f32.vlgmr.msra.gmra.mxu1 %vm214_vm0, %v182_v5  ;;  %v193_v18 = vld [vmem:[%s984_s26 + $0x98] sm:$0xff]  ;;  %v194_v22 = vld [vmem:[%s984_s26 + $0xa0] sm:$0xff]  ;;  %v195_v26 = vld [vmem:[%s984_s26 + $0xa8] sm:$0xff] }
  0x15   : > { %825 = vmatmul.msk.f32.vlgmr.msra.gmra.mxu2 %vm214_vm0, %v190_v6  ;;  %833 = vmatmul.msk.f32.vlgmr.msra.gmra.mxu3 %vm214_vm0, %v198_v7  ;;  %v201_v19 = vld [vmem:[%s984_s26 + $0xd8] sm:$0xff]  ;;  %v202_v23 = vld [vmem:[%s984_s26 + $0xe0] sm:$0xff]  ;;  %v203_v27 = vld [vmem:[%s984_s26 + $0xe8] sm:$0xff] }
  0x16   : > { %v180_v28 = vld [vmem:[%s984_s26 + $0x30] sm:$0xff]  ;;  %v181_v32 = vld [vmem:[%s984_s26 + $0x38] sm:$0xff] }
  0x17   : > { %v188_v29 = vld [vmem:[%s984_s26 + $0x70] sm:$0xff]  ;;  %v189_v33 = vld [vmem:[%s984_s26 + $0x78] sm:$0xff] }
  0x18   : > { %v196_v30 = vld [vmem:[%s984_s26 + $0xb0] sm:$0xff]  ;;  %v197_v34 = vld [vmem:[%s984_s26 + $0xb8] sm:$0xff] }
  0x19   : > { %v204_v31 = vld [vmem:[%s984_s26 + $0xf0] sm:$0xff]  ;;  %v205_v35 = vld [vmem:[%s984_s26 + $0xf8] sm:$0xff] }
  0x1c   : > { %810 = vmatmul.msk.f32.gmra.mxu0 %vm214_vm0, %v175_v8  ;;  %818 = vmatmul.msk.f32.gmra.mxu1 %vm214_vm0, %v183_v9 }
  0x1d   : > { %826 = vmatmul.msk.f32.gmra.mxu2 %vm214_vm0, %v191_v10  ;;  %834 = vmatmul.msk.f32.gmra.mxu3 %vm214_vm0, %v199_v11 }
  0x24   : > { %811 = vmatmul.msk.f32.gmra.mxu0 %vm214_vm0, %v176_v12  ;;  %819 = vmatmul.msk.f32.gmra.mxu1 %vm214_vm0, %v184_v13 }
  0x25   : > { %827 = vmatmul.msk.f32.gmra.mxu2 %vm214_vm0, %v192_v14  ;;  %835 = vmatmul.msk.f32.gmra.mxu3 %vm214_vm0, %v200_v15 }
  0x2c   : > { %812 = vmatmul.msk.f32.gmra.mxu0 %vm214_vm0, %v177_v16  ;;  %820 = vmatmul.msk.f32.gmra.mxu1 %vm214_vm0, %v185_v17 }
  0x2d   : > { %828 = vmatmul.msk.f32.gmra.mxu2 %vm214_vm0, %v193_v18  ;;  %836 = vmatmul.msk.f32.gmra.mxu3 %vm214_vm0, %v201_v19 }
  0x34   : > { %813 = vmatmul.msk.f32.gmra.mxu0 %vm214_vm0, %v178_v20  ;;  %821 = vmatmul.msk.f32.gmra.mxu1 %vm214_vm0, %v186_v21 }
  0x35   : > { %829 = vmatmul.msk.f32.gmra.mxu2 %vm214_vm0, %v194_v22  ;;  %837 = vmatmul.msk.f32.gmra.mxu3 %vm214_vm0, %v202_v23 }
  0x3c   : > { %814 = vmatmul.msk.f32.gmra.mxu0 %vm214_vm0, %v179_v24  ;;  %822 = vmatmul.msk.f32.gmra.mxu1 %vm214_vm0, %v187_v25 }
  0x3d   : > { %830 = vmatmul.msk.f32.gmra.mxu2 %vm214_vm0, %v195_v26  ;;  %838 = vmatmul.msk.f32.gmra.mxu3 %vm214_vm0, %v203_v27 }
  0x44   : > { %815 = vmatmul.msk.f32.gmra.mxu0 %vm214_vm0, %v180_v28  ;;  %823 = vmatmul.msk.f32.gmra.mxu1 %vm214_vm0, %v188_v29 }
  0x45   : > { %831 = vmatmul.msk.f32.gmra.mxu2 %vm214_vm0, %v196_v30  ;;  %839 = vmatmul.msk.f32.gmra.mxu3 %vm214_vm0, %v204_v31 }
  0x4c   : > { %816 = vmatmul.msk.f32.gmra.mxu0 %vm214_vm0, %v181_v32  ;;  %824 = vmatmul.msk.f32.gmra.mxu1 %vm214_vm0, %v189_v33 }
  0x4d   : > { %832 = vmatmul.msk.f32.gmra.mxu2 %vm214_vm0, %v197_v34  ;;  %840 = vmatmul.msk.f32.gmra.mxu3 %vm214_vm0, %v205_v35 }
  0x91   : > { %v328_v37 = vpop.f32.mrf.mxu0  ;;  %v352_v38 = vpop.f32.mrf.mxu1 }
  0x92   : > { %v329_v39 = vadd.f32 %v1053_v36, %v328_v37  ;;  %v353_v40 = vadd.f32 %v1053_v36, %v352_v38 }
  0x94   : > { %v456_v41 = vmul.f32 0.044715, %v329_v39  ;;  %v464_v42 = vmul.f32 0.044715, %v353_v40  ;;  %v424_v13 = vmul.f32 0.5, %v329_v39  ;;  %v432_v14 = vmul.f32 0.5, %v353_v40 }
  0x96   : > { %v488_v43 = vmul.f32 %v456_v41, %v329_v39  ;;  %v496_v44 = vmul.f32 %v464_v42, %v353_v40 }
  0x98   : > { %v520_v45 = vmul.f32 %v488_v43, %v329_v39  ;;  %v528_v46 = vmul.f32 %v496_v44, %v353_v40  ;;  %v376_v47 = vpop.f32.mrf.mxu2  ;;  %v400_v48 = vpop.f32.mrf.mxu3 }
  0x99   : > { %v377_v49 = vadd.f32 %v1053_v36, %v376_v47  ;;  %v401_v50 = vadd.f32 %v1053_v36, %v400_v48  ;;  %v331_v51 = vpop.f32.mrf.mxu0  ;;  %v355_v52 = vpop.f32.mrf.mxu1 }
  0x9a   : > { %v552_v53 = vadd.f32 %v520_v45, %v329_v39  ;;  %v560_v54 = vadd.f32 %v528_v46, %v353_v40  ;;  %v1060_v55 = vadd.f32 %v1053_v36, %v331_v51  ;;  %v1063_v56 = vadd.f32 %v1053_v36, %v355_v52 }
  0x9b   : > { %v472_v57 = vmul.f32 0.044715, %v377_v49  ;;  %v480_v58 = vmul.f32 0.044715, %v401_v50  ;;  %v440_v22 = vmul.f32 0.5, %v377_v49  ;;  %v448_v38 = vmul.f32 0.5, %v401_v50 }
  0x9c   : > { %v584_v59 = vmul.f32 0.7978846, %v552_v53  ;;  %v592_v60 = vmul.f32 0.7978846, %v560_v54  ;;  %v457_v63 = vmul.f32 0.044715, %v1060_v55 }
  0x9d   : > { %v504_v61 = vmul.f32 %v472_v57, %v377_v49  ;;  %v512_v62 = vmul.f32 %v480_v58, %v401_v50  ;;  %v465_v0 = vmul.f32 0.044715, %v1063_v56  ;;  %v425_v48 = vmul.f32 0.5, %v1060_v55 }
  0x9e   : > { %864 = vtanh.f32 %v584_v59  ;;  %v489_v3 = vmul.f32 %v457_v63, %v1060_v55 }
  0x9f   : > { %866 = vtanh.f32 %v592_v60  ;;  %v536_v1 = vmul.f32 %v504_v61, %v377_v49  ;;  %v544_v2 = vmul.f32 %v512_v62, %v401_v50  ;;  %v497_v4 = vmul.f32 %v465_v0, %v1063_v56 }
  0xa0   : > { %v379_v5 = vpop.f32.mrf.mxu2  ;;  %v403_v6 = vpop.f32.mrf.mxu3  ;;  %v521_v9 = vmul.f32 %v489_v3, %v1060_v55 }
  0xa1   : > { %v568_v7 = vadd.f32 %v536_v1, %v377_v49  ;;  %v576_v8 = vadd.f32 %v544_v2, %v401_v50  ;;  %v1071_v10 = vadd.f32 %v1053_v36, %v379_v5  ;;  %v334_v11 = vpop.f32.mrf.mxu0  ;;  %v358_v12 = vpop.f32.mrf.mxu1  ;;  %v529_v15 = vmul.f32 %v497_v4, %v1063_v56 }
  0xa2   : > { %v1075_v16 = vadd.f32 %v1053_v36, %v403_v6  ;;  %v553_v19 = vadd.f32 %v521_v9, %v1060_v55  ;;  %v1079_v20 = vadd.f32 %v1053_v36, %v334_v11  ;;  %v1085_v29 = vadd.f32 %v1053_v36, %v358_v12 }
  0xa3   : > { %v600_v17 = vmul.f32 0.7978846, %v568_v7  ;;  %v608_v18 = vmul.f32 0.7978846, %v576_v8  ;;  %v561_v23 = vadd.f32 %v529_v15, %v1063_v56  ;;  %v473_v24 = vmul.f32 0.044715, %v1071_v10 }
  0xa4   : > { %v865_v21 = vpop.eup %864  ;;  %v481_v25 = vmul.f32 0.044715, %v1075_v16  ;;  %v585_v28 = vmul.f32 0.7978846, %v553_v19  ;;  %v458_v35 = vmul.f32 0.044715, %v1079_v20 }
  0xa5   : > { %v867_v26 = vpop.eup %866  ;;  %v648_v27 = vadd.f32 1.0, %v865_v21  ;;  %868 = vtanh.f32 %v600_v17  ;;  %v593_v31 = vmul.f32 0.7978846, %v561_v23  ;;  %v505_v32 = vmul.f32 %v473_v24, %v1071_v10 }
  0xa6   : > { %v656_v30 = vadd.f32 1.0, %v867_v26  ;;  %870 = vtanh.f32 %v608_v18  ;;  %v513_v34 = vmul.f32 %v481_v25, %v1075_v16  ;;  %v490_v43 = vmul.f32 %v458_v35, %v1079_v20 }
  0xa7   : > { %v680_v33 = vmul.f32 %v648_v27, %v424_v13  ;;  %872 = vtanh.f32 %v585_v28  ;;  %v537_v39 = vmul.f32 %v505_v32, %v1071_v10  ;;  %v466_v44 = vmul.f32 0.044715, %v1085_v29 }
  0xa8   : > { %v688_v37 = vmul.f32 %v656_v30, %v432_v14  ;;  %874 = vtanh.f32 %v593_v31  ;;  %v382_v40 = vpop.f32.mrf.mxu2  ;;  %v406_v41 = vpop.f32.mrf.mxu3  ;;  %v545_v42 = vmul.f32 %v513_v34, %v1075_v16  ;;  %v433_v49 = vmul.f32 0.5, %v1063_v56 }
  0xa9   : > { %712 = vst [vmem:[%s1092_s4] sm:$0xff] %v680_v33  ;;  %v1103_v45 = vadd.f32 %v1053_v36, %v382_v40  ;;  %v337_v46 = vpop.f32.mrf.mxu0  ;;  %v361_v47 = vpop.f32.mrf.mxu1  ;;  %v569_v50 = vadd.f32 %v537_v39, %v1071_v10  ;;  %v1110_v51 = vadd.f32 %v1053_v36, %v406_v41  ;;  %v522_v54 = vmul.f32 %v490_v43, %v1079_v20 }
  0xaa   : > { %720 = vst [vmem:[%s1092_s4 + $0x40] sm:$0xff] %v688_v37  ;;  %v577_v53 = vadd.f32 %v545_v42, %v1075_v16  ;;  %v498_v57 = vmul.f32 %v466_v44, %v1085_v29  ;;  %v1116_v58 = vadd.f32 %v1053_v36, %v337_v46  ;;  %v1120_v61 = vadd.f32 %v1053_v36, %v361_v47 }
  0xab   : > { %v869_v52 = vpop.eup %868  ;;  %v601_v55 = vmul.f32 0.7978846, %v569_v50  ;;  %v474_v56 = vmul.f32 0.044715, %v1103_v45  ;;  %v554_v1 = vadd.f32 %v522_v54, %v1079_v20  ;;  %v482_v14 = vmul.f32 0.044715, %v1110_v51 }
  0xac   : > { %v871_v59 = vpop.eup %870  ;;  %v664_v60 = vadd.f32 1.0, %v869_v52  ;;  %v609_v0 = vmul.f32 0.7978846, %v577_v53  ;;  %v530_v2 = vmul.f32 %v498_v57, %v1085_v29  ;;  %v441_v18 = vmul.f32 0.5, %v1071_v10 }
  0xad   : > { %v873_v62 = vpop.eup %872  ;;  %v672_v63 = vadd.f32 1.0, %v871_v59  ;;  %876 = vtanh.f32 %v601_v55  ;;  %v506_v6 = vmul.f32 %v474_v56, %v1103_v45  ;;  %v586_v9 = vmul.f32 0.7978846, %v554_v1 }
  0xae   : > { %v875_v3 = vpop.eup %874  ;;  %v696_v4 = vmul.f32 %v664_v60, %v440_v22  ;;  %v649_v5 = vadd.f32 1.0, %v873_v62  ;;  %878 = vtanh.f32 %v609_v0  ;;  %v562_v12 = vadd.f32 %v530_v2, %v1085_v29 }
  0xaf   : > { %v704_v7 = vmul.f32 %v672_v63, %v448_v38  ;;  %v657_v8 = vadd.f32 1.0, %v875_v3  ;;  %v538_v13 = vmul.f32 %v506_v6, %v1103_v45  ;;  %880 = vtanh.f32 %v586_v9 }
  0xb0   : > { %728 = vst [vmem:[%s1092_s4 + $0x80] sm:$0xff] %v696_v4  ;;  %v681_v11 = vmul.f32 %v649_v5, %v425_v48  ;;  %v385_v15 = vpop.f32.mrf.mxu2  ;;  %v459_v19 = vmul.f32 0.044715, %v1116_v58  ;;  %v409_v21 = vpop.f32.mrf.mxu3  ;;  %v449_v22 = vmul.f32 0.5, %v1075_v16  ;;  %v594_v23 = vmul.f32 0.7978846, %v562_v12 }
  0xb1   : > { %736 = vst [vmem:[%s1092_s4 + $0xc0] sm:$0xff] %v704_v7  ;;  %v689_v17 = vmul.f32 %v657_v8, %v433_v49  ;;  %v570_v24 = vadd.f32 %v538_v13, %v1103_v45  ;;  %v514_v25 = vmul.f32 %v482_v14, %v1110_v51  ;;  %v340_v26 = vpop.f32.mrf.mxu0  ;;  %v426_v27 = vmul.f32 0.5, %v1079_v20  ;;  %v364_v53 = vpop.f32.mrf.mxu1 }
  0xb2   : > { %713 = vst [vmem:[%s1092_s4 + $0x8] sm:$0xff] %v681_v11  ;;  %v491_v28 = vmul.f32 %v459_v19, %v1116_v58  ;;  %v467_v10 = vmul.f32 0.044715, %v1120_v61  ;;  %v1141_v30 = vadd.f32 %v1053_v36, %v385_v15  ;;  %882 = vtanh.f32 %v594_v23 }
  0xb3   : > { %721 = vst [vmem:[%s1092_s4 + $0x48] sm:$0xff] %v689_v17  ;;  %v877_v31 = vpop.eup %876  ;;  %v602_v32 = vmul.f32 0.7978846, %v570_v24  ;;  %v546_v16 = vmul.f32 %v514_v25, %v1110_v51  ;;  %v1145_v33 = vadd.f32 %v1053_v36, %v409_v21  ;;  %v1150_v38 = vadd.f32 %v1053_v36, %v340_v26 }
  0xb4   : > { %v879_v34 = vpop.eup %878  ;;  %v665_v35 = vadd.f32 1.0, %v877_v31  ;;  %v523_v37 = vmul.f32 %v491_v28, %v1116_v58  ;;  %v499_v20 = vmul.f32 %v467_v10, %v1120_v61  ;;  %v475_v41 = vmul.f32 0.044715, %v1141_v30 }
  0xb5   : > { %v673_v39 = vadd.f32 1.0, %v879_v34  ;;  %884 = vtanh.f32 %v602_v32  ;;  %v578_v40 = vadd.f32 %v546_v16, %v1110_v51  ;;  %v881_v42 = vpop.eup %880  ;;  %v434_v44 = vmul.f32 0.5, %v1085_v29 }
  0xb6   : > { %v697_v43 = vmul.f32 %v665_v35, %v441_v18  ;;  %v555_v46 = vadd.f32 %v523_v37, %v1116_v58  ;;  %v531_v47 = vmul.f32 %v499_v20, %v1120_v61  ;;  %v650_v49 = vadd.f32 1.0, %v881_v42 }
  0xb7   : > { %v705_v48 = vmul.f32 %v673_v39, %v449_v22  ;;  %v610_v50 = vmul.f32 0.7978846, %v578_v40  ;;  %v507_v52 = vmul.f32 %v475_v41, %v1141_v30  ;;  %v442_v54 = vmul.f32 0.5, %v1103_v45 }
  0xb8   : > { %729 = vst [vmem:[%s1092_s4 + $0x88] sm:$0xff] %v697_v43  ;;  %v587_v57 = vmul.f32 0.7978846, %v555_v46  ;;  %v563_v59 = vadd.f32 %v531_v47, %v1120_v61  ;;  %v483_v60 = vmul.f32 0.044715, %v1145_v33  ;;  %v388_v29 = vpop.f32.mrf.mxu2  ;;  %v883_v55 = vpop.eup %882  ;;  %v682_v56 = vmul.f32 %v650_v49, %v426_v27 }
  0xb9   : > { %737 = vst [vmem:[%s1092_s4 + $0xc8] sm:$0xff] %v705_v48  ;;  %886 = vtanh.f32 %v610_v50  ;;  %v539_v62 = vmul.f32 %v507_v52, %v1141_v30  ;;  %v460_v63 = vmul.f32 0.044715, %v1150_v38  ;;  %v658_v0 = vadd.f32 1.0, %v883_v55  ;;  %v412_v7 = vpop.f32.mrf.mxu3  ;;  %v343_v12 = vpop.f32.mrf.mxu0 }
  0xba   : > { %888 = vtanh.f32 %v587_v57  ;;  %v595_v1 = vmul.f32 0.7978846, %v563_v59  ;;  %v515_v45 = vmul.f32 %v483_v60, %v1145_v33  ;;  %714 = vst [vmem:[%s1092_s4 + $0x10] sm:$0xff] %v682_v56  ;;  %v1170_v5 = vadd.f32 %v1053_v36, %v364_v53  ;;  %v367_v35 = vpop.f32.mrf.mxu1 }
  0xbb   : > { %v885_v2 = vpop.eup %884  ;;  %v571_v3 = vadd.f32 %v539_v62, %v1141_v30  ;;  %v492_v4 = vmul.f32 %v460_v63, %v1150_v38  ;;  %v1173_v6 = vadd.f32 %v1053_v36, %v388_v29  ;;  %v690_v8 = vmul.f32 %v658_v0, %v434_v44 }
  0xbc   : > { %v666_v9 = vadd.f32 1.0, %v885_v2  ;;  %890 = vtanh.f32 %v595_v1  ;;  %v547_v11 = vmul.f32 %v515_v45, %v1145_v33  ;;  %v450_v13 = vmul.f32 0.5, %v1110_v51 }
  0xbd   : > { %v603_v14 = vmul.f32 0.7978846, %v571_v3  ;;  %v524_v15 = vmul.f32 %v492_v4, %v1150_v38  ;;  %v468_v17 = vmul.f32 0.044715, %v1170_v5  ;;  %722 = vst [vmem:[%s1092_s4 + $0x50] sm:$0xff] %v690_v8  ;;  %v427_v19 = vmul.f32 0.5, %v1116_v58 }
  0xbe   : > { %v698_v18 = vmul.f32 %v666_v9, %v442_v54  ;;  %v579_v21 = vadd.f32 %v547_v11, %v1145_v33  ;;  %v476_v22 = vmul.f32 0.044715, %v1173_v6  ;;  %v1186_v51 = vadd.f32 %v1053_v36, %v412_v7 }
  0xbf   : > { %v887_v23 = vpop.eup %886  ;;  %892 = vtanh.f32 %v603_v14  ;;  %v556_v24 = vadd.f32 %v524_v15, %v1150_v38  ;;  %v500_v25 = vmul.f32 %v468_v17, %v1170_v5  ;;  %v1191_v58 = vadd.f32 %v1053_v36, %v343_v12 }
  0xc0   : > { %v889_v26 = vpop.eup %888  ;;  %730 = vst [vmem:[%s1092_s4 + $0x90] sm:$0xff] %v698_v18  ;;  %v674_v27 = vadd.f32 1.0, %v887_v23  ;;  %v611_v28 = vmul.f32 0.7978846, %v579_v21  ;;  %v508_v10 = vmul.f32 %v476_v22, %v1173_v6  ;;  %v435_v32 = vmul.f32 0.5, %v1120_v61  ;;  %v391_v41 = vpop.f32.mrf.mxu2 }
  0xc1   : > { %v651_v31 = vadd.f32 1.0, %v889_v26  ;;  %v588_v16 = vmul.f32 0.7978846, %v556_v24  ;;  %v532_v34 = vmul.f32 %v500_v25, %v1170_v5  ;;  %v484_v40 = vmul.f32 0.044715, %v1186_v51  ;;  %v415_v57 = vpop.f32.mrf.mxu3  ;;  %v346_v55 = vpop.f32.mrf.mxu0 }
  0xc2   : > { %v891_v37 = vpop.eup %890  ;;  %v706_v20 = vmul.f32 %v674_v27, %v450_v13  ;;  %894 = vtanh.f32 %v611_v28  ;;  %v540_v39 = vmul.f32 %v508_v10, %v1173_v6  ;;  %v443_v61 = vmul.f32 0.5, %v1141_v30  ;;  %v370_v18 = vpop.f32.mrf.mxu1 }
  0xc3   : > { %v683_v42 = vmul.f32 %v651_v31, %v427_v19  ;;  %v659_v43 = vadd.f32 1.0, %v891_v37  ;;  %896 = vtanh.f32 %v588_v16  ;;  %v564_v44 = vadd.f32 %v532_v34, %v1170_v5 }
  0xc4   : > { %738 = vst [vmem:[%s1092_s4 + $0xd0] sm:$0xff] %v706_v20  ;;  %v572_v46 = vadd.f32 %v540_v39, %v1173_v6  ;;  %v516_v47 = vmul.f32 %v484_v40, %v1186_v51  ;;  %v461_v48 = vmul.f32 0.044715, %v1191_v58  ;;  %v1205_v53 = vadd.f32 %v1053_v36, %v367_v35 }
  0xc5   : > { %v893_v49 = vpop.eup %892  ;;  %715 = vst [vmem:[%s1092_s4 + $0x18] sm:$0xff] %v683_v42  ;;  %v691_v50 = vmul.f32 %v659_v43, %v435_v32  ;;  %v596_v52 = vmul.f32 0.7978846, %v564_v44  ;;  %v1208_v54 = vadd.f32 %v1053_v36, %v391_v41  ;;  %v451_v56 = vmul.f32 0.5, %v1145_v33 }
  0xc6   : > { %v667_v59 = vadd.f32 1.0, %v893_v49  ;;  %v604_v30 = vmul.f32 0.7978846, %v572_v46  ;;  %v548_v60 = vmul.f32 %v516_v47, %v1186_v51  ;;  %v493_v29 = vmul.f32 %v461_v48, %v1191_v58 }
  0xc7   : > { %723 = vst [vmem:[%s1092_s4 + $0x58] sm:$0xff] %v691_v50  ;;  %v428_v62 = vmul.f32 0.5, %v1150_v38  ;;  %898 = vtanh.f32 %v596_v52  ;;  %v469_v63 = vmul.f32 0.044715, %v1205_v53  ;;  %v477_v8 = vmul.f32 0.044715, %v1208_v54 }
  0xc8   : > { %v895_v0 = vpop.eup %894  ;;  %v699_v1 = vmul.f32 %v667_v59, %v443_v61  ;;  %900 = vtanh.f32 %v604_v30  ;;  %v580_v45 = vadd.f32 %v548_v60, %v1186_v51  ;;  %v525_v2 = vmul.f32 %v493_v29, %v1191_v58  ;;  %v394_v23 = vpop.f32.mrf.mxu2 }
  0xc9   : > { %v897_v3 = vpop.eup %896  ;;  %v675_v4 = vadd.f32 1.0, %v895_v0  ;;  %v501_v7 = vmul.f32 %v469_v63, %v1205_v53  ;;  %v1221_v33 = vadd.f32 %v1053_v36, %v415_v57  ;;  %v1226_v12 = vadd.f32 %v1053_v36, %v346_v55  ;;  %v418_v37 = vpop.f32.mrf.mxu3 }
  0xca   : > { %731 = vst [vmem:[%s1092_s4 + $0x98] sm:$0xff] %v699_v1  ;;  %v652_v38 = vadd.f32 1.0, %v897_v3  ;;  %v612_v9 = vmul.f32 0.7978846, %v580_v45  ;;  %v557_v11 = vadd.f32 %v525_v2, %v1191_v58  ;;  %v436_v14 = vmul.f32 0.5, %v1170_v5  ;;  %v349_v42 = vpop.f32.mrf.mxu0  ;;  %v373_v2 = vpop.f32.mrf.mxu1 }
  0xcb   : > { %v707_v13 = vmul.f32 %v675_v4, %v451_v56  ;;  %v533_v15 = vmul.f32 %v501_v7, %v1205_v53  ;;  %v509_v17 = vmul.f32 %v477_v8, %v1208_v54  ;;  %v485_v22 = vmul.f32 0.044715, %v1221_v33 }
  0xcc   : > { %v684_v19 = vmul.f32 %v652_v38, %v428_v62  ;;  %902 = vtanh.f32 %v612_v9  ;;  %v589_v21 = vmul.f32 0.7978846, %v557_v11  ;;  %v444_v25 = vmul.f32 0.5, %v1173_v6 }
  0xcd   : > { %v899_v24 = vpop.eup %898  ;;  %739 = vst [vmem:[%s1092_s4 + $0xd8] sm:$0xff] %v707_v13  ;;  %v565_v26 = vadd.f32 %v533_v15, %v1205_v53  ;;  %v541_v5 = vmul.f32 %v509_v17, %v1208_v54  ;;  %v462_v27 = vmul.f32 0.044715, %v1226_v12  ;;  %v517_v31 = vmul.f32 %v485_v22, %v1221_v33 }
  0xce   : > { %v901_v28 = vpop.eup %900  ;;  %716 = vst [vmem:[%s1092_s4 + $0x20] sm:$0xff] %v684_v19  ;;  %v660_v10 = vadd.f32 1.0, %v899_v24  ;;  %904 = vtanh.f32 %v589_v21  ;;  %v1240_v32 = vadd.f32 %v1053_v36, %v370_v18  ;;  %v452_v39 = vmul.f32 0.5, %v1186_v51 }
  0xcf   : > { %v668_v16 = vadd.f32 1.0, %v901_v28  ;;  %v597_v34 = vmul.f32 0.7978846, %v565_v26  ;;  %v573_v6 = vadd.f32 %v541_v5, %v1208_v54  ;;  %v494_v35 = vmul.f32 %v462_v27, %v1226_v12 }
  0xd0   : > { %v692_v20 = vmul.f32 %v660_v10, %v436_v14  ;;  %v549_v40 = vmul.f32 %v517_v31, %v1221_v33  ;;  %v470_v41 = vmul.f32 0.044715, %v1240_v32  ;;  %v1252_v49 = vadd.f32 %v1053_v36, %v394_v23  ;;  %v397_v3 = vpop.f32.mrf.mxu2 }
  0xd1   : > { %v700_v43 = vmul.f32 %v668_v16, %v444_v25  ;;  %906 = vtanh.f32 %v597_v34  ;;  %v605_v44 = vmul.f32 0.7978846, %v573_v6  ;;  %v526_v61 = vmul.f32 %v494_v35, %v1226_v12  ;;  %v421_v19 = vpop.f32.mrf.mxu3 }
  0xd2   : > { %v903_v46 = vpop.eup %902  ;;  %724 = vst [vmem:[%s1092_s4 + $0x60] sm:$0xff] %v692_v20  ;;  %v581_v47 = vadd.f32 %v549_v40, %v1221_v33  ;;  %v502_v48 = vmul.f32 %v470_v41, %v1240_v32  ;;  %v1255_v51 = vadd.f32 %v1053_v36, %v418_v37  ;;  %v1260_v57 = vadd.f32 %v1053_v36, %v349_v42 }
  0xd3   : > { %732 = vst [vmem:[%s1092_s4 + $0xa0] sm:$0xff] %v700_v43  ;;  %v676_v50 = vadd.f32 1.0, %v903_v46  ;;  %908 = vtanh.f32 %v605_v44  ;;  %v558_v52 = vadd.f32 %v526_v61, %v1226_v12  ;;  %v478_v29 = vmul.f32 0.044715, %v1252_v49 }
  0xd4   : > { %v905_v59 = vpop.eup %904  ;;  %v613_v30 = vmul.f32 0.7978846, %v581_v47  ;;  %v534_v60 = vmul.f32 %v502_v48, %v1240_v32  ;;  %v429_v56 = vmul.f32 0.5, %v1191_v58  ;;  %v486_v45 = vmul.f32 0.044715, %v1255_v51 }
  0xd5   : > { %v708_v55 = vmul.f32 %v676_v50, %v452_v39  ;;  %v653_v62 = vadd.f32 1.0, %v905_v59  ;;  %v590_v63 = vmul.f32 0.7978846, %v558_v52  ;;  %v510_v1 = vmul.f32 %v478_v29, %v1252_v49 }
  0xd6   : > { %910 = vtanh.f32 %v613_v30  ;;  %v566_v0 = vadd.f32 %v534_v60, %v1240_v32  ;;  %v437_v8 = vmul.f32 0.5, %v1205_v53  ;;  %v463_v58 = vmul.f32 0.044715, %v1260_v57 }
  0xd7   : > { %v907_v4 = vpop.eup %906  ;;  %740 = vst [vmem:[%s1092_s4 + $0xe0] sm:$0xff] %v708_v55  ;;  %v685_v7 = vmul.f32 %v653_v62, %v429_v56  ;;  %912 = vtanh.f32 %v590_v63  ;;  %v542_v11 = vmul.f32 %v510_v1, %v1252_v49  ;;  %v518_v13 = vmul.f32 %v486_v45, %v1255_v51 }
  0xd8   : > { %v661_v38 = vadd.f32 1.0, %v907_v4  ;;  %v598_v9 = vmul.f32 0.7978846, %v566_v0  ;;  %v445_v15 = vmul.f32 0.5, %v1208_v54  ;;  %v495_v17 = vmul.f32 %v463_v58, %v1260_v57 }
  0xd9   : > { %v909_v14 = vpop.eup %908  ;;  %717 = vst [vmem:[%s1092_s4 + $0x28] sm:$0xff] %v685_v7  ;;  %v1277_v18 = vadd.f32 %v1053_v36, %v373_v2  ;;  %v1280_v53 = vadd.f32 %v1053_v36, %v397_v3  ;;  %v574_v23 = vadd.f32 %v542_v11, %v1252_v49  ;;  %v453_v24 = vmul.f32 0.5, %v1221_v33 }
  0xda   : > { %v693_v21 = vmul.f32 %v661_v38, %v437_v8  ;;  %v669_v22 = vadd.f32 1.0, %v909_v14  ;;  %914 = vtanh.f32 %v598_v9  ;;  %v550_v25 = vmul.f32 %v518_v13, %v1255_v51 }
  0xdb   : > { %v527_v54 = vmul.f32 %v495_v17, %v1260_v57  ;;  %v471_v26 = vmul.f32 0.044715, %v1277_v18  ;;  %v606_v28 = vmul.f32 0.7978846, %v574_v23  ;;  %v479_v10 = vmul.f32 0.044715, %v1280_v53 }
  0xdc   : > { %v911_v5 = vpop.eup %910  ;;  %725 = vst [vmem:[%s1092_s4 + $0x68] sm:$0xff] %v693_v21  ;;  %v701_v27 = vmul.f32 %v669_v22, %v445_v15  ;;  %v1290_v31 = vadd.f32 %v1053_v36, %v421_v19  ;;  %v582_v6 = vadd.f32 %v550_v25, %v1255_v51  ;;  %v430_v37 = vmul.f32 0.5, %v1226_v12 }
  0xdd   : > { %v913_v16 = vpop.eup %912  ;;  %v677_v34 = vadd.f32 1.0, %v911_v5  ;;  %v559_v33 = vadd.f32 %v527_v54, %v1260_v57  ;;  %v503_v35 = vmul.f32 %v471_v26, %v1277_v18  ;;  %916 = vtanh.f32 %v606_v28 }
  0xde   : > { %733 = vst [vmem:[%s1092_s4 + $0xa8] sm:$0xff] %v701_v27  ;;  %v654_v20 = vadd.f32 1.0, %v913_v16  ;;  %v511_v39 = vmul.f32 %v479_v10, %v1280_v53  ;;  %v614_v36 = vmul.f32 0.7978846, %v582_v6  ;;  %v487_v46 = vmul.f32 0.044715, %v1290_v31 }
  0xdf   : > { %v709_v40 = vmul.f32 %v677_v34, %v453_v24  ;;  %v591_v41 = vmul.f32 0.7978846, %v559_v33  ;;  %v535_v42 = vmul.f32 %v503_v35, %v1277_v18  ;;  %v438_v12 = vmul.f32 0.5, %v1240_v32 }
  0xe0   : > { %v915_v43 = vpop.eup %914  ;;  %v686_v44 = vmul.f32 %v654_v20, %v430_v37  ;;  %v543_v61 = vmul.f32 %v511_v39, %v1280_v53  ;;  %918 = vtanh.f32 %v614_v36  ;;  %v519_v52 = vmul.f32 %v487_v46, %v1290_v31 }
  0xe1   : > { %741 = vst [vmem:[%s1092_s4 + $0xe8] sm:$0xff] %v709_v40  ;;  %v662_v47 = vadd.f32 1.0, %v915_v43  ;;  %v567_v48 = vadd.f32 %v535_v42, %v1277_v18  ;;  %920 = vtanh.f32 %v591_v41  ;;  %v446_v32 = vmul.f32 0.5, %v1252_v49 }
  0xe2   : > { %718 = vst [vmem:[%s1092_s4 + $0x30] sm:$0xff] %v686_v44  ;;  %v575_v50 = vadd.f32 %v543_v61, %v1280_v53  ;;  %v551_v55 = vmul.f32 %v519_v52, %v1290_v31  ;;  %v454_v45 = vmul.f32 0.5, %v1255_v51  ;;  %v431_v4 = vmul.f32 0.5, %v1260_v57 }
  0xe3   : > { %v694_v59 = vmul.f32 %v662_v47, %v438_v12  ;;  %v599_v30 = vmul.f32 0.7978846, %v567_v48  ;;  %v917_v60 = vpop.eup %916  ;;  %v439_v9 = vmul.f32 0.5, %v1277_v18  ;;  %v447_v51 = vmul.f32 0.5, %v1280_v53 }
  0xe4   : > { %v607_v29 = vmul.f32 0.7978846, %v575_v50  ;;  %v670_v56 = vadd.f32 1.0, %v917_v60  ;;  %v583_v62 = vadd.f32 %v551_v55, %v1290_v31  ;;  %v455_v17 = vmul.f32 0.5, %v1290_v31 }
  0xe5   : > { %726 = vst [vmem:[%s1092_s4 + $0x70] sm:$0xff] %v694_v59  ;;  %922 = vtanh.f32 %v599_v30 }
  0xe6   : > { %924 = vtanh.f32 %v607_v29  ;;  %v919_v63 = vpop.eup %918  ;;  %v702_v0 = vmul.f32 %v670_v56, %v446_v32  ;;  %v615_v3 = vmul.f32 0.7978846, %v583_v62 }
  0xe7   : > { %v921_v1 = vpop.eup %920  ;;  %v678_v2 = vadd.f32 1.0, %v919_v63 }
  0xe8   : > { %734 = vst [vmem:[%s1092_s4 + $0xb0] sm:$0xff] %v702_v0  ;;  %v655_v7 = vadd.f32 1.0, %v921_v1  ;;  %926 = vtanh.f32 %v615_v3 }
  0xe9   : > { %v710_v49 = vmul.f32 %v678_v2, %v454_v45 }
  0xea   : > { %v687_v58 = vmul.f32 %v655_v7, %v431_v4 }
  0xeb   : > { %v923_v8 = vpop.eup %922  ;;  %742 = vst [vmem:[%s1092_s4 + $0xf0] sm:$0xff] %v710_v49 }
  0xec   : > { %v925_v38 = vpop.eup %924  ;;  %v663_v11 = vadd.f32 1.0, %v923_v8  ;;  %719 = vst [vmem:[%s1092_s4 + $0x38] sm:$0xff] %v687_v58 }
  0xed   : > { %v671_v13 = vadd.f32 1.0, %v925_v38 }
  0xee   : > { %v695_v14 = vmul.f32 %v663_v11, %v439_v9  ;;  %v927_v57 = vpop.eup %926 }
  0xef   : > { %v703_v15 = vmul.f32 %v671_v13, %v447_v51  ;;  %v679_v19 = vadd.f32 1.0, %v927_v57 }
  0xf0   : > { %727 = vst [vmem:[%s1092_s4 + $0x78] sm:$0xff] %v695_v14 }
  0xf1   : > { %735 = vst [vmem:[%s1092_s4 + $0xb8] sm:$0xff] %v703_v15  ;;  %v711_v21 = vmul.f32 %v679_v19, %v455_v17 }
  0xf3   : > { %743 = vst [vmem:[%s1092_s4 + $0xf8] sm:$0xff] %v711_v21 }
  0xf4 PF: > { %s13_s12 = sadd.s32 1, %s934_s12  }
  0xf5   : > { %p10_p4 = scmp.ge.s32.totalorder %s13_s12, 4  }
  0xf7   :  { %12 = sbr.rel (!%p10_p4) target bundleno = 1 (0x1), region = 62 }

// kernel: _lambda_.23
= control target key start
LH: loop header
LB: loop body
LE: loop exit
PB: predicated region body
PF: predicated region fallthrough
CT: control target
= control target key end

     0   :  { %s656_s15 = smov 0   ;;  %s902_s0 = inlined_call_operand.vmem [shape: f32[512,128], index: 0, kind: input, shape index: {}]   ;;  %s903_s1 = inlined_call_operand.vmem [shape: f32[128,32], index: 1, kind: input, shape index: {}]   ;;  %s904_s2 = inlined_call_operand.vmem [shape: f32[1,32], index: 2, kind: input, shape index: {}]   ;;  %s905_s3 = inlined_call_operand.vmem [shape: f32[512,32], index: 3, kind: input, shape index: {}]   ;;  %s906_s4 = inlined_call_operand.vmem [shape: f32[512,32], index: 4, kind: output, shape index: {}]  }
   0x1 LB: > { %s553_s16 = sadd.s32 4294967295, %s629_s15   ;;  %p557_p0 = scmp.ge.s32.totalorder %s629_s15, 1  ;;  %s629_s15 = sphi %s656_s15, %s14_s15  }
   0x2   : > { %p174_p1 = scmp.lt.s32.totalorder %s629_s15, 3 }
   0x4   : > { %p175_p2 = pnand %p557_p0, %p174_p1 }
   0x5   : > { %s558_s7 = sshll.u32 (!%p175_p2), %s553_s16, 5 }
   0x6   : > { %178 = sbr.rel (%p175_p2) target bundleno = 237 (0xed), region = 36  ;;  %p206_p3 = scmp.lt.s32.totalorder (!%p175_p2), %s558_s7, 63 }
   0xb   : > { %v270_v0 = vld [vmem:[%s903_s1 + $0x78] sm:$0xff]  ;;  %v269_v1 = vld [vmem:[%s903_s1 + $0x70] sm:$0xff]  ;;  %v268_v2 = vld [vmem:[%s903_s1 + $0x68] sm:$0xff]  ;;  %s908_s7 = smov (!%p206_p3, %s558_s7), 63  ;;  %vm452_vm0 = vcmask 261120  }
   0xc   : > { %567 = vmatpush.msra.mxu2 %v270_v0  ;;  %568 = vmatpush.msra.mxu3 %v270_v0  ;;  %v267_v3 = vld [vmem:[%s903_s1 + $0x60] sm:$0xff]  ;;  %v266_v4 = vld [vmem:[%s903_s1 + $0x58] sm:$0xff]  ;;  %v265_v5 = vld [vmem:[%s903_s1 + $0x50] sm:$0xff]  ;;  %s705_s19 = sshll.u32 %s908_s7, 3 }
   0xd   : > { %275 = vmatpush.msra.mxu0 %v270_v0  ;;  %566 = vmatpush.msra.mxu1 %v270_v0  ;;  %v264_v6 = vld [vmem:[%s903_s1 + $0x48] sm:$0xff]  ;;  %v263_v7 = vld [vmem:[%s903_s1 + $0x40] sm:$0xff]  ;;  %v262_v8 = vld [vmem:[%s903_s1 + $0x38] sm:$0xff]  ;;  %s717_s26 = scalar_lea.vmem %s902_s0, %s705_s19  ;;  %s758_s5 = scalar_lea.vmem %s905_s3, %s705_s19 }
   0xe   : > { %570 = vmatpush.msra.mxu2 %v269_v1  ;;  %571 = vmatpush.msra.mxu3 %v269_v1  ;;  %v261_v9 = vld [vmem:[%s903_s1 + $0x30] sm:$0xff]  ;;  %v260_v10 = vld [vmem:[%s903_s1 + $0x28] sm:$0xff]  ;;  %v259_v11 = vld [vmem:[%s903_s1 + $0x20] sm:$0xff]  ;;  %s773_s10 = scalar_lea.vmem %s906_s4, %s705_s19 }
   0xf   : > { %276 = vmatpush.msra.mxu0 %v269_v1  ;;  %569 = vmatpush.msra.mxu1 %v269_v1  ;;  %v258_v12 = vld [vmem:[%s903_s1 + $0x18] sm:$0xff]  ;;  %v257_v13 = vld [vmem:[%s903_s1 + $0x10] sm:$0xff]  ;;  %v256_v14 = vld [vmem:[%s903_s1 + $0x8] sm:$0xff] }
  0x10   : > { %573 = vmatpush.msra.mxu2 %v268_v2  ;;  %574 = vmatpush.msra.mxu3 %v268_v2  ;;  %v255_v15 = vld [vmem:[%s903_s1] sm:$0xff]  ;;  %v240_v20 = vld [vmem:[%s717_s26 + $0x88] sm:$0xff]  ;;  %v241_v24 = vld [vmem:[%s717_s26 + $0x90] sm:$0xff] }
  0x11   : > { %277 = vmatpush.msra.mxu0 %v268_v2  ;;  %572 = vmatpush.msra.mxu1 %v268_v2  ;;  %v239_v16 = vld [vmem:[%s717_s26 + $0x80] sm:$0xff]  ;;  %v248_v21 = vld [vmem:[%s717_s26 + $0xc8] sm:$0xff]  ;;  %v249_v25 = vld [vmem:[%s717_s26 + $0xd0] sm:$0xff] }
  0x12   : > { %576 = vmatpush.msra.mxu2 %v267_v3  ;;  %577 = vmatpush.msra.mxu3 %v267_v3  ;;  %v247_v17 = vld [vmem:[%s717_s26 + $0xc0] sm:$0xff]  ;;  %v224_v22 = vld [vmem:[%s717_s26 + $0x8] sm:$0xff]  ;;  %v225_v26 = vld [vmem:[%s717_s26 + $0x10] sm:$0xff] }
  0x13   : > { %278 = vmatpush.msra.mxu0 %v267_v3  ;;  %575 = vmatpush.msra.mxu1 %v267_v3  ;;  %v223_v18 = vld [vmem:[%s717_s26] sm:$0xff]  ;;  %v232_v23 = vld [vmem:[%s717_s26 + $0x48] sm:$0xff]  ;;  %v233_v27 = vld [vmem:[%s717_s26 + $0x50] sm:$0xff] }
  0x14   : > { %579 = vmatpush.msra.mxu2 %v266_v4  ;;  %580 = vmatpush.msra.mxu3 %v266_v4  ;;  %v231_v19 = vld [vmem:[%s717_s26 + $0x40] sm:$0xff]  ;;  %v242_v28 = vld [vmem:[%s717_s26 + $0x98] sm:$0xff]  ;;  %v244_v36 = vld [vmem:[%s717_s26 + $0xa8] sm:$0xff] }
  0x15   : > { %279 = vmatpush.msra.mxu0 %v266_v4  ;;  %578 = vmatpush.msra.mxu1 %v266_v4  ;;  %v250_v29 = vld [vmem:[%s717_s26 + $0xd8] sm:$0xff]  ;;  %v243_v32 = vld [vmem:[%s717_s26 + $0xa0] sm:$0xff]  ;;  %v252_v37 = vld [vmem:[%s717_s26 + $0xe8] sm:$0xff] }
  0x16   : > { %582 = vmatpush.msra.mxu2 %v265_v5  ;;  %583 = vmatpush.msra.mxu3 %v265_v5  ;;  %v226_v30 = vld [vmem:[%s717_s26 + $0x18] sm:$0xff]  ;;  %v251_v33 = vld [vmem:[%s717_s26 + $0xe0] sm:$0xff]  ;;  %v228_v38 = vld [vmem:[%s717_s26 + $0x28] sm:$0xff] }
  0x17   : > { %280 = vmatpush.msra.mxu0 %v265_v5  ;;  %581 = vmatpush.msra.mxu1 %v265_v5  ;;  %v234_v31 = vld [vmem:[%s717_s26 + $0x58] sm:$0xff]  ;;  %v227_v34 = vld [vmem:[%s717_s26 + $0x20] sm:$0xff]  ;;  %v236_v39 = vld [vmem:[%s717_s26 + $0x68] sm:$0xff] }
  0x18   : > { %585 = vmatpush.msra.mxu2 %v264_v6  ;;  %586 = vmatpush.msra.mxu3 %v264_v6  ;;  %v235_v35 = vld [vmem:[%s717_s26 + $0x60] sm:$0xff]  ;;  %v245_v40 = vld [vmem:[%s717_s26 + $0xb0] sm:$0xff]  ;;  %v246_v44 = vld [vmem:[%s717_s26 + $0xb8] sm:$0xff] }
  0x19   : > { %281 = vmatpush.msra.mxu0 %v264_v6  ;;  %584 = vmatpush.msra.mxu1 %v264_v6  ;;  %v253_v41 = vld [vmem:[%s717_s26 + $0xf0] sm:$0xff]  ;;  %v254_v45 = vld [vmem:[%s717_s26 + $0xf8] sm:$0xff]  ;;  %v763_v48 = vld [vmem:[%s904_s2] ss:$0 sm:$0xff] }
  0x1a   : > { %588 = vmatpush.msra.mxu2 %v263_v7  ;;  %589 = vmatpush.msra.mxu3 %v263_v7  ;;  %v229_v42 = vld [vmem:[%s717_s26 + $0x30] sm:$0xff]  ;;  %v230_v46 = vld [vmem:[%s717_s26 + $0x38] sm:$0xff]  ;;  %v388_v50 = vld [vmem:[%s758_s5] sm:$0xff] }
  0x1b   : > { %282 = vmatpush.msra.mxu0 %v263_v7  ;;  %587 = vmatpush.msra.mxu1 %v263_v7  ;;  %v237_v43 = vld [vmem:[%s717_s26 + $0x70] sm:$0xff]  ;;  %v238_v47 = vld [vmem:[%s717_s26 + $0x78] sm:$0xff]  ;;  %v396_v52 = vld [vmem:[%s758_s5 + $0x40] sm:$0xff] }
  0x1c   : > { %591 = vmatpush.msra.mxu2 %v262_v8  ;;  %592 = vmatpush.msra.mxu3 %v262_v8  ;;  %v404_v58 = vld [vmem:[%s758_s5 + $0x80] sm:$0xff]  ;;  %v389_v2 = vld [vmem:[%s758_s5 + $0x8] sm:$0xff] }
  0x1d   : > { %283 = vmatpush.msra.mxu0 %v262_v8  ;;  %590 = vmatpush.msra.mxu1 %v262_v8  ;;  %v412_v60 = vld [vmem:[%s758_s5 + $0xc0] sm:$0xff]  ;;  %v397_v4 = vld [vmem:[%s758_s5 + $0x48] sm:$0xff] }
  0x1e   : > { %594 = vmatpush.msra.mxu2 %v261_v9  ;;  %595 = vmatpush.msra.mxu3 %v261_v9 }
  0x1f   : > { %284 = vmatpush.msra.mxu0 %v261_v9  ;;  %593 = vmatpush.msra.mxu1 %v261_v9 }
  0x20   : > { %597 = vmatpush.msra.mxu2 %v260_v10  ;;  %598 = vmatpush.msra.mxu3 %v260_v10 }
  0x21   : > { %285 = vmatpush.msra.mxu0 %v260_v10  ;;  %596 = vmatpush.msra.mxu1 %v260_v10  ;;  %v405_v10 = vld [vmem:[%s758_s5 + $0x88] sm:$0xff] }
  0x22   : > { %600 = vmatpush.msra.mxu2 %v259_v11  ;;  %601 = vmatpush.msra.mxu3 %v259_v11 }
  0x23   : > { %286 = vmatpush.msra.mxu0 %v259_v11  ;;  %599 = vmatpush.msra.mxu1 %v259_v11 }
  0x24   : > { %603 = vmatpush.msra.mxu2 %v258_v12  ;;  %604 = vmatpush.msra.mxu3 %v258_v12 }
  0x25   : > { %287 = vmatpush.msra.mxu0 %v258_v12  ;;  %602 = vmatpush.msra.mxu1 %v258_v12  ;;  %v413_v12 = vld [vmem:[%s758_s5 + $0xc8] sm:$0xff] }
  0x26   : > { %606 = vmatpush.msra.mxu2 %v257_v13  ;;  %607 = vmatpush.msra.mxu3 %v257_v13 }
  0x27   : > { %288 = vmatpush.msra.mxu0 %v257_v13  ;;  %605 = vmatpush.msra.mxu1 %v257_v13 }
  0x28   : > { %609 = vmatpush.msra.mxu2 %v256_v14  ;;  %610 = vmatpush.msra.mxu3 %v256_v14 }
  0x29   : > { %289 = vmatpush.msra.mxu0 %v256_v14  ;;  %608 = vmatpush.msra.mxu1 %v256_v14 }
  0x2a   : > { %612 = vmatpush.msra.mxu2 %v255_v15  ;;  %613 = vmatpush.msra.mxu3 %v255_v15 }
  0x2b   : > { %339 = vmatmul.f32.vlgmr.msra.gmra.mxu2 %v239_v16  ;;  %363 = vmatmul.f32.vlgmr.msra.gmra.mxu3 %v247_v17 }
  0x2c   : > { %290 = vmatpush.msra.mxu0 %v255_v15  ;;  %611 = vmatpush.msra.mxu1 %v255_v15 }
  0x2d   : > { %291 = vmatmul.f32.vlgmr.msra.gmra.mxu0 %v223_v18  ;;  %315 = vmatmul.f32.vlgmr.msra.gmra.mxu1 %v231_v19  ;;  %v390_v18 = vld [vmem:[%s758_s5 + $0x10] sm:$0xff] }
  0x33   : > { %342 = vmatmul.f32.gmra.mxu2 %v240_v20  ;;  %366 = vmatmul.f32.gmra.mxu3 %v248_v21  ;;  %v398_v20 = vld [vmem:[%s758_s5 + $0x50] sm:$0xff] }
  0x35   : > { %294 = vmatmul.f32.gmra.mxu0 %v224_v22  ;;  %318 = vmatmul.f32.gmra.mxu1 %v232_v23 }
  0x3b   : > { %345 = vmatmul.f32.gmra.mxu2 %v241_v24  ;;  %369 = vmatmul.f32.gmra.mxu3 %v249_v25 }
  0x3d   : > { %297 = vmatmul.f32.gmra.mxu0 %v225_v26  ;;  %321 = vmatmul.f32.gmra.mxu1 %v233_v27  ;;  %v406_v26 = vld [vmem:[%s758_s5 + $0x90] sm:$0xff] }
  0x43   : > { %348 = vmatmul.f32.gmra.mxu2 %v242_v28  ;;  %372 = vmatmul.f32.gmra.mxu3 %v250_v29  ;;  %v414_v28 = vld [vmem:[%s758_s5 + $0xd0] sm:$0xff] }
  0x45   : > { %300 = vmatmul.f32.gmra.mxu0 %v226_v30  ;;  %324 = vmatmul.f32.gmra.mxu1 %v234_v31 }
  0x4b   : > { %351 = vmatmul.f32.gmra.mxu2 %v243_v32  ;;  %375 = vmatmul.f32.gmra.mxu3 %v251_v33 }
  0x4d   : > { %303 = vmatmul.f32.gmra.mxu0 %v227_v34  ;;  %327 = vmatmul.f32.gmra.mxu1 %v235_v35  ;;  %v391_v34 = vld [vmem:[%s758_s5 + $0x18] sm:$0xff] }
  0x53   : > { %354 = vmatmul.f32.gmra.mxu2 %v244_v36  ;;  %378 = vmatmul.f32.gmra.mxu3 %v252_v37  ;;  %v399_v36 = vld [vmem:[%s758_s5 + $0x58] sm:$0xff] }
  0x55   : > { %306 = vmatmul.f32.gmra.mxu0 %v228_v38  ;;  %330 = vmatmul.f32.gmra.mxu1 %v236_v39 }
  0x5b   : > { %357 = vmatmul.f32.gmra.mxu2 %v245_v40  ;;  %381 = vmatmul.f32.gmra.mxu3 %v253_v41 }
  0x5d   : > { %309 = vmatmul.f32.gmra.mxu0 %v229_v42  ;;  %333 = vmatmul.f32.gmra.mxu1 %v237_v43  ;;  %v407_v42 = vld [vmem:[%s758_s5 + $0x98] sm:$0xff] }
  0x63   : > { %360 = vmatmul.f32.gmra.mxu2 %v246_v44  ;;  %384 = vmatmul.f32.gmra.mxu3 %v254_v45  ;;  %v415_v44 = vld [vmem:[%s758_s5 + $0xd8] sm:$0xff] }
  0x65   : > { %312 = vmatmul.f32.gmra.mxu0 %v230_v46  ;;  %336 = vmatmul.f32.gmra.mxu1 %v238_v47 }
  0xaa   : > { %v292_v49 = vpop.f32.mrf.mxu0  ;;  %v316_v51 = vpop.f32.mrf.mxu1 }
  0xab   : > { %v293_v53 = vadd.f32 %v763_v48, %v292_v49  ;;  %v317_v54 = vadd.f32 %v763_v48, %v316_v51  ;;  %v392_v51 = vld [vmem:[%s758_s5 + $0x20] sm:$0xff] }
  0xad   : > { %v420_v55 = vadd.f32 %v388_v50, %v293_v53  ;;  %v428_v56 = vadd.f32 %v396_v52, %v317_v54  ;;  %v400_v53 = vld [vmem:[%s758_s5 + $0x60] sm:$0xff] }
  0xae   : > { %v340_v57 = vpop.f32.mrf.mxu2  ;;  %v364_v59 = vpop.f32.mrf.mxu3 }
  0xaf   : > { %453 = vst.msk [vmem:[%s773_s10] sm:$0xff] %vm452_vm0, %v420_v55  ;;  %v341_v61 = vadd.f32 %v763_v48, %v340_v57  ;;  %v365_v62 = vadd.f32 %v763_v48, %v364_v59  ;;  %v408_v59 = vld [vmem:[%s758_s5 + $0xa0] sm:$0xff] }
  0xb0   : > { %461 = vst.msk [vmem:[%s773_s10 + $0x40] sm:$0xff] %vm452_vm0, %v428_v56 }
  0xb1   : > { %v436_v63 = vadd.f32 %v404_v58, %v341_v61  ;;  %v444_v0 = vadd.f32 %v412_v60, %v365_v62  ;;  %v416_v61 = vld [vmem:[%s758_s5 + $0xe0] sm:$0xff] }
  0xb2   : > { %v295_v1 = vpop.f32.mrf.mxu0  ;;  %v319_v3 = vpop.f32.mrf.mxu1 }
  0xb3   : > { %469 = vst.msk [vmem:[%s773_s10 + $0x80] sm:$0xff] %vm452_vm0, %v436_v63  ;;  %v296_v5 = vadd.f32 %v763_v48, %v295_v1  ;;  %v320_v6 = vadd.f32 %v763_v48, %v319_v3  ;;  %v393_v3 = vld [vmem:[%s758_s5 + $0x28] sm:$0xff] }
  0xb4   : > { %477 = vst.msk [vmem:[%s773_s10 + $0xc0] sm:$0xff] %vm452_vm0, %v444_v0 }
  0xb5   : > { %v421_v7 = vadd.f32 %v389_v2, %v296_v5  ;;  %v429_v8 = vadd.f32 %v397_v4, %v320_v6  ;;  %v401_v5 = vld [vmem:[%s758_s5 + $0x68] sm:$0xff] }
  0xb6   : > { %v343_v9 = vpop.f32.mrf.mxu2  ;;  %v367_v11 = vpop.f32.mrf.mxu3 }
  0xb7   : > { %454 = vst.msk [vmem:[%s773_s10 + $0x8] sm:$0xff] %vm452_vm0, %v421_v7  ;;  %v344_v13 = vadd.f32 %v763_v48, %v343_v9  ;;  %v368_v14 = vadd.f32 %v763_v48, %v367_v11  ;;  %v409_v11 = vld [vmem:[%s758_s5 + $0xa8] sm:$0xff] }
  0xb8   : > { %462 = vst.msk [vmem:[%s773_s10 + $0x48] sm:$0xff] %vm452_vm0, %v429_v8 }
  0xb9   : > { %v437_v15 = vadd.f32 %v405_v10, %v344_v13  ;;  %v445_v16 = vadd.f32 %v413_v12, %v368_v14  ;;  %v417_v13 = vld [vmem:[%s758_s5 + $0xe8] sm:$0xff] }
  0xba   : > { %v298_v17 = vpop.f32.mrf.mxu0  ;;  %v322_v19 = vpop.f32.mrf.mxu1 }
  0xbb   : > { %470 = vst.msk [vmem:[%s773_s10 + $0x88] sm:$0xff] %vm452_vm0, %v437_v15  ;;  %v299_v21 = vadd.f32 %v763_v48, %v298_v17  ;;  %v323_v22 = vadd.f32 %v763_v48, %v322_v19  ;;  %v394_v19 = vld [vmem:[%s758_s5 + $0x30] sm:$0xff] }
  0xbc   : > { %478 = vst.msk [vmem:[%s773_s10 + $0xc8] sm:$0xff] %vm452_vm0, %v445_v16 }
  0xbd   : > { %v422_v23 = vadd.f32 %v390_v18, %v299_v21  ;;  %v430_v24 = vadd.f32 %v398_v20, %v323_v22  ;;  %v402_v21 = vld [vmem:[%s758_s5 + $0x70] sm:$0xff] }
  0xbe   : > { %v346_v25 = vpop.f32.mrf.mxu2  ;;  %v370_v27 = vpop.f32.mrf.mxu3 }
  0xbf   : > { %455 = vst.msk [vmem:[%s773_s10 + $0x10] sm:$0xff] %vm452_vm0, %v422_v23  ;;  %v347_v29 = vadd.f32 %v763_v48, %v346_v25  ;;  %v371_v30 = vadd.f32 %v763_v48, %v370_v27  ;;  %v410_v27 = vld [vmem:[%s758_s5 + $0xb0] sm:$0xff] }
  0xc0   : > { %463 = vst.msk [vmem:[%s773_s10 + $0x50] sm:$0xff] %vm452_vm0, %v430_v24 }
  0xc1   : > { %v438_v31 = vadd.f32 %v406_v26, %v347_v29  ;;  %v446_v32 = vadd.f32 %v414_v28, %v371_v30  ;;  %v418_v29 = vld [vmem:[%s758_s5 + $0xf0] sm:$0xff] }
  0xc2   : > { %v301_v33 = vpop.f32.mrf.mxu0  ;;  %v325_v35 = vpop.f32.mrf.mxu1 }
  0xc3   : > { %471 = vst.msk [vmem:[%s773_s10 + $0x90] sm:$0xff] %vm452_vm0, %v438_v31  ;;  %v302_v37 = vadd.f32 %v763_v48, %v301_v33  ;;  %v326_v38 = vadd.f32 %v763_v48, %v325_v35  ;;  %v395_v35 = vld [vmem:[%s758_s5 + $0x38] sm:$0xff] }
  0xc4   : > { %479 = vst.msk [vmem:[%s773_s10 + $0xd0] sm:$0xff] %vm452_vm0, %v446_v32 }
  0xc5   : > { %v423_v39 = vadd.f32 %v391_v34, %v302_v37  ;;  %v431_v40 = vadd.f32 %v399_v36, %v326_v38  ;;  %v403_v37 = vld [vmem:[%s758_s5 + $0x78] sm:$0xff] }
  0xc6   : > { %v349_v41 = vpop.f32.mrf.mxu2  ;;  %v373_v43 = vpop.f32.mrf.mxu3 }
  0xc7   : > { %456 = vst.msk [vmem:[%s773_s10 + $0x18] sm:$0xff] %vm452_vm0, %v423_v39  ;;  %v350_v45 = vadd.f32 %v763_v48, %v349_v41  ;;  %v374_v46 = vadd.f32 %v763_v48, %v373_v43  ;;  %v411_v43 = vld [vmem:[%s758_s5 + $0xb8] sm:$0xff] }
  0xc8   : > { %464 = vst.msk [vmem:[%s773_s10 + $0x58] sm:$0xff] %vm452_vm0, %v431_v40 }
  0xc9   : > { %v439_v47 = vadd.f32 %v407_v42, %v350_v45  ;;  %v447_v49 = vadd.f32 %v415_v44, %v374_v46  ;;  %v419_v45 = vld [vmem:[%s758_s5 + $0xf8] sm:$0xff] }
  0xca   : > { %v304_v50 = vpop.f32.mrf.mxu0  ;;  %v328_v52 = vpop.f32.mrf.mxu1 }
  0xcb   : > { %472 = vst.msk [vmem:[%s773_s10 + $0x98] sm:$0xff] %vm452_vm0, %v439_v47  ;;  %v305_v54 = vadd.f32 %v763_v48, %v304_v50  ;;  %v329_v55 = vadd.f32 %v763_v48, %v328_v52 }
  0xcc   : > { %480 = vst.msk [vmem:[%s773_s10 + $0xd8] sm:$0xff] %vm452_vm0, %v447_v49 }
  0xcd   : > { %v424_v56 = vadd.f32 %v392_v51, %v305_v54  ;;  %v432_v57 = vadd.f32 %v400_v53, %v329_v55 }
  0xce   : > { %v352_v58 = vpop.f32.mrf.mxu2  ;;  %v376_v60 = vpop.f32.mrf.mxu3 }
  0xcf   : > { %457 = vst.msk [vmem:[%s773_s10 + $0x20] sm:$0xff] %vm452_vm0, %v424_v56  ;;  %v353_v62 = vadd.f32 %v763_v48, %v352_v58  ;;  %v377_v63 = vadd.f32 %v763_v48, %v376_v60 }
  0xd0   : > { %465 = vst.msk [vmem:[%s773_s10 + $0x60] sm:$0xff] %vm452_vm0, %v432_v57 }
  0xd1   : > { %v440_v0 = vadd.f32 %v408_v59, %v353_v62  ;;  %v448_v1 = vadd.f32 %v416_v61, %v377_v63 }
  0xd2   : > { %v307_v2 = vpop.f32.mrf.mxu0  ;;  %v331_v4 = vpop.f32.mrf.mxu1 }
  0xd3   : > { %473 = vst.msk [vmem:[%s773_s10 + $0xa0] sm:$0xff] %vm452_vm0, %v440_v0  ;;  %v308_v6 = vadd.f32 %v763_v48, %v307_v2  ;;  %v332_v7 = vadd.f32 %v763_v48, %v331_v4 }
  0xd4   : > { %481 = vst.msk [vmem:[%s773_s10 + $0xe0] sm:$0xff] %vm452_vm0, %v448_v1 }
  0xd5   : > { %v425_v8 = vadd.f32 %v393_v3, %v308_v6  ;;  %v433_v9 = vadd.f32 %v401_v5, %v332_v7 }
  0xd6   : > { %v355_v10 = vpop.f32.mrf.mxu2  ;;  %v379_v12 = vpop.f32.mrf.mxu3 }
  0xd7   : > { %458 = vst.msk [vmem:[%s773_s10 + $0x28] sm:$0xff] %vm452_vm0, %v425_v8  ;;  %v356_v14 = vadd.f32 %v763_v48, %v355_v10  ;;  %v380_v15 = vadd.f32 %v763_v48, %v379_v12 }
  0xd8   : > { %466 = vst.msk [vmem:[%s773_s10 + $0x68] sm:$0xff] %vm452_vm0, %v433_v9 }
  0xd9   : > { %v441_v16 = vadd.f32 %v409_v11, %v356_v14  ;;  %v449_v17 = vadd.f32 %v417_v13, %v380_v15 }
  0xda   : > { %v310_v18 = vpop.f32.mrf.mxu0  ;;  %v334_v20 = vpop.f32.mrf.mxu1 }
  0xdb   : > { %474 = vst.msk [vmem:[%s773_s10 + $0xa8] sm:$0xff] %vm452_vm0, %v441_v16  ;;  %v311_v22 = vadd.f32 %v763_v48, %v310_v18  ;;  %v335_v23 = vadd.f32 %v763_v48, %v334_v20 }
  0xdc   : > { %482 = vst.msk [vmem:[%s773_s10 + $0xe8] sm:$0xff] %vm452_vm0, %v449_v17 }
  0xdd   : > { %v426_v24 = vadd.f32 %v394_v19, %v311_v22  ;;  %v434_v25 = vadd.f32 %v402_v21, %v335_v23 }
  0xde   : > { %v358_v26 = vpop.f32.mrf.mxu2  ;;  %v382_v28 = vpop.f32.mrf.mxu3 }
  0xdf   : > { %459 = vst.msk [vmem:[%s773_s10 + $0x30] sm:$0xff] %vm452_vm0, %v426_v24  ;;  %v359_v30 = vadd.f32 %v763_v48, %v358_v26  ;;  %v383_v31 = vadd.f32 %v763_v48, %v382_v28 }
  0xe0   : > { %467 = vst.msk [vmem:[%s773_s10 + $0x70] sm:$0xff] %vm452_vm0, %v434_v25 }
  0xe1   : > { %v442_v32 = vadd.f32 %v410_v27, %v359_v30  ;;  %v450_v33 = vadd.f32 %v418_v29, %v383_v31 }
  0xe2   : > { %v313_v34 = vpop.f32.mrf.mxu0  ;;  %v337_v36 = vpop.f32.mrf.mxu1 }
  0xe3   : > { %475 = vst.msk [vmem:[%s773_s10 + $0xb0] sm:$0xff] %vm452_vm0, %v442_v32  ;;  %v314_v38 = vadd.f32 %v763_v48, %v313_v34  ;;  %v338_v39 = vadd.f32 %v763_v48, %v337_v36 }
  0xe4   : > { %483 = vst.msk [vmem:[%s773_s10 + $0xf0] sm:$0xff] %vm452_vm0, %v450_v33 }
  0xe5   : > { %v427_v40 = vadd.f32 %v395_v35, %v314_v38  ;;  %v435_v41 = vadd.f32 %v403_v37, %v338_v39 }
  0xe6   : > { %v361_v42 = vpop.f32.mrf.mxu2  ;;  %v385_v44 = vpop.f32.mrf.mxu3 }
  0xe7   : > { %460 = vst.msk [vmem:[%s773_s10 + $0x38] sm:$0xff] %vm452_vm0, %v427_v40  ;;  %v362_v46 = vadd.f32 %v763_v48, %v361_v42  ;;  %v386_v47 = vadd.f32 %v763_v48, %v385_v44 }
  0xe8   : > { %468 = vst.msk [vmem:[%s773_s10 + $0x78] sm:$0xff] %vm452_vm0, %v435_v41 }
  0xe9   : > { %v443_v49 = vadd.f32 %v411_v43, %v362_v46  ;;  %v451_v50 = vadd.f32 %v419_v45, %v386_v47 }
  0xeb   : > { %476 = vst.msk [vmem:[%s773_s10 + $0xb8] sm:$0xff] %vm452_vm0, %v443_v49 }
  0xec   : > { %484 = vst.msk [vmem:[%s773_s10 + $0xf8] sm:$0xff] %vm452_vm0, %v451_v50 }
  0xed PF: > { %s14_s15 = sadd.s32 1, %s629_s15  }
  0xee   : > { %p11_p4 = scmp.ge.s32.totalorder %s14_s15, 4  }
  0xf0   :  { %13 = sbr.rel (!%p11_p4) target bundleno = 1 (0x1), region = 69 }

</bundles_post_ra>
